<compile_context>
chip_gen: v5e
topology: v5e:2x2
jax: 0.10.0
libtpu: 0.0.40
codegen_flags: <defaults>
</compile_context>

<pallas_src>
import functools
import numpy as np
import jax
import jax.numpy as jnp
from jax import lax
from jax.experimental import pallas as pl
from jax.experimental.pallas import tpu as pltpu


_VMEM_LIMIT = 64 * 1024 * 1024  # explicit scoped-VMEM budget (fits v5e/v6e/v7x)


def _round_up(x, m):
    return ((x + m - 1) // m) * m


def _pick_div(dim, candidates):
    for c in candidates:
        if dim % c == 0:
            return c
    return dim


def _cparams(*sem):
    return pltpu.CompilerParams(dimension_semantics=sem, vmem_limit_bytes=_VMEM_LIMIT)


# ----------------------------- GEMM kernel (M/N/K tiled, bf16 MXU) -----------------------------

def _gemm_kernel(x_ref, w_ref, b_ref, o_ref, acc_ref, *, act):
    @pl.when(pl.program_id(2) == 0)
    def _():
        acc_ref[...] = jnp.zeros_like(acc_ref)

    acc_ref[...] += jnp.dot(x_ref[...], w_ref[...], preferred_element_type=jnp.float32)

    @pl.when(pl.program_id(2) == pl.num_programs(2) - 1)
    def _():
        acc = acc_ref[...] + b_ref[...]
        if act == "relu":
            acc = jnp.maximum(acc, 0.0)
        elif act == "tanh":
            acc = jnp.tanh(acc)
        o_ref[...] = acc.astype(o_ref.dtype)


@functools.lru_cache(maxsize=None)
def _build_gemm(Mp, K, N, tm, tk, tn, act, out_dtype):
    fn = pl.pallas_call(
        functools.partial(_gemm_kernel, act=act),
        out_shape=jax.ShapeDtypeStruct((Mp, N), out_dtype),
        grid=(pl.cdiv(Mp, tm), N // tn, K // tk),
        in_specs=[
            pl.BlockSpec((tm, tk), lambda i, j, k: (i, k)),
            pl.BlockSpec((tk, tn), lambda i, j, k: (k, j)),
            pl.BlockSpec((1, tn), lambda i, j, k: (0, j)),
        ],
        out_specs=pl.BlockSpec((tm, tn), lambda i, j, k: (i, j)),
        scratch_shapes=[pltpu.VMEM((tm, tn), jnp.float32)],
        compiler_params=_cparams("parallel", "parallel", "arbitrary"),
    )
    return jax.jit(fn)


def pallas_gemm(x, w, b=None, act="none", out_dtype=jnp.bfloat16):
    """act((M,K) @ (K,N) + b): bf16 operands, f32 accumulation, tiled over M/N/K."""
    M, K = x.shape
    K2, N = w.shape
    assert K == K2
    x = x.astype(jnp.bfloat16)
    w = w.astype(jnp.bfloat16)
    if b is None:
        b = jnp.zeros((N,), jnp.float32)
    b = b.reshape(1, N).astype(jnp.float32)
    Mp = _round_up(M, 8)
    if Mp != M:
        x = jnp.pad(x, ((0, Mp - M), (0, 0)))
    tm = min(512, Mp)
    tk = _pick_div(K, (512, 256, 128))
    tn = _pick_div(N, (512, 256, 128))
    out = _build_gemm(Mp, K, N, tm, tk, tn, act, out_dtype)(x, w, b)
    return out[:M]


# ----------------------------- direct conv kernel (no im2col) -----------------------------

def _direct_conv_kernel(x_ref, w_ref, b_ref, o_ref, *, kh, kw, dil, Ho, Wo, act):
    cin = x_ref.shape[-1]
    cout = o_ref.shape[-1]
    acc = jnp.zeros((Ho * Wo, cout), jnp.float32)
    for ky in range(kh):
        for kx in range(kw):
            xs = x_ref[0, ky * dil:ky * dil + Ho, kx * dil:kx * dil + Wo, :]
            acc = acc + jnp.dot(xs.reshape(Ho * Wo, cin), w_ref[ky * kw + kx],
                                preferred_element_type=jnp.float32)
    acc = acc + b_ref[...]
    if act == "relu":
        acc = jnp.maximum(acc, 0.0)
    elif act == "tanh":
        acc = jnp.tanh(acc)
    o_ref[0] = acc.reshape(Ho, Wo, cout).astype(o_ref.dtype)


@functools.lru_cache(maxsize=None)
def _build_direct_conv(N, Hp, Wp, C, kh, kw, dil, Ho, Wo, cout, act):
    fn = pl.pallas_call(
        functools.partial(_direct_conv_kernel, kh=kh, kw=kw, dil=dil, Ho=Ho, Wo=Wo, act=act),
        out_shape=jax.ShapeDtypeStruct((N, Ho, Wo, cout), jnp.bfloat16),
        grid=(N,),
        in_specs=[
            pl.BlockSpec((1, Hp, Wp, C), lambda n: (n, 0, 0, 0)),
            pl.BlockSpec((kh * kw, C, cout), lambda n: (0, 0, 0)),
            pl.BlockSpec((1, cout), lambda n: (0, 0)),
        ],
        out_specs=pl.BlockSpec((1, Ho, Wo, cout), lambda n: (n, 0, 0, 0)),
        compiler_params=_cparams("parallel"),
    )
    return jax.jit(fn)


def conv2d_direct(x, p, padding, dilation, act):
    # TODO(synk): one whole padded image per batch element is kept resident in VMEM; very large
    # resolutions would need halo-banded row tiling with manual DMA.
    N, H, W, C = x.shape
    kh, kw = p["kh"], p["kw"]
    if padding:
        x = jnp.pad(x, ((0, 0), (padding, padding), (padding, padding), (0, 0)))
    Hp, Wp = H + 2 * padding, W + 2 * padding
    Ho = Hp - dilation * (kh - 1)
    Wo = Wp - dilation * (kw - 1)
    cout = p["w"].shape[-1]
    b = p["b"].reshape(1, cout).astype(jnp.float32)
    return _build_direct_conv(N, Hp, Wp, C, kh, kw, dilation, Ho, Wo, cout, act)(
        x.astype(jnp.bfloat16), p["w"].astype(jnp.bfloat16), b)


# ----------------------------- InstanceNorm (HW tiled, single-pass stats) -----------------------------

def _in_stats_kernel(x_ref, s_ref):
    @pl.when(pl.program_id(1) == 0)
    def _():
        s_ref[...] = jnp.zeros_like(s_ref)
    x = x_ref[0].astype(jnp.float32)                     # (thw, C)
    ssum = jnp.sum(x, axis=0, keepdims=True)             # sum(x)
    ssq = jnp.sum(x * x, axis=0, keepdims=True)          # sum(x^2) in the same pass
    s_ref[0] = s_ref[0] + jnp.concatenate([ssum, ssq], axis=0)


def _in_apply_kernel(x_ref, s_ref, o_ref, *, hw, act, eps):
    s = s_ref[0]                                         # (2, C)
    mean = s[0:1, :] * (1.0 / hw)
    var = s[1:2, :] * (1.0 / hw) - mean * mean            # E[x^2] - mean^2
    rstd = lax.rsqrt(jnp.maximum(var, 0.0) + eps)
    y = (x_ref[0].astype(jnp.float32) - mean) * rstd
    if act == "relu":
        y = jnp.maximum(y, 0.0)
    elif act == "tanh":
        y = jnp.tanh(y)
    o_ref[0] = y.astype(o_ref.dtype)


@functools.lru_cache(maxsize=None)
def _build_instance_norm(N, HW, C, thw, act):
    stats = pl.pallas_call(
        _in_stats_kernel,
        out_shape=jax.ShapeDtypeStruct((N, 2, C), jnp.float32),
        grid=(N, HW // thw),
        in_specs=[pl.BlockSpec((1, thw, C), lambda n, t: (n, t, 0))],
        out_specs=pl.BlockSpec((1, 2, C), lambda n, t: (n, 0, 0)),
        compiler_params=_cparams("parallel", "arbitrary"),
    )
    apply = pl.pallas_call(
        functools.partial(_in_apply_kernel, hw=float(HW), act=act, eps=1e-5),
        out_shape=jax.ShapeDtypeStruct((N, HW, C), jnp.bfloat16),
        grid=(N, HW // thw),
        in_specs=[pl.BlockSpec((1, thw, C), lambda n, t: (n, t, 0)),
                  pl.BlockSpec((1, 2, C), lambda n, t: (n, 0, 0))],
        out_specs=pl.BlockSpec((1, thw, C), lambda n, t: (n, t, 0)),
        compiler_params=_cparams("parallel", "parallel"),
    )
    return jax.jit(stats), jax.jit(apply)


def instance_norm_act(x, act="none"):
    """InstanceNorm2d (affine=False, eps=1e-5) + activation; tiled over HW, stats in f32."""
    N, H, W, C = x.shape
    HW = H * W
    thw = _pick_div(HW, (2048, 1024, 512, 256, 128, 64, 32, 16, 8))
    xf = x.reshape(N, HW, C).astype(jnp.bfloat16)
    stats_fn, apply_fn = _build_instance_norm(N, HW, C, thw, act)
    s = stats_fn(xf)
    y = apply_fn(xf, s)
    return y.reshape(N, H, W, C)


# ----------------------------- conv helpers -----------------------------

def extract_patches(x, kh, kw, stride, padding, dilation=1):
    """im2col (XLA glue, used only for the two stride-2 convs): (N,H,W,C)->(N,Ho,Wo,kh*kw*C)."""
    N, H, W, C = x.shape
    xp = jnp.pad(x, ((0, 0), (padding, padding), (padding, padding), (0, 0)))
    Ho = (H + 2 * padding - dilation * (kh - 1) - 1) // stride + 1
    Wo = (W + 2 * padding - dilation * (kw - 1) - 1) // stride + 1
    cols = []
    for i in range(kh):
        for j in range(kw):
            sl = xp[:, i * dilation: i * dilation + (Ho - 1) * stride + 1: stride,
                       j * dilation: j * dilation + (Wo - 1) * stride + 1: stride, :]
            cols.append(sl)
    return jnp.concatenate(cols, axis=-1), Ho, Wo


def conv2d(x, p, stride=1, padding=0, dilation=1, act="none"):
    kh, kw = p["kh"], p["kw"]
    N, H, W, C = x.shape
    cout = p["w"].shape[-1]
    if kh == 1 and kw == 1 and stride == 1 and padding == 0:
        y = pallas_gemm(x.reshape(N * H * W, C), p["w"].reshape(C, cout), p["b"], act=act)
        return y.reshape(N, H, W, cout)
    if stride == 1:
        return conv2d_direct(x, p, padding, dilation, act)
    # TODO(synk): stride>1 convs (two encoder layers) still use XLA im2col before the GEMM.
    patches, Ho, Wo = extract_patches(x, kh, kw, stride, padding, dilation)
    y = pallas_gemm(patches.reshape(N * Ho * Wo, kh * kw * C),
                    p["w"].reshape(kh * kw * C, cout), p["b"], act=act)
    return y.reshape(N, Ho, Wo, cout)


def conv_block(x, p, stride=1, padding=0, dilation=1, norm="none", act="relu"):
    if norm == "in":
        y = conv2d(x, p, stride, padding, dilation, act="none")
        return instance_norm_act(y, act=act)
    return conv2d(x, p, stride, padding, dilation, act=act)


def upconv_block(x, p, stride=2, padding=1, output_padding=1, norm="in", act="relu"):
    """ConvTranspose2d(k=3,s=2,p=1,op=1) as interior-dilated pad + stride-1 direct conv.
    TODO(synk): the zero-inserted pixels still cost MXU flops; a 4-parity sub-conv split would
    cut ~4x of that work."""
    k = p["kh"]
    lead = k - 1 - padding
    trail = k - 1 - padding + output_padding
    cfg = [(0, 0, 0), (lead, trail, stride - 1), (lead, trail, stride - 1), (0, 0, 0)]
    xd = lax.pad(x.astype(jnp.bfloat16), jnp.zeros((), jnp.bfloat16), cfg)
    if norm == "in":
        y = conv2d_direct(xd, p, 0, 1, "none")
        return instance_norm_act(y, act=act)
    return conv2d_direct(xd, p, 0, 1, act)


# ----------------------------- fused contextual attention -----------------------------

def _ctx_attn_kernel(kp_ref, valid_ref, v_ref, o_ref, *, scale):
    kp32 = kp_ref[0].astype(jnp.float32)                                    # (L, D)
    norm = jnp.maximum(jnp.sqrt(jnp.sum(kp32 * kp32, axis=-1, keepdims=True)), 1e-4)
    kn = (kp32 / norm).astype(jnp.bfloat16)
    # scores = kp @ kn^T  (contract last dims; no host-side transpose / HBM round trip)
    s = lax.dot_general(kp_ref[0], kn, (((1,), (1,)), ((), ())),
                        preferred_element_type=jnp.float32)                 # (L, L)
    valid = valid_ref[...]                                                  # (1, L)
    s = s * valid * scale
    m = jnp.max(s, axis=-1, keepdims=True)
    e = jnp.exp(s - m)
    p = e * pl.reciprocal(jnp.sum(e, axis=-1, keepdims=True), approx=True)
    p = p * valid
    y = jnp.dot(p.astype(jnp.bfloat16), v_ref[0], preferred_element_type=jnp.float32)
    o_ref[0] = y.astype(o_ref.dtype)


@functools.lru_cache(maxsize=None)
def _build_ctx_attn(N, L, D, C, scale):
    fn = pl.pallas_call(
        functools.partial(_ctx_attn_kernel, scale=scale),
        out_shape=jax.ShapeDtypeStruct((N, L, C), jnp.bfloat16),
        grid=(N,),
        in_specs=[pl.BlockSpec((1, L, D), lambda n: (n, 0, 0)),
                  pl.BlockSpec((1, L), lambda n: (0, 0)),
                  pl.BlockSpec((1, L, C), lambda n: (n, 0, 0))],
        out_specs=pl.BlockSpec((1, L, C), lambda n: (n, 0, 0)),
        compiler_params=_cparams("parallel"),
    )
    return jax.jit(fn)


# TODO(synk): ContextualAttention's source was not provided; simplified DeepFill-style patch
# attention (rate-2 downsample, normalized 3x3 patch similarity, masked scaled softmax,
# weighted reconstruction, nearest upsample); the unused `flow` output is skipped.
def contextual_attention(x, mask, rate=2, ksize=3, softmax_scale=10.0):
    N, H, W, C = x.shape
    xd = x[:, ::rate, ::rate, :]
    Hd, Wd = xd.shape[1], xd.shape[2]
    L = Hd * Wd
    kp, _, _ = extract_patches(xd, ksize, ksize, 1, ksize // 2)
    kp = kp.reshape(N, L, ksize * ksize * C).astype(jnp.bfloat16)
    mh, mw = mask.shape[2], mask.shape[3]
    md = mask[0, 0, :: max(mh // Hd, 1), :: max(mw // Wd, 1)][:Hd, :Wd]
    valid = (md.reshape(1, L) < 0.5).astype(jnp.float32)    # background patches are valid keys
    vals = xd.reshape(N, L, C).astype(jnp.bfloat16)
    y = _build_ctx_attn(N, L, kp.shape[-1], C, float(softmax_scale))(kp, valid, vals)
    y = y.reshape(N, Hd, Wd, C)
    y = jnp.repeat(jnp.repeat(y, rate, axis=1), rate, axis=2)   # nearest upsample
    return y


# ----------------------------- fused hypergraph convolution -----------------------------

def _hypergraph_kernel(x_ref, wphi_ref, bphi_ref, omega_ref, wedge_ref,
                       theta_ref, bout_ref, o_ref):
    xf = x_ref[0]                                                            # (L, C) bf16
    phi = jnp.maximum(
        jnp.dot(xf, wphi_ref[...], preferred_element_type=jnp.float32) + bphi_ref[...], 0.0)
    hinc = jnp.maximum(
        jnp.dot(phi.astype(jnp.bfloat16), omega_ref[...],
                preferred_element_type=jnp.float32), 0.0)                    # (L, E)
    deg_v = jnp.sum(hinc, axis=1, keepdims=True) + 1e-6                      # (L, 1)
    deg_e = jnp.sum(hinc, axis=0, keepdims=True) + 1e-6                      # (1, E)
    xt = jnp.dot(xf, theta_ref[...], preferred_element_type=jnp.float32) + bout_ref[...]
    # m1 = H^T @ (X Theta): contract dim 0 of both (no transpose materialization)
    m1 = lax.dot_general(hinc.astype(jnp.bfloat16), xt.astype(jnp.bfloat16),
                         (((0,), (0,)), ((), ())), preferred_element_type=jnp.float32)
    h_scaled = (hinc * (wedge_ref[...] / deg_e)).astype(jnp.bfloat16)        # fold W_e B^-1 into H
    y = jnp.dot(h_scaled, m1.astype(jnp.bfloat16), preferred_element_type=jnp.float32)
    y = y * pl.reciprocal(deg_v, approx=True)                                # D^-1
    o_ref[0] = y.astype(o_ref.dtype)


@functools.lru_cache(maxsize=None)
def _build_hypergraph(N, L, C, F, E, cout):
    fn = pl.pallas_call(
        _hypergraph_kernel,
        out_shape=jax.ShapeDtypeStruct((N, L, cout), jnp.bfloat16),
        grid=(N,),
        in_specs=[pl.BlockSpec((1, L, C), lambda n: (n, 0, 0)),
                  pl.BlockSpec((C, F), lambda n: (0, 0)),
                  pl.BlockSpec((1, F), lambda n: (0, 0)),
                  pl.BlockSpec((F, E), lambda n: (0, 0)),
                  pl.BlockSpec((1, E), lambda n: (0, 0)),
                  pl.BlockSpec((C, cout), lambda n: (0, 0)),
                  pl.BlockSpec((1, cout), lambda n: (0, 0))],
        out_specs=pl.BlockSpec((1, L, cout), lambda n: (n, 0, 0)),
        compiler_params=_cparams("parallel"),
    )
    return jax.jit(fn)


# TODO(synk): HypergraphConv's source was not provided; implemented D^-1 H W_e B^-1 H^T X Theta
# with a learned non-negative incidence H = relu(relu(X W_phi) Omega).
def hypergraph_conv(x, p):
    N, H, W, C = x.shape
    L = H * W
    F = p["w_phi"].shape[1]
    E = p["omega"].shape[1]
    cout = p["theta"].shape[1]
    y = _build_hypergraph(N, L, C, F, E, cout)(
        x.reshape(N, L, C).astype(jnp.bfloat16),
        p["w_phi"].astype(jnp.bfloat16),
        p["b_phi"].reshape(1, F).astype(jnp.float32),
        p["omega"].astype(jnp.bfloat16),
        p["w_edge"].reshape(1, E).astype(jnp.float32),
        p["theta"].astype(jnp.bfloat16),
        p["b_out"].reshape(1, cout).astype(jnp.float32))
    return y.reshape(N, H, W, cout)


# ----------------------------- sub-modules -----------------------------

# TODO(synk): B.ResConv's source was not provided; implemented as the standard residual block
# x + conv_d2(relu(conv_d2(x))) with 3x3 / dilation-2 / padding-2 convolutions.
def res_conv(x, p):
    y = conv2d(x, p["c1"], 1, 2, 2, act="relu")
    y = conv2d(y, p["c2"], 1, 2, 2, act="none")
    return x + y


# TODO(synk): DMFB's source was not provided; implemented following the DMFN dense multi-scale
# fusion block (4 dilated branches + cumulative fusion + 1x1 conv + IN + residual).
def dmfb(x, p):
    h = conv2d(x, p["cin"], 1, 1, 1, act="relu")
    d1 = conv2d(h, p["d1"], 1, 1, 1, act="none")
    d2 = conv2d(h, p["d2"], 1, 2, 2, act="none")
    d4 = conv2d(h, p["d4"], 1, 4, 4, act="none")
    d8 = conv2d(h, p["d8"], 1, 8, 8, act="none")
    k2 = conv2d(d1 + d2, p["f2"], 1, 1, 1, act="none")
    k3 = conv2d(k2 + d4, p["f3"], 1, 1, 1, act="none")
    k4 = conv2d(k3 + d8, p["f4"], 1, 1, 1, act="none")
    fused = jnp.concatenate([d1, k2, k3, k4], axis=-1)
    out = conv2d(fused, p["cout"], 1, 0, 1, act="none")
    out = instance_norm_act(out, act="none")
    return x + out


# ----------------------------- parameters -----------------------------

class PGen:
    def __init__(self, seed=0):
        self.key = jax.random.PRNGKey(seed)
        self.n = 0

    def _next(self):
        self.n += 1
        return jax.random.fold_in(self.key, self.n)

    def conv(self, kh, kw, cin, cout):
        fan_in = kh * kw * cin
        w = jax.random.normal(self._next(), (kh * kw, cin, cout), jnp.float32) / np.sqrt(fan_in)
        return {"w": w.astype(jnp.bfloat16), "b": jnp.zeros((cout,), jnp.float32),
                "kh": kh, "kw": kw}

    def mat(self, rows, cols):
        return (jax.random.normal(self._next(), (rows, cols), jnp.float32)
                / np.sqrt(rows)).astype(jnp.bfloat16)

    def vec(self, n):
        return jax.random.normal(self._next(), (n,), jnp.float32) * 0.1 + 1.0


def init_fine_generator(cfg, seed=0):
    g = PGen(seed)
    c, in_nc, out_nc = cfg["c_num"], cfg["in_nc"], cfg["out_nc"]
    cb = 4 * c
    c4 = cb // 4
    p = {}
    p["encoder"] = [
        g.conv(5, 5, in_nc, c),
        g.conv(3, 3, c, 2 * c),
        g.conv(3, 3, 2 * c, 2 * c),
        g.conv(3, 3, 2 * c, 4 * c),
        g.conv(3, 3, 4 * c, 4 * c),
        g.conv(3, 3, 4 * c, 4 * c),
    ]
    p["res"] = [{"c1": g.conv(3, 3, cb, cb), "c2": g.conv(3, 3, cb, cb)}
                for _ in range(cfg["res_blocks_num"])]
    p["dmfb"] = [{
        "cin": g.conv(3, 3, cb, c4),
        "d1": g.conv(3, 3, c4, c4), "d2": g.conv(3, 3, c4, c4),
        "d4": g.conv(3, 3, c4, c4), "d8": g.conv(3, 3, c4, c4),
        "f2": g.conv(3, 3, c4, c4), "f3": g.conv(3, 3, c4, c4), "f4": g.conv(3, 3, c4, c4),
        "cout": g.conv(1, 1, cb, cb),
    } for _ in range(cfg["dmfb_blocks_num"])]
    F, E = cfg["hg_filters"], cfg["hg_edges"]
    p["hyper"] = {
        "w_phi": g.mat(cb, F), "b_phi": jnp.zeros((F,), jnp.float32),
        "omega": g.mat(F, E), "w_edge": g.vec(E),
        "theta": g.mat(cb, cb), "b_out": jnp.zeros((cb,), jnp.float32),
    }
    p["out_1"] = [g.conv(1, 1, 3 * cb, cb), g.conv(3, 3, cb, cb)]
    p["out"] = [g.conv(1, 1, 2 * cb, cb), g.conv(3, 3, cb, cb)]
    p["decoder"] = [
        g.conv(3, 3, 4 * c, 4 * c),
        g.conv(3, 3, 4 * c, 4 * c),
        g.conv(3, 3, 4 * c, 2 * c),          # upconv
        g.conv(3, 3, 4 * c, 2 * c),          # after skip-cat (2c + 2c)
        g.conv(3, 3, 2 * c, c),              # upconv
        g.conv(3, 3, 2 * c, c // 2),         # after skip-cat (c + c)
        g.conv(3, 3, c // 2, out_nc),
    ]
    return p


# ----------------------------- full forward -----------------------------

def fine_generator_forward(params, x_nchw, mask):
    x = jnp.transpose(x_nchw, (0, 2, 3, 1)).astype(jnp.bfloat16)       # NCHW -> NHWC bf16

    enc_specs = [dict(stride=1, padding=2), dict(stride=2, padding=1), dict(stride=1, padding=1),
                 dict(stride=2, padding=1), dict(stride=1, padding=1), dict(stride=1, padding=1)]
    enc_states = {}
    for i, (pp, sp) in enumerate(zip(params["encoder"], enc_specs)):
        x = conv_block(x, pp, stride=sp["stride"], padding=sp["padding"], norm="in", act="relu")
        if i == 0 or i == 2:
            enc_states[f"encoder_{i + 1}"] = x

    # ---- FineBottleneck ----
    res = x
    for pp in params["res"]:
        res = res_conv(res, pp)
    dm = x
    for pp in params["dmfb"]:
        dm = dmfb(dm, pp)
    attn = contextual_attention(x, mask, rate=2, ksize=3, softmax_scale=10.0)
    hyper = hypergraph_conv(x, params["hyper"])
    h = jnp.concatenate([attn, dm, res], axis=-1)
    h = conv_block(h, params["out_1"][0], stride=1, padding=0, norm="in", act="relu")
    h = conv_block(h, params["out_1"][1], stride=1, padding=1, norm="in", act="relu")
    h = jnp.concatenate([h, hyper], axis=-1)
    h = conv_block(h, params["out"][0], stride=1, padding=0, norm="in", act="relu")
    x = conv_block(h, params["out"][1], stride=1, padding=1, norm="in", act="relu")

    # ---- decoder ----
    dec = params["decoder"]
    # TODO(synk): conv_block's defaults were not provided; decoder layer 0 assumes norm='none', relu.
    x = conv_block(x, dec[0], stride=1, padding=1, norm="none", act="relu")
    x = conv_block(x, dec[1], stride=1, padding=1, norm="in", act="relu")
    x = upconv_block(x, dec[2], stride=2, padding=1, output_padding=1, norm="in", act="relu")
    x = jnp.concatenate([enc_states["encoder_3"], x], axis=-1)
    x = conv_block(x, dec[3], stride=1, padding=1, norm="in", act="relu")
    x = upconv_block(x, dec[4], stride=2, padding=1, output_padding=1, norm="in", act="relu")
    x = jnp.concatenate([enc_states["encoder_1"], x], axis=-1)
    x = conv_block(x, dec[5], stride=1, padding=1, norm="in", act="relu")
    x = conv_block(x, dec[6], stride=1, padding=1, norm="none", act="tanh")

    return jnp.transpose(x.astype(jnp.float32), (0, 3, 1, 2))          # NHWC -> NCHW f32


# ----------------------------- demo -----------------------------

if __name__ == "__main__":
    cfg = dict(in_nc=4, out_nc=3, c_num=8, res_blocks_num=2, dmfb_blocks_num=2,
               hg_filters=16, hg_edges=16)   # reduced from (c_num=48, 8/8 blocks, 256/256) for a small test
    N, H, W = 2, 16, 16

    key = jax.random.PRNGKey(0)
    x = jax.random.normal(key, (N, cfg["in_nc"], H, W), jnp.float32)
    mask = jnp.zeros((1, 1, H, W), jnp.float32).at[:, :, 4:12, 4:12].set(1.0)

    params = init_fine_generator(cfg, seed=0)
    out = fine_generator_forward(params, x, mask)
    out = jax.block_until_ready(out)
    assert out.shape == (N, cfg["out_nc"], H, W), out.shape
    assert jnp.all(jnp.isfinite(out))
    print("KERNEL_OK")
</pallas_src>

<mosaic_0001>
module attributes {stable_mosaic.version = 11 : i64} {
  func.func @_direct_conv_kernel(%arg0: i32, %arg1: memref<1x20x20x4xbf16, #tpu.memory_space<vmem>>, %arg2: memref<25x4x8xbf16, #tpu.memory_space<vmem>>, %arg3: memref<1x8xf32, #tpu.memory_space<vmem>>, %arg4: memref<1x16x16x8xbf16, #tpu.memory_space<vmem>>) attributes {dimension_semantics = [#tpu.dimension_semantics<parallel>], iteration_bounds = array<i64: 2>, scalar_prefetch = 0 : i64, scratch_operands = 0 : i64, tpu.core_type = #tpu.core_type<tc>, window_params = [{transform_indices = @transform_0, window_bounds = array<i64: 1, 20, 20, 4>}, {pipeline_mode = #tpu.pipeline_mode<synchronous>, transform_indices = @transform_1, window_bounds = array<i64: 25, 4, 8>}, {pipeline_mode = #tpu.pipeline_mode<synchronous>, transform_indices = @transform_2, window_bounds = array<i64: 1, 8>}, {transform_indices = @transform_3, window_bounds = array<i64: 1, 16, 16, 8>}]} {
    %cst = arith.constant 0.000000e+00 : f32
    %0 = vector.broadcast %cst : f32 to vector<256x8xf32>
    %c0 = arith.constant 0 : index
    %c0_0 = arith.constant 0 : index
    %c0_1 = arith.constant 0 : index
    %c0_2 = arith.constant 0 : index
    %1 = vector.load %arg1[%c0, %c0_0, %c0_1, %c0_2] : memref<1x20x20x4xbf16, #tpu.memory_space<vmem>>, vector<1x16x16x4xbf16>
    %2 = vector.shape_cast %1 : vector<1x16x16x4xbf16> to vector<16x16x4xbf16>
    %3 = vector.shape_cast %2 : vector<16x16x4xbf16> to vector<256x4xbf16>
    %c0_3 = arith.constant 0 : index
    %c0_4 = arith.constant 0 : index
    %c0_5 = arith.constant 0 : index
    %4 = vector.load %arg2[%c0_3, %c0_4, %c0_5] : memref<25x4x8xbf16, #tpu.memory_space<vmem>>, vector<1x4x8xbf16>
    %5 = vector.shape_cast %4 : vector<1x4x8xbf16> to vector<4x8xbf16>
    %cst_6 = arith.constant dense<0.000000e+00> : vector<256x8xf32>
    %6 = tpu.matmul %3, %5, %cst_6 {dimension_numbers = #tpu.dot_dimension_numbers<[1], [0], [0], [1], [0, 0, 1, 1], [], []>} : vector<256x4xbf16>, vector<4x8xbf16>, vector<256x8xf32> -> vector<256x8xf32>
    %7 = arith.addf %0, %6 : vector<256x8xf32>
    %c0_7 = arith.constant 0 : index
    %c0_8 = arith.constant 0 : index
    %c1 = arith.constant 1 : index
    %c0_9 = arith.constant 0 : index
    %8 = vector.load %arg1[%c0_7, %c0_8, %c1, %c0_9] : memref<1x20x20x4xbf16, #tpu.memory_space<vmem>>, vector<1x16x16x4xbf16>
    %9 = vector.shape_cast %8 : vector<1x16x16x4xbf16> to vector<16x16x4xbf16>
    %10 = vector.shape_cast %9 : vector<16x16x4xbf16> to vector<256x4xbf16>
    %c1_10 = arith.constant 1 : index
    %c0_11 = arith.constant 0 : index
    %c0_12 = arith.constant 0 : index
    %11 = vector.load %arg2[%c1_10, %c0_11, %c0_12] : memref<25x4x8xbf16, #tpu.memory_space<vmem>>, vector<1x4x8xbf16>
    %12 = vector.shape_cast %11 : vector<1x4x8xbf16> to vector<4x8xbf16>
    %cst_13 = arith.constant dense<0.000000e+00> : vector<256x8xf32>
    %13 = tpu.matmul %10, %12, %cst_13 {dimension_numbers = #tpu.dot_dimension_numbers<[1], [0], [0], [1], [0, 0, 1, 1], [], []>} : vector<256x4xbf16>, vector<4x8xbf16>, vector<256x8xf32> -> vector<256x8xf32>
    %14 = arith.addf %7, %13 : vector<256x8xf32>
    %c0_14 = arith.constant 0 : index
    %c0_15 = arith.constant 0 : index
    %c2 = arith.constant 2 : index
    %c0_16 = arith.constant 0 : index
    %15 = vector.load %arg1[%c0_14, %c0_15, %c2, %c0_16] : memref<1x20x20x4xbf16, #tpu.memory_space<vmem>>, vector<1x16x16x4xbf16>
    %16 = vector.shape_cast %15 : vector<1x16x16x4xbf16> to vector<16x16x4xbf16>
    %17 = vector.shape_cast %16 : vector<16x16x4xbf16> to vector<256x4xbf16>
    %c2_17 = arith.constant 2 : index
    %c0_18 = arith.constant 0 : index
    %c0_19 = arith.constant 0 : index
    %18 = vector.load %arg2[%c2_17, %c0_18, %c0_19] : memref<25x4x8xbf16, #tpu.memory_space<vmem>>, vector<1x4x8xbf16>
    %19 = vector.shape_cast %18 : vector<1x4x8xbf16> to vector<4x8xbf16>
    %cst_20 = arith.constant dense<0.000000e+00> : vector<256x8xf32>
    %20 = tpu.matmul %17, %19, %cst_20 {dimension_numbers = #tpu.dot_dimension_numbers<[1], [0], [0], [1], [0, 0, 1, 1], [], []>} : vector<256x4xbf16>, vector<4x8xbf16>, vector<256x8xf32> -> vector<256x8xf32>
    %21 = arith.addf %14, %20 : vector<256x8xf32>
    %c0_21 = arith.constant 0 : index
    %c0_22 = arith.constant 0 : index
    %c3 = arith.constant 3 : index
    %c0_23 = arith.constant 0 : index
    %22 = vector.load %arg1[%c0_21, %c0_22, %c3, %c0_23] : memref<1x20x20x4xbf16, #tpu.memory_space<vmem>>, vector<1x16x16x4xbf16>
    %23 = vector.shape_cast %22 : vector<1x16x16x4xbf16> to vector<16x16x4xbf16>
    %24 = vector.shape_cast %23 : vector<16x16x4xbf16> to vector<256x4xbf16>
    %c3_24 = arith.constant 3 : index
    %c0_25 = arith.constant 0 : index
    %c0_26 = arith.constant 0 : index
    %25 = vector.load %arg2[%c3_24, %c0_25, %c0_26] : memref<25x4x8xbf16, #tpu.memory_space<vmem>>, vector<1x4x8xbf16>
    %26 = vector.shape_cast %25 : vector<1x4x8xbf16> to vector<4x8xbf16>
    %cst_27 = arith.constant dense<0.000000e+00> : vector<256x8xf32>
    %27 = tpu.matmul %24, %26, %cst_27 {dimension_numbers = #tpu.dot_dimension_numbers<[1], [0], [0], [1], [0, 0, 1, 1], [], []>} : vector<256x4xbf16>, vector<4x8xbf16>, vector<256x8xf32> -> vector<256x8xf32>
    %28 = arith.addf %21, %27 : vector<256x8xf32>
    %c0_28 = arith.constant 0 : index
    %c0_29 = arith.constant 0 : index
    %c4 = arith.constant 4 : index
    %c0_30 = arith.constant 0 : index
    %29 = vector.load %arg1[%c0_28, %c0_29, %c4, %c0_30] : memref<1x20x20x4xbf16, #tpu.memory_space<vmem>>, vector<1x16x16x4xbf16>
    %30 = vector.shape_cast %29 : vector<1x16x16x4xbf16> to vector<16x16x4xbf16>
    %31 = vector.shape_cast %30 : vector<16x16x4xbf16> to vector<256x4xbf16>
    %c4_31 = arith.constant 4 : index
    %c0_32 = arith.constant 0 : index
    %c0_33 = arith.constant 0 : index
    %32 = vector.load %arg2[%c4_31, %c0_32, %c0_33] : memref<25x4x8xbf16, #tpu.memory_space<vmem>>, vector<1x4x8xbf16>
    %33 = vector.shape_cast %32 : vector<1x4x8xbf16> to vector<4x8xbf16>
    %cst_34 = arith.constant dense<0.000000e+00> : vector<256x8xf32>
    %34 = tpu.matmul %31, %33, %cst_34 {dimension_numbers = #tpu.dot_dimension_numbers<[1], [0], [0], [1], [0, 0, 1, 1], [], []>} : vector<256x4xbf16>, vector<4x8xbf16>, vector<256x8xf32> -> vector<256x8xf32>
    %35 = arith.addf %28, %34 : vector<256x8xf32>
    %c0_35 = arith.constant 0 : index
    %c1_36 = arith.constant 1 : index
    %c0_37 = arith.constant 0 : index
    %c0_38 = arith.constant 0 : index
    %36 = vector.load %arg1[%c0_35, %c1_36, %c0_37, %c0_38] : memref<1x20x20x4xbf16, #tpu.memory_space<vmem>>, vector<1x16x16x4xbf16>
    %37 = vector.shape_cast %36 : vector<1x16x16x4xbf16> to vector<16x16x4xbf16>
    %38 = vector.shape_cast %37 : vector<16x16x4xbf16> to vector<256x4xbf16>
    %c5 = arith.constant 5 : index
    %c0_39 = arith.constant 0 : index
    %c0_40 = arith.constant 0 : index
    %39 = vector.load %arg2[%c5, %c0_39, %c0_40] : memref<25x4x8xbf16, #tpu.memory_space<vmem>>, vector<1x4x8xbf16>
    %40 = vector.shape_cast %39 : vector<1x4x8xbf16> to vector<4x8xbf16>
    %cst_41 = arith.constant dense<0.000000e+00> : vector<256x8xf32>
    %41 = tpu.matmul %38, %40, %cst_41 {dimension_numbers = #tpu.dot_dimension_numbers<[1], [0], [0], [1], [0, 0, 1, 1], [], []>} : vector<256x4xbf16>, vector<4x8xbf16>, vector<256x8xf32> -> vector<256x8xf32>
    %42 = arith.addf %35, %41 : vector<256x8xf32>
    %c0_42 = arith.constant 0 : index
    %c1_43 = arith.constant 1 : index
    %c1_44 = arith.constant 1 : index
    %c0_45 = arith.constant 0 : index
    %43 = vector.load %arg1[%c0_42, %c1_43, %c1_44, %c0_45] : memref<1x20x20x4xbf16, #tpu.memory_space<vmem>>, vector<1x16x16x4xbf16>
    %44 = vector.shape_cast %43 : vector<1x16x16x4xbf16> to vector<16x16x4xbf16>
    %45 = vector.shape_cast %44 : vector<16x16x4xbf16> to vector<256x4xbf16>
    %c6 = arith.constant 6 : index
    %c0_46 = arith.constant 0 : index
    %c0_47 = arith.constant 0 : index
    %46 = vector.load %arg2[%c6, %c0_46, %c0_47] : memref<25x4x8xbf16, #tpu.memory_space<vmem>>, vector<1x4x8xbf16>
    %47 = vector.shape_cast %46 : vector<1x4x8xbf16> to vector<4x8xbf16>
    %cst_48 = arith.constant dense<0.000000e+00> : vector<256x8xf32>
    %48 = tpu.matmul %45, %47, %cst_48 {dimension_numbers = #tpu.dot_dimension_numbers<[1], [0], [0], [1], [0, 0, 1, 1], [], []>} : vector<256x4xbf16>, vector<4x8xbf16>, vector<256x8xf32> -> vector<256x8xf32>
    %49 = arith.addf %42, %48 : vector<256x8xf32>
    %c0_49 = arith.constant 0 : index
    %c1_50 = arith.constant 1 : index
    %c2_51 = arith.constant 2 : index
    %c0_52 = arith.constant 0 : index
    %50 = vector.load %arg1[%c0_49, %c1_50, %c2_51, %c0_52] : memref<1x20x20x4xbf16, #tpu.memory_space<vmem>>, vector<1x16x16x4xbf16>
    %51 = vector.shape_cast %50 : vector<1x16x16x4xbf16> to vector<16x16x4xbf16>
    %52 = vector.shape_cast %51 : vector<16x16x4xbf16> to vector<256x4xbf16>
    %c7 = arith.constant 7 : index
    %c0_53 = arith.constant 0 : index
    %c0_54 = arith.constant 0 : index
    %53 = vector.load %arg2[%c7, %c0_53, %c0_54] : memref<25x4x8xbf16, #tpu.memory_space<vmem>>, vector<1x4x8xbf16>
    %54 = vector.shape_cast %53 : vector<1x4x8xbf16> to vector<4x8xbf16>
    %cst_55 = arith.constant dense<0.000000e+00> : vector<256x8xf32>
    %55 = tpu.matmul %52, %54, %cst_55 {dimension_numbers = #tpu.dot_dimension_numbers<[1], [0], [0], [1], [0, 0, 1, 1], [], []>} : vector<256x4xbf16>, vector<4x8xbf16>, vector<256x8xf32> -> vector<256x8xf32>
    %56 = arith.addf %49, %55 : vector<256x8xf32>
    %c0_56 = arith.constant 0 : index
    %c1_57 = arith.constant 1 : index
    %c3_58 = arith.constant 3 : index
    %c0_59 = arith.constant 0 : index
    %57 = vector.load %arg1[%c0_56, %c1_57, %c3_58, %c0_59] : memref<1x20x20x4xbf16, #tpu.memory_space<vmem>>, vector<1x16x16x4xbf16>
    %58 = vector.shape_cast %57 : vector<1x16x16x4xbf16> to vector<16x16x4xbf16>
    %59 = vector.shape_cast %58 : vector<16x16x4xbf16> to vector<256x4xbf16>
    %c8 = arith.constant 8 : index
    %c0_60 = arith.constant 0 : index
    %c0_61 = arith.constant 0 : index
    %60 = vector.load %arg2[%c8, %c0_60, %c0_61] : memref<25x4x8xbf16, #tpu.memory_space<vmem>>, vector<1x4x8xbf16>
    %61 = vector.shape_cast %60 : vector<1x4x8xbf16> to vector<4x8xbf16>
    %cst_62 = arith.constant dense<0.000000e+00> : vector<256x8xf32>
    %62 = tpu.matmul %59, %61, %cst_62 {dimension_numbers = #tpu.dot_dimension_numbers<[1], [0], [0], [1], [0, 0, 1, 1], [], []>} : vector<256x4xbf16>, vector<4x8xbf16>, vector<256x8xf32> -> vector<256x8xf32>
    %63 = arith.addf %56, %62 : vector<256x8xf32>
    %c0_63 = arith.constant 0 : index
    %c1_64 = arith.constant 1 : index
    %c4_65 = arith.constant 4 : index
    %c0_66 = arith.constant 0 : index
    %64 = vector.load %arg1[%c0_63, %c1_64, %c4_65, %c0_66] : memref<1x20x20x4xbf16, #tpu.memory_space<vmem>>, vector<1x16x16x4xbf16>
    %65 = vector.shape_cast %64 : vector<1x16x16x4xbf16> to vector<16x16x4xbf16>
    %66 = vector.shape_cast %65 : vector<16x16x4xbf16> to vector<256x4xbf16>
    %c9 = arith.constant 9 : index
    %c0_67 = arith.constant 0 : index
    %c0_68 = arith.constant 0 : index
    %67 = vector.load %arg2[%c9, %c0_67, %c0_68] : memref<25x4x8xbf16, #tpu.memory_space<vmem>>, vector<1x4x8xbf16>
    %68 = vector.shape_cast %67 : vector<1x4x8xbf16> to vector<4x8xbf16>
    %cst_69 = arith.constant dense<0.000000e+00> : vector<256x8xf32>
    %69 = tpu.matmul %66, %68, %cst_69 {dimension_numbers = #tpu.dot_dimension_numbers<[1], [0], [0], [1], [0, 0, 1, 1], [], []>} : vector<256x4xbf16>, vector<4x8xbf16>, vector<256x8xf32> -> vector<256x8xf32>
    %70 = arith.addf %63, %69 : vector<256x8xf32>
    %c0_70 = arith.constant 0 : index
    %c2_71 = arith.constant 2 : index
    %c0_72 = arith.constant 0 : index
    %c0_73 = arith.constant 0 : index
    %71 = vector.load %arg1[%c0_70, %c2_71, %c0_72, %c0_73] : memref<1x20x20x4xbf16, #tpu.memory_space<vmem>>, vector<1x16x16x4xbf16>
    %72 = vector.shape_cast %71 : vector<1x16x16x4xbf16> to vector<16x16x4xbf16>
    %73 = vector.shape_cast %72 : vector<16x16x4xbf16> to vector<256x4xbf16>
    %c10 = arith.constant 10 : index
    %c0_74 = arith.constant 0 : index
    %c0_75 = arith.constant 0 : index
    %74 = vector.load %arg2[%c10, %c0_74, %c0_75] : memref<25x4x8xbf16, #tpu.memory_space<vmem>>, vector<1x4x8xbf16>
    %75 = vector.shape_cast %74 : vector<1x4x8xbf16> to vector<4x8xbf16>
    %cst_76 = arith.constant dense<0.000000e+00> : vector<256x8xf32>
    %76 = tpu.matmul %73, %75, %cst_76 {dimension_numbers = #tpu.dot_dimension_numbers<[1], [0], [0], [1], [0, 0, 1, 1], [], []>} : vector<256x4xbf16>, vector<4x8xbf16>, vector<256x8xf32> -> vector<256x8xf32>
    %77 = arith.addf %70, %76 : vector<256x8xf32>
    %c0_77 = arith.constant 0 : index
    %c2_78 = arith.constant 2 : index
    %c1_79 = arith.constant 1 : index
    %c0_80 = arith.constant 0 : index
    %78 = vector.load %arg1[%c0_77, %c2_78, %c1_79, %c0_80] : memref<1x20x20x4xbf16, #tpu.memory_space<vmem>>, vector<1x16x16x4xbf16>
    %79 = vector.shape_cast %78 : vector<1x16x16x4xbf16> to vector<16x16x4xbf16>
    %80 = vector.shape_cast %79 : vector<16x16x4xbf16> to vector<256x4xbf16>
    %c11 = arith.constant 11 : index
    %c0_81 = arith.constant 0 : index
    %c0_82 = arith.constant 0 : index
    %81 = vector.load %arg2[%c11, %c0_81, %c0_82] : memref<25x4x8xbf16, #tpu.memory_space<vmem>>, vector<1x4x8xbf16>
    %82 = vector.shape_cast %81 : vector<1x4x8xbf16> to vector<4x8xbf16>
    %cst_83 = arith.constant dense<0.000000e+00> : vector<256x8xf32>
    %83 = tpu.matmul %80, %82, %cst_83 {dimension_numbers = #tpu.dot_dimension_numbers<[1], [0], [0], [1], [0, 0, 1, 1], [], []>} : vector<256x4xbf16>, vector<4x8xbf16>, vector<256x8xf32> -> vector<256x8xf32>
    %84 = arith.addf %77, %83 : vector<256x8xf32>
    %c0_84 = arith.constant 0 : index
    %c2_85 = arith.constant 2 : index
    %c2_86 = arith.constant 2 : index
    %c0_87 = arith.constant 0 : index
    %85 = vector.load %arg1[%c0_84, %c2_85, %c2_86, %c0_87] : memref<1x20x20x4xbf16, #tpu.memory_space<vmem>>, vector<1x16x16x4xbf16>
    %86 = vector.shape_cast %85 : vector<1x16x16x4xbf16> to vector<16x16x4xbf16>
    %87 = vector.shape_cast %86 : vector<16x16x4xbf16> to vector<256x4xbf16>
    %c12 = arith.constant 12 : index
    %c0_88 = arith.constant 0 : index
    %c0_89 = arith.constant 0 : index
    %88 = vector.load %arg2[%c12, %c0_88, %c0_89] : memref<25x4x8xbf16, #tpu.memory_space<vmem>>, vector<1x4x8xbf16>
    %89 = vector.shape_cast %88 : vector<1x4x8xbf16> to vector<4x8xbf16>
    %cst_90 = arith.constant dense<0.000000e+00> : vector<256x8xf32>
    %90 = tpu.matmul %87, %89, %cst_90 {dimension_numbers = #tpu.dot_dimension_numbers<[1], [0], [0], [1], [0, 0, 1, 1], [], []>} : vector<256x4xbf16>, vector<4x8xbf16>, vector<256x8xf32> -> vector<256x8xf32>
    %91 = arith.addf %84, %90 : vector<256x8xf32>
    %c0_91 = arith.constant 0 : index
    %c2_92 = arith.constant 2 : index
    %c3_93 = arith.constant 3 : index
    %c0_94 = arith.constant 0 : index
    %92 = vector.load %arg1[%c0_91, %c2_92, %c3_93, %c0_94] : memref<1x20x20x4xbf16, #tpu.memory_space<vmem>>, vector<1x16x16x4xbf16>
    %93 = vector.shape_cast %92 : vector<1x16x16x4xbf16> to vector<16x16x4xbf16>
    %94 = vector.shape_cast %93 : vector<16x16x4xbf16> to vector<256x4xbf16>
    %c13 = arith.constant 13 : index
    %c0_95 = arith.constant 0 : index
    %c0_96 = arith.constant 0 : index
    %95 = vector.load %arg2[%c13, %c0_95, %c0_96] : memref<25x4x8xbf16, #tpu.memory_space<vmem>>, vector<1x4x8xbf16>
    %96 = vector.shape_cast %95 : vector<1x4x8xbf16> to vector<4x8xbf16>
    %cst_97 = arith.constant dense<0.000000e+00> : vector<256x8xf32>
    %97 = tpu.matmul %94, %96, %cst_97 {dimension_numbers = #tpu.dot_dimension_numbers<[1], [0], [0], [1], [0, 0, 1, 1], [], []>} : vector<256x4xbf16>, vector<4x8xbf16>, vector<256x8xf32> -> vector<256x8xf32>
    %98 = arith.addf %91, %97 : vector<256x8xf32>
    %c0_98 = arith.constant 0 : index
    %c2_99 = arith.constant 2 : index
    %c4_100 = arith.constant 4 : index
    %c0_101 = arith.constant 0 : index
    %99 = vector.load %arg1[%c0_98, %c2_99, %c4_100, %c0_101] : memref<1x20x20x4xbf16, #tpu.memory_space<vmem>>, vector<1x16x16x4xbf16>
    %100 = vector.shape_cast %99 : vector<1x16x16x4xbf16> to vector<16x16x4xbf16>
    %101 = vector.shape_cast %100 : vector<16x16x4xbf16> to vector<256x4xbf16>
    %c14 = arith.constant 14 : index
    %c0_102 = arith.constant 0 : index
    %c0_103 = arith.constant 0 : index
    %102 = vector.load %arg2[%c14, %c0_102, %c0_103] : memref<25x4x8xbf16, #tpu.memory_space<vmem>>, vector<1x4x8xbf16>
    %103 = vector.shape_cast %102 : vector<1x4x8xbf16> to vector<4x8xbf16>
    %cst_104 = arith.constant dense<0.000000e+00> : vector<256x8xf32>
    %104 = tpu.matmul %101, %103, %cst_104 {dimension_numbers = #tpu.dot_dimension_numbers<[1], [0], [0], [1], [0, 0, 1, 1], [], []>} : vector<256x4xbf16>, vector<4x8xbf16>, vector<256x8xf32> -> vector<256x8xf32>
    %105 = arith.addf %98, %104 : vector<256x8xf32>
    %c0_105 = arith.constant 0 : index
    %c3_106 = arith.constant 3 : index
    %c0_107 = arith.constant 0 : index
    %c0_108 = arith.constant 0 : index
    %106 = vector.load %arg1[%c0_105, %c3_106, %c0_107, %c0_108] : memref<1x20x20x4xbf16, #tpu.memory_space<vmem>>, vector<1x16x16x4xbf16>
    %107 = vector.shape_cast %106 : vector<1x16x16x4xbf16> to vector<16x16x4xbf16>
    %108 = vector.shape_cast %107 : vector<16x16x4xbf16> to vector<256x4xbf16>
    %c15 = arith.constant 15 : index
    %c0_109 = arith.constant 0 : index
    %c0_110 = arith.constant 0 : index
    %109 = vector.load %arg2[%c15, %c0_109, %c0_110] : memref<25x4x8xbf16, #tpu.memory_space<vmem>>, vector<1x4x8xbf16>
    %110 = vector.shape_cast %109 : vector<1x4x8xbf16> to vector<4x8xbf16>
    %cst_111 = arith.constant dense<0.000000e+00> : vector<256x8xf32>
    %111 = tpu.matmul %108, %110, %cst_111 {dimension_numbers = #tpu.dot_dimension_numbers<[1], [0], [0], [1], [0, 0, 1, 1], [], []>} : vector<256x4xbf16>, vector<4x8xbf16>, vector<256x8xf32> -> vector<256x8xf32>
    %112 = arith.addf %105, %111 : vector<256x8xf32>
    %c0_112 = arith.constant 0 : index
    %c3_113 = arith.constant 3 : index
    %c1_114 = arith.constant 1 : index
    %c0_115 = arith.constant 0 : index
    %113 = vector.load %arg1[%c0_112, %c3_113, %c1_114, %c0_115] : memref<1x20x20x4xbf16, #tpu.memory_space<vmem>>, vector<1x16x16x4xbf16>
    %114 = vector.shape_cast %113 : vector<1x16x16x4xbf16> to vector<16x16x4xbf16>
    %115 = vector.shape_cast %114 : vector<16x16x4xbf16> to vector<256x4xbf16>
    %c16 = arith.constant 16 : index
    %c0_116 = arith.constant 0 : index
    %c0_117 = arith.constant 0 : index
    %116 = vector.load %arg2[%c16, %c0_116, %c0_117] : memref<25x4x8xbf16, #tpu.memory_space<vmem>>, vector<1x4x8xbf16>
    %117 = vector.shape_cast %116 : vector<1x4x8xbf16> to vector<4x8xbf16>
    %cst_118 = arith.constant dense<0.000000e+00> : vector<256x8xf32>
    %118 = tpu.matmul %115, %117, %cst_118 {dimension_numbers = #tpu.dot_dimension_numbers<[1], [0], [0], [1], [0, 0, 1, 1], [], []>} : vector<256x4xbf16>, vector<4x8xbf16>, vector<256x8xf32> -> vector<256x8xf32>
    %119 = arith.addf %112, %118 : vector<256x8xf32>
    %c0_119 = arith.constant 0 : index
    %c3_120 = arith.constant 3 : index
    %c2_121 = arith.constant 2 : index
    %c0_122 = arith.constant 0 : index
    %120 = vector.load %arg1[%c0_119, %c3_120, %c2_121, %c0_122] : memref<1x20x20x4xbf16, #tpu.memory_space<vmem>>, vector<1x16x16x4xbf16>
    %121 = vector.shape_cast %120 : vector<1x16x16x4xbf16> to vector<16x16x4xbf16>
    %122 = vector.shape_cast %121 : vector<16x16x4xbf16> to vector<256x4xbf16>
    %c17 = arith.constant 17 : index
    %c0_123 = arith.constant 0 : index
    %c0_124 = arith.constant 0 : index
    %123 = vector.load %arg2[%c17, %c0_123, %c0_124] : memref<25x4x8xbf16, #tpu.memory_space<vmem>>, vector<1x4x8xbf16>
    %124 = vector.shape_cast %123 : vector<1x4x8xbf16> to vector<4x8xbf16>
    %cst_125 = arith.constant dense<0.000000e+00> : vector<256x8xf32>
    %125 = tpu.matmul %122, %124, %cst_125 {dimension_numbers = #tpu.dot_dimension_numbers<[1], [0], [0], [1], [0, 0, 1, 1], [], []>} : vector<256x4xbf16>, vector<4x8xbf16>, vector<256x8xf32> -> vector<256x8xf32>
    %126 = arith.addf %119, %125 : vector<256x8xf32>
    %c0_126 = arith.constant 0 : index
    %c3_127 = arith.constant 3 : index
    %c3_128 = arith.constant 3 : index
    %c0_129 = arith.constant 0 : index
    %127 = vector.load %arg1[%c0_126, %c3_127, %c3_128, %c0_129] : memref<1x20x20x4xbf16, #tpu.memory_space<vmem>>, vector<1x16x16x4xbf16>
    %128 = vector.shape_cast %127 : vector<1x16x16x4xbf16> to vector<16x16x4xbf16>
    %129 = vector.shape_cast %128 : vector<16x16x4xbf16> to vector<256x4xbf16>
    %c18 = arith.constant 18 : index
    %c0_130 = arith.constant 0 : index
    %c0_131 = arith.constant 0 : index
    %130 = vector.load %arg2[%c18, %c0_130, %c0_131] : memref<25x4x8xbf16, #tpu.memory_space<vmem>>, vector<1x4x8xbf16>
    %131 = vector.shape_cast %130 : vector<1x4x8xbf16> to vector<4x8xbf16>
    %cst_132 = arith.constant dense<0.000000e+00> : vector<256x8xf32>
    %132 = tpu.matmul %129, %131, %cst_132 {dimension_numbers = #tpu.dot_dimension_numbers<[1], [0], [0], [1], [0, 0, 1, 1], [], []>} : vector<256x4xbf16>, vector<4x8xbf16>, vector<256x8xf32> -> vector<256x8xf32>
    %133 = arith.addf %126, %132 : vector<256x8xf32>
    %c0_133 = arith.constant 0 : index
    %c3_134 = arith.constant 3 : index
    %c4_135 = arith.constant 4 : index
    %c0_136 = arith.constant 0 : index
    %134 = vector.load %arg1[%c0_133, %c3_134, %c4_135, %c0_136] : memref<1x20x20x4xbf16, #tpu.memory_space<vmem>>, vector<1x16x16x4xbf16>
    %135 = vector.shape_cast %134 : vector<1x16x16x4xbf16> to vector<16x16x4xbf16>
    %136 = vector.shape_cast %135 : vector<16x16x4xbf16> to vector<256x4xbf16>
    %c19 = arith.constant 19 : index
    %c0_137 = arith.constant 0 : index
    %c0_138 = arith.constant 0 : index
    %137 = vector.load %arg2[%c19, %c0_137, %c0_138] : memref<25x4x8xbf16, #tpu.memory_space<vmem>>, vector<1x4x8xbf16>
    %138 = vector.shape_cast %137 : vector<1x4x8xbf16> to vector<4x8xbf16>
    %cst_139 = arith.constant dense<0.000000e+00> : vector<256x8xf32>
    %139 = tpu.matmul %136, %138, %cst_139 {dimension_numbers = #tpu.dot_dimension_numbers<[1], [0], [0], [1], [0, 0, 1, 1], [], []>} : vector<256x4xbf16>, vector<4x8xbf16>, vector<256x8xf32> -> vector<256x8xf32>
    %140 = arith.addf %133, %139 : vector<256x8xf32>
    %c0_140 = arith.constant 0 : index
    %c4_141 = arith.constant 4 : index
    %c0_142 = arith.constant 0 : index
    %c0_143 = arith.constant 0 : index
    %141 = vector.load %arg1[%c0_140, %c4_141, %c0_142, %c0_143] : memref<1x20x20x4xbf16, #tpu.memory_space<vmem>>, vector<1x16x16x4xbf16>
    %142 = vector.shape_cast %141 : vector<1x16x16x4xbf16> to vector<16x16x4xbf16>
    %143 = vector.shape_cast %142 : vector<16x16x4xbf16> to vector<256x4xbf16>
    %c20 = arith.constant 20 : index
    %c0_144 = arith.constant 0 : index
    %c0_145 = arith.constant 0 : index
    %144 = vector.load %arg2[%c20, %c0_144, %c0_145] : memref<25x4x8xbf16, #tpu.memory_space<vmem>>, vector<1x4x8xbf16>
    %145 = vector.shape_cast %144 : vector<1x4x8xbf16> to vector<4x8xbf16>
    %cst_146 = arith.constant dense<0.000000e+00> : vector<256x8xf32>
    %146 = tpu.matmul %143, %145, %cst_146 {dimension_numbers = #tpu.dot_dimension_numbers<[1], [0], [0], [1], [0, 0, 1, 1], [], []>} : vector<256x4xbf16>, vector<4x8xbf16>, vector<256x8xf32> -> vector<256x8xf32>
    %147 = arith.addf %140, %146 : vector<256x8xf32>
    %c0_147 = arith.constant 0 : index
    %c4_148 = arith.constant 4 : index
    %c1_149 = arith.constant 1 : index
    %c0_150 = arith.constant 0 : index
    %148 = vector.load %arg1[%c0_147, %c4_148, %c1_149, %c0_150] : memref<1x20x20x4xbf16, #tpu.memory_space<vmem>>, vector<1x16x16x4xbf16>
    %149 = vector.shape_cast %148 : vector<1x16x16x4xbf16> to vector<16x16x4xbf16>
    %150 = vector.shape_cast %149 : vector<16x16x4xbf16> to vector<256x4xbf16>
    %c21 = arith.constant 21 : index
    %c0_151 = arith.constant 0 : index
    %c0_152 = arith.constant 0 : index
    %151 = vector.load %arg2[%c21, %c0_151, %c0_152] : memref<25x4x8xbf16, #tpu.memory_space<vmem>>, vector<1x4x8xbf16>
    %152 = vector.shape_cast %151 : vector<1x4x8xbf16> to vector<4x8xbf16>
    %cst_153 = arith.constant dense<0.000000e+00> : vector<256x8xf32>
    %153 = tpu.matmul %150, %152, %cst_153 {dimension_numbers = #tpu.dot_dimension_numbers<[1], [0], [0], [1], [0, 0, 1, 1], [], []>} : vector<256x4xbf16>, vector<4x8xbf16>, vector<256x8xf32> -> vector<256x8xf32>
    %154 = arith.addf %147, %153 : vector<256x8xf32>
    %c0_154 = arith.constant 0 : index
    %c4_155 = arith.constant 4 : index
    %c2_156 = arith.constant 2 : index
    %c0_157 = arith.constant 0 : index
    %155 = vector.load %arg1[%c0_154, %c4_155, %c2_156, %c0_157] : memref<1x20x20x4xbf16, #tpu.memory_space<vmem>>, vector<1x16x16x4xbf16>
    %156 = vector.shape_cast %155 : vector<1x16x16x4xbf16> to vector<16x16x4xbf16>
    %157 = vector.shape_cast %156 : vector<16x16x4xbf16> to vector<256x4xbf16>
    %c22 = arith.constant 22 : index
    %c0_158 = arith.constant 0 : index
    %c0_159 = arith.constant 0 : index
    %158 = vector.load %arg2[%c22, %c0_158, %c0_159] : memref<25x4x8xbf16, #tpu.memory_space<vmem>>, vector<1x4x8xbf16>
    %159 = vector.shape_cast %158 : vector<1x4x8xbf16> to vector<4x8xbf16>
    %cst_160 = arith.constant dense<0.000000e+00> : vector<256x8xf32>
    %160 = tpu.matmul %157, %159, %cst_160 {dimension_numbers = #tpu.dot_dimension_numbers<[1], [0], [0], [1], [0, 0, 1, 1], [], []>} : vector<256x4xbf16>, vector<4x8xbf16>, vector<256x8xf32> -> vector<256x8xf32>
    %161 = arith.addf %154, %160 : vector<256x8xf32>
    %c0_161 = arith.constant 0 : index
    %c4_162 = arith.constant 4 : index
    %c3_163 = arith.constant 3 : index
    %c0_164 = arith.constant 0 : index
    %162 = vector.load %arg1[%c0_161, %c4_162, %c3_163, %c0_164] : memref<1x20x20x4xbf16, #tpu.memory_space<vmem>>, vector<1x16x16x4xbf16>
    %163 = vector.shape_cast %162 : vector<1x16x16x4xbf16> to vector<16x16x4xbf16>
    %164 = vector.shape_cast %163 : vector<16x16x4xbf16> to vector<256x4xbf16>
    %c23 = arith.constant 23 : index
    %c0_165 = arith.constant 0 : index
    %c0_166 = arith.constant 0 : index
    %165 = vector.load %arg2[%c23, %c0_165, %c0_166] : memref<25x4x8xbf16, #tpu.memory_space<vmem>>, vector<1x4x8xbf16>
    %166 = vector.shape_cast %165 : vector<1x4x8xbf16> to vector<4x8xbf16>
    %cst_167 = arith.constant dense<0.000000e+00> : vector<256x8xf32>
    %167 = tpu.matmul %164, %166, %cst_167 {dimension_numbers = #tpu.dot_dimension_numbers<[1], [0], [0], [1], [0, 0, 1, 1], [], []>} : vector<256x4xbf16>, vector<4x8xbf16>, vector<256x8xf32> -> vector<256x8xf32>
    %168 = arith.addf %161, %167 : vector<256x8xf32>
    %c0_168 = arith.constant 0 : index
    %c4_169 = arith.constant 4 : index
    %c4_170 = arith.constant 4 : index
    %c0_171 = arith.constant 0 : index
    %169 = vector.load %arg1[%c0_168, %c4_169, %c4_170, %c0_171] : memref<1x20x20x4xbf16, #tpu.memory_space<vmem>>, vector<1x16x16x4xbf16>
    %170 = vector.shape_cast %169 : vector<1x16x16x4xbf16> to vector<16x16x4xbf16>
    %171 = vector.shape_cast %170 : vector<16x16x4xbf16> to vector<256x4xbf16>
    %c24 = arith.constant 24 : index
    %c0_172 = arith.constant 0 : index
    %c0_173 = arith.constant 0 : index
    %172 = vector.load %arg2[%c24, %c0_172, %c0_173] : memref<25x4x8xbf16, #tpu.memory_space<vmem>>, vector<1x4x8xbf16>
    %173 = vector.shape_cast %172 : vector<1x4x8xbf16> to vector<4x8xbf16>
    %cst_174 = arith.constant dense<0.000000e+00> : vector<256x8xf32>
    %174 = tpu.matmul %171, %173, %cst_174 {dimension_numbers = #tpu.dot_dimension_numbers<[1], [0], [0], [1], [0, 0, 1, 1], [], []>} : vector<256x4xbf16>, vector<4x8xbf16>, vector<256x8xf32> -> vector<256x8xf32>
    %175 = arith.addf %168, %174 : vector<256x8xf32>
    %c0_175 = arith.constant 0 : index
    %c0_176 = arith.constant 0 : index
    %176 = vector.load %arg3[%c0_175, %c0_176] : memref<1x8xf32, #tpu.memory_space<vmem>>, vector<1x8xf32>
    %177 = vector.broadcast %176 : vector<1x8xf32> to vector<256x8xf32>
    %178 = arith.addf %175, %177 : vector<256x8xf32>
    %179 = vector.shape_cast %178 : vector<256x8xf32> to vector<16x16x8xf32>
    %180 = arith.truncf %179 : vector<16x16x8xf32> to vector<16x16x8xbf16>
    %c0_177 = arith.constant 0 : index
    %c0_178 = arith.constant 0 : index
    %c0_179 = arith.constant 0 : index
    %c0_180 = arith.constant 0 : index
    %181 = vector.load %arg4[%c0_177, %c0_178, %c0_179, %c0_180] : memref<1x16x16x8xbf16, #tpu.memory_space<vmem>>, vector<1x16x16x8xbf16>
    %182 = vector.shape_cast %181 : vector<1x16x16x8xbf16> to vector<16x16x8xbf16>
    %183 = vector.shape_cast %180 : vector<16x16x8xbf16> to vector<1x16x16x8xbf16>
    tpu.vector_store %arg4[%c0_177, %c0_178, %c0_179, %c0_180], %183 {strides = array<i32>} : memref<1x16x16x8xbf16, #tpu.memory_space<vmem>>, vector<1x16x16x8xbf16>,
    return
  }
  func.func @transform_0(%arg0: i32) -> (i32, i32, i32, i32) {
    %c0_i32 = arith.constant 0 : i32
    %c0_i32_0 = arith.constant 0 : i32
    %c0_i32_1 = arith.constant 0 : i32
    %c0_i32_2 = arith.constant 0 : i32
    return %arg0, %c0_i32, %c0_i32_0, %c0_i32_1 : i32, i32, i32, i32
  }
  func.func @transform_1(%arg0: i32) -> (i32, i32, i32) {
    %c0_i32 = arith.constant 0 : i32
    %c0_i32_0 = arith.constant 0 : i32
    %c0_i32_1 = arith.constant 0 : i32
    %c0_i32_2 = arith.constant 0 : i32
    return %c0_i32, %c0_i32_0, %c0_i32_1 : i32, i32, i32
  }
  func.func @transform_2(%arg0: i32) -> (i32, i32) {
    %c0_i32 = arith.constant 0 : i32
    %c0_i32_0 = arith.constant 0 : i32
    %c0_i32_1 = arith.constant 0 : i32
    return %c0_i32, %c0_i32_0 : i32, i32
  }
  func.func @transform_3(%arg0: i32) -> (i32, i32, i32, i32) {
    %c0_i32 = arith.constant 0 : i32
    %c0_i32_0 = arith.constant 0 : i32
    %c0_i32_1 = arith.constant 0 : i32
    %c0_i32_2 = arith.constant 0 : i32
    return %arg0, %c0_i32, %c0_i32_0, %c0_i32_1 : i32, i32, i32, i32
  }
}

</mosaic_0001>

<bundles_post_ra>
// kernel: tpu_custom_call.1
= control target key start
LH: loop header
LB: loop body
LE: loop exit
PB: predicated region body
PF: predicated region fallthrough
CT: control target
= control target key end

     0   :  { %s13530_s12 = smov 0   ;;  %s18756_s0 = inlined_call_operand.vmem [shape: bf16[2,20,20,4], index: 0, kind: input, shape index: {}]   ;;  %s18757_s1 = inlined_call_operand.vmem [shape: bf16[25,4,8], index: 1, kind: input, shape index: {}]   ;;  %s18758_s2 = inlined_call_operand.vmem [shape: f32[1,8], index: 2, kind: input, shape index: {}]   ;;  %s18759_s3 = inlined_call_operand.vmem [shape: bf16[2,16,16,8], index: 3, kind: output, shape index: {}]  }
   0x1 LB: > { %s11863_s13 = sadd.s32 4294967295, %s13508_s12   ;;  %p11867_p0 = scmp.ge.s32.totalorder %s13508_s12, 1  ;;  %s13508_s12 = sphi %s13530_s12, %s13_s12  }
   0x2   : > { %p137_p1 = scmp.lt.s32.totalorder %s13508_s12, 3 }
   0x4   : > { %p138_p2 = pnand %p11867_p0, %p137_p1 }
   0x6   : > { %141 = sbr.rel (%p138_p2) target bundleno = 1782 (0x6f6), region = 32 }
   0xb   : > { %v11871_v0 = vld [vmem:[%s18757_s1 + $0x2] sm:$0x3]  ;;  %vm707_vm0 = vcmask 1041408   ;;  %p161_p3 = scmp.lt.s32.totalorder %s11863_s13, 1  ;;  %v11984_v2 = vld [vmem:[%s18757_s1 + $0x4] sm:$0x3] }
   0xc   : > { %v709_v1 = vsel %vm707_vm0, %v11871_v0, 0  ;;  %v1282_v3 = vsel %vm707_vm0, %v11984_v2, 0  ;;  %v12001_v4 = vld [vmem:[%s18757_s1 + $0x6] sm:$0x3]  ;;  %v204_v5 = vld [vmem:[%s18757_s1] sm:$0x3] }
   0xd   : > { %13370 = vmatpush.bf16.msra.mxu1 %v709_v1  ;;  %13371 = vmatpush.bf16.msra.mxu2 %v709_v1  ;;  %s19160_s13 = smov (!%p161_p3, %s11863_s13), 1  ;;  %v1891_v6 = vsel %vm707_vm0, %v12001_v4, 0  ;;  %v929_v7 = vsel %vm707_vm0, %v204_v5, 0  ;;  %v12034_v8 = vld [vmem:[%s18757_s1 + $0x8] sm:$0x3]  ;;  %vm658_vm4 = vcmask 31744  }
   0xe   : > { %13372 = vmatpush.bf16.msra.mxu3 %v709_v1  ;;  %718 = vmatpush.bf16.msra.mxu0 %v709_v1  ;;  %s13373_s18 = smul.u32 240, %s19160_s13  ;;  %vm221_vm1 = vsmask.f32 3328  ;;  %vm222_vm2 = vsmask.f32 7440  ;;  %v2276_v9 = vsel %vm707_vm0, %v12034_v8, 0 }
   0xf   : > { %vm13590_vm3 = vmor %vm221_vm1, %vm222_vm2  ;;  %vm2063_vm5 = vcmask 1045508   ;;  %vm1068_vm6 = vcmask 1042432   ;;  %vm1069_vm7 = vcmask 1046532   ;;  %vm1421_vm9 = vsmask.f32 2304  ;;  %s13289_s21 = sshll.u32 %s19160_s13, 7 }
  0x10   : > { %s13563_s27 = scalar_lea.vmem %s18756_s0, %s13373_s18  ;;  %vm13839_vm8 = vmor %vm1068_vm6, %vm1069_vm7  ;;  %vm1422_vm10 = vsmask.f32 6416  ;;  %vm11775_vm13 = vcmask 60416   ;;  %s18359_s23 = scalar_lea.vmem %s18759_s3, %s13289_s21 }
  0x11   : > { %1291 = vmatpush.bf16.msrb.mxu2 %v1282_v3  ;;  %938 = vmatpush.bf16.msrb.mxu1 %v929_v7  ;;  %v180_v10 = vld [vmem:[%s13563_s27 + $0x30] sm:$0xf]  ;;  %v13568_v11 = vld [vmem:[%s13563_s27 + $0x34] sm:$0xf]  ;;  %v209_v12 = vld [vmem:[%s13563_s27 + $0x38] sm:$0x1] }
  0x12   : > { %1900 = vmatpush.bf16.msrb.mxu3 %v1891_v6  ;;  %2285 = vmatpush.bf16.msrb.mxu0 %v2276_v9  ;;  %v321_v13 = vshrl.u32 %v180_v10, 16  ;;  %v324_v14 = vshll.u32 %v180_v10, 16  ;;  %v330_v15 = vshll.u32 %v13568_v11, 16  ;;  %v334_v16 = vshrl.u32 %v13568_v11, 16  ;;  %v188_v17 = vld [vmem:[%s13563_s27 + $0x60] sm:$0xf]  ;;  %vm13875_vm11 = vmor %vm1421_vm9, %vm1422_vm10 }
  0x13   : > { %v340_v18 = vshll.u32 %v209_v12, 16  ;;  %v13575_v19 = vld [vmem:[%s13563_s27 + $0x64] sm:$0xf]  ;;  %v213_v20 = vld [vmem:[%s13563_s27 + $0x68] sm:$0x1]  ;;  %v417_v21 = vshrl.u32 %v188_v17, 16  ;;  %vm13882_vm12 = vmor %vm707_vm0, %vm2063_vm5 }
  0x14   : > { %v323_v22 = vrot.slane %v321_v13, 4  ;;  %v326_v23 = vrot.slane %v324_v14, 5  ;;  %v332_v24 = vrot.slane %v330_v15, 5  ;;  %v336_v25 = vrot.slane %v334_v16, 4  ;;  %v196_v34 = vld [vmem:[%s13563_s27 + $0x90] sm:$0xf] }
  0x15   : > { %v342_v26 = vrot.slane %v340_v18, 5  ;;  %v419_v27 = vrot.slane %v417_v21, 4  ;;  %v420_v28 = vshll.u32 %v188_v17, 16  ;;  %v426_v29 = vshll.u32 %v13575_v19, 16  ;;  %v13586_v35 = vld [vmem:[%s13563_s27 + $0x94] sm:$0xf] }
  0x16   : > { %v327_v30 = vor.u32 %v326_v23, %v323_v22  ;;  %v337_v31 = vor.u32 %v336_v25, %v332_v24  ;;  %v430_v32 = vshrl.u32 %v13575_v19, 16  ;;  %v436_v33 = vshll.u32 %v213_v20, 16  ;;  %v217_v50 = vld [vmem:[%s13563_s27 + $0x98] sm:$0x1]  ;;  %v172_v60 = vld [vmem:[%s13563_s27] sm:$0xf] }
  0x17   : > { %v422_v37 = vrot.slane %v420_v28, 5  ;;  %v428_v38 = vrot.slane %v426_v29, 5  ;;  %v513_v44 = vshrl.u32 %v196_v34, 16  ;;  %v516_v45 = vshll.u32 %v196_v34, 16  ;;  %v13613_v0 = vld [vmem:[%s13563_s27 + $0x4] sm:$0xf] }
  0x18   : > { %v328_v39 = vrot.slane %v327_v30, 4  ;;  %v338_v40 = vrot.slane %v337_v31, 4  ;;  %v432_v41 = vrot.slane %v430_v32, 4  ;;  %v438_v42 = vrot.slane %v436_v33, 5  ;;  %v13618_v5 = vld [vmem:[%s13563_s27 + $0x8] sm:$0x1] }
  0x19   : > { %v423_v43 = vor.u32 %v422_v37, %v419_v27  ;;  %v18765_v46 = vshll.u32 %v13586_v35, 16  ;;  %v18764_v51 = vshrl.u32 %v13586_v35, 16  ;;  %v515_v55 = vrot.slane %v513_v44, 4  ;;  %v182_v21 = vld [vmem:[%s13563_s27 + $0x3c] sm:$0xf] }
  0x1a   : > { %v333_v47 = vsel %vm13590_vm3, %v328_v39, %v332_v24  ;;  %v343_v48 = vsel %vm13590_vm3, %v338_v40, %v342_v26  ;;  %v433_v49 = vor.u32 %v432_v41, %v428_v38  ;;  %v518_v57 = vrot.slane %v516_v45, 5  ;;  %v13632_v26 = vld [vmem:[%s13563_s27 + $0x40] sm:$0xf]  ;;  %v210_v31 = vld [vmem:[%s13563_s27 + $0x44] sm:$0x1] }
  0x1b   : > { %v618_v52 = vunpack.c.l.b16 %v333_v47  ;;  %v619_v53 = vunpack.c.l.b16 %v343_v48  ;;  %v424_v54 = vrot.slane %v423_v43, 4  ;;  %v524_v58 = vrot.slane %v18765_v46, 5 }
  0x1c   : > { %v434_v56 = vrot.slane %v433_v49, 4  ;;  %v528_v59 = vrot.slane %v18764_v51, 4  ;;  %v532_v63 = vshll.u32 %v217_v50, 16  ;;  %v519_v3 = vor.u32 %v518_v57, %v515_v55  ;;  %v214_v57 = vld [vmem:[%s13563_s27 + $0x74] sm:$0x1] }
  0x1d   : > { %v646_v61 = vpack.c.b16 %v619_v53, %v618_v52  ;;  %v429_v62 = vsel %vm13590_vm3, %v424_v54, %v428_v38  ;;  %v225_v8 = vshrl.u32 %v172_v60, 16  ;;  %v228_v12 = vshll.u32 %v172_v60, 16  ;;  %v190_v38 = vld [vmem:[%s13563_s27 + $0x6c] sm:$0xf]  ;;  %v13645_v52 = vld [vmem:[%s13563_s27 + $0x70] sm:$0xf] }
  0x1e   : > { %v439_v1 = vsel %vm13590_vm3, %v434_v56, %v438_v42  ;;  %v626_v2 = vunpack.c.l.b16 %v429_v62  ;;  %v529_v4 = vor.u32 %v528_v59, %v524_v58  ;;  %v534_v7 = vrot.slane %v532_v63, 5  ;;  %v202_v51 = vld [vmem:[%s13563_s27 + $0xb4] sm:$0xf] }
  0x1f   : > { %11876 = vmatmul.msk.bf16.vlgmr.msra.gmra.mxu1 %vm658_vm4, %v646_v61  ;;  %v627_v6 = vunpack.c.l.b16 %v439_v1  ;;  %v520_v9 = vrot.slane %v519_v3, 4  ;;  %v234_v13 = vshll.u32 %v13613_v0, 16  ;;  %v227_v17 = vrot.slane %v225_v8, 4  ;;  %v198_v8 = vld [vmem:[%s13563_s27 + $0x9c] sm:$0xf] }
  0x20   : > { %v530_v10 = vrot.slane %v529_v4, 4  ;;  %v238_v18 = vshrl.u32 %v13613_v0, 16  ;;  %v244_v20 = vshll.u32 %v13618_v5, 16  ;;  %v230_v24 = vrot.slane %v228_v12, 5 }
  0x21   : > { %v650_v14 = vpack.c.b16 %v627_v6, %v626_v2  ;;  %v525_v22 = vsel %vm13590_vm3, %v520_v9, %v524_v58  ;;  %v236_v25 = vrot.slane %v234_v13, 5  ;;  %v345_v37 = vshrl.u32 %v182_v21, 16 }
  0x22   : > { %v535_v23 = vsel %vm13590_vm3, %v530_v10, %v534_v7  ;;  %v634_v27 = vunpack.c.l.b16 %v525_v22  ;;  %v240_v30 = vrot.slane %v238_v18, 4  ;;  %v231_v33 = vor.u32 %v230_v24, %v227_v17  ;;  %v13660_v17 = vld [vmem:[%s13563_s27 + $0xa0] sm:$0xf] }
  0x23   : > { %11880 = vmatmul.msk.bf16.vlgmr.msra.gmra.mxu2 %vm658_vm4, %v650_v14  ;;  %v635_v28 = vunpack.c.l.b16 %v535_v23  ;;  %v246_v34 = vrot.slane %v244_v20, 5  ;;  %v348_v41 = vshll.u32 %v182_v21, 16  ;;  %v354_v42 = vshll.u32 %v13632_v26, 16  ;;  %v218_v23 = vld [vmem:[%s13563_s27 + $0xa4] sm:$0x1] }
  0x24   : > { %v241_v40 = vor.u32 %v240_v30, %v236_v25  ;;  %v232_v43 = vrot.slane %v231_v33, 4  ;;  %v347_v44 = vrot.slane %v345_v37, 4  ;;  %v358_v45 = vshrl.u32 %v13632_v26, 16 }
  0x25   : > { %v654_v39 = vpack.c.b16 %v635_v28, %v634_v27  ;;  %v364_v47 = vshll.u32 %v210_v31, 16  ;;  %v350_v49 = vrot.slane %v348_v41, 5  ;;  %v356_v50 = vrot.slane %v354_v42, 5  ;;  %v174_v41 = vld [vmem:[%s13563_s27 + $0xc] sm:$0xf] }
  0x26   : > { %v242_v48 = vrot.slane %v241_v40, 4  ;;  %v441_v53 = vshrl.u32 %v190_v38, 16  ;;  %v237_v54 = vsel %vm13590_vm3, %v232_v43, %v236_v25  ;;  %v360_v55 = vrot.slane %v358_v45, 4 }
  0x27   : > { %11884 = vmatmul.msk.bf16.vlgmr.msra.gmra.mxu3 %vm658_vm4, %v654_v39  ;;  %v366_v56 = vrot.slane %v364_v47, 5  ;;  %v444_v58 = vshll.u32 %v190_v38, 16  ;;  %v610_v60 = vunpack.c.l.b16 %v237_v54  ;;  %v351_v61 = vor.u32 %v350_v49, %v347_v44  ;;  %v13683_v54 = vld [vmem:[%s13563_s27 + $0x14] sm:$0x1] }
  0x28   : > { %v247_v59 = vsel %vm13590_vm3, %v242_v48, %v246_v34  ;;  %v443_v62 = vrot.slane %v441_v53, 4  ;;  %v361_v1 = vor.u32 %v360_v55, %v356_v50  ;;  %v18773_v3 = vshll.u32 %v13645_v52, 16  ;;  %v13676_v48 = vld [vmem:[%s13563_s27 + $0x10] sm:$0xf] }
  0x29   : > { %v611_v63 = vunpack.c.l.b16 %v247_v59  ;;  %v446_v2 = vrot.slane %v444_v58, 5  ;;  %v352_v4 = vrot.slane %v351_v61, 4  ;;  %v18772_v6 = vshrl.u32 %v13645_v52, 16 }
  0x2a   : > { %v460_v7 = vshll.u32 %v214_v57, 16  ;;  %v362_v10 = vrot.slane %v361_v1, 4  ;;  %v452_v14 = vrot.slane %v18773_v3, 5  ;;  %v537_v28 = vshrl.u32 %v198_v8, 16 }
  0x2b   : > { %v642_v9 = vpack.c.b16 %v611_v63, %v610_v60  ;;  %v447_v12 = vor.u32 %v446_v2, %v443_v62  ;;  %v357_v20 = vsel %vm13590_vm3, %v352_v4, %v356_v50  ;;  %v456_v21 = vrot.slane %v18772_v6, 4  ;;  %v184_v63 = vld [vmem:[%s13563_s27 + $0x48] sm:$0xf] }
  0x2c   : > { %v462_v22 = vrot.slane %v460_v7, 5  ;;  %v367_v24 = vsel %vm13590_vm3, %v362_v10, %v366_v56  ;;  %v620_v25 = vunpack.c.l.b16 %v357_v20  ;;  %v540_v33 = vshll.u32 %v198_v8, 16 }
  0x2d   : > { %11872 = vmatmul.msk.bf16.vlgmr.msra.gmra.mxu0 %vm658_vm4, %v642_v9  ;;  %v448_v27 = vrot.slane %v447_v12, 4  ;;  %v621_v30 = vunpack.c.l.b16 %v367_v24  ;;  %v457_v31 = vor.u32 %v456_v21, %v452_v14  ;;  %v18763_v34 = vshll.u32 %v13660_v17, 16 }
  0x2e   : > { %v539_v38 = vrot.slane %v537_v28, 4  ;;  %v18762_v39 = vshrl.u32 %v13660_v17, 16  ;;  %v556_v40 = vshll.u32 %v218_v23, 16  ;;  %v542_v47 = vrot.slane %v540_v33, 5  ;;  %v211_v23 = vld [vmem:[%s13563_s27 + $0x50] sm:$0x1] }
  0x2f   : > { %v453_v37 = vsel %vm13590_vm3, %v448_v27, %v452_v14  ;;  %v647_v43 = vpack.c.b16 %v621_v30, %v620_v25  ;;  %v458_v44 = vrot.slane %v457_v31, 4  ;;  %v548_v50 = vrot.slane %v18763_v34, 5  ;;  %v13695_v14 = vld [vmem:[%s13563_s27 + $0x4c] sm:$0xf]  ;;  %v192_v31 = vld [vmem:[%s13563_s27 + $0x78] sm:$0xf] }
  0x30   : > { %v628_v49 = vunpack.c.l.b16 %v453_v37  ;;  %v552_v53 = vrot.slane %v18762_v39, 4  ;;  %v543_v56 = vor.u32 %v542_v47, %v539_v38  ;;  %v558_v57 = vrot.slane %v556_v40, 5 }
  0x31   : > { %11877 = vmatmul.msk.bf16.gmra.mxu1 %vm658_vm4, %v647_v43  ;;  %v463_v55 = vsel %vm13590_vm3, %v458_v44, %v462_v22  ;;  %v249_v58 = vshrl.u32 %v174_v41, 16  ;;  %v252_v61 = vshll.u32 %v174_v41, 16  ;;  %v258_v62 = vshll.u32 %v13676_v48, 16 }
  0x32   : > { %v629_v59 = vunpack.c.l.b16 %v463_v55  ;;  %v553_v60 = vor.u32 %v552_v53, %v548_v50  ;;  %v544_v1 = vrot.slane %v543_v56, 4  ;;  %v262_v4 = vshrl.u32 %v13676_v48, 16  ;;  %v13711_v55 = vld [vmem:[%s13563_s27 + $0x7c] sm:$0xf] }
  0x33   : > { %v251_v2 = vrot.slane %v249_v58, 4  ;;  %v268_v7 = vshll.u32 %v13683_v54, 16  ;;  %v254_v10 = vrot.slane %v252_v61, 5  ;;  %v260_v12 = vrot.slane %v258_v62, 5  ;;  %v215_v61 = vld [vmem:[%s13563_s27 + $0x80] sm:$0x1] }
  0x34   : > { %v651_v8 = vpack.c.b16 %v629_v59, %v628_v49  ;;  %v554_v9 = vrot.slane %v553_v60, 4  ;;  %v549_v20 = vsel %vm13590_vm3, %v544_v1, %v548_v50  ;;  %v264_v21 = vrot.slane %v262_v4, 4 }
  0x35   : > { %v270_v22 = vrot.slane %v268_v7, 5  ;;  %v369_v24 = vshrl.u32 %v184_v63, 16  ;;  %v636_v27 = vunpack.c.l.b16 %v549_v20  ;;  %v255_v28 = vor.u32 %v254_v10, %v251_v2 }
  0x36   : > { %11881 = vmatmul.msk.bf16.gmra.mxu2 %vm658_vm4, %v651_v8  ;;  %v559_v25 = vsel %vm13590_vm3, %v554_v9, %v558_v57  ;;  %v372_v30 = vshll.u32 %v184_v63, 16  ;;  %v265_v37 = vor.u32 %v264_v21, %v260_v12  ;;  %v378_v40 = vshll.u32 %v13695_v14, 16 }
  0x37   : > { %v637_v33 = vunpack.c.l.b16 %v559_v25  ;;  %v371_v38 = vrot.slane %v369_v24, 4  ;;  %v256_v41 = vrot.slane %v255_v28, 4  ;;  %v382_v44 = vshrl.u32 %v13695_v14, 16  ;;  %v200_v24 = vld [vmem:[%s13563_s27 + $0xa8] sm:$0xf] }
  0x38   : > { %v374_v43 = vrot.slane %v372_v30, 5  ;;  %v388_v47 = vshll.u32 %v211_v23, 16  ;;  %v266_v50 = vrot.slane %v265_v37, 4  ;;  %v380_v53 = vrot.slane %v378_v40, 5  ;;  %v13729_v30 = vld [vmem:[%s13563_s27 + $0xac] sm:$0xf] }
  0x39   : > { %v655_v49 = vpack.c.b16 %v637_v33, %v636_v27  ;;  %v465_v56 = vshrl.u32 %v192_v31, 16  ;;  %v261_v57 = vsel %vm13590_vm3, %v256_v41, %v260_v12  ;;  %v384_v59 = vrot.slane %v382_v44, 4 }
  0x3a   : > { %v375_v58 = vor.u32 %v374_v43, %v371_v38  ;;  %v390_v60 = vrot.slane %v388_v47, 5  ;;  %v271_v63 = vsel %vm13590_vm3, %v266_v50, %v270_v22  ;;  %v612_v1 = vunpack.c.l.b16 %v261_v57  ;;  %v219_v38 = vld [vmem:[%s13563_s27 + $0xb0] sm:$0x1] }
  0x3b   : > { %11885 = vmatmul.msk.bf16.gmra.mxu3 %vm658_vm4, %v655_v49  ;;  %v467_v2 = vrot.slane %v465_v56, 4  ;;  %v468_v7 = vshll.u32 %v192_v31, 16  ;;  %v613_v8 = vunpack.c.l.b16 %v271_v63  ;;  %v385_v10 = vor.u32 %v384_v59, %v380_v53 }
  0x3c   : > { %v376_v9 = vrot.slane %v375_v58, 4  ;;  %v18771_v12 = vshll.u32 %v13711_v55, 16  ;;  %v18770_v21 = vshrl.u32 %v13711_v55, 16  ;;  %v484_v23 = vshll.u32 %v215_v61, 16 }
  0x3d   : > { %v470_v20 = vrot.slane %v468_v7, 5  ;;  %v643_v25 = vpack.c.b16 %v613_v8, %v612_v1  ;;  %v386_v22 = vrot.slane %v385_v10, 4  ;;  %v561_v47 = vshrl.u32 %v200_v24, 16  ;;  %v176_v1 = vld [vmem:[%s13563_s27 + $0x18] sm:$0xf] }
  0x3e   : > { %v381_v27 = vsel %vm13590_vm3, %v376_v9, %v380_v53  ;;  %v476_v28 = vrot.slane %v18771_v12, 5  ;;  %v480_v37 = vrot.slane %v18770_v21, 4  ;;  %v486_v43 = vrot.slane %v484_v23, 5  ;;  %v13747_v23 = vld [vmem:[%s13563_s27 + $0x1c] sm:$0xf] }
  0x3f   : > { %v622_v31 = vunpack.c.l.b16 %v381_v27  ;;  %v471_v33 = vor.u32 %v470_v20, %v467_v2  ;;  %11873 = vmatmul.msk.bf16.gmra.mxu0 %vm658_vm4, %v643_v25  ;;  %v391_v41 = vsel %vm13590_vm3, %v386_v22, %v390_v60  ;;  %v564_v49 = vshll.u32 %v200_v24, 16  ;;  %v13750_v24 = vld [vmem:[%s13563_s27 + $0x20] sm:$0x1] }
  0x40   : > { %v623_v50 = vunpack.c.l.b16 %v391_v41  ;;  %v481_v56 = vor.u32 %v480_v37, %v476_v28  ;;  %v18761_v57 = vshll.u32 %v13729_v30, 16  ;;  %v563_v58 = vrot.slane %v561_v47, 4 }
  0x41   : > { %v472_v53 = vrot.slane %v471_v33, 4  ;;  %v566_v59 = vrot.slane %v564_v49, 5  ;;  %v18760_v61 = vshrl.u32 %v13729_v30, 16  ;;  %v580_v63 = vshll.u32 %v219_v38, 16 }
  0x42   : > { %v648_v2 = vpack.c.b16 %v623_v50, %v622_v31  ;;  %v482_v7 = vrot.slane %v481_v56, 4  ;;  %v572_v8 = vrot.slane %v18761_v57, 5  ;;  %v273_v22 = vshrl.u32 %v176_v1, 16  ;;  %v186_v50 = vld [vmem:[%s13563_s27 + $0x54] sm:$0xf] }
  0x43   : > { %v477_v60 = vsel %vm13590_vm3, %v472_v53, %v476_v28  ;;  %v567_v10 = vor.u32 %v566_v59, %v563_v58  ;;  %v576_v20 = vrot.slane %v18760_v61, 4  ;;  %v582_v27 = vrot.slane %v580_v63, 5  ;;  %v13762_v59 = vld [vmem:[%s13563_s27 + $0x58] sm:$0xf] }
  0x44   : > { %v630_v9 = vunpack.c.l.b16 %v477_v60  ;;  %11878 = vmatmul.msk.bf16.gmra.mxu1 %vm658_vm4, %v648_v2  ;;  %v487_v25 = vsel %vm13590_vm3, %v482_v7, %v486_v43  ;;  %v276_v37 = vshll.u32 %v176_v1, 16  ;;  %v275_v38 = vrot.slane %v273_v22, 4  ;;  %v13769_v7 = vld [vmem:[%s13563_s27 + $0x5c] sm:$0x1] }
  0x45   : > { %v631_v28 = vunpack.c.l.b16 %v487_v25  ;;  %v568_v31 = vrot.slane %v567_v10, 4  ;;  %v577_v33 = vor.u32 %v576_v20, %v572_v8  ;;  %v282_v41 = vshll.u32 %v13747_v23, 16 }
  0x46   : > { %v286_v47 = vshrl.u32 %v13747_v23, 16  ;;  %v292_v49 = vshll.u32 %v13750_v24, 16  ;;  %v278_v58 = vrot.slane %v276_v37, 5  ;;  %v393_v10 = vshrl.u32 %v186_v50, 16 }
  0x47   : > { %v652_v53 = vpack.c.b16 %v631_v28, %v630_v9  ;;  %v573_v43 = vsel %vm13590_vm3, %v568_v31, %v572_v8  ;;  %v578_v56 = vrot.slane %v577_v33, 4  ;;  %v284_v1 = vrot.slane %v282_v41, 5  ;;  %v194_v33 = vld [vmem:[%s13563_s27 + $0x84] sm:$0xf] }
  0x48   : > { %v638_v63 = vunpack.c.l.b16 %v573_v43  ;;  %v288_v2 = vrot.slane %v286_v47, 4  ;;  %v294_v60 = vrot.slane %v292_v49, 5  ;;  %v279_v9 = vor.u32 %v278_v58, %v275_v38 }
  0x49   : > { %11882 = vmatmul.msk.bf16.gmra.mxu2 %vm658_vm4, %v652_v53  ;;  %v583_v8 = vsel %vm13590_vm3, %v578_v56, %v582_v27  ;;  %v396_v20 = vshll.u32 %v186_v50, 16  ;;  %v402_v28 = vshll.u32 %v13762_v59, 16  ;;  %v406_v31 = vshrl.u32 %v13762_v59, 16  ;;  %v13783_v50 = vld [vmem:[%s13563_s27 + $0x88] sm:$0xf] }
  0x4a   : > { %v639_v25 = vunpack.c.l.b16 %v583_v8  ;;  %v289_v22 = vor.u32 %v288_v2, %v284_v1  ;;  %v280_v37 = vrot.slane %v279_v9, 4  ;;  %v395_v49 = vrot.slane %v393_v10, 4  ;;  %v216_v8 = vld [vmem:[%s13563_s27 + $0x8c] sm:$0x1] }
  0x4b   : > { %v398_v43 = vrot.slane %v396_v20, 5  ;;  %v412_v53 = vshll.u32 %v13769_v7, 16  ;;  %v404_v27 = vrot.slane %v402_v28, 5  ;;  %v408_v38 = vrot.slane %v406_v31, 4 }
  0x4c   : > { %v656_v61 = vpack.c.b16 %v639_v25, %v638_v63  ;;  %v290_v57 = vrot.slane %v289_v22, 4  ;;  %v285_v56 = vsel %vm13590_vm3, %v280_v37, %v284_v1  ;;  %v489_v9 = vshrl.u32 %v194_v33, 16 }
  0x4d   : > { %v399_v58 = vor.u32 %v398_v43, %v395_v49  ;;  %v414_v2 = vrot.slane %v412_v53, 5  ;;  %v614_v10 = vunpack.c.l.b16 %v285_v56  ;;  %v409_v20 = vor.u32 %v408_v38, %v404_v27 }
  0x4e   : > { %11886 = vmatmul.msk.bf16.gmra.mxu3 %vm658_vm4, %v656_v61  ;;  %v295_v63 = vsel %vm13590_vm3, %v290_v57, %v294_v60  ;;  %v492_v25 = vshll.u32 %v194_v33, 16  ;;  %v491_v34 = vrot.slane %v489_v9, 4  ;;  %v18769_v1 = vshll.u32 %v13783_v50, 16  ;;  %v13799_v33 = vld [vmem:[%s13563_s27 + $0xb8] sm:$0xf] }
  0x4f   : > { %v615_v22 = vunpack.c.l.b16 %v295_v63  ;;  %v400_v39 = vrot.slane %v399_v58, 4  ;;  %v410_v37 = vrot.slane %v409_v20, 4  ;;  %v18767_v43 = vshrl.u32 %v13783_v50, 16 }
  0x50   : > { %v494_v49 = vrot.slane %v492_v25, 5  ;;  %v508_v53 = vshll.u32 %v216_v8, 16  ;;  %v500_v60 = vrot.slane %v18769_v1, 5  ;;  %v220_v8 = vld [vmem:[%s13563_s27 + $0xbc] sm:$0x1]  ;;  %v588_v25 = vshll.u32 %v202_v51, 16 }
  0x51   : > { %v644_v61 = vpack.c.b16 %v615_v22, %v614_v10  ;;  %v405_v57 = vsel %vm13590_vm3, %v400_v39, %v404_v27  ;;  %v415_v38 = vsel %vm13590_vm3, %v410_v37, %v414_v2  ;;  %v504_v9 = vrot.slane %v18767_v43, 4 }
  0x52   : > { %v624_v56 = vunpack.c.l.b16 %v405_v57  ;;  %v495_v58 = vor.u32 %v494_v49, %v491_v34  ;;  %v625_v63 = vunpack.c.l.b16 %v415_v38  ;;  %v510_v39 = vrot.slane %v508_v53, 5  ;;  %v178_v57 = vld [vmem:[%s13563_s27 + $0x24] sm:$0xf] }
  0x53   : > { %11874 = vmatmul.msk.bf16.gmra.mxu0 %vm658_vm4, %v644_v61  ;;  %v585_v27 = vshrl.u32 %v202_v51, 16  ;;  %v505_v20 = vor.u32 %v504_v9, %v500_v60  ;;  %v18766_v22 = vshll.u32 %v13799_v33, 16  ;;  %v18768_v34 = vshrl.u32 %v13799_v33, 16 }
  0x54   : > { %v496_v10 = vrot.slane %v495_v58, 4  ;;  %v649_v2 = vpack.c.b16 %v625_v63, %v624_v56  ;;  %v604_v49 = vshll.u32 %v220_v8, 16  ;;  %v590_v38 = vrot.slane %v588_v25, 5  ;;  %v13815_v58 = vld [vmem:[%s13563_s27 + $0x28] sm:$0xf] }
  0x55   : > { %v587_v37 = vrot.slane %v585_v27, 4  ;;  %v506_v61 = vrot.slane %v505_v20, 4  ;;  %v596_v53 = vrot.slane %v18766_v22, 5  ;;  %v1076_v51 = vrot.slane %v13618_v5, 5  ;;  %v13822_v8 = vld [vmem:[%s13563_s27 + $0x2c] sm:$0x1] }
  0x56   : > { %v501_v46 = vsel %vm13590_vm3, %v496_v10, %v500_v60  ;;  %11879 = vmatmul.msk.bf16.gmra.mxu1 %vm658_vm4, %v649_v2  ;;  %v600_v9 = vrot.slane %v18768_v34, 4  ;;  %v606_v27 = vrot.slane %v604_v49, 5  ;;  %v297_v10 = vshrl.u32 %v178_v57, 16 }
  0x57   : > { %v632_v56 = vunpack.c.l.b16 %v501_v46  ;;  %v511_v60 = vsel %vm13590_vm3, %v506_v61, %v510_v39  ;;  %v591_v63 = vor.u32 %v590_v38, %v587_v37  ;;  %v300_v22 = vshll.u32 %v178_v57, 16  ;;  %v1020_v61 = vld [vmem:[%s13563_s27] sm:$0xe] }
  0x58   : > { %v633_v20 = vunpack.c.l.b16 %v511_v60  ;;  %v601_v25 = vor.u32 %v600_v9, %v596_v53  ;;  %v306_v5 = vshll.u32 %v13815_v58, 16  ;;  %v299_v2 = vrot.slane %v297_v10, 4 }
  0x59   : > { %v592_v43 = vrot.slane %v591_v63, 4  ;;  %v310_v46 = vshrl.u32 %v13815_v58, 16  ;;  %v316_v34 = vshll.u32 %v13822_v8, 16  ;;  %v302_v12 = vrot.slane %v300_v22, 5 }
  0x5a   : > { %v653_v1 = vpack.c.b16 %v633_v20, %v632_v56  ;;  %v602_v21 = vrot.slane %v601_v25, 4  ;;  %v308_v39 = vrot.slane %v306_v5, 5  ;;  %v18881_v63 = vmov 0  ;;  %v1405_v25 = vld [vmem:[%s13563_s27 + $0x8] sm:$0x3] }
  0x5b   : > { %v597_v37 = vsel %vm13590_vm3, %v592_v43, %v596_v53  ;;  %v312_v49 = vrot.slane %v310_v46, 4  ;;  %v318_v57 = vrot.slane %v316_v34, 5  ;;  %v303_v22 = vor.u32 %v302_v12, %v299_v2 }
  0x5c   : > { %11883 = vmatmul.msk.bf16.gmra.mxu2 %vm658_vm4, %v653_v1  ;;  %v607_v38 = vsel %vm13590_vm3, %v602_v21, %v606_v27  ;;  %v640_v56 = vunpack.c.l.b16 %v597_v37  ;;  %v18882_v63 = vsel %vm13839_vm8, 4294967295, %v18881_v63  ;;  %v11968_v43 = vrot.slane %v1020_v61, 9 }
  0x5d   : > { %v641_v9 = vunpack.c.l.b16 %v607_v38  ;;  %v313_v60 = vor.u32 %v312_v49, %v308_v39  ;;  %18883 = vst [vmem:[#allocation2_spill] sm:$0xff] %v18882_v63  ;;  %v1073_v34 = vrot.slane %v13613_v0, 5  ;;  %v1434_v53 = vrot.slane %v234_v13, 6  ;;  %v12212_v13 = vld [vmem:[%s18757_s1 + $0xc] sm:$0x3] }
  0x5e   : > { %v304_v1 = vrot.slane %v303_v22, 4  ;;  %v1425_v10 = vshrl.u32 %v1020_v61, 16  ;;  %v1428_v49 = vshll.u32 %v1020_v61, 16 }
  0x5f   : > { %v657_v21 = vpack.c.b16 %v641_v9, %v640_v56  ;;  %v314_v27 = vrot.slane %v313_v60, 4  ;;  %v1074_v12 = vsel %vm13839_vm8, %v11968_v43, %v1073_v34  ;;  %v1075_v20 = vrot.slane %v1073_v34, 4  ;;  %v13290_v43 = vld [vmem:[%s13563_s27] sm:$0xff] }
  0x60   : > { %v309_v2 = vsel %vm13590_vm3, %v304_v1, %v308_v39  ;;  %v1427_v37 = vrot.slane %v1425_v10, 5  ;;  %v1433_v9 = vrot.slane %v238_v18, 5  ;;  %v2014_v39 = vld [vmem:[%s13563_s27] sm:$0xc]  ;;  %v1185_v61 = vunpack.c.l.b16 %v1074_v12  ;;  %v12261_v10 = vld [vmem:[%s18757_s1 + $0xe] sm:$0x3] }
  0x61   : > { %11887 = vmatmul.msk.bf16.gmra.mxu3 %vm658_vm4, %v657_v21  ;;  %v319_v38 = vsel %vm13590_vm3, %v314_v27, %v318_v57  ;;  %v616_v56 = vunpack.c.l.b16 %v309_v2  ;;  %v1077_v22 = vsel %vm13839_vm8, %v1075_v20, %v1076_v51  ;;  %v1430_v34 = vrot.slane %v1428_v49, 6  ;;  %v12083_v51 = vld [vmem:[%s18757_s1 + $0xa] sm:$0x3]  ;;  %v12294_v18 = vld [vmem:[%s18757_s1 + $0x10] sm:$0x3] }
  0x62   : > { %v617_v60 = vunpack.c.l.b16 %v319_v38  ;;  %v1439_v1 = vshrl.u32 %v1405_v25, 16  ;;  %v1186_v21 = vunpack.c.l.b16 %v1077_v22  ;;  %v1435_v6 = vor.u32 %v1434_v53, %v1433_v9 }
  0x63   : > { %v1442_v57 = vshll.u32 %v1405_v25, 16  ;;  %v3217_v27 = vsel %vm707_vm0, %v12212_v13, 0  ;;  %v1431_v20 = vor.u32 %v1430_v34, %v1427_v37  ;;  %v12018_v49 = vrot.slane %v2014_v39, 10 }
  0x64   : > { %v645_v12 = vpack.c.b16 %v617_v60, %v616_v56  ;;  %v1441_v2 = vrot.slane %v1439_v1, 5  ;;  %3226 = vmatpush.bf16.msra.mxu2 %v3217_v27  ;;  %v1437_v13 = vrot.slane %v1435_v6, 4  ;;  %v2067_v22 = vrot.slane %v13613_v0, 6  ;;  %v1021_v1 = vld [vmem:[%s13563_s27 + $0xc] sm:$0xe] }
  0x65   : > { %v1444_v38 = vrot.slane %v1442_v57, 6  ;;  %v2070_v9 = vrot.slane %v1405_v25, 6  ;;  %v1432_v37 = vrot.slane %v1431_v20, 4  ;;  %v3615_v39 = vsel %vm707_vm0, %v12261_v10, 0  ;;  %v18664_v56 = vld [vmem:[%s18758_s2] ss:$0 sm:$0xff] }
  0x66   : > { %11875 = vmatmul.msk.bf16.gmra.mxu0 %vm658_vm4, %v645_v12  ;;  %11952 = vmatmul.msk.bf16.vlgmr.msrb.gmra.mxu1 %vm658_vm4, %v13290_v43  ;;  %v2563_v60 = vsel %vm707_vm0, %v12083_v51, 0  ;;  %v4221_v34 = vsel %vm707_vm0, %v12294_v18, 0  ;;  %v2069_v25 = vrot.slane %v2067_v22, 4  ;;  %v11969_v57 = vrot.slane %v1021_v1, 9 }
  0x67   : > { %v1445_v0 = vor.u32 %v1444_v38, %v1441_v2  ;;  %3624 = vmatpush.bf16.msra.mxu3 %v3615_v39  ;;  %2572 = vmatpush.bf16.msra.mxu1 %v2563_v60  ;;  %v1217_v27 = vpack.c.b16 %v1186_v21, %v1185_v61  ;;  %v1436_v12 = vsel %vm13875_vm11, %v1432_v37, %v1435_v6  ;;  %v1080_v43 = vrot.slane %v13676_v48, 5  ;;  %v1406_v37 = vld [vmem:[%s13563_s27 + $0x14] sm:$0x3] }
  0x68   : > { %4230 = vmatpush.bf16.msra.mxu0 %v4221_v34  ;;  %v1083_v10 = vrot.slane %v13683_v54, 5  ;;  %v1794_v18 = vunpack.c.l.b16 %v1436_v12  ;;  %v2068_v20 = vsel %vm13882_vm12, %v12018_v49, %v2067_v22  ;;  %v1448_v2 = vshrl.u32 %v1021_v1, 16 }
  0x69   : > { %v1446_v51 = vsel %vm13875_vm11, %v1437_v13, %v1445_v0  ;;  %v2071_v61 = vsel %vm13882_vm12, %v2069_v25, %v2070_v9  ;;  %v1081_v6 = vsel %vm13839_vm8, %v11969_v57, %v1080_v43  ;;  %v1082_v21 = vrot.slane %v1080_v43, 4 }
  0x6a   : > { %v1795_v38 = vunpack.c.l.b16 %v1446_v51  ;;  %v1187_v39 = vunpack.c.l.b16 %v1081_v6  ;;  %v1450_v60 = vrot.slane %v1448_v2, 5  ;;  %v1451_v54 = vshll.u32 %v1021_v1, 16 }
  0x6b   : > { %v1456_v13 = vrot.slane %v262_v4, 5  ;;  %v1084_v49 = vsel %vm13839_vm8, %v1082_v21, %v1083_v10  ;;  %v1457_v22 = vrot.slane %v258_v62, 6  ;;  %v1462_v25 = vshrl.u32 %v1406_v37, 16  ;;  %v13291_v21 = vld [vmem:[%s13563_s27 + $0xc] sm:$0xff] }
  0x6c   : > { %11985 = vmatmul.msk.bf16.vlgmr.msrb.gmra.mxu2 %vm658_vm4, %v1217_v27  ;;  %v1826_v34 = vpack.c.b16 %v1795_v38, %v1794_v18  ;;  %v1188_v9 = vunpack.c.l.b16 %v1084_v49  ;;  %v1453_v0 = vrot.slane %v1451_v54, 6  ;;  %v1465_v57 = vshll.u32 %v1406_v37, 16  ;;  %v1022_v38 = vld [vmem:[%s13563_s27 + $0x18] sm:$0xe]  ;;  %v2015_v49 = vld [vmem:[%s13563_s27 + $0xc] sm:$0xc] }
  0x6d   : > { %v2179_v1 = vunpack.c.l.b16 %v2068_v20  ;;  %v2180_v12 = vunpack.c.l.b16 %v2071_v61  ;;  %v1458_v43 = vor.u32 %v1457_v22, %v1456_v13  ;;  %v1464_v27 = vrot.slane %v1462_v25, 5  ;;  %v1407_v13 = vld [vmem:[%s13563_s27 + $0x20] sm:$0x3] }
  0x6e   : > { %v1218_v4 = vpack.c.b16 %v1188_v9, %v1187_v39  ;;  %v1454_v51 = vor.u32 %v1453_v0, %v1450_v60  ;;  %v1467_v18 = vrot.slane %v1465_v57, 6  ;;  %v2074_v54 = vrot.slane %v13676_v48, 6 }
  0x6f   : > { %v1460_v2 = vrot.slane %v1458_v43, 4  ;;  %v2211_v6 = vpack.c.b16 %v2180_v12, %v2179_v1  ;;  %v1471_v3 = vshrl.u32 %v1022_v38, 16  ;;  %v1474_v39 = vshll.u32 %v1022_v38, 16 }
  0x70   : > { %v1455_v10 = vrot.slane %v1454_v51, 4  ;;  %v1468_v62 = vor.u32 %v1467_v18, %v1464_v27  ;;  %v1479_v60 = vrot.slane %v286_v47, 5  ;;  %v1480_v48 = vrot.slane %v282_v41, 6 }
  0x71   : > { %12002 = vmatmul.msk.bf16.vlgmr.msrb.gmra.mxu3 %vm658_vm4, %v1826_v34  ;;  %v12019_v34 = vrot.slane %v2015_v49, 10  ;;  %v2076_v22 = vrot.slane %v2074_v54, 4  ;;  %v2077_v9 = vrot.slane %v1406_v37, 6  ;;  %v1087_v57 = vrot.slane %v13747_v23, 5 }
  0x72   : > { %v1459_v20 = vsel %vm13875_vm11, %v1455_v10, %v1458_v43  ;;  %v1469_v61 = vsel %vm13875_vm11, %v1460_v2, %v1468_v62  ;;  %v1481_v1 = vor.u32 %v1480_v48, %v1479_v60  ;;  %v1473_v12 = vrot.slane %v1471_v3, 5  ;;  %v13292_v60 = vld [vmem:[%s13563_s27 + $0x18] sm:$0xff] }
  0x73   : > { %v1796_v0 = vunpack.c.l.b16 %v1459_v20  ;;  %v1797_v25 = vunpack.c.l.b16 %v1469_v61  ;;  %v1476_v43 = vrot.slane %v1474_v39, 6  ;;  %v1485_v51 = vshrl.u32 %v1407_v13, 16 }
  0x74   : > { %v1488_v47 = vshll.u32 %v1407_v13, 16  ;;  %v2075_v27 = vsel %vm13882_vm12, %v12019_v34, %v2074_v54  ;;  %v2078_v18 = vsel %vm13882_vm12, %v2076_v22, %v2077_v9  ;;  %v11970_v41 = vrot.slane %v1022_v38, 9  ;;  %v2016_v22 = vld [vmem:[%s13563_s27 + $0x18] sm:$0xc] }
  0x75   : > { %v1089_v37 = vrot.slane %v1087_v57, 4  ;;  %v1090_v10 = vrot.slane %v13750_v24, 5  ;;  %v1827_v2 = vpack.c.b16 %v1797_v25, %v1796_v0  ;;  %v1477_v62 = vor.u32 %v1476_v43, %v1473_v12  ;;  %v1023_v24 = vld [vmem:[%s13563_s27 + $0x24] sm:$0xe] }
  0x76   : > { %12035 = vmatmul.msk.bf16.vlgmr.msrb.gmra.mxu0 %vm658_vm4, %v2211_v6  ;;  %11953 = vmatmul.msk.bf16.gmra.mxu1 %vm658_vm4, %v13291_v21  ;;  %v1487_v3 = vrot.slane %v1485_v51, 5  ;;  %v1490_v6 = vrot.slane %v1488_v47, 6  ;;  %v2181_v21 = vunpack.c.l.b16 %v2075_v27  ;;  %v2182_v49 = vunpack.c.l.b16 %v2078_v18  ;;  %v13951_v51 = vld [vmem:[%s13563_s27 + $0x2c] sm:$0x3] }
  0x77   : > { %v1088_v54 = vsel %vm13839_vm8, %v11970_v41, %v1087_v57  ;;  %v1091_v20 = vsel %vm13839_vm8, %v1089_v37, %v1090_v10  ;;  %v1483_v38 = vrot.slane %v1481_v1, 4  ;;  %v2081_v9 = vrot.slane %v13747_v23, 6 }
  0x78   : > { %v1491_v61 = vor.u32 %v1490_v6, %v1487_v3  ;;  %v2212_v39 = vpack.c.b16 %v2182_v49, %v2181_v21  ;;  %v1189_v48 = vunpack.c.l.b16 %v1088_v54  ;;  %v1190_v34 = vunpack.c.l.b16 %v1091_v20 }
  0x79   : > { %v1494_v0 = vshrl.u32 %v1023_v24, 16  ;;  %v1497_v25 = vshll.u32 %v1023_v24, 16  ;;  %v12020_v43 = vrot.slane %v2016_v22, 10  ;;  %v2083_v27 = vrot.slane %v2081_v9, 4 }
  0x7a   : > { %v1492_v12 = vsel %vm13875_vm11, %v1483_v38, %v1491_v61  ;;  %v1219_v47 = vpack.c.b16 %v1190_v34, %v1189_v48  ;;  %v2084_v18 = vrot.slane %v1407_v13, 6  ;;  %v1094_v23 = vrot.slane %v13815_v58, 5 }
  0x7b   : > { %v1799_v37 = vunpack.c.l.b16 %v1492_v12  ;;  %v1496_v10 = vrot.slane %v1494_v0, 5  ;;  %v1508_v3 = vshrl.u32 %v13951_v51, 16  ;;  %v1511_v6 = vshll.u32 %v13951_v51, 16 }
  0x7c   : > { %11986 = vmatmul.msk.bf16.gmra.mxu2 %vm658_vm4, %v1218_v4  ;;  %v1478_v4 = vrot.slane %v1477_v62, 4  ;;  %v1503_v62 = vrot.slane %v306_v5, 6  ;;  %v11971_v21 = vrot.slane %v1023_v24, 9  ;;  %v2082_v13 = vsel %vm13882_vm12, %v12020_v43, %v2081_v9  ;;  %v1024_v9 = vld [vmem:[%s13563_s27 + $0x30] sm:$0xe] }
  0x7d   : > { %v2085_v49 = vsel %vm13882_vm12, %v2083_v27, %v2084_v18  ;;  %v1096_v54 = vrot.slane %v1094_v23, 4  ;;  %v1097_v20 = vrot.slane %v13822_v8, 5  ;;  %v1510_v38 = vrot.slane %v1508_v3, 5  ;;  %v2017_v27 = vld [vmem:[%s13563_s27 + $0x24] sm:$0xc] }
  0x7e   : > { %v1482_v57 = vsel %vm13875_vm11, %v1478_v4, %v1481_v1  ;;  %v1502_v1 = vrot.slane %v310_v46, 5  ;;  %v1513_v61 = vrot.slane %v1511_v6, 6  ;;  %v2183_v24 = vunpack.c.l.b16 %v2082_v13 }
  0x7f   : > { %v1798_v41 = vunpack.c.l.b16 %v1482_v57  ;;  %v1098_v48 = vsel %vm13839_vm8, %v1096_v54, %v1097_v20  ;;  %v2088_v43 = vrot.slane %v13815_v58, 6  ;;  %v1517_v18 = vshrl.u32 %v1024_v9, 16 }
  0x80   : > { %v1504_v4 = vor.u32 %v1503_v62, %v1502_v1  ;;  %v1514_v22 = vor.u32 %v1513_v61, %v1510_v38  ;;  %v1192_v12 = vunpack.c.l.b16 %v1098_v48  ;;  %v12021_v1 = vrot.slane %v2017_v27, 10 }
  0x81   : > { %12003 = vmatmul.msk.bf16.gmra.mxu3 %vm658_vm4, %v1827_v2  ;;  %v1499_v2 = vrot.slane %v1497_v25, 6  ;;  %v1828_v5 = vpack.c.b16 %v1799_v37, %v1798_v41  ;;  %v13293_v25 = vld [vmem:[%s13563_s27 + $0x24] sm:$0xff]  ;;  %v1520_v41 = vshll.u32 %v1024_v9, 16  ;;  %v2090_v62 = vrot.slane %v2088_v43, 4 }
  0x82   : > { %v1506_v8 = vrot.slane %v1504_v4, 4  ;;  %v2091_v58 = vrot.slane %v13951_v51, 6  ;;  %v1525_v54 = vrot.slane %v334_v16, 5  ;;  %v2089_v38 = vsel %vm13882_vm12, %v12021_v1, %v2088_v43 }
  0x83   : > { %v1500_v46 = vor.u32 %v1499_v2, %v1496_v10  ;;  %v1409_v10 = vld [vmem:[%s13563_s27 + $0x38] sm:$0x3]  ;;  %v1522_v20 = vrot.slane %v1520_v41, 6  ;;  %v1025_v41 = vld [vmem:[%s13563_s27 + $0x3c] sm:$0xe] }
  0x84   : > { %v2092_v51 = vsel %vm13882_vm12, %v2090_v62, %v2091_v58 }
  0x85   : > { %v1501_v34 = vrot.slane %v1500_v46, 4  ;;  %v1526_v46 = vrot.slane %v330_v15, 6 }
  0x86   : > { %12036 = vmatmul.msk.bf16.gmra.mxu0 %vm658_vm4, %v2212_v39  ;;  %11954 = vmatmul.msk.bf16.gmra.mxu1 %vm658_vm4, %v13292_v60  ;;  %v2184_v39 = vunpack.c.l.b16 %v2085_v49  ;;  %v1095_v60 = vsel %vm13839_vm8, %v11971_v21, %v1094_v23  ;;  %v1515_v23 = vsel %vm13875_vm11, %v1506_v8, %v1514_v22  ;;  %v13383_v21 = vld [vmem:[%s13563_s27 + $0x34] sm:$0xf]  ;;  %v1519_v49 = vrot.slane %v1517_v18, 5 }
  0x87   : > { %v1191_v57 = vunpack.c.l.b16 %v1095_v60  ;;  %v1801_v3 = vunpack.c.l.b16 %v1515_v23  ;;  %v1101_v13 = vrot.slane %v13383_v21, 5  ;;  %v13384_v60 = vld [vmem:[%s13563_s27 + $0x38] sm:$0x1]  ;;  %v1527_v11 = vor.u32 %v1526_v46, %v1525_v54  ;;  %v13294_v18 = vld [vmem:[%s13563_s27 + $0x30] sm:$0xff]  ;;  %v14017_v46 = vld [vmem:[%s13563_s27 + $0x44] sm:$0x3] }
  0x88   : > { %v2213_v0 = vpack.c.b16 %v2184_v39, %v2183_v24  ;;  %v11972_v24 = vrot.slane %v1024_v9, 9  ;;  %v1104_v16 = vrot.slane %v13384_v60, 5  ;;  %v1523_v48 = vor.u32 %v1522_v20, %v1519_v49 }
  0x89   : > { %v1220_v37 = vpack.c.b16 %v1192_v12, %v1191_v57  ;;  %v1103_v39 = vrot.slane %v1101_v13, 4  ;;  %v2185_v8 = vunpack.c.l.b16 %v2089_v38  ;;  %v2186_v22 = vunpack.c.l.b16 %v2092_v51 }
  0x8a   : > { %v1524_v57 = vrot.slane %v1523_v48, 4  ;;  %v1529_v12 = vrot.slane %v1527_v11, 4  ;;  %v1540_v49 = vshrl.u32 %v1025_v41, 16  ;;  %v1543_v54 = vshll.u32 %v1025_v41, 16 }
  0x8b   : > { %v1105_v9 = vsel %vm13839_vm8, %v1103_v39, %v1104_v16  ;;  %v2214_v27 = vpack.c.b16 %v2186_v22, %v2185_v8  ;;  %v1548_v48 = vrot.slane %v358_v45, 5  ;;  %v13386_v45 = vld [vmem:[%s13563_s27 + $0x44] sm:$0x1] }
  0x8c   : > { %11987 = vmatmul.msk.bf16.gmra.mxu2 %vm658_vm4, %v1219_v47  ;;  %v1505_v47 = vsel %vm13875_vm11, %v1501_v34, %v1504_v4  ;;  %v1534_v4 = vshll.u32 %v1409_v10, 16  ;;  %v1194_v1 = vunpack.c.l.b16 %v1105_v9  ;;  %v1542_v60 = vrot.slane %v1540_v49, 5 }
  0x8d   : > { %v1800_v2 = vunpack.c.l.b16 %v1505_v47  ;;  %v2018_v47 = vld [vmem:[%s13563_s27 + $0x30] sm:$0xc]  ;;  %v1545_v16 = vrot.slane %v1543_v54, 6  ;;  %v1111_v26 = vrot.slane %v13386_v45, 5 }
  0x8e   : > { %v1536_v34 = vrot.slane %v1534_v4, 6  ;;  %v12022_v62 = vrot.slane %v2018_v47, 10 }
  0x8f   : > { %v1829_v61 = vpack.c.b16 %v1801_v3, %v1800_v2  ;;  %v2098_v3 = vrot.slane %v1409_v10, 6 }
  0x91   : > { %12004 = vmatmul.msk.bf16.gmra.mxu3 %vm658_vm4, %v1828_v5  ;;  %v1531_v5 = vshrl.u32 %v1409_v10, 16 }
  0x93   : > { %v1533_v15 = vrot.slane %v1531_v5, 5 }
  0x95   : > { %v1537_v43 = vor.u32 %v1536_v34, %v1533_v15  ;;  %v1554_v15 = vshrl.u32 %v14017_v46, 16  ;;  %v1557_v34 = vshll.u32 %v14017_v46, 16 }
  0x96   : > { %12037 = vmatmul.msk.bf16.gmra.mxu0 %vm658_vm4, %v2213_v0  ;;  %11955 = vmatmul.msk.bf16.gmra.mxu1 %vm658_vm4, %v13293_v25  ;;  %v1102_v0 = vsel %vm13839_vm8, %v11972_v24, %v1101_v13  ;;  %v2095_v25 = vrot.slane %v13383_v21, 6  ;;  %v1528_v21 = vsel %vm13875_vm11, %v1524_v57, %v1527_v11  ;;  %v13385_v24 = vld [vmem:[%s13563_s27 + $0x40] sm:$0xf]  ;;  %v1549_v11 = vrot.slane %v354_v42, 6 }
  0x97   : > { %v1538_v13 = vsel %vm13875_vm11, %v1529_v12, %v1537_v43  ;;  %v1802_v4 = vunpack.c.l.b16 %v1528_v21  ;;  %v1108_v39 = vrot.slane %v13385_v24, 5  ;;  %v11973_v57 = vrot.slane %v1025_v41, 9 }
  0x98   : > { %v2097_v58 = vrot.slane %v2095_v25, 4  ;;  %v1803_v38 = vunpack.c.l.b16 %v1538_v13  ;;  %v2096_v10 = vsel %vm13882_vm12, %v12022_v62, %v2095_v25  ;;  %v1546_v42 = vor.u32 %v1545_v16, %v1542_v60  ;;  %v13295_v13 = vld [vmem:[%s13563_s27 + $0x3c] sm:$0xff]  ;;  %v14051_v60 = vld [vmem:[%s13563_s27 + $0x50] sm:$0x3] }
  0x99   : > { %v2187_v22 = vunpack.c.l.b16 %v2096_v10  ;;  %v1110_v12 = vrot.slane %v1108_v39, 4  ;;  %v1550_v43 = vor.u32 %v1549_v11, %v1548_v48  ;;  %v1556_v47 = vrot.slane %v1554_v15, 5 }
  0x9a   : > { %v1830_v8 = vpack.c.b16 %v1803_v38, %v1802_v4  ;;  %v1109_v62 = vsel %vm13839_vm8, %v11973_v57, %v1108_v39  ;;  %v2105_v11 = vrot.slane %v14017_v46, 6  ;;  %v1572_v57 = vrot.slane %v378_v40, 6 }
  0x9b   : > { %v1112_v41 = vsel %vm13839_vm8, %v1110_v12, %v1111_v26  ;;  %v1552_v49 = vrot.slane %v1550_v43, 4  ;;  %v1195_v10 = vunpack.c.l.b16 %v1109_v62  ;;  %v1577_v12 = vshrl.u32 %v14051_v60, 16 }
  0x9c   : > { %v13983_v6 = vpop.f32.mrf.mxu1  ;;  %11988 = vmatmul.msk.bf16.gmra.mxu2 %vm658_vm4, %v1220_v37  ;;  %v1193_v37 = vunpack.c.l.b16 %v1102_v0  ;;  %v1580_v45 = vshll.u32 %v14051_v60, 16  ;;  %v1115_v46 = vrot.slane %v13695_v14, 5 }
  0x9d   : > { %v1579_v62 = vrot.slane %v1577_v12, 5 }
  0x9e   : > { %v1221_v5 = vpack.c.b16 %v1194_v1, %v1193_v37 }
  0xa1   : > { %12005 = vmatmul.msk.bf16.gmra.mxu3 %vm658_vm4, %v1829_v61  ;;  %v2099_v61 = vsel %vm13882_vm12, %v2097_v58, %v2098_v3  ;;  %v1547_v58 = vrot.slane %v1546_v42, 4  ;;  %v2102_v3 = vrot.slane %v13385_v24, 6 }
  0xa2   : > { %v2188_v0 = vunpack.c.l.b16 %v2099_v61  ;;  %v1196_v61 = vunpack.c.l.b16 %v1112_v41  ;;  %v1582_v41 = vrot.slane %v1580_v45, 6 }
  0xa3   : > { %v1551_v39 = vsel %vm13875_vm11, %v1547_v58, %v1550_v43  ;;  %v2104_v48 = vrot.slane %v2102_v3, 4 }
  0xa4   : > { %v14003_v23 = vpop.f32.mrf.mxu1  ;;  %v2215_v37 = vpack.c.b16 %v2188_v0, %v2187_v22  ;;  %v1571_v0 = vrot.slane %v382_v44, 5  ;;  %v1222_v26 = vpack.c.b16 %v1196_v61, %v1195_v10  ;;  %v1804_v42 = vunpack.c.l.b16 %v1551_v39 }
  0xa5   : > { %v2106_v44 = vsel %vm13882_vm12, %v2104_v48, %v2105_v11  ;;  %v1583_v61 = vor.u32 %v1582_v41, %v1579_v62  ;;  %v1027_v48 = vld [vmem:[%s13563_s27 + $0x54] sm:$0xe] }
  0xa6   : > { %v14006_v2 = vpop.f32.mrf.mxu2  ;;  %12038 = vmatmul.msk.bf16.gmra.mxu0 %vm658_vm4, %v2214_v27  ;;  %11956 = vmatmul.msk.bf16.gmra.mxu1 %vm658_vm4, %v13294_v18  ;;  %v1559_v27 = vrot.slane %v1557_v34, 6  ;;  %v1026_v18 = vld [vmem:[%s13563_s27 + $0x48] sm:$0xe]  ;;  %v1573_v40 = vor.u32 %v1572_v57, %v1571_v0  ;;  %v13388_v0 = vld [vmem:[%s13563_s27 + $0x4c] sm:$0xf] }
  0xa7   : > { %v1563_v4 = vshrl.u32 %v1026_v18, 16  ;;  %v1566_v38 = vshll.u32 %v1026_v18, 16  ;;  %v11974_v14 = vrot.slane %v1026_v18, 9  ;;  %v2109_v57 = vrot.slane %v13388_v0, 6 }
  0xa8   : > { %v1560_v54 = vor.u32 %v1559_v27, %v1556_v47  ;;  %v1575_v10 = vrot.slane %v1573_v40, 4  ;;  %v11975_v0 = vrot.slane %v1027_v48, 9 }
  0xa9   : > { %v1565_v34 = vrot.slane %v1563_v4, 5  ;;  %v2190_v4 = vunpack.c.l.b16 %v2106_v44 }
  0xaa   : > { %v14014_v20 = vpop.f32.mrf.mxu0  ;;  %v14021_v51 = vpop.f32.mrf.mxu3  ;;  %v1561_v24 = vsel %vm13875_vm11, %v1552_v49, %v1560_v54  ;;  %v13387_v49 = vld [vmem:[%s13563_s27 + $0x50] sm:$0x1] }
  0xab   : > { %18888 = vst [vmem:[#allocation3_spill] sm:$0xff] %v14021_v51  ;;  %v1805_v43 = vunpack.c.l.b16 %v1561_v24  ;;  %v1118_v54 = vrot.slane %v13387_v49, 5  ;;  %v2112_v49 = vrot.slane %v14051_v60, 6  ;;  %v14220_v51 = vld [vmem:[%s13563_s27 + $0x78] sm:$0xe] }
  0xac   : > { %11989 = vmatmul.msk.bf16.gmra.mxu2 %vm658_vm4, %v1221_v5  ;;  %v2019_v5 = vld [vmem:[%s13563_s27 + $0x3c] sm:$0xc] }
  0xad   : > { %v12023_v16 = vrot.slane %v2019_v5, 10 }
  0xae   : > { %v14033_v25 = vpop.f32.mrf.mxu1  ;;  %v14035_v9 = vpop.f32.mrf.mxu2 }
  0xaf   : > { %v2103_v47 = vsel %vm13882_vm12, %v12023_v16, %v2102_v3  ;;  %v1831_v3 = vpack.c.b16 %v1805_v43, %v1804_v42  ;;  %v1116_v16 = vsel %vm13839_vm8, %v11974_v14, %v1115_v46  ;;  %v1586_v42 = vshrl.u32 %v1027_v48, 16 }
  0xb0   : > { %v2189_v5 = vunpack.c.l.b16 %v2103_v47  ;;  %v1197_v12 = vunpack.c.l.b16 %v1116_v16  ;;  %v1589_v43 = vshll.u32 %v1027_v48, 16 }
  0xb1   : > { %12006 = vmatmul.msk.bf16.gmra.mxu3 %vm658_vm4, %v1830_v8  ;;  %v1568_v8 = vrot.slane %v1566_v38, 6 }
  0xb2   : > { %v14040_v1 = vpop.f32.mrf.mxu0  ;;  %v14046_v21 = vpop.f32.mrf.mxu3  ;;  %v2216_v11 = vpack.c.b16 %v2190_v4, %v2189_v5  ;;  %v1594_v5 = vrot.slane %v406_v31, 5  ;;  %v1595_v4 = vrot.slane %v402_v28, 6 }
  0xb3   : > { %18889 = vst [vmem:[#allocation4_spill] sm:$0xff] %v14046_v21  ;;  %v1569_v27 = vor.u32 %v1568_v8, %v1565_v34  ;;  %v13296_v34 = vld [vmem:[%s13563_s27 + $0x48] sm:$0xff] }
  0xb5   : > { %v1570_v38 = vrot.slane %v1569_v27, 4  ;;  %v14101_v27 = vld [vmem:[%s13563_s27 + $0x5c] sm:$0x3] }
  0xb6   : > { %12039 = vmatmul.msk.bf16.gmra.mxu0 %vm658_vm4, %v2215_v37  ;;  %11957 = vmatmul.msk.bf16.gmra.mxu1 %vm658_vm4, %v13295_v13  ;;  %v14060_v15 = vpop.f32.mrf.mxu1  ;;  %v1117_v13 = vrot.slane %v1115_v46, 4  ;;  %v2020_v46 = vld [vmem:[%s13563_s27 + $0x48] sm:$0xc]  ;;  %v1603_v16 = vshll.u32 %v14101_v27, 16 }
  0xb7   : > { %v1574_v8 = vsel %vm13875_vm11, %v1570_v38, %v1573_v40  ;;  %v12024_v41 = vrot.slane %v2020_v46, 10  ;;  %v1600_v38 = vshrl.u32 %v14101_v27, 16 }
  0xb8   : > { %v1119_v18 = vsel %vm13839_vm8, %v1117_v13, %v1118_v54  ;;  %v1806_v40 = vunpack.c.l.b16 %v1574_v8  ;;  %v2111_v13 = vrot.slane %v2109_v57, 4  ;;  %v1588_v54 = vrot.slane %v1586_v42, 5 }
  0xb9   : > { %v14062_v22 = vpop.f32.mrf.mxu2  ;;  %v1198_v45 = vunpack.c.l.b16 %v1119_v18  ;;  %v2110_v18 = vsel %vm13882_vm12, %v12024_v41, %v2109_v57  ;;  %v1602_v8 = vrot.slane %v1600_v38, 5 }
  0xba   : > { %v2113_v60 = vsel %vm13882_vm12, %v2111_v13, %v2112_v49  ;;  %v2191_v57 = vunpack.c.l.b16 %v2110_v18  ;;  %v2116_v13 = vrot.slane %v13762_v59, 6 }
  0xbb   : > { %v1223_v14 = vpack.c.b16 %v1198_v45, %v1197_v12  ;;  %v1125_v45 = vrot.slane %v13769_v7, 5  ;;  %v2192_v46 = vunpack.c.l.b16 %v2113_v60  ;;  %v2021_v7 = vld [vmem:[%s13563_s27 + $0x54] sm:$0xc] }
  0xbc   : > { %v14073_v37 = vpop.f32.mrf.mxu0  ;;  %11990 = vmatmul.msk.bf16.gmra.mxu2 %vm658_vm4, %v1222_v26  ;;  %v1584_v26 = vsel %vm13875_vm11, %v1575_v10, %v1583_v61  ;;  %v1122_v61 = vrot.slane %v13762_v59, 5  ;;  %v12025_v18 = vrot.slane %v2021_v7, 10  ;;  %v2119_v59 = vrot.slane %v14101_v27, 6 }
  0xbd   : > { %v1807_v62 = vunpack.c.l.b16 %v1584_v26  ;;  %v1605_v26 = vrot.slane %v1603_v16, 6  ;;  %v2217_v49 = vpack.c.b16 %v2192_v46, %v2191_v57 }
  0xbe   : > { %v14078_v58 = vpop.f32.mrf.mxu3  ;;  %v1124_v12 = vrot.slane %v1122_v61, 4  ;;  %v2117_v27 = vsel %vm13882_vm12, %v12025_v18, %v2116_v13 }
  0xbf   : > { %18890 = vst [vmem:[#allocation5_spill] sm:$0xff] %v14078_v58  ;;  %v1832_v31 = vpack.c.b16 %v1807_v62, %v1806_v40  ;;  %v1123_v40 = vsel %vm13839_vm8, %v11975_v0, %v1122_v61  ;;  %v1606_v62 = vor.u32 %v1605_v26, %v1602_v8  ;;  %v14150_v0 = vld [vmem:[%s13563_s27 + $0x68] sm:$0x3]  ;;  %v2193_v18 = vunpack.c.l.b16 %v2117_v27 }
  0xc0   : > { %v1126_v48 = vsel %vm13839_vm8, %v1124_v12, %v1125_v45  ;;  %v1623_v7 = vshrl.u32 %v14150_v0, 16 }
  0xc1   : > { %v14081_v39 = vpop.f32.mrf.mxu1  ;;  %12007 = vmatmul.msk.bf16.gmra.mxu3 %vm658_vm4, %v1831_v3  ;;  %v14089_v24 = vpop.f32.mrf.mxu2  ;;  %v1591_v3 = vrot.slane %v1589_v43, 6  ;;  %v1200_v38 = vunpack.c.l.b16 %v1126_v48 }
  0xc3   : > { %v1592_v28 = vor.u32 %v1591_v3, %v1588_v54  ;;  %v13297_v54 = vld [vmem:[%s13563_s27 + $0x54] sm:$0xff]  ;;  %v1028_v3 = vld [vmem:[%s13563_s27 + $0x60] sm:$0xe] }
  0xc4   : > { %v14098_v47 = vpop.f32.mrf.mxu0  ;;  %v1612_v8 = vshll.u32 %v1028_v3, 16 }
  0xc5   : > { %v1593_v41 = vrot.slane %v1592_v28, 4  ;;  %v1609_v28 = vshrl.u32 %v1028_v3, 16 }
  0xc6   : > { %12040 = vmatmul.msk.bf16.gmra.mxu0 %vm658_vm4, %v2216_v11  ;;  %v14104_v44 = vpop.f32.mrf.mxu3  ;;  %11958 = vmatmul.msk.bf16.gmra.mxu1 %vm658_vm4, %v13296_v34  ;;  %v1596_v34 = vor.u32 %v1595_v4, %v1594_v5  ;;  %v1199_v4 = vunpack.c.l.b16 %v1123_v40 }
  0xc7   : > { %18891 = vst [vmem:[#allocation6_spill] sm:$0xff] %v14104_v44  ;;  %v1611_v40 = vrot.slane %v1609_v28, 5 }
  0xc8   : > { %v1597_v16 = vsel %vm13875_vm11, %v1593_v41, %v1596_v34  ;;  %v1224_v12 = vpack.c.b16 %v1200_v38, %v1199_v4  ;;  %v13389_v41 = vld [vmem:[%s13563_s27 + $0x64] sm:$0xf]  ;;  %v13390_v4 = vld [vmem:[%s13563_s27 + $0x68] sm:$0x1]  ;;  %v11976_v38 = vrot.slane %v1028_v3, 9 }
  0xc9   : > { %v14113_v10 = vpop.f32.mrf.mxu1  ;;  %v1808_v45 = vunpack.c.l.b16 %v1597_v16  ;;  %v1029_v3 = vld [vmem:[%s13563_s27 + $0x6c] sm:$0xe] }
  0xcc   : > { %v14121_v11 = vpop.f32.mrf.mxu2  ;;  %11991 = vmatmul.msk.bf16.gmra.mxu2 %vm658_vm4, %v1223_v14  ;;  %v1598_v14 = vrot.slane %v1596_v34, 4  ;;  %v1618_v34 = vrot.slane %v426_v29, 6  ;;  %v1617_v29 = vrot.slane %v430_v32, 5  ;;  %v1625_v32 = vrot.slane %v1623_v7, 5  ;;  %v2022_v7 = vld [vmem:[%s13563_s27 + $0x60] sm:$0xc] }
  0xce   : > { %v1607_v60 = vsel %vm13875_vm11, %v1598_v14, %v1606_v62  ;;  %v1129_v14 = vrot.slane %v13389_v41, 5  ;;  %v1614_v62 = vrot.slane %v1612_v8, 6  ;;  %v1619_v19 = vor.u32 %v1618_v34, %v1617_v29 }
  0xcf   : > { %v1809_v26 = vunpack.c.l.b16 %v1607_v60 }
  0xd0   : > { %v14125_v42 = vpop.f32.mrf.mxu0 }
  0xd1   : > { %v14127_v43 = vpop.f32.mrf.mxu3  ;;  %12008 = vmatmul.msk.bf16.gmra.mxu3 %vm658_vm4, %v1832_v31  ;;  %v2118_v31 = vrot.slane %v2116_v13, 4  ;;  %v1132_v13 = vrot.slane %v13390_v4, 5  ;;  %v1833_v16 = vpack.c.b16 %v1809_v26, %v1808_v45  ;;  %v13298_v26 = vld [vmem:[%s13563_s27 + $0x60] sm:$0xff] }
  0xd2   : > { %18892 = vst [vmem:[#allocation7_spill] sm:$0xff] %v14127_v43  ;;  %v11977_v43 = vrot.slane %v1029_v3, 9 }
  0xd3   : > { %v14138_v5 = vpop.f32.mrf.mxu1  ;;  %v2120_v46 = vsel %vm13882_vm12, %v2118_v31, %v2119_v59  ;;  %v1131_v31 = vrot.slane %v1129_v14, 4  ;;  %v1615_v59 = vor.u32 %v1614_v62, %v1611_v40 }
  0xd4   : > { %v14142_v61 = vpop.f32.mrf.mxu2  ;;  %v2194_v60 = vunpack.c.l.b16 %v2120_v46  ;;  %v1621_v46 = vrot.slane %v1619_v19, 4 }
  0xd5   : > { %18893 = vst [vmem:[#allocation8_spill] sm:$0xff] %v14142_v61  ;;  %v1616_v27 = vrot.slane %v1615_v59, 4  ;;  %v14196_v59 = vld [vmem:[%s13563_s27 + $0x74] sm:$0x3]  ;;  %v11978_v61 = vrot.slane %v14220_v51, 9 }
  0xd6   : > { %12041 = vmatmul.msk.bf16.gmra.mxu0 %vm658_vm4, %v2217_v49  ;;  %11959 = vmatmul.msk.bf16.gmra.mxu1 %vm658_vm4, %v13297_v54  ;;  %v1626_v49 = vshll.u32 %v14150_v0, 16  ;;  %v2218_v45 = vpack.c.b16 %v2194_v60, %v2193_v18  ;;  %v12026_v60 = vrot.slane %v2022_v7, 10 }
  0xd7   : > { %v1620_v18 = vsel %vm13875_vm11, %v1616_v27, %v1619_v19  ;;  %v14201_v27 = vld [vmem:[%s13563_s27 + $0x70] sm:$0xf] }
  0xd8   : > { %v14154_v57 = vpop.f32.mrf.mxu0  ;;  %v1628_v28 = vrot.slane %v1626_v49, 6  ;;  %v2123_v49 = vrot.slane %v13389_v41, 6 }
  0xd9   : > { %v14161_v48 = vpop.f32.mrf.mxu3 }
  0xda   : > { %18894 = vst [vmem:[#allocation9_spill] sm:$0xff] %v14161_v48  ;;  %v1130_v48 = vsel %vm13839_vm8, %v11976_v38, %v1129_v14  ;;  %v1629_v40 = vor.u32 %v1628_v28, %v1625_v32 }
  0xdb   : > { %v14167_v54 = vpop.f32.mrf.mxu1  ;;  %v1201_v29 = vunpack.c.l.b16 %v1130_v48 }
  0xdc   : > { %11992 = vmatmul.msk.bf16.gmra.mxu2 %vm658_vm4, %v1224_v12  ;;  %v1133_v12 = vsel %vm13839_vm8, %v1131_v31, %v1132_v13  ;;  %v1635_v13 = vshll.u32 %v1029_v3, 16  ;;  %v1630_v48 = vsel %vm13875_vm11, %v1621_v46, %v1629_v40  ;;  %v2125_v31 = vrot.slane %v2123_v49, 4 }
  0xdd   : > { %v1202_v38 = vunpack.c.l.b16 %v1133_v12  ;;  %v1811_v19 = vunpack.c.l.b16 %v1630_v48  ;;  %v1136_v46 = vrot.slane %v14201_v27, 5  ;;  %v2124_v40 = vsel %vm13882_vm12, %v12026_v60, %v2123_v49 }
  0xde   : > { %v1637_v12 = vrot.slane %v1635_v13, 6 }
  0xdf   : > { %v14171_v8 = vpop.f32.mrf.mxu2  ;;  %v1225_v32 = vpack.c.b16 %v1202_v38, %v1201_v29  ;;  %v1649_v29 = vshll.u32 %v14196_v59, 16  ;;  %v1138_v44 = vrot.slane %v1136_v46, 4 }
  0xe0   : > { %18895 = vst [vmem:[#allocation10_spill] sm:$0xff] %v14171_v8 }
  0xe1   : > { %12009 = vmatmul.msk.bf16.gmra.mxu3 %vm658_vm4, %v1833_v16  ;;  %v1632_v16 = vshrl.u32 %v1029_v3, 16 }
  0xe3   : > { %v14180_v34 = vpop.f32.mrf.mxu0  ;;  %v940_v62 = vpop.f32.mrf.mxu1  ;;  %v1634_v28 = vrot.slane %v1632_v16, 5 }
  0xe4   : > { %v14183_v4 = vpop.f32.mrf.mxu3  ;;  %v941_v14 = vadd.f32 %v940_v62, %v14014_v20  ;;  %v2126_v20 = vrot.slane %v14150_v0, 6  ;;  %v1810_v62 = vunpack.c.l.b16 %v1620_v18  ;;  %v18899_v0 = vshrl.u32 %v13645_v52, 16  ;;  %v13392_v18 = vld [vmem:[%s13563_s27 + $0x74] sm:$0x1] }
  0xe5   : > { %18896 = vst [vmem:[#allocation11_spill] sm:$0xff] %v14183_v4  ;;  %v1646_v4 = vshrl.u32 %v14196_v59, 16  ;;  %v1139_v48 = vrot.slane %v13392_v18, 5  ;;  %v1638_v49 = vor.u32 %v1637_v12, %v1634_v28  ;;  %v1658_v28 = vshll.u32 %v14220_v51, 16  ;;  %v13299_v12 = vld [vmem:[%s13563_s27 + $0x6c] sm:$0xff] }
  0xe6   : > { %12042 = vmatmul.msk.bf16.gmra.mxu0 %vm658_vm4, %v2218_v45  ;;  %11960 = vmatmul.msk.bf16.gmra.mxu1 %vm658_vm4, %v13298_v26  ;;  %v18898_v45 = vshll.u32 %v13645_v52, 16  ;;  %v1640_v7 = vrot.slane %v18899_v0, 5  ;;  %v2127_v16 = vsel %vm13882_vm12, %v2125_v31, %v2126_v20  ;;  %v1834_v60 = vpack.c.b16 %v1811_v19, %v1810_v62  ;;  %v2023_v19 = vld [vmem:[%s13563_s27 + $0x6c] sm:$0xc] }
  0xe7   : > { %v14192_v41 = vpop.f32.mrf.mxu2  ;;  %v2195_v0 = vunpack.c.l.b16 %v2124_v40  ;;  %v2196_v58 = vunpack.c.l.b16 %v2127_v16  ;;  %v1648_v31 = vrot.slane %v1646_v4, 5  ;;  %v1651_v20 = vrot.slane %v1649_v29, 6 }
  0xe8   : > { %18897 = vst [vmem:[#allocation12_spill] sm:$0xff] %v14192_v41  ;;  %v1641_v26 = vrot.slane %v18898_v45, 6  ;;  %v1140_v3 = vsel %vm13839_vm8, %v1138_v44, %v1139_v48  ;;  %v18901_v40 = vshll.u32 %v13711_v55, 16  ;;  %v14238_v48 = vld [vmem:[%s13563_s27 + $0x80] sm:$0x3] }
  0xe9   : > { %v2219_v4 = vpack.c.b16 %v2196_v58, %v2195_v0  ;;  %v1652_v62 = vor.u32 %v1651_v20, %v1648_v31  ;;  %v2133_v20 = vrot.slane %v14196_v59, 6 }
  0xea   : > { %v1642_v21 = vor.u32 %v1641_v26, %v1640_v7  ;;  %v1664_v7 = vrot.slane %v18901_v40, 6 }
  0xeb   : > { %v14210_v38 = vpop.f32.mrf.mxu0  ;;  %v942_v13 = vpop.f32.mrf.mxu1 }
  0xec   : > { %v14215_v45 = vpop.f32.mrf.mxu3  ;;  %11993 = vmatmul.msk.bf16.gmra.mxu2 %vm658_vm4, %v1225_v32  ;;  %v943_v52 = vadd.f32 %v942_v13, %v14040_v1  ;;  %v1137_v1 = vsel %vm13839_vm8, %v11977_v43, %v1136_v46  ;;  %v1655_v32 = vshrl.u32 %v14220_v51, 16  ;;  %v1644_v26 = vrot.slane %v1642_v21, 4 }
  0xed   : > { %18900 = vst [vmem:[#allocation13_spill] sm:$0xff] %v14215_v45  ;;  %v1639_v45 = vrot.slane %v1638_v49, 4  ;;  %v1203_v16 = vunpack.c.l.b16 %v1137_v1  ;;  %v1204_v13 = vunpack.c.l.b16 %v1140_v3  ;;  %v14248_v1 = vld [vmem:[%s13563_s27 + $0x7c] sm:$0xf]  ;;  %v1669_v3 = vshrl.u32 %v14238_v48, 16 }
  0xee   : > { %v1657_v0 = vrot.slane %v1655_v32, 5  ;;  %v1653_v31 = vsel %vm13875_vm11, %v1644_v26, %v1652_v62  ;;  %v1672_v32 = vshll.u32 %v14238_v48, 16 }
  0xef   : > { %v1293_v18 = vpop.f32.mrf.mxu2  ;;  %v1643_v58 = vsel %vm13875_vm11, %v1639_v45, %v1642_v21  ;;  %v1813_v62 = vunpack.c.l.b16 %v1653_v31 }
  0xf0   : > { %v1373_v41 = vadd.f32 %v1293_v18, %v941_v14  ;;  %v2130_v14 = vrot.slane %v14201_v27, 6  ;;  %v1660_v27 = vrot.slane %v1658_v28, 6  ;;  %v18902_v18 = vshrl.u32 %v13711_v55, 16 }
  0xf1   : > { %12010 = vmatmul.msk.bf16.gmra.mxu3 %vm658_vm4, %v1834_v60  ;;  %v12027_v60 = vrot.slane %v2023_v19, 10  ;;  %v1812_v26 = vunpack.c.l.b16 %v1643_v58  ;;  %v13394_v19 = vld [vmem:[%s13563_s27 + $0x80] sm:$0x1] }
  0xf2   : > { %v1663_v21 = vrot.slane %v18902_v18, 5  ;;  %v1661_v55 = vor.u32 %v1660_v27, %v1657_v0  ;;  %v1146_v40 = vrot.slane %v13394_v19, 5 }
  0xf3   : > { %v2287_v29 = vpop.f32.mrf.mxu0  ;;  %v945_v43 = vpop.f32.mrf.mxu1  ;;  %v2131_v59 = vsel %vm13882_vm12, %v12027_v60, %v2130_v14  ;;  %v1835_v60 = vpack.c.b16 %v1813_v62, %v1812_v26 }
  0xf4   : > { %v1902_v46 = vpop.f32.mrf.mxu3  ;;  %v946_v44 = vadd.f32 %v945_v43, %v14073_v37  ;;  %v2132_v37 = vrot.slane %v2130_v14, 4  ;;  %v2197_v14 = vunpack.c.l.b16 %v2131_v59 }
  0xf5   : > { %v1982_v49 = vadd.f32 %v1902_v46, %v1373_v41  ;;  %v1143_v41 = vrot.slane %v14248_v1, 5  ;;  %v1665_v46 = vor.u32 %v1664_v7, %v1663_v21  ;;  %v1662_v7 = vrot.slane %v1661_v55, 4  ;;  %v2024_v21 = vld [vmem:[%s13563_s27 + $0x78] sm:$0xc] }
  0xf6   : > { %12043 = vmatmul.msk.bf16.gmra.mxu0 %vm658_vm4, %v2219_v4  ;;  %11961 = vmatmul.msk.bf16.gmra.mxu1 %vm658_vm4, %v13299_v12  ;;  %v1226_v12 = vpack.c.b16 %v1204_v13, %v1203_v16  ;;  %v2134_v43 = vsel %vm13882_vm12, %v2132_v37, %v2133_v20  ;;  %v1674_v16 = vrot.slane %v1672_v32, 6  ;;  %v14270_v32 = vld [vmem:[%s13563_s27 + $0x84] sm:$0xe]  ;;  %v2140_v55 = vrot.slane %v14238_v48, 6 }
  0xf7   : > { %v1295_v45 = vpop.f32.mrf.mxu2  ;;  %v14253_v28 = vadd.f32 %v2287_v29, %v1982_v49  ;;  %v1145_v29 = vrot.slane %v1143_v41, 4  ;;  %v2198_v0 = vunpack.c.l.b16 %v2134_v43  ;;  %v1667_v27 = vrot.slane %v1665_v46, 4 }
  0xf8   : > { %v1374_v4 = vadd.f32 %v1295_v45, %v943_v52  ;;  %v1671_v52 = vrot.slane %v1669_v3, 5  ;;  %v1144_v51 = vsel %vm13839_vm8, %v11978_v61, %v1143_v41  ;;  %v2137_v45 = vrot.slane %v14248_v1, 6 }
  0xf9   : > { %v1147_v37 = vsel %vm13839_vm8, %v1145_v29, %v1146_v40  ;;  %v12028_v41 = vrot.slane %v2024_v21, 10  ;;  %v1678_v19 = vshrl.u32 %v14270_v32, 16  ;;  %v14301_v21 = vld [vmem:[%s13563_s27 + $0x88] sm:$0xf] }
  0xfa   : > { %v1675_v20 = vor.u32 %v1674_v16, %v1671_v52  ;;  %v1206_v61 = vunpack.c.l.b16 %v1147_v37  ;;  %v2139_v1 = vrot.slane %v2137_v45, 4  ;;  %v14285_v52 = vld [vmem:[%s13563_s27 + $0x8c] sm:$0x3] }
  0xfb   : > { %v2289_v18 = vpop.f32.mrf.mxu0  ;;  %v947_v8 = vpop.f32.mrf.mxu1 }
  0xfc   : > { %v1904_v13 = vpop.f32.mrf.mxu3  ;;  %11994 = vmatmul.msk.bf16.gmra.mxu2 %vm658_vm4, %v1226_v12  ;;  %v948_v58 = vadd.f32 %v947_v8, %v14098_v47  ;;  %v2220_v47 = vpack.c.b16 %v2198_v0, %v2197_v14  ;;  %v1666_v8 = vsel %vm13875_vm11, %v1662_v7, %v1665_v46  ;;  %v1205_v12 = vunpack.c.l.b16 %v1144_v51 }
  0xfd   : > { %v1983_v49 = vadd.f32 %v1904_v13, %v1374_v4  ;;  %v13300_v4 = vld [vmem:[%s13563_s27 + $0x78] sm:$0xff]  ;;  %v1681_v46 = vshll.u32 %v14270_v32, 16  ;;  %v1814_v48 = vunpack.c.l.b16 %v1666_v8  ;;  %v2138_v14 = vsel %vm13882_vm12, %v12028_v41, %v2137_v45 }
  0xfe   : > { %v1680_v0 = vrot.slane %v1678_v19, 5  ;;  %v18904_v51 = vshrl.u32 %v13783_v50, 16  ;;  %v1695_v45 = vshll.u32 %v14285_v52, 16  ;;  %v11979_v19 = vrot.slane %v14270_v32, 9  ;;  %v13301_v32 = vld [vmem:[%s13563_s27 + $0x84] sm:$0xff] }
  0xff   : > { %v1298_v31 = vpop.f32.mrf.mxu2  ;;  %v14276_v26 = vadd.f32 %v2289_v18, %v1983_v49  ;;  %v18903_v18 = vshll.u32 %v13783_v50, 16  ;;  %v1227_v49 = vpack.c.b16 %v1206_v61, %v1205_v12  ;;  %v2199_v61 = vunpack.c.l.b16 %v2138_v14 }
 0x100   : > { %v1375_v3 = vadd.f32 %v1298_v31, %v946_v44  ;;  %v1676_v44 = vsel %vm13875_vm11, %v1667_v27, %v1675_v20  ;;  %v1683_v31 = vrot.slane %v1681_v46, 6  ;;  %v1686_v37 = vrot.slane %v18904_v51, 5 }
 0x101   : > { %12011 = vmatmul.msk.bf16.gmra.mxu3 %vm658_vm4, %v1835_v60  ;;  %v1687_v16 = vrot.slane %v18903_v18, 6  ;;  %v1815_v13 = vunpack.c.l.b16 %v1676_v44  ;;  %v2141_v60 = vsel %vm13882_vm12, %v2139_v1, %v2140_v55  ;;  %v1692_v20 = vshrl.u32 %v14285_v52, 16  ;;  %v14310_v18 = vld [vmem:[%s13563_s27 + $0x90] sm:$0xe] }
 0x102   : > { %v2200_v41 = vunpack.c.l.b16 %v2141_v60  ;;  %v1697_v46 = vrot.slane %v1695_v45, 6  ;;  %v2025_v60 = vld [vmem:[%s13563_s27 + $0x84] sm:$0xc] }
 0x103   : > { %v2292_v62 = vpop.f32.mrf.mxu0  ;;  %v950_v59 = vpop.f32.mrf.mxu1  ;;  %v1836_v12 = vpack.c.b16 %v1815_v13, %v1814_v48  ;;  %v1688_v44 = vor.u32 %v1687_v16, %v1686_v37  ;;  %v1694_v1 = vrot.slane %v1692_v20, 5  ;;  %v18905_v20 = vshll.u32 %v13586_v35, 16 }
 0x104   : > { %v1907_v40 = vpop.f32.mrf.mxu3  ;;  %v951_v43 = vadd.f32 %v950_v59, %v14125_v42  ;;  %v1684_v59 = vor.u32 %v1683_v31, %v1680_v0  ;;  %v2221_v48 = vpack.c.b16 %v2200_v41, %v2199_v61  ;;  %v2144_v0 = vrot.slane %v14301_v21, 6  ;;  %v14328_v61 = vld [vmem:[%s13563_s27 + $0x98] sm:$0x3] }
 0x105   : > { %v1984_v29 = vadd.f32 %v1907_v40, %v1375_v3  ;;  %v1150_v3 = vrot.slane %v14301_v21, 5 }
 0x106   : > { %12044 = vmatmul.msk.bf16.gmra.mxu0 %vm658_vm4, %v2220_v47  ;;  %11962 = vmatmul.msk.bf16.gmra.mxu1 %vm658_vm4, %v13300_v4  ;;  %v13396_v47 = vld [vmem:[%s13563_s27 + $0x8c] sm:$0x1]  ;;  %v1685_v14 = vrot.slane %v1684_v59, 4 }
 0x107   : > { %v1300_v42 = vpop.f32.mrf.mxu2  ;;  %v14295_v7 = vadd.f32 %v2292_v62, %v1984_v29  ;;  %v1153_v8 = vrot.slane %v13396_v47, 5  ;;  %v1152_v40 = vrot.slane %v1150_v3, 4 }
 0x108   : > { %v1376_v27 = vadd.f32 %v1300_v42, %v948_v58  ;;  %v1690_v42 = vrot.slane %v1688_v44, 4  ;;  %v1689_v21 = vsel %vm13875_vm11, %v1685_v14, %v1688_v44  ;;  %v1715_v44 = vshrl.u32 %v14328_v61, 16  ;;  %v14344_v14 = vld [vmem:[%s13563_s27 + $0x94] sm:$0xf] }
 0x109   : > { %v1154_v16 = vsel %vm13839_vm8, %v1152_v40, %v1153_v8 }
 0x10b   : > { %v2294_v4 = vpop.f32.mrf.mxu0  ;;  %v952_v58 = vpop.f32.mrf.mxu1 }
 0x10c   : > { %v1909_v62 = vpop.f32.mrf.mxu3  ;;  %11995 = vmatmul.msk.bf16.gmra.mxu2 %vm658_vm4, %v1227_v49  ;;  %v953_v50 = vadd.f32 %v952_v58, %v14154_v57  ;;  %v1151_v57 = vsel %vm13839_vm8, %v11979_v19, %v1150_v3  ;;  %v1698_v49 = vor.u32 %v1697_v46, %v1694_v1  ;;  %v1710_v3 = vrot.slane %v18905_v20, 6 }
 0x10d   : > { %v1985_v55 = vadd.f32 %v1909_v62, %v1376_v27  ;;  %v1701_v27 = vshrl.u32 %v14310_v18, 16  ;;  %v1207_v8 = vunpack.c.l.b16 %v1151_v57  ;;  %v12029_v58 = vrot.slane %v2025_v60, 10 }
 0x10e   : > { %v2146_v62 = vrot.slane %v2144_v0, 4  ;;  %v18906_v19 = vshrl.u32 %v13586_v35, 16  ;;  %v1718_v46 = vshll.u32 %v14328_v61, 16  ;;  %v1157_v57 = vrot.slane %v14344_v14, 5 }
 0x10f   : > { %v1303_v29 = vpop.f32.mrf.mxu2  ;;  %v14322_v31 = vadd.f32 %v2294_v4, %v1985_v55  ;;  %v1699_v4 = vsel %vm13875_vm11, %v1690_v42, %v1698_v49  ;;  %v1703_v59 = vrot.slane %v1701_v27, 5  ;;  %v2145_v42 = vsel %vm13882_vm12, %v12029_v58, %v2144_v0 }
 0x110   : > { %v1377_v13 = vadd.f32 %v1303_v29, %v951_v43  ;;  %v1704_v43 = vshll.u32 %v14310_v18, 16  ;;  %v1709_v40 = vrot.slane %v18906_v19, 5  ;;  %v1159_v0 = vrot.slane %v1157_v57, 4  ;;  %v13302_v19 = vld [vmem:[%s13563_s27 + $0x90] sm:$0xff] }
 0x111   : > { %12012 = vmatmul.msk.bf16.gmra.mxu3 %vm658_vm4, %v1836_v12  ;;  %v1208_v12 = vunpack.c.l.b16 %v1154_v16  ;;  %v1817_v16 = vunpack.c.l.b16 %v1699_v4 }
 0x112   : > { %v1706_v1 = vrot.slane %v1704_v43, 6  ;;  %v1711_v27 = vor.u32 %v1710_v3, %v1709_v40  ;;  %v1717_v43 = vrot.slane %v1715_v44, 5  ;;  %v2151_v44 = vrot.slane %v14344_v14, 6  ;;  %v14377_v14 = vld [vmem:[%s13563_s27 + $0xa4] sm:$0x3] }
 0x113   : > { %v2297_v51 = vpop.f32.mrf.mxu0  ;;  %v955_v37 = vpop.f32.mrf.mxu1 }
 0x114   : > { %v1912_v45 = vpop.f32.mrf.mxu3  ;;  %v956_v47 = vadd.f32 %v955_v37, %v14180_v34  ;;  %v2147_v34 = vrot.slane %v14285_v52, 6  ;;  %v1816_v52 = vunpack.c.l.b16 %v1689_v21  ;;  %v1707_v35 = vor.u32 %v1706_v1, %v1703_v59 }
 0x115   : > { %v1986_v41 = vadd.f32 %v1912_v45, %v1377_v13  ;;  %v2201_v21 = vunpack.c.l.b16 %v2145_v42 }
 0x116   : > { %12045 = vmatmul.msk.bf16.gmra.mxu0 %vm658_vm4, %v2221_v48  ;;  %11963 = vmatmul.msk.bf16.gmra.mxu1 %vm658_vm4, %v13301_v32  ;;  %v1228_v48 = vpack.c.b16 %v1208_v12, %v1207_v8  ;;  %v2148_v32 = vsel %vm13882_vm12, %v2146_v62, %v2147_v34  ;;  %v11980_v8 = vrot.slane %v14310_v18, 9  ;;  %v1708_v58 = vrot.slane %v1707_v35, 4 }
 0x117   : > { %v1305_v55 = vpop.f32.mrf.mxu2  ;;  %v14341_v29 = vadd.f32 %v2297_v51, %v1986_v41  ;;  %v1720_v51 = vrot.slane %v1718_v46, 6  ;;  %v1837_v41 = vpack.c.b16 %v1817_v16, %v1816_v52  ;;  %v2202_v4 = vunpack.c.l.b16 %v2148_v32  ;;  %v2026_v16 = vld [vmem:[%s13563_s27 + $0x90] sm:$0xc] }
 0x118   : > { %v1378_v13 = vadd.f32 %v1305_v55, %v953_v50  ;;  %v13398_v50 = vld [vmem:[%s13563_s27 + $0x98] sm:$0x1]  ;;  %v1713_v62 = vrot.slane %v1711_v27, 4  ;;  %v1158_v1 = vsel %vm13839_vm8, %v11980_v8, %v1157_v57  ;;  %v14360_v55 = vld [vmem:[%s13563_s27 + $0x9c] sm:$0xe]  ;;  %v1712_v40 = vsel %vm13875_vm11, %v1708_v58, %v1711_v27 }
 0x119   : > { %v1160_v37 = vrot.slane %v13398_v50, 5  ;;  %v1721_v34 = vor.u32 %v1720_v51, %v1717_v43  ;;  %v2222_v18 = vpack.c.b16 %v2202_v4, %v2201_v21  ;;  %v1724_v42 = vshrl.u32 %v14360_v55, 16 }
 0x11a   : > { %v1727_v32 = vshll.u32 %v14360_v55, 16  ;;  %v12030_v50 = vrot.slane %v2026_v16, 10  ;;  %v18908_v58 = vshrl.u32 %v13660_v17, 16 }
 0x11b   : > { %v2299_v49 = vpop.f32.mrf.mxu0  ;;  %v957_v60 = vpop.f32.mrf.mxu1  ;;  %v1722_v52 = vsel %vm13875_vm11, %v1713_v62, %v1721_v34  ;;  %v1738_v62 = vshrl.u32 %v14377_v14, 16  ;;  %v14388_v34 = vld [vmem:[%s13563_s27 + $0xa0] sm:$0xf] }
 0x11c   : > { %v1914_v20 = vpop.f32.mrf.mxu3  ;;  %11996 = vmatmul.msk.bf16.gmra.mxu2 %vm658_vm4, %v1228_v48  ;;  %v958_v45 = vadd.f32 %v957_v60, %v14210_v38  ;;  %v1161_v38 = vsel %vm13839_vm8, %v1159_v0, %v1160_v37  ;;  %v1209_v48 = vunpack.c.l.b16 %v1158_v1  ;;  %v18907_v60 = vshll.u32 %v13660_v17, 16 }
 0x11d   : > { %v1987_v12 = vadd.f32 %v1914_v20, %v1378_v13  ;;  %v1210_v57 = vunpack.c.l.b16 %v1161_v38  ;;  %v1819_v51 = vunpack.c.l.b16 %v1722_v52  ;;  %v2153_v37 = vrot.slane %v2151_v44, 4  ;;  %v13400_v38 = vld [vmem:[%s13563_s27 + $0xa4] sm:$0x1] }
 0x11e   : > { %v1733_v27 = vrot.slane %v18907_v60, 6  ;;  %v2154_v0 = vrot.slane %v14328_v61, 6  ;;  %v1729_v4 = vrot.slane %v1727_v32, 6  ;;  %v1741_v1 = vshll.u32 %v14377_v14, 16 }
 0x11f   : > { %v1308_v3 = vpop.f32.mrf.mxu2  ;;  %v14367_v46 = vadd.f32 %v2299_v49, %v1987_v12  ;;  %v1818_v49 = vunpack.c.l.b16 %v1712_v40  ;;  %v1229_v8 = vpack.c.b16 %v1210_v57, %v1209_v48  ;;  %v1726_v12 = vrot.slane %v1724_v42, 5 }
 0x120   : > { %v1379_v59 = vadd.f32 %v1308_v3, %v956_v47  ;;  %v1732_v3 = vrot.slane %v18908_v58, 5  ;;  %v2152_v61 = vsel %vm13882_vm12, %v12030_v50, %v2151_v44  ;;  %v1740_v52 = vrot.slane %v1738_v62, 5 }
 0x121   : > { %12013 = vmatmul.msk.bf16.gmra.mxu3 %vm658_vm4, %v1837_v41  ;;  %v1730_v48 = vor.u32 %v1729_v4, %v1726_v12  ;;  %v11981_v42 = vrot.slane %v14360_v55, 9  ;;  %v1743_v32 = vrot.slane %v1741_v1, 6  ;;  %v2203_v60 = vunpack.c.l.b16 %v2152_v61  ;;  %v2027_v12 = vld [vmem:[%s13563_s27 + $0x9c] sm:$0xc] }
 0x122   : > { %v1734_v57 = vor.u32 %v1733_v27, %v1732_v3 }
 0x123   : > { %v2302_v47 = vpop.f32.mrf.mxu0  ;;  %v960_v13 = vpop.f32.mrf.mxu1 }
 0x124   : > { %v1917_v35 = vpop.f32.mrf.mxu3  ;;  %v961_v44 = vadd.f32 %v960_v13, %v13983_v6  ;;  %v2158_v6 = vrot.slane %v14388_v34, 6 }
 0x125   : > { %v1988_v43 = vadd.f32 %v1917_v35, %v1379_v59  ;;  %v1164_v59 = vrot.slane %v14388_v34, 5 }
 0x126   : > { %12046 = vmatmul.msk.bf16.gmra.mxu0 %vm658_vm4, %v2222_v18  ;;  %11964 = vmatmul.msk.bf16.gmra.mxu1 %vm658_vm4, %v13302_v19  ;;  %v1167_v18 = vrot.slane %v13400_v38, 5 }
 0x127   : > { %v1310_v20 = vpop.f32.mrf.mxu2  ;;  %v14382_v41 = vadd.f32 %v2302_v47, %v1988_v43  ;;  %v1838_v47 = vpack.c.b16 %v1819_v51, %v1818_v49  ;;  %v1166_v35 = vrot.slane %v1164_v59, 4  ;;  %v1736_v49 = vrot.slane %v1734_v57, 4 }
 0x128   : > { %v1380_v21 = vadd.f32 %v1310_v20, %v958_v45  ;;  %v2155_v45 = vsel %vm13882_vm12, %v2153_v37, %v2154_v0  ;;  %v14401_v37 = vld [vmem:[%s13563_s27 + $0xa8] sm:$0xe]  ;;  %v1165_v27 = vsel %vm13839_vm8, %v11981_v42, %v1164_v59  ;;  %v1744_v51 = vor.u32 %v1743_v32, %v1740_v52  ;;  %v13303_v0 = vld [vmem:[%s13563_s27 + $0x9c] sm:$0xff] }
 0x129   : > { %v2204_v43 = vunpack.c.l.b16 %v2155_v45  ;;  %v1168_v55 = vsel %vm13839_vm8, %v1166_v35, %v1167_v18  ;;  %v1750_v4 = vshll.u32 %v14401_v37, 16  ;;  %v18909_v59 = vshll.u32 %v13729_v30, 16  ;;  %v14420_v45 = vld [vmem:[%s13563_s27 + $0xb0] sm:$0x3] }
 0x12a   : > { %v1211_v18 = vunpack.c.l.b16 %v1165_v27  ;;  %v1212_v61 = vunpack.c.l.b16 %v1168_v55  ;;  %v18910_v32 = vshrl.u32 %v13729_v30, 16 }
 0x12b   : > { %v2304_v19 = vpop.f32.mrf.mxu0  ;;  %v962_v17 = vpop.f32.mrf.mxu1  ;;  %v2223_v13 = vpack.c.b16 %v2204_v43, %v2203_v60  ;;  %v1756_v1 = vrot.slane %v18909_v59, 6  ;;  %v1752_v35 = vrot.slane %v1750_v4, 6  ;;  %v1761_v60 = vshrl.u32 %v14420_v45, 16 }
 0x12c   : > { %v1919_v40 = vpop.f32.mrf.mxu3  ;;  %11997 = vmatmul.msk.bf16.gmra.mxu2 %vm658_vm4, %v1229_v8  ;;  %v1731_v8 = vrot.slane %v1730_v48, 4  ;;  %v2160_v48 = vrot.slane %v2158_v6, 4  ;;  %v963_v52 = vadd.f32 %v962_v17, %v14003_v23  ;;  %v1764_v43 = vshll.u32 %v14420_v45, 16  ;;  %v13401_v23 = vld [vmem:[%s13563_s27 + $0xac] sm:$0xf] }
 0x12d   : > { %v1989_v16 = vadd.f32 %v1919_v40, %v1380_v21  ;;  %v1747_v21 = vshrl.u32 %v14401_v37, 16  ;;  %v1171_v17 = vrot.slane %v13401_v23, 5 }
 0x12e   : > { %v1735_v34 = vsel %vm13875_vm11, %v1731_v8, %v1734_v57  ;;  %v1230_v8 = vpack.c.b16 %v1212_v61, %v1211_v18  ;;  %v1766_v4 = vrot.slane %v1764_v43, 6 }
 0x12f   : > { %v1313_v50 = vpop.f32.mrf.mxu2  ;;  %v14413_v58 = vadd.f32 %v2304_v19, %v1989_v16  ;;  %v12031_v19 = vrot.slane %v2027_v12, 10  ;;  %v2161_v16 = vrot.slane %v14377_v14, 6  ;;  %v1749_v42 = vrot.slane %v1747_v21, 5 }
 0x130   : > { %v1381_v20 = vadd.f32 %v1313_v50, %v961_v44  ;;  %v1755_v44 = vrot.slane %v18910_v32, 5  ;;  %v1763_v21 = vrot.slane %v1761_v60, 5  ;;  %v1173_v18 = vrot.slane %v1171_v17, 4 }
 0x131   : > { %12014 = vmatmul.msk.bf16.gmra.mxu3 %vm658_vm4, %v1838_v47  ;;  %v1745_v47 = vsel %vm13875_vm11, %v1736_v49, %v1744_v51  ;;  %v1820_v49 = vunpack.c.l.b16 %v1735_v34  ;;  %v2159_v14 = vsel %vm13882_vm12, %v12031_v19, %v2158_v6  ;;  %v2162_v30 = vsel %vm13882_vm12, %v2160_v48, %v2161_v16  ;;  %v2028_v16 = vld [vmem:[%s13563_s27 + $0xa8] sm:$0xc] }
 0x132   : > { %v1821_v27 = vunpack.c.l.b16 %v1745_v47  ;;  %v1753_v55 = vor.u32 %v1752_v35, %v1749_v42  ;;  %v1757_v12 = vor.u32 %v1756_v1, %v1755_v44  ;;  %v2205_v34 = vunpack.c.l.b16 %v2159_v14 }
 0x133   : > { %v2307_v3 = vpop.f32.mrf.mxu0  ;;  %v965_v62 = vpop.f32.mrf.mxu1  ;;  %v2165_v44 = vrot.slane %v13401_v23, 6  ;;  %v12032_v43 = vrot.slane %v2028_v16, 10  ;;  %v12164_v16 = vld [vmem:[%s13563_s27 + $0xc] sm:$0xf] }
 0x134   : > { %v1922_v38 = vpop.f32.mrf.mxu3  ;;  %v1839_v61 = vpack.c.b16 %v1821_v27, %v1820_v49  ;;  %v966_v47 = vadd.f32 %v965_v62, %v14033_v25  ;;  %v1754_v19 = vrot.slane %v1753_v55, 4  ;;  %v1759_v48 = vrot.slane %v1757_v12, 4  ;;  %v13304_v25 = vld [vmem:[%s13563_s27 + $0xa8] sm:$0xff] }
 0x135   : > { %v1990_v40 = vadd.f32 %v1922_v38, %v1381_v20 }
 0x136   : > { %12047 = vmatmul.msk.bf16.gmra.mxu0 %vm658_vm4, %v2223_v13  ;;  %11965 = vmatmul.msk.bf16.gmra.mxu1 %vm658_vm4, %v13303_v0  ;;  %v11982_v0 = vrot.slane %v14401_v37, 9  ;;  %v1758_v60 = vsel %vm13875_vm11, %v1754_v19, %v1757_v12 }
 0x137   : > { %v1315_v57 = vpop.f32.mrf.mxu2  ;;  %v14432_v50 = vadd.f32 %v2307_v3, %v1990_v40  ;;  %v13402_v3 = vld [vmem:[%s13563_s27 + $0xb0] sm:$0x1]  ;;  %v2206_v40 = vunpack.c.l.b16 %v2162_v30 }
 0x138   : > { %v1382_v20 = vadd.f32 %v1315_v57, %v963_v52  ;;  %v1174_v59 = vrot.slane %v13402_v3, 5  ;;  %v1172_v1 = vsel %vm13839_vm8, %v11982_v0, %v1171_v17  ;;  %v1767_v52 = vor.u32 %v1766_v4, %v1763_v21  ;;  %v14449_v57 = vld [vmem:[%s13563_s27 + $0xb4] sm:$0xe]  ;;  %v14463_v4 = vld [vmem:[%s13563_s27 + $0xbc] sm:$0x3] }
 0x139   : > { %v2224_v32 = vpack.c.b16 %v2206_v40, %v2205_v34  ;;  %v1213_v62 = vunpack.c.l.b16 %v1172_v1  ;;  %v1770_v14 = vshrl.u32 %v14449_v57, 16  ;;  %v1773_v30 = vshll.u32 %v14449_v57, 16  ;;  %v14480_v1 = vld [vmem:[%s13563_s27 + $0xb8] sm:$0xf] }
 0x13a   : > { %v1175_v35 = vsel %vm13839_vm8, %v1173_v18, %v1174_v59  ;;  %v1768_v27 = vsel %vm13875_vm11, %v1759_v48, %v1767_v52  ;;  %v2167_v0 = vrot.slane %v2165_v44, 4  ;;  %v2168_v21 = vrot.slane %v14420_v45, 6 }
 0x13b   : > { %v2309_v51 = vpop.f32.mrf.mxu0  ;;  %v967_v13 = vpop.f32.mrf.mxu1  ;;  %v1214_v49 = vunpack.c.l.b16 %v1175_v35  ;;  %v1822_v59 = vunpack.c.l.b16 %v1758_v60  ;;  %v2166_v45 = vsel %vm13882_vm12, %v12032_v43, %v2165_v44  ;;  %v1775_v34 = vrot.slane %v1773_v30, 6  ;;  %v14487_v60 = vld [vmem:[%s13563_s27 + $0x10] sm:$0xf] }
 0x13c   : > { %v1924_v38 = vpop.f32.mrf.mxu3  ;;  %11998 = vmatmul.msk.bf16.gmra.mxu2 %vm658_vm4, %v1230_v8  ;;  %v968_v3 = vadd.f32 %v967_v13, %v14060_v15  ;;  %v1784_v15 = vshrl.u32 %v14463_v4, 16  ;;  %v1178_v48 = vrot.slane %v14480_v1, 5  ;;  %v1787_v52 = vshll.u32 %v14463_v4, 16 }
 0x13d   : > { %v1991_v6 = vadd.f32 %v1924_v38, %v1382_v20  ;;  %v1823_v38 = vunpack.c.l.b16 %v1768_v27  ;;  %v2207_v44 = vunpack.c.l.b16 %v2166_v45  ;;  %v2029_v45 = vld [vmem:[%s13563_s27 + $0xb4] sm:$0xc] }
 0x13f   : > { %v1318_v37 = vpop.f32.mrf.mxu2  ;;  %v14455_v20 = vadd.f32 %v2309_v51, %v1991_v6  ;;  %v18911_v51 = vshll.u32 %v13799_v33, 16  ;;  %v1231_v6 = vpack.c.b16 %v1214_v49, %v1213_v62  ;;  %v11983_v49 = vrot.slane %v14449_v57, 9 }
 0x140   : > { %v1383_v42 = vadd.f32 %v1318_v37, %v966_v47  ;;  %v18912_v47 = vshrl.u32 %v13799_v33, 16  ;;  %v2169_v37 = vsel %vm13882_vm12, %v2167_v0, %v2168_v21  ;;  %v1840_v33 = vpack.c.b16 %v1823_v38, %v1822_v59 }
 0x141   : > { %12015 = vmatmul.msk.bf16.gmra.mxu3 %vm658_vm4, %v1839_v61  ;;  %v1779_v12 = vrot.slane %v18911_v51, 6  ;;  %v1772_v61 = vrot.slane %v1770_v14, 5  ;;  %v1786_v14 = vrot.slane %v1784_v15, 5  ;;  %v2735_v0 = vshrl.u32 %v12164_v16, 16 }
 0x142   : > { %v1778_v19 = vrot.slane %v18912_v47, 5  ;;  %v2738_v51 = vshll.u32 %v12164_v16, 16  ;;  %v2748_v59 = vshrl.u32 %v14487_v60, 16  ;;  %v13305_v47 = vld [vmem:[%s13563_s27 + $0xb4] sm:$0xff] }
 0x143   : > { %v2312_v8 = vpop.f32.mrf.mxu0  ;;  %v970_v17 = vpop.f32.mrf.mxu1  ;;  %v1776_v62 = vor.u32 %v1775_v34, %v1772_v61  ;;  %v2172_v61 = vrot.slane %v14480_v1, 6 }
 0x144   : > { %v1927_v23 = vpop.f32.mrf.mxu3  ;;  %v1780_v27 = vor.u32 %v1779_v12, %v1778_v19  ;;  %v971_v21 = vadd.f32 %v970_v17, %v14081_v39  ;;  %v1179_v12 = vsel %vm13839_vm8, %v11983_v49, %v1178_v48  ;;  %v2740_v19 = vrot.slane %v2738_v51, 5 }
 0x145   : > { %v1992_v55 = vadd.f32 %v1927_v23, %v1383_v42  ;;  %v13404_v42 = vld [vmem:[%s13563_s27 + $0xbc] sm:$0x1]  ;;  %v1180_v23 = vrot.slane %v1178_v48, 4  ;;  %v14507_v48 = vld [vmem:[%s13563_s27 + $0xc] sm:$0xe]  ;;  %v2174_v49 = vrot.slane %v2172_v61, 4 }
 0x146   : > { %12048 = vmatmul.msk.bf16.gmra.mxu0 %vm658_vm4, %v2224_v32  ;;  %11966 = vmatmul.msk.bf16.gmra.mxu1 %vm658_vm4, %v13304_v25  ;;  %v1181_v35 = vrot.slane %v13404_v42, 5  ;;  %v1782_v17 = vrot.slane %v1780_v27, 4  ;;  %v1215_v42 = vunpack.c.l.b16 %v1179_v12 }
 0x147   : > { %v1320_v18 = vpop.f32.mrf.mxu2  ;;  %v14475_v13 = vadd.f32 %v2312_v8, %v1992_v55  ;;  %v2208_v8 = vunpack.c.l.b16 %v2169_v37  ;;  %v1789_v55 = vrot.slane %v1787_v52, 6  ;;  %v2750_v37 = vrot.slane %v2748_v59, 4 }
 0x148   : > { %v1384_v40 = vadd.f32 %v1320_v18, %v968_v3  ;;  %v2744_v3 = vshll.u32 %v14487_v60, 16  ;;  %v1777_v18 = vrot.slane %v1776_v62, 4  ;;  %v1182_v39 = vsel %vm13839_vm8, %v1180_v23, %v1181_v35  ;;  %v12392_v62 = vld [vmem:[%s18757_s1 + $0x14] sm:$0x3] }
 0x149   : > { %v1790_v34 = vor.u32 %v1789_v55, %v1786_v14  ;;  %v4890_v14 = vsel %vm707_vm0, %v12392_v62, 0  ;;  %v3758_v55 = vshll.u32 %v14507_v48, 16 }
 0x14a   : > { %v14504_v15 = vrot.slane %v2744_v3, 5  ;;  %v1781_v35 = vsel %vm13875_vm11, %v1777_v18, %v1780_v27  ;;  %4899 = vmatpush.bf16.msrb.mxu2 %v4890_v14  ;;  %v3755_v27 = vshrl.u32 %v14507_v48, 16  ;;  %v12343_v18 = vld [vmem:[%s18757_s1 + $0x12] sm:$0x3] }
 0x14b   : > { %v2314_v32 = vpop.f32.mrf.mxu0  ;;  %v972_v25 = vpop.f32.mrf.mxu1  ;;  %v1791_v23 = vsel %vm13875_vm11, %v1782_v17, %v1790_v34  ;;  %v4603_v12 = vsel %vm707_vm0, %v12343_v18, 0 }
 0x14c   : > { %v1929_v43 = vpop.f32.mrf.mxu3  ;;  %11999 = vmatmul.msk.bf16.gmra.mxu2 %vm658_vm4, %v1231_v6  ;;  %v2225_v6 = vpack.c.b16 %v2208_v8, %v2207_v44  ;;  %v14516_v44 = vld [vmem:[%s13563_s27 + $0x14] sm:$0x1]  ;;  %v1216_v8 = vunpack.c.l.b16 %v1182_v39  ;;  %v1825_v17 = vunpack.c.l.b16 %v1791_v23  ;;  %4612 = vmatpush.bf16.msrb.mxu1 %v4603_v12 }
 0x14d   : > { %v1993_v30 = vadd.f32 %v1929_v43, %v1384_v40  ;;  %v2737_v40 = vrot.slane %v2735_v0, 4  ;;  %v973_v0 = vadd.f32 %v972_v25, %v14113_v10  ;;  %v2754_v51 = vshll.u32 %v14516_v44, 16 }
 0x14e   : > { %v1232_v39 = vpack.c.b16 %v1216_v8, %v1215_v42 }
 0x14f   : > { %v1323_v38 = vpop.f32.mrf.mxu2  ;;  %v14509_v52 = vadd.f32 %v2314_v32, %v1993_v30  ;;  %v2175_v32 = vrot.slane %v14463_v4, 6  ;;  %v2751_v4 = vor.u32 %v2750_v37, %v14504_v15  ;;  %v3760_v37 = vrot.slane %v3758_v55, 6 }
 0x150   : > { %v1385_v57 = vadd.f32 %v1323_v38, %v971_v21  ;;  %v2741_v21 = vor.u32 %v2740_v19, %v2737_v40  ;;  %v12521_v38 = vld [vmem:[%s18757_s1 + $0x16] sm:$0x3]  ;;  %v12278_v40 = vld [vmem:[%s13563_s27 + $0x14] sm:$0x3]  ;;  %v3757_v19 = vrot.slane %v3755_v27, 5 }
 0x151   : > { %12016 = vmatmul.msk.bf16.gmra.mxu3 %vm658_vm4, %v1840_v33  ;;  %v12033_v33 = vrot.slane %v2029_v45, 10  ;;  %v5544_v25 = vsel %vm707_vm0, %v12521_v38, 0  ;;  %v2176_v34 = vsel %vm13882_vm12, %v2174_v49, %v2175_v32  ;;  %v3769_v23 = vshrl.u32 %v12278_v40, 16  ;;  %v12570_v32 = vld [vmem:[%s18757_s1 + $0x18] sm:$0x3] }
 0x152   : > { %5553 = vmatpush.bf16.msrb.mxu3 %v5544_v25  ;;  %v2742_v62 = vrot.slane %v2741_v21, 4  ;;  %v3772_v49 = vshll.u32 %v12278_v40, 16  ;;  %v12167_v21 = vld [vmem:[%s13563_s27 + $0x18] sm:$0xf]  ;;  %v3409_v38 = vrot.slane %v14516_v44, 5  ;;  %v3761_v18 = vor.u32 %v3760_v37, %v3757_v19  ;;  %v13306_v40 = vld [vmem:[%s13563_s27 + $0xc] sm:$0xff] }
 0x153   : > { %v2317_v1 = vpop.f32.mrf.mxu0  ;;  %v14511_v16 = vpop.f32.mrf.mxu1  ;;  %v2173_v10 = vsel %vm13882_vm12, %v12033_v33, %v2172_v61  ;;  %v2752_v61 = vrot.slane %v2751_v4, 4  ;;  %v2756_v33 = vrot.slane %v2754_v51, 5  ;;  %v3771_v25 = vrot.slane %v3769_v23, 5 }
 0x154   : > { %v1932_v43 = vpop.f32.mrf.mxu3  ;;  %v2209_v8 = vunpack.c.l.b16 %v2173_v10  ;;  %v3774_v12 = vrot.slane %v3772_v49, 6  ;;  %v2759_v44 = vshrl.u32 %v12167_v21, 16 }
 0x155   : > { %v1994_v30 = vadd.f32 %v1932_v43, %v1385_v57  ;;  %v3764_v43 = vrot.slane %v2744_v3, 6  ;;  %v5942_v3 = vsel %vm707_vm0, %v12570_v32, 0 }
 0x156   : > { %12049 = vmatmul.msk.bf16.gmra.mxu0 %vm658_vm4, %v2225_v6  ;;  %11967 = vmatmul.msk.bf16.gmra.mxu1 %vm658_vm4, %v13305_v47  ;;  %v1824_v6 = vunpack.c.l.b16 %v1781_v35  ;;  %v3406_v47 = vrot.slane %v14487_v60, 5  ;;  %v3763_v35 = vrot.slane %v2748_v59, 5  ;;  %v12245_v60 = vrot.slane %v14507_v48, 9 }
 0x157   : > { %v1325_v57 = vpop.f32.mrf.mxu2  ;;  %v14551_v27 = vadd.f32 %v2317_v1, %v1994_v30  ;;  %5951 = vmatpush.bf16.msrb.mxu0 %v5942_v3  ;;  %v976_v1 = vadd.f32 %v14511_v16, %v14138_v5  ;;  %v2747_v30 = vsel %vm13590_vm3, %v2742_v62, %v14504_v15  ;;  %v2757_v48 = vsel %vm13590_vm3, %v2752_v61, %v2756_v33 }
 0x158   : > { %v1386_v45 = vadd.f32 %v1325_v57, %v973_v0  ;;  %v1841_v55 = vpack.c.b16 %v1825_v17, %v1824_v6  ;;  %v2210_v0 = vunpack.c.l.b16 %v2176_v34  ;;  %v3408_v51 = vrot.slane %v3406_v47, 4  ;;  %v14559_v57 = vld [vmem:[%s13563_s27 + $0x1c] sm:$0xf] }
 0x159   : > { %v3765_v6 = vor.u32 %v3764_v43, %v3763_v35  ;;  %v2768_v17 = vshll.u32 %v14559_v57, 16  ;;  %v2772_v34 = vshrl.u32 %v14559_v57, 16  ;;  %v3120_v16 = vunpack.c.l.b16 %v2747_v30 }
 0x15a   : > { %v2226_v5 = vpack.c.b16 %v2210_v0, %v2209_v8  ;;  %v3407_v15 = vsel %vm13839_vm8, %v12245_v60, %v3406_v47  ;;  %v3121_v19 = vunpack.c.l.b16 %v2757_v48  ;;  %v3410_v37 = vsel %vm13839_vm8, %v3408_v51, %v3409_v38  ;;  %v14584_v0 = vld [vmem:[%s13563_s27 + $0x18] sm:$0xe] }
 0x15b   : > { %v2319_v42 = vpop.f32.mrf.mxu0  ;;  %v977_v14 = vpop.f32.mrf.mxu1  ;;  %v3762_v35 = vrot.slane %v3761_v18, 4  ;;  %v3767_v62 = vrot.slane %v3765_v6, 4  ;;  %v3775_v43 = vor.u32 %v3774_v12, %v3771_v25  ;;  %v2761_v23 = vrot.slane %v2759_v44, 4  ;;  %v12279_v44 = vld [vmem:[%s13563_s27 + $0x20] sm:$0x3] }
 0x15c   : > { %v1934_v59 = vpop.f32.mrf.mxu3  ;;  %12000 = vmatmul.msk.bf16.gmra.mxu2 %vm658_vm4, %v1232_v39  ;;  %v2774_v47 = vrot.slane %v2772_v34, 4  ;;  %v3518_v3 = vunpack.c.l.b16 %v3407_v15  ;;  %v3152_v51 = vpack.c.b16 %v3121_v19, %v3120_v16  ;;  %v3778_v48 = vshrl.u32 %v14584_v0, 16  ;;  %v12170_v19 = vld [vmem:[%s13563_s27 + $0x24] sm:$0xf] }
 0x15d   : > { %v1995_v4 = vadd.f32 %v1934_v59, %v1386_v45  ;;  %v2762_v45 = vshll.u32 %v12167_v21, 16  ;;  %v14579_v59 = vld [vmem:[%s13563_s27 + $0x20] sm:$0x1]  ;;  %v978_v21 = vadd.f32 %v977_v14, %v14167_v54  ;;  %v3776_v18 = vsel %vm13875_vm11, %v3767_v62, %v3775_v43 }
 0x15e   : > { %v2778_v30 = vshll.u32 %v14579_v59, 16  ;;  %v3781_v14 = vshll.u32 %v14584_v0, 16  ;;  %v3780_v62 = vrot.slane %v3778_v48, 5 }
 0x15f   : > { %v1328_v10 = vpop.f32.mrf.mxu2  ;;  %v2764_v49 = vrot.slane %v2762_v45, 5  ;;  %v14576_v32 = vadd.f32 %v2319_v42, %v1995_v4  ;;  %v3519_v42 = vunpack.c.l.b16 %v3410_v37  ;;  %v3766_v4 = vsel %vm13875_vm11, %v3762_v35, %v3765_v6 }
 0x160   : > { %v1387_v39 = vadd.f32 %v1328_v10, %v976_v1  ;;  %v4124_v6 = vunpack.c.l.b16 %v3766_v4  ;;  %v2780_v15 = vrot.slane %v2778_v30, 5  ;;  %v3783_v43 = vrot.slane %v3781_v14, 6 }
 0x161   : > { %12017 = vmatmul.msk.bf16.gmra.mxu3 %vm658_vm4, %v1841_v55  ;;  %v14581_v55 = vrot.slane %v2768_v17, 5  ;;  %v2765_v1 = vor.u32 %v2764_v49, %v2761_v23  ;;  %v3550_v12 = vpack.c.b16 %v3519_v42, %v3518_v3  ;;  %v14604_v23 = vld [vmem:[%s13563_s27 + $0x28] sm:$0xf]  ;;  %v2783_v42 = vshrl.u32 %v12170_v19, 16 }
 0x163   : > { %v2322_v61 = vpop.f32.mrf.mxu0  ;;  %v980_v33 = vpop.f32.mrf.mxu1  ;;  %v2775_v54 = vor.u32 %v2774_v47, %v14581_v55  ;;  %v2766_v16 = vrot.slane %v2765_v1, 4  ;;  %v3792_v47 = vshrl.u32 %v12279_v44, 16 }
 0x164   : > { %v1937_v8 = vpop.f32.mrf.mxu3  ;;  %v981_v3 = vadd.f32 %v980_v33, %v14006_v2  ;;  %v3784_v33 = vor.u32 %v3783_v43, %v3780_v62 }
 0x165   : > { %v1996_v60 = vadd.f32 %v1937_v8, %v1387_v39  ;;  %v4125_v39 = vunpack.c.l.b16 %v3776_v18  ;;  %v2776_v35 = vrot.slane %v2775_v54, 4  ;;  %v3787_v8 = vrot.slane %v2768_v17, 6 }
 0x166   : > { %12050 = vmatmul.msk.bf16.gmra.mxu0 %vm658_vm4, %v2226_v5  ;;  %12148 = vmatmul.msk.bf16.vlgmr.msra.gmra.mxu1 %vm658_vm4, %v13306_v40  ;;  %v3413_v40 = vrot.slane %v14559_v57, 5  ;;  %v2786_v57 = vshll.u32 %v12170_v19, 16  ;;  %v2792_v18 = vshll.u32 %v14604_v23, 16  ;;  %v2771_v17 = vsel %vm13590_vm3, %v2766_v16, %v14581_v55 }
 0x167   : > { %v1330_v38 = vpop.f32.mrf.mxu2  ;;  %v14597_v25 = vadd.f32 %v2322_v61, %v1996_v60  ;;  %v3786_v61 = vrot.slane %v2772_v34, 5  ;;  %v3795_v60 = vshll.u32 %v12279_v44, 16  ;;  %v2796_v34 = vshrl.u32 %v14604_v23, 16 }
 0x168   : > { %v1388_v10 = vadd.f32 %v1330_v38, %v978_v21  ;;  %v12246_v21 = vrot.slane %v14584_v0, 9  ;;  %v3415_v38 = vrot.slane %v3413_v40, 4  ;;  %v2781_v2 = vsel %vm13590_vm3, %v2776_v35, %v2780_v15 }
 0x169   : > { %v3788_v0 = vor.u32 %v3787_v8, %v3786_v61  ;;  %v3794_v30 = vrot.slane %v3792_v47, 5  ;;  %v3797_v48 = vrot.slane %v3795_v60, 6  ;;  %v2785_v54 = vrot.slane %v2783_v42, 4 }
 0x16a   : > { %v2788_v14 = vrot.slane %v2786_v57, 5  ;;  %v3414_v55 = vsel %vm13839_vm8, %v12246_v21, %v3413_v40  ;;  %v14624_v16 = vrot.slane %v2792_v18, 5  ;;  %v2798_v15 = vrot.slane %v2796_v34, 4 }
 0x16b   : > { %v2324_v45 = vpop.f32.mrf.mxu0  ;;  %v982_v5 = vpop.f32.mrf.mxu1  ;;  %v3122_v62 = vunpack.c.l.b16 %v2771_v17  ;;  %v3123_v43 = vunpack.c.l.b16 %v2781_v2  ;;  %v3785_v61 = vrot.slane %v3784_v33, 4  ;;  %v3798_v8 = vor.u32 %v3797_v48, %v3794_v30  ;;  %v12280_v48 = vld [vmem:[%s13563_s27 + $0x2c] sm:$0x3] }
 0x16c   : > { %v1939_v37 = vpop.f32.mrf.mxu3  ;;  %12213 = vmatmul.msk.bf16.vlgmr.msra.gmra.mxu2 %vm658_vm4, %v3152_v51  ;;  %v3416_v51 = vrot.slane %v14579_v59, 5  ;;  %v4156_v59 = vpack.c.b16 %v4125_v39, %v4124_v6  ;;  %v14627_v6 = vld [vmem:[%s13563_s27 + $0x2c] sm:$0x1]  ;;  %v14630_v39 = vld [vmem:[%s13563_s27 + $0x24] sm:$0xe]  ;;  %v983_v40 = vadd.f32 %v982_v5, %v14035_v9  ;;  %v3520_v47 = vunpack.c.l.b16 %v3414_v55 }
 0x16d   : > { %v1997_v49 = vadd.f32 %v1939_v37, %v1388_v10  ;;  %v13307_v10 = vld [vmem:[%s13563_s27 + $0x18] sm:$0xff]  ;;  %v2799_v42 = vor.u32 %v2798_v15, %v14624_v16  ;;  %v2802_v57 = vshll.u32 %v14627_v6, 16  ;;  %v3789_v9 = vsel %vm13875_vm11, %v3785_v61, %v3788_v0 }
 0x16e   : > { %v3420_v30 = vrot.slane %v14604_v23, 5  ;;  %v12247_v61 = vrot.slane %v14630_v39, 9  ;;  %v3815_v23 = vshrl.u32 %v12280_v48, 16 }
 0x16f   : > { %v1333_v4 = vpop.f32.mrf.mxu2  ;;  %v14618_v44 = vadd.f32 %v2324_v45, %v1997_v49  ;;  %v3790_v49 = vrot.slane %v3788_v0, 4  ;;  %v4126_v0 = vunpack.c.l.b16 %v3789_v9 }
 0x170   : > { %v1389_v1 = vadd.f32 %v1333_v4, %v981_v3  ;;  %v2789_v3 = vor.u32 %v2788_v14, %v2785_v54  ;;  %v3801_v4 = vshrl.u32 %v14630_v39, 16  ;;  %v2800_v54 = vrot.slane %v2799_v42, 4 }
 0x171   : > { %12262 = vmatmul.msk.bf16.vlgmr.msra.gmra.mxu3 %vm658_vm4, %v3550_v12  ;;  %v3417_v12 = vsel %vm13839_vm8, %v3415_v38, %v3416_v51  ;;  %v3804_v38 = vshll.u32 %v14630_v39, 16  ;;  %v3799_v5 = vsel %vm13875_vm11, %v3790_v49, %v3798_v8  ;;  %v2804_v14 = vrot.slane %v2802_v57, 5  ;;  %v14651_v8 = vld [vmem:[%s13563_s27 + $0x34] sm:$0xf] }
 0x172   : > { %v3521_v60 = vunpack.c.l.b16 %v3417_v12  ;;  %v2790_v33 = vrot.slane %v2789_v3, 4  ;;  %v3803_v55 = vrot.slane %v3801_v4, 5  ;;  %v4127_v15 = vunpack.c.l.b16 %v3799_v5  ;;  %v14667_v5 = vld [vmem:[%s13563_s27 + $0x30] sm:$0xe] }
 0x173   : > { %v2327_v19 = vpop.f32.mrf.mxu0  ;;  %v985_v37 = vpop.f32.mrf.mxu1  ;;  %v3818_v49 = vshll.u32 %v12280_v48, 16  ;;  %v3423_v3 = vrot.slane %v14627_v6, 5  ;;  %v3421_v9 = vsel %vm13839_vm8, %v12247_v61, %v3420_v30  ;;  %v3827_v61 = vshll.u32 %v14667_v5, 16 }
 0x174   : > { %v1942_v35 = vpop.f32.mrf.mxu3  ;;  %v3551_v2 = vpack.c.b16 %v3521_v60, %v3520_v47  ;;  %v2795_v47 = vsel %vm13590_vm3, %v2790_v33, %v14624_v16  ;;  %v3422_v60 = vrot.slane %v3420_v30, 4  ;;  %v3817_v16 = vrot.slane %v3815_v23, 5 }
 0x175   : > { %v1998_v45 = vadd.f32 %v1942_v35, %v1389_v1  ;;  %v3153_v1 = vpack.c.b16 %v3123_v43, %v3122_v62  ;;  %v3809_v35 = vrot.slane %v2796_v34, 5  ;;  %v3810_v62 = vrot.slane %v2792_v18, 6  ;;  %v12173_v43 = vld [vmem:[%s13563_s27 + $0x30] sm:$0xf] }
 0x176   : > { %12295 = vmatmul.msk.bf16.vlgmr.msra.gmra.mxu0 %vm658_vm4, %v4156_v59  ;;  %12149 = vmatmul.msk.bf16.gmra.mxu1 %vm658_vm4, %v13307_v10  ;;  %v2805_v18 = vsel %vm13590_vm3, %v2800_v54, %v2804_v14  ;;  %v2810_v42 = vshll.u32 %v12173_v43, 16  ;;  %v4157_v6 = vpack.c.b16 %v4127_v15, %v4126_v0  ;;  %v14674_v15 = vld [vmem:[%s13563_s27 + $0x38] sm:$0x1] }
 0x177   : > { %v1335_v21 = vpop.f32.mrf.mxu2  ;;  %v14639_v17 = vadd.f32 %v2327_v19, %v1998_v45  ;;  %v3806_v19 = vrot.slane %v3804_v38, 6  ;;  %v3811_v4 = vor.u32 %v3810_v62, %v3809_v35  ;;  %v3820_v38 = vrot.slane %v3818_v49, 6 }
 0x178   : > { %v1390_v51 = vadd.f32 %v1335_v21, %v983_v40  ;;  %v986_v40 = vadd.f32 %v985_v37, %v14062_v22  ;;  %v2807_v21 = vshrl.u32 %v12173_v43, 16  ;;  %v2816_v22 = vshll.u32 %v14651_v8, 16 }
 0x179   : > { %v3807_v39 = vor.u32 %v3806_v19, %v3803_v55  ;;  %v2820_v37 = vshrl.u32 %v14651_v8, 16  ;;  %v3125_v14 = vunpack.c.l.b16 %v2805_v18  ;;  %v3424_v55 = vsel %vm13839_vm8, %v3422_v60, %v3423_v3  ;;  %v12281_v18 = vld [vmem:[%s13563_s27 + $0x38] sm:$0x3] }
 0x17a   : > { %v2812_v19 = vrot.slane %v2810_v42, 5  ;;  %v3813_v0 = vrot.slane %v3811_v4, 4  ;;  %v14676_v62 = vrot.slane %v2816_v22, 5  ;;  %v3522_v49 = vunpack.c.l.b16 %v3421_v9 }
 0x17b   : > { %v2329_v59 = vpop.f32.mrf.mxu0  ;;  %v987_v10 = vpop.f32.mrf.mxu1  ;;  %v3808_v35 = vrot.slane %v3807_v39, 4  ;;  %v2822_v30 = vrot.slane %v2820_v37, 4  ;;  %v3523_v60 = vunpack.c.l.b16 %v3424_v55  ;;  %v3841_v9 = vshll.u32 %v12281_v18, 16 }
 0x17c   : > { %v1944_v12 = vpop.f32.mrf.mxu3  ;;  %12214 = vmatmul.msk.bf16.gmra.mxu2 %vm658_vm4, %v3153_v1  ;;  %v3124_v1 = vunpack.c.l.b16 %v2795_v47  ;;  %v988_v23 = vadd.f32 %v987_v10, %v14089_v24  ;;  %v3427_v10 = vrot.slane %v14651_v8, 5  ;;  %v12248_v8 = vrot.slane %v14667_v5, 9 }
 0x17d   : > { %v1999_v45 = vadd.f32 %v1944_v12, %v1390_v51  ;;  %v13308_v51 = vld [vmem:[%s13563_s27 + $0x24] sm:$0xff]  ;;  %v2823_v42 = vor.u32 %v2822_v30, %v14676_v62  ;;  %v3552_v55 = vpack.c.b16 %v3523_v60, %v3522_v49  ;;  %v12176_v30 = vld [vmem:[%s13563_s27 + $0x3c] sm:$0xf] }
 0x17e   : > { %v3154_v47 = vpack.c.b16 %v3125_v14, %v3124_v1  ;;  %v3838_v1 = vshrl.u32 %v12281_v18, 16  ;;  %v2831_v60 = vshrl.u32 %v12176_v30, 16 }
 0x17f   : > { %v1338_v34 = vpop.f32.mrf.mxu2  ;;  %v14669_v33 = vadd.f32 %v2329_v59, %v1999_v45  ;;  %v3821_v59 = vor.u32 %v3820_v38, %v3817_v16  ;;  %v3824_v45 = vshrl.u32 %v14667_v5, 16  ;;  %v3829_v38 = vrot.slane %v3827_v61, 6 }
 0x180   : > { %v1391_v57 = vadd.f32 %v1338_v34, %v986_v40  ;;  %v2826_v34 = vshll.u32 %v14674_v15, 16  ;;  %v3840_v49 = vrot.slane %v3838_v1, 5 }
 0x181   : > { %12263 = vmatmul.msk.bf16.gmra.mxu3 %vm658_vm4, %v3551_v2  ;;  %v2809_v2 = vrot.slane %v2807_v21, 4  ;;  %v3812_v21 = vsel %vm13875_vm11, %v3808_v35, %v3811_v4  ;;  %v3822_v24 = vsel %vm13875_vm11, %v3813_v0, %v3821_v59  ;;  %v3826_v16 = vrot.slane %v3824_v45, 5 }
 0x182   : > { %v4129_v35 = vunpack.c.l.b16 %v3822_v24  ;;  %v2824_v0 = vrot.slane %v2823_v42, 4  ;;  %v3430_v59 = vrot.slane %v14674_v15, 5  ;;  %v3428_v15 = vsel %vm13839_vm8, %v12248_v8, %v3427_v10  ;;  %v13309_v42 = vld [vmem:[%s13563_s27 + $0x30] sm:$0xff] }
 0x183   : > { %v2332_v48 = vpop.f32.mrf.mxu0  ;;  %v990_v54 = vpop.f32.mrf.mxu1  ;;  %v2813_v3 = vor.u32 %v2812_v19, %v2809_v2  ;;  %v2828_v19 = vrot.slane %v2826_v34, 5  ;;  %v3830_v45 = vor.u32 %v3829_v38, %v3826_v16  ;;  %v3524_v8 = vunpack.c.l.b16 %v3428_v15 }
 0x184   : > { %v1947_v12 = vpop.f32.mrf.mxu3  ;;  %v991_v61 = vadd.f32 %v990_v54, %v14121_v11 }
 0x185   : > { %v2000_v43 = vadd.f32 %v1947_v12, %v1391_v57  ;;  %v2814_v2 = vrot.slane %v2813_v3, 4  ;;  %v4128_v12 = vunpack.c.l.b16 %v3812_v21  ;;  %v2834_v3 = vshll.u32 %v12176_v30, 16 }
 0x186   : > { %12296 = vmatmul.msk.bf16.gmra.mxu0 %vm658_vm4, %v4157_v6  ;;  %12150 = vmatmul.msk.bf16.gmra.mxu1 %vm658_vm4, %v13308_v51  ;;  %v3832_v6 = vrot.slane %v2820_v37, 5  ;;  %v3833_v51 = vrot.slane %v2816_v22, 6  ;;  %v3429_v22 = vrot.slane %v3427_v10, 4  ;;  %v2829_v54 = vsel %vm13590_vm3, %v2824_v0, %v2828_v19  ;;  %v14719_v19 = vld [vmem:[%s13563_s27 + $0x3c] sm:$0xe] }
 0x187   : > { %v1340_v40 = vpop.f32.mrf.mxu2  ;;  %v14688_v57 = vadd.f32 %v2332_v48, %v2000_v43  ;;  %v14697_v43 = vld [vmem:[%s13563_s27 + $0x40] sm:$0xf]  ;;  %v4158_v18 = vpack.c.b16 %v4129_v35, %v4128_v12  ;;  %v2819_v11 = vsel %vm13590_vm3, %v2814_v2, %v14676_v62  ;;  %v3831_v24 = vrot.slane %v3830_v45, 4  ;;  %v14722_v35 = vld [vmem:[%s13563_s27 + $0x44] sm:$0x1] }
 0x188   : > { %v1392_v39 = vadd.f32 %v1340_v40, %v988_v23  ;;  %v3834_v23 = vor.u32 %v3833_v51, %v3832_v6  ;;  %v3843_v40 = vrot.slane %v3841_v9, 6  ;;  %v2840_v34 = vshll.u32 %v14697_v43, 16 }
 0x189   : > { %v2844_v5 = vshrl.u32 %v14697_v43, 16  ;;  %v2833_v9 = vrot.slane %v2831_v60, 4  ;;  %v2836_v62 = vrot.slane %v2834_v3, 5  ;;  %v3127_v12 = vunpack.c.l.b16 %v2829_v54 }
 0x18a   : > { %v3836_v16 = vrot.slane %v3834_v23, 4  ;;  %v3844_v38 = vor.u32 %v3843_v40, %v3840_v49  ;;  %v3847_v45 = vshrl.u32 %v14719_v19, 16  ;;  %v3850_v60 = vshll.u32 %v14719_v19, 16 }
 0x18b   : > { %v2334_v14 = vpop.f32.mrf.mxu0  ;;  %v992_v4 = vpop.f32.mrf.mxu1  ;;  %v2846_v2 = vrot.slane %v2844_v5, 4  ;;  %v2837_v49 = vor.u32 %v2836_v62, %v2833_v9  ;;  %v3434_v15 = vrot.slane %v14697_v43, 5  ;;  %v12249_v43 = vrot.slane %v14719_v19, 9 }
 0x18c   : > { %v1949_v48 = vpop.f32.mrf.mxu3  ;;  %12215 = vmatmul.msk.bf16.gmra.mxu2 %vm658_vm4, %v3154_v47  ;;  %v3437_v19 = vrot.slane %v14722_v35, 5 }
 0x18d   : > { %v2001_v37 = vadd.f32 %v1949_v48, %v1392_v39  ;;  %v3431_v39 = vsel %vm13839_vm8, %v3429_v22, %v3430_v59  ;;  %v3126_v48 = vunpack.c.l.b16 %v2819_v11  ;;  %v3835_v22 = vsel %vm13875_vm11, %v3831_v24, %v3834_v23 }
 0x18e   : > { %v3525_v30 = vunpack.c.l.b16 %v3431_v39  ;;  %v3845_v59 = vsel %vm13875_vm11, %v3836_v16, %v3844_v38  ;;  %v4130_v11 = vunpack.c.l.b16 %v3835_v22  ;;  %v3849_v39 = vrot.slane %v3847_v45, 5  ;;  %v18916_v22 = vld [vmem:[#allocation10_spill] sm:$0xff] }
 0x18f   : > { %v1343_v47 = vpop.f32.mrf.mxu2  ;;  %v14714_v6 = vadd.f32 %v2334_v14, %v2001_v37  ;;  %v18914_v14 = vld [vmem:[#allocation8_spill] sm:$0xff]  ;;  %v3155_v3 = vpack.c.b16 %v3127_v12, %v3126_v48  ;;  %v4131_v54 = vunpack.c.l.b16 %v3845_v59  ;;  %v2838_v38 = vrot.slane %v2837_v49, 4 }
 0x190   : > { %v1393_v21 = vadd.f32 %v1343_v47, %v991_v61  ;;  %v993_v37 = vadd.f32 %v992_v4, %v18914_v14  ;;  %v2850_v47 = vshll.u32 %v14722_v35, 16  ;;  %v3553_v23 = vpack.c.b16 %v3525_v30, %v3524_v8 }
 0x191   : > { %12264 = vmatmul.msk.bf16.gmra.mxu3 %vm658_vm4, %v3552_v55  ;;  %18913 = vst [vmem:[#allocation14_spill] sm:$0xff] %v14714_v6  ;;  %v14716_v55 = vrot.slane %v2840_v34, 5  ;;  %v3856_v48 = vrot.slane %v2840_v34, 6  ;;  %v3436_v45 = vrot.slane %v3434_v15, 4  ;;  %v14762_v6 = vld [vmem:[%s13563_s27 + $0x48] sm:$0xe] }
 0x192   : > { %v2852_v62 = vrot.slane %v2850_v47, 5 }
 0x193   : > { %v2337_v51 = vpop.f32.mrf.mxu0  ;;  %v995_v1 = vpop.f32.mrf.mxu1  ;;  %v2847_v40 = vor.u32 %v2846_v2, %v14716_v55  ;;  %v3852_v2 = vrot.slane %v3850_v60, 6  ;;  %v2843_v34 = vsel %vm13590_vm3, %v2838_v38, %v14716_v55 }
 0x194   : > { %v1952_v10 = vpop.f32.mrf.mxu3  ;;  %v996_v59 = vadd.f32 %v995_v1, %v18916_v22  ;;  %v4159_v22 = vpack.c.b16 %v4131_v54, %v4130_v11  ;;  %v3438_v11 = vsel %vm13839_vm8, %v3436_v45, %v3437_v19 }
 0x195   : > { %v2002_v0 = vadd.f32 %v1952_v10, %v1393_v21  ;;  %v12282_v21 = vld [vmem:[%s13563_s27 + $0x44] sm:$0x3]  ;;  %v2848_v9 = vrot.slane %v2847_v40, 4  ;;  %v14741_v10 = vld [vmem:[%s13563_s27 + $0x4c] sm:$0xf]  ;;  %v3853_v47 = vor.u32 %v3852_v2, %v3849_v39 }
 0x196   : > { %12297 = vmatmul.msk.bf16.gmra.mxu0 %vm658_vm4, %v4158_v18  ;;  %12151 = vmatmul.msk.bf16.gmra.mxu1 %vm658_vm4, %v13309_v42  ;;  %v12179_v42 = vld [vmem:[%s13563_s27 + $0x48] sm:$0xf]  ;;  %v3861_v12 = vshrl.u32 %v12282_v21, 16  ;;  %v2868_v49 = vshrl.u32 %v14741_v10, 16 }
 0x197   : > { %v1345_v61 = vpop.f32.mrf.mxu2  ;;  %v14735_v18 = vadd.f32 %v2337_v51, %v2002_v0  ;;  %v3855_v51 = vrot.slane %v2844_v5, 5  ;;  %v3864_v0 = vshll.u32 %v12282_v21, 16  ;;  %v2855_v30 = vshrl.u32 %v12179_v42, 16  ;;  %v13310_v21 = vld [vmem:[%s13563_s27 + $0x3c] sm:$0xff] }
 0x198   : > { %v1394_v4 = vadd.f32 %v1345_v61, %v993_v37  ;;  %v2858_v37 = vshll.u32 %v12179_v42, 16  ;;  %v2864_v61 = vshll.u32 %v14741_v10, 16  ;;  %v2853_v5 = vsel %vm13590_vm3, %v2848_v9, %v2852_v62 }
 0x199   : > { %18915 = vst [vmem:[#allocation8_spill] sm:$0xff] %v14735_v18  ;;  %v3857_v1 = vor.u32 %v3856_v48, %v3855_v51  ;;  %v2857_v42 = vrot.slane %v2855_v30, 4  ;;  %v14757_v18 = vld [vmem:[%s13563_s27 + $0x50] sm:$0x1]  ;;  %v2870_v38 = vrot.slane %v2868_v49, 4  ;;  %v3128_v62 = vunpack.c.l.b16 %v2843_v34 }
 0x19a   : > { %v14759_v55 = vrot.slane %v2864_v61, 5  ;;  %v3129_v2 = vunpack.c.l.b16 %v2853_v5  ;;  %v3854_v54 = vrot.slane %v3853_v47, 4  ;;  %v3527_v5 = vunpack.c.l.b16 %v3438_v11 }
 0x19b   : > { %v2339_v24 = vpop.f32.mrf.mxu0  ;;  %v997_v16 = vpop.f32.mrf.mxu1  ;;  %v3859_v48 = vrot.slane %v3857_v1, 4 }
 0x19c   : > { %v1954_v14 = vpop.f32.mrf.mxu3  ;;  %12216 = vmatmul.msk.bf16.gmra.mxu2 %vm658_vm4, %v3155_v3  ;;  %v3866_v3 = vrot.slane %v3864_v0, 6  ;;  %v3858_v47 = vsel %vm13875_vm11, %v3854_v54, %v3857_v1 }
 0x19d   : > { %v2003_v8 = vadd.f32 %v1954_v14, %v1394_v4  ;;  %v3863_v4 = vrot.slane %v3861_v12, 5  ;;  %v2860_v14 = vrot.slane %v2858_v37, 5  ;;  %v18917_v37 = vld [vmem:[#allocation12_spill] sm:$0xff] }
 0x19f   : > { %v1348_v40 = vpop.f32.mrf.mxu2  ;;  %v14764_v9 = vadd.f32 %v2339_v24, %v2003_v8  ;;  %v3867_v12 = vor.u32 %v3866_v3, %v3863_v4  ;;  %v2861_v30 = vor.u32 %v2860_v14, %v2857_v42  ;;  %v2874_v24 = vshll.u32 %v14757_v18, 16  ;;  %v12283_v4 = vld [vmem:[%s13563_s27 + $0x50] sm:$0x3] }
 0x1a0   : > { %v1395_v60 = vadd.f32 %v1348_v40, %v996_v59  ;;  %v3870_v8 = vshrl.u32 %v14762_v6, 16  ;;  %v998_v59 = vadd.f32 %v997_v16, %v18917_v37  ;;  %v3156_v40 = vpack.c.b16 %v3129_v2, %v3128_v62  ;;  %v18918_v37 = vld [vmem:[#allocation3_spill] sm:$0xff] }
 0x1a1   : > { %12265 = vmatmul.msk.bf16.gmra.mxu3 %vm658_vm4, %v3553_v23  ;;  %v3435_v23 = vsel %vm13839_vm8, %v12249_v43, %v3434_v15  ;;  %v2871_v15 = vor.u32 %v2870_v38, %v14759_v55  ;;  %v3873_v43 = vshll.u32 %v14762_v6, 16  ;;  %v2862_v16 = vrot.slane %v2861_v30, 4 }
 0x1a2   : > { %v3526_v34 = vunpack.c.l.b16 %v3435_v23  ;;  %v3441_v42 = vrot.slane %v14741_v10, 5  ;;  %v3872_v14 = vrot.slane %v3870_v8, 5  ;;  %v3878_v62 = vrot.slane %v2868_v49, 5  ;;  %v12182_v10 = vld [vmem:[%s13563_s27 + $0x54] sm:$0xf] }
 0x1a3   : > { %v2342_v35 = vpop.f32.mrf.mxu0  ;;  %v1000_v39 = vpop.f32.mrf.mxu1  ;;  %v3875_v38 = vrot.slane %v3873_v43, 6  ;;  %v3879_v2 = vrot.slane %v2864_v61, 6  ;;  %v3884_v1 = vshrl.u32 %v12283_v4, 16  ;;  %v3887_v11 = vshll.u32 %v12283_v4, 16  ;;  %v14793_v8 = vld [vmem:[%s13563_s27 + $0x58] sm:$0xf] }
 0x1a4   : > { %v1957_v51 = vpop.f32.mrf.mxu3  ;;  %v2867_v49 = vsel %vm13590_vm3, %v2862_v16, %v14759_v55  ;;  %v3443_v61 = vrot.slane %v3441_v42, 4  ;;  %v2888_v55 = vshll.u32 %v14793_v8, 16  ;;  %v13311_v16 = vld [vmem:[%s13563_s27 + $0x48] sm:$0xff] }
 0x1a5   : > { %v2004_v0 = vadd.f32 %v1957_v51, %v1395_v60  ;;  %v3868_v60 = vsel %vm13875_vm11, %v3859_v48, %v3867_v12  ;;  %v4132_v48 = vunpack.c.l.b16 %v3858_v47  ;;  %v3876_v43 = vor.u32 %v3875_v38, %v3872_v14 }
 0x1a6   : > { %12298 = vmatmul.msk.bf16.gmra.mxu0 %vm658_vm4, %v4159_v22  ;;  %12152 = vmatmul.msk.bf16.gmra.mxu1 %vm658_vm4, %v13310_v21  ;;  %v2876_v21 = vrot.slane %v2874_v24, 5  ;;  %v2872_v22 = vrot.slane %v2871_v15, 4  ;;  %v4133_v12 = vunpack.c.l.b16 %v3868_v60  ;;  %v3444_v24 = vrot.slane %v14757_v18, 5 }
 0x1a7   : > { %v1350_v45 = vpop.f32.mrf.mxu2  ;;  %v14782_v3 = vadd.f32 %v2342_v35, %v2004_v0  ;;  %v3554_v35 = vpack.c.b16 %v3527_v5, %v3526_v34  ;;  %v12250_v0 = vrot.slane %v14762_v6, 9  ;;  %v3889_v34 = vrot.slane %v3887_v11, 6 }
 0x1a8   : > { %v1396_v19 = vadd.f32 %v1350_v45, %v998_v59  ;;  %v1001_v59 = vadd.f32 %v1000_v39, %v18918_v37  ;;  %v2877_v15 = vsel %vm13590_vm3, %v2872_v22, %v2876_v21  ;;  %v3880_v45 = vor.u32 %v3879_v2, %v3878_v62 }
 0x1a9   : > { %v2879_v5 = vshrl.u32 %v12182_v10, 16  ;;  %v2892_v18 = vshrl.u32 %v14793_v8, 16  ;;  %v4160_v39 = vpack.c.b16 %v4133_v12, %v4132_v48  ;;  %v3130_v60 = vunpack.c.l.b16 %v2867_v49  ;;  %v14809_v12 = vld [vmem:[%s13563_s27 + $0x5c] sm:$0x1] }
 0x1aa   : > { %v3442_v4 = vsel %vm13839_vm8, %v12250_v0, %v3441_v42  ;;  %v3131_v21 = vunpack.c.l.b16 %v2877_v15  ;;  %v3445_v14 = vsel %vm13839_vm8, %v3443_v61, %v3444_v24  ;;  %v3877_v22 = vrot.slane %v3876_v43, 4  ;;  %v14814_v0 = vld [vmem:[%s13563_s27 + $0x54] sm:$0xe] }
 0x1ab   : > { %v2344_v23 = vpop.f32.mrf.mxu0  ;;  %v1002_v51 = vpop.f32.mrf.mxu1  ;;  %v2894_v42 = vrot.slane %v2892_v18, 4  ;;  %v3528_v37 = vunpack.c.l.b16 %v3442_v4  ;;  %v3529_v24 = vunpack.c.l.b16 %v3445_v14 }
 0x1ac   : > { %v1959_v54 = vpop.f32.mrf.mxu3  ;;  %12217 = vmatmul.msk.bf16.gmra.mxu2 %vm658_vm4, %v3156_v40  ;;  %v3886_v40 = vrot.slane %v3884_v1, 5  ;;  %v3882_v1 = vrot.slane %v3880_v45, 4  ;;  %v3157_v61 = vpack.c.b16 %v3131_v21, %v3130_v60  ;;  %v12284_v60 = vld [vmem:[%s13563_s27 + $0x5c] sm:$0x3] }
 0x1ad   : > { %v2005_v30 = vadd.f32 %v1959_v54, %v1396_v19  ;;  %v2882_v19 = vshll.u32 %v12182_v10, 16  ;;  %v2881_v54 = vrot.slane %v2879_v5, 4  ;;  %v14811_v10 = vrot.slane %v2888_v55, 5 }
 0x1ae   : > { %v3890_v11 = vor.u32 %v3889_v34, %v3886_v40  ;;  %v2898_v40 = vshll.u32 %v14809_v12, 16  ;;  %v3893_v34 = vshrl.u32 %v14814_v0, 16 }
 0x1af   : > { %v1353_v6 = vpop.f32.mrf.mxu2  ;;  %v14806_v38 = vadd.f32 %v2344_v23, %v2005_v30  ;;  %v18920_v23 = vld [vmem:[#allocation4_spill] sm:$0xff] }
 0x1b0   : > { %v1397_v47 = vadd.f32 %v1353_v6, %v1001_v59  ;;  %v1003_v30 = vadd.f32 %v1002_v51, %v18920_v23  ;;  %v3881_v59 = vsel %vm13875_vm11, %v3877_v22, %v3880_v45  ;;  %v3891_v43 = vsel %vm13875_vm11, %v3882_v1, %v3890_v11  ;;  %v12185_v11 = vld [vmem:[%s13563_s27 + $0x60] sm:$0xf] }
 0x1b1   : > { %12266 = vmatmul.msk.bf16.gmra.mxu3 %vm658_vm4, %v3554_v35  ;;  %18919 = vst [vmem:[#allocation10_spill] sm:$0xff] %v14806_v38  ;;  %v2884_v35 = vrot.slane %v2882_v19, 5  ;;  %v2895_v51 = vor.u32 %v2894_v42, %v14811_v10  ;;  %v3896_v19 = vshll.u32 %v14814_v0, 16  ;;  %v4134_v45 = vunpack.c.l.b16 %v3881_v59  ;;  %v18922_v59 = vld [vmem:[#allocation5_spill] sm:$0xff] }
 0x1b2   : > { %v3448_v22 = vrot.slane %v14793_v8, 5  ;;  %v3895_v1 = vrot.slane %v3893_v34, 5  ;;  %v3902_v23 = vrot.slane %v2888_v55, 6  ;;  %v2903_v8 = vshrl.u32 %v12185_v11, 16 }
 0x1b3   : > { %v2347_v62 = vpop.f32.mrf.mxu0  ;;  %v1005_v2 = vpop.f32.mrf.mxu1  ;;  %v2885_v6 = vor.u32 %v2884_v35, %v2881_v54  ;;  %v2896_v35 = vrot.slane %v2895_v51, 4  ;;  %v3898_v42 = vrot.slane %v3896_v19, 6 }
 0x1b4   : > { %v1962_v48 = vpop.f32.mrf.mxu3 }
 0x1b5   : > { %v2006_v49 = vadd.f32 %v1962_v48, %v1397_v47  ;;  %v2886_v14 = vrot.slane %v2885_v6, 4  ;;  %v2900_v48 = vrot.slane %v2898_v40, 5  ;;  %v2906_v6 = vshll.u32 %v12185_v11, 16  ;;  %v13312_v11 = vld [vmem:[%s13563_s27 + $0x54] sm:$0xff] }
 0x1b6   : > { %12299 = vmatmul.msk.bf16.gmra.mxu0 %vm658_vm4, %v4160_v39  ;;  %12153 = vmatmul.msk.bf16.gmra.mxu1 %vm658_vm4, %v13311_v16  ;;  %v3555_v39 = vpack.c.b16 %v3529_v24, %v3528_v37  ;;  %v4135_v16 = vunpack.c.l.b16 %v3891_v43  ;;  %v3910_v24 = vshll.u32 %v12284_v60, 16  ;;  %v12251_v43 = vrot.slane %v14814_v0, 9 }
 0x1b7   : > { %v1355_v15 = vpop.f32.mrf.mxu2  ;;  %v14827_v47 = vadd.f32 %v2347_v62, %v2006_v49  ;;  %v3901_v62 = vrot.slane %v2892_v18, 5  ;;  %v14834_v49 = vld [vmem:[%s13563_s27 + $0x64] sm:$0xf]  ;;  %v2891_v55 = vsel %vm13590_vm3, %v2886_v14, %v14811_v10  ;;  %v3899_v0 = vor.u32 %v3898_v42, %v3895_v1 }
 0x1b8   : > { %v1398_v5 = vadd.f32 %v1355_v15, %v1003_v30  ;;  %v3907_v30 = vshrl.u32 %v12284_v60, 16  ;;  %v1006_v15 = vadd.f32 %v1005_v2, %v18922_v59  ;;  %v2912_v40 = vshll.u32 %v14834_v49, 16 }
 0x1b9   : > { %18921 = vst [vmem:[#allocation12_spill] sm:$0xff] %v14827_v47  ;;  %v3450_v47 = vrot.slane %v3448_v22, 4  ;;  %v2916_v18 = vshrl.u32 %v14834_v49, 16  ;;  %v2901_v2 = vsel %vm13590_vm3, %v2896_v35, %v2900_v48  ;;  %v3912_v60 = vrot.slane %v3910_v24, 6 }
 0x1ba   : > { %v3909_v19 = vrot.slane %v3907_v30, 5  ;;  %v2908_v59 = vrot.slane %v2906_v6, 5  ;;  %v3449_v10 = vsel %vm13839_vm8, %v12251_v43, %v3448_v22  ;;  %v14854_v14 = vrot.slane %v2912_v40, 5  ;;  %v18923_v22 = vld [vmem:[#allocation6_spill] sm:$0xff] }
 0x1bb   : > { %v2349_v4 = vpop.f32.mrf.mxu0  ;;  %v1007_v21 = vpop.f32.mrf.mxu1  ;;  %v2918_v1 = vrot.slane %v2916_v18, 4  ;;  %v3132_v48 = vunpack.c.l.b16 %v2891_v55  ;;  %v3133_v42 = vunpack.c.l.b16 %v2901_v2 }
 0x1bc   : > { %v1964_v54 = vpop.f32.mrf.mxu3  ;;  %12218 = vmatmul.msk.bf16.gmra.mxu2 %vm658_vm4, %v3157_v61  ;;  %v3451_v61 = vrot.slane %v14809_v12, 5  ;;  %v4161_v12 = vpack.c.b16 %v4135_v16, %v4134_v45  ;;  %v14857_v45 = vld [vmem:[%s13563_s27 + $0x68] sm:$0x1]  ;;  %v14860_v16 = vld [vmem:[%s13563_s27 + $0x60] sm:$0xe]  ;;  %v1008_v30 = vadd.f32 %v1007_v21, %v18923_v22 }
 0x1bd   : > { %v2007_v37 = vadd.f32 %v1964_v54, %v1398_v5  ;;  %v3903_v5 = vor.u32 %v3902_v23, %v3901_v62  ;;  %v2905_v54 = vrot.slane %v2903_v8, 4  ;;  %v3900_v62 = vrot.slane %v3899_v0, 4 }
 0x1be   : > { %v3913_v23 = vor.u32 %v3912_v60, %v3909_v19  ;;  %v2919_v6 = vor.u32 %v2918_v1, %v14854_v14  ;;  %v3919_v55 = vshll.u32 %v14860_v16, 16  ;;  %v3158_v0 = vpack.c.b16 %v3133_v42, %v3132_v48 }
 0x1bf   : > { %v1358_v34 = vpop.f32.mrf.mxu2  ;;  %v2909_v43 = vor.u32 %v2908_v59, %v2905_v54  ;;  %v3904_v21 = vsel %vm13875_vm11, %v3900_v62, %v3903_v5  ;;  %v3455_v54 = vrot.slane %v14834_v49, 5  ;;  %v12285_v59 = vld [vmem:[%s13563_s27 + $0x68] sm:$0x3]  ;;  %v3924_v62 = vrot.slane %v2916_v18, 5 }
 0x1c0   : > { %v1399_v51 = vadd.f32 %v1358_v34, %v1006_v15  ;;  %v14848_v15 = vadd.f32 %v2349_v4, %v2007_v37  ;;  %v3905_v37 = vrot.slane %v3903_v5, 4  ;;  %v2920_v1 = vrot.slane %v2919_v6, 4 }
 0x1c1   : > { %12267 = vmatmul.msk.bf16.gmra.mxu3 %vm658_vm4, %v3555_v39  ;;  %v3452_v39 = vsel %vm13839_vm8, %v3450_v47, %v3451_v61  ;;  %v3530_v47 = vunpack.c.l.b16 %v3449_v10  ;;  %v2922_v61 = vshll.u32 %v14857_v45, 16  ;;  %v4136_v5 = vunpack.c.l.b16 %v3904_v21 }
 0x1c2   : > { %v3531_v24 = vunpack.c.l.b16 %v3452_v39  ;;  %v3914_v60 = vsel %vm13875_vm11, %v3905_v37, %v3913_v23  ;;  %v3925_v37 = vrot.slane %v2912_v40, 6  ;;  %v12188_v23 = vld [vmem:[%s13563_s27 + $0x6c] sm:$0xf]  ;;  %v3930_v49 = vshrl.u32 %v12285_v59, 16 }
 0x1c3   : > { %v2352_v34 = vpop.f32.mrf.mxu0  ;;  %v1010_v38 = vpop.f32.mrf.mxu1 }
 0x1c4   : > { %v1967_v35 = vpop.f32.mrf.mxu3  ;;  %v3926_v21 = vor.u32 %v3925_v37, %v3924_v62 }
 0x1c5   : > { %v2008_v4 = vadd.f32 %v1967_v35, %v1399_v51  ;;  %v3916_v51 = vshrl.u32 %v14860_v16, 16  ;;  %v2924_v35 = vrot.slane %v2922_v61, 5  ;;  %v3457_v61 = vrot.slane %v3455_v54, 4 }
 0x1c6   : > { %12300 = vmatmul.msk.bf16.gmra.mxu0 %vm658_vm4, %v4161_v12  ;;  %12154 = vmatmul.msk.bf16.gmra.mxu1 %vm658_vm4, %v13312_v11  ;;  %v3556_v12 = vpack.c.b16 %v3531_v24, %v3530_v47  ;;  %v2910_v11 = vrot.slane %v2909_v43, 4  ;;  %v3933_v47 = vshll.u32 %v12285_v59, 16  ;;  %v14881_v24 = vld [vmem:[%s13563_s27 + $0x70] sm:$0xf]  ;;  %v18925_v43 = vld [vmem:[#allocation7_spill] sm:$0xff]  ;;  %v13313_v59 = vld [vmem:[%s13563_s27 + $0x60] sm:$0xff] }
 0x1c7   : > { %v1360_v8 = vpop.f32.mrf.mxu2  ;;  %v14869_v19 = vadd.f32 %v2352_v34, %v2008_v4  ;;  %v3918_v48 = vrot.slane %v3916_v51, 5  ;;  %v3921_v34 = vrot.slane %v3919_v55, 6  ;;  %v4137_v4 = vunpack.c.l.b16 %v3914_v60 }
 0x1c8   : > { %v1400_v2 = vadd.f32 %v1360_v8, %v1008_v30  ;;  %v12252_v30 = vrot.slane %v14860_v16, 9  ;;  %v1011_v8 = vadd.f32 %v1010_v38, %v18925_v43  ;;  %v2915_v6 = vsel %vm13590_vm3, %v2910_v11, %v14854_v14 }
 0x1c9   : > { %18924 = vst [vmem:[#allocation3_spill] sm:$0xff] %v14869_v19  ;;  %v3458_v51 = vrot.slane %v14857_v45, 5  ;;  %v2925_v40 = vsel %vm13590_vm3, %v2920_v1, %v2924_v35  ;;  %v3922_v16 = vor.u32 %v3921_v34, %v3918_v48  ;;  %v2927_v55 = vshrl.u32 %v12188_v23, 16  ;;  %v14897_v35 = vld [vmem:[%s13563_s27 + $0x6c] sm:$0xe] }
 0x1ca   : > { %v2936_v38 = vshll.u32 %v14881_v24, 16  ;;  %v2940_v60 = vshrl.u32 %v14881_v24, 16  ;;  %v3932_v14 = vrot.slane %v3930_v49, 5  ;;  %v3935_v11 = vrot.slane %v3933_v47, 6  ;;  %v12286_v19 = vld [vmem:[%s13563_s27 + $0x74] sm:$0x3] }
 0x1cb   : > { %v2354_v10 = vpop.f32.mrf.mxu0  ;;  %v1012_v39 = vpop.f32.mrf.mxu1  ;;  %v4162_v45 = vpack.c.b16 %v4137_v4, %v4136_v5  ;;  %v3456_v1 = vsel %vm13839_vm8, %v12252_v30, %v3455_v54  ;;  %v3135_v37 = vunpack.c.l.b16 %v2925_v40  ;;  %v3923_v43 = vrot.slane %v3922_v16, 4  ;;  %v14904_v4 = vld [vmem:[%s13563_s27 + $0x74] sm:$0x1] }
 0x1cc   : > { %v1969_v42 = vpop.f32.mrf.mxu3  ;;  %12219 = vmatmul.msk.bf16.gmra.mxu2 %vm658_vm4, %v3158_v0  ;;  %v3928_v5 = vrot.slane %v3926_v21, 4  ;;  %v2942_v54 = vrot.slane %v2940_v60, 4 }
 0x1cd   : > { %v2009_v22 = vadd.f32 %v1969_v42, %v1400_v2  ;;  %v2930_v2 = vshll.u32 %v12188_v23, 16  ;;  %v3134_v42 = vunpack.c.l.b16 %v2915_v6  ;;  %v3459_v23 = vsel %vm13839_vm8, %v3457_v61, %v3458_v51  ;;  %v18927_v61 = vld [vmem:[#allocation9_spill] sm:$0xff] }
 0x1ce   : > { %v3942_v6 = vshll.u32 %v14897_v35, 16  ;;  %v1013_v51 = vadd.f32 %v1012_v39, %v18927_v61 }
 0x1cf   : > { %v1363_v18 = vpop.f32.mrf.mxu2  ;;  %v14899_v48 = vadd.f32 %v2354_v10, %v2009_v22  ;;  %v2932_v49 = vrot.slane %v2930_v2, 5  ;;  %v3936_v10 = vor.u32 %v3935_v11, %v3932_v14  ;;  %v3939_v22 = vshrl.u32 %v14897_v35, 16 }
 0x1d0   : > { %v1401_v0 = vadd.f32 %v1363_v18, %v1011_v8  ;;  %v14906_v8 = vrot.slane %v2936_v38, 5  ;;  %v3532_v18 = vunpack.c.l.b16 %v3456_v1  ;;  %v3159_v16 = vpack.c.b16 %v3135_v37, %v3134_v42 }
 0x1d1   : > { %12268 = vmatmul.msk.bf16.gmra.mxu3 %vm658_vm4, %v3556_v12  ;;  %18926 = vst [vmem:[#allocation4_spill] sm:$0xff] %v14899_v48  ;;  %v2929_v12 = vrot.slane %v2927_v55, 4  ;;  %v3533_v55 = vunpack.c.l.b16 %v3459_v23  ;;  %v2946_v48 = vshll.u32 %v14904_v4, 16  ;;  %v3927_v14 = vsel %vm13875_vm11, %v3923_v43, %v3926_v21 }
 0x1d2   : > { %v2943_v11 = vor.u32 %v2942_v54, %v14906_v8  ;;  %v3937_v39 = vsel %vm13875_vm11, %v3928_v5, %v3936_v10  ;;  %v3944_v42 = vrot.slane %v3942_v6, 6  ;;  %v3947_v1 = vrot.slane %v2940_v60, 5  ;;  %v14927_v6 = vld [vmem:[%s13563_s27 + $0x7c] sm:$0xf] }
 0x1d3   : > { %v2357_v34 = vpop.f32.mrf.mxu0  ;;  %v1015_v62 = vpop.f32.mrf.mxu1  ;;  %v2933_v2 = vor.u32 %v2932_v49, %v2929_v12  ;;  %v3948_v37 = vrot.slane %v2936_v38, 6  ;;  %v3953_v23 = vshrl.u32 %v12286_v19, 16  ;;  %v3956_v12 = vshll.u32 %v12286_v19, 16 }
 0x1d4   : > { %v1972_v47 = vpop.f32.mrf.mxu3  ;;  %v3557_v61 = vpack.c.b16 %v3533_v55, %v3532_v18  ;;  %v2948_v54 = vrot.slane %v2946_v48, 5  ;;  %v4139_v5 = vunpack.c.l.b16 %v3937_v39  ;;  %v2944_v10 = vrot.slane %v2943_v11, 4  ;;  %v18929_v18 = vld [vmem:[#allocation11_spill] sm:$0xff] }
 0x1d5   : > { %v2010_v30 = vadd.f32 %v1972_v47, %v1401_v0  ;;  %v2934_v43 = vrot.slane %v2933_v2, 4  ;;  %v3465_v19 = vrot.slane %v14904_v4, 5  ;;  %v3949_v48 = vor.u32 %v3948_v37, %v3947_v1  ;;  %v13314_v1 = vld [vmem:[%s13563_s27 + $0x6c] sm:$0xff] }
 0x1d6   : > { %12301 = vmatmul.msk.bf16.gmra.mxu0 %vm658_vm4, %v4162_v45  ;;  %12155 = vmatmul.msk.bf16.gmra.mxu1 %vm658_vm4, %v13313_v59  ;;  %v3462_v45 = vrot.slane %v14881_v24, 5  ;;  %v3941_v59 = vrot.slane %v3939_v22, 5  ;;  %v12253_v24 = vrot.slane %v14897_v35, 9  ;;  %v12191_v22 = vld [vmem:[%s13563_s27 + $0x78] sm:$0xf]  ;;  %v3955_v55 = vrot.slane %v3953_v23, 5 }
 0x1d7   : > { %v1365_v40 = vpop.f32.mrf.mxu2  ;;  %v14918_v47 = vadd.f32 %v2357_v34, %v2010_v30  ;;  %v4138_v30 = vunpack.c.l.b16 %v3927_v14  ;;  %v3958_v2 = vrot.slane %v3956_v12, 6  ;;  %v2951_v14 = vshrl.u32 %v12191_v22, 16 }
 0x1d8   : > { %v1402_v0 = vadd.f32 %v1365_v40, %v1013_v51  ;;  %v3464_v38 = vrot.slane %v3462_v45, 4  ;;  %v3945_v51 = vor.u32 %v3944_v42, %v3941_v59  ;;  %v1016_v40 = vadd.f32 %v1015_v62, %v18929_v18 }
 0x1d9   : > { %18928 = vst [vmem:[#allocation5_spill] sm:$0xff] %v14918_v47  ;;  %v2954_v11 = vshll.u32 %v12191_v22, 16  ;;  %v2960_v35 = vshll.u32 %v14927_v6, 16  ;;  %v2964_v39 = vshrl.u32 %v14927_v6, 16  ;;  %v4163_v47 = vpack.c.b16 %v4139_v5, %v4138_v30 }
 0x1da   : > { %v2939_v62 = vsel %vm13590_vm3, %v2934_v43, %v14906_v8  ;;  %v2949_v4 = vsel %vm13590_vm3, %v2944_v10, %v2948_v54  ;;  %v3463_v59 = vsel %vm13839_vm8, %v12253_v24, %v3462_v45  ;;  %v3466_v42 = vsel %vm13839_vm8, %v3464_v38, %v3465_v19  ;;  %v12193_v19 = vld [vmem:[%s13563_s27 + $0x80] sm:$0x1] }
 0x1db   : > { %v2359_v49 = vpop.f32.mrf.mxu0  ;;  %v1017_v21 = vpop.f32.mrf.mxu1  ;;  %v3946_v37 = vrot.slane %v3945_v51, 4  ;;  %v3951_v23 = vrot.slane %v3949_v48, 4  ;;  %v3959_v12 = vor.u32 %v3958_v2, %v3955_v55  ;;  %v2953_v43 = vrot.slane %v2951_v14, 4 }
 0x1dc   : > { %v1974_v34 = vpop.f32.mrf.mxu3  ;;  %12220 = vmatmul.msk.bf16.gmra.mxu2 %vm658_vm4, %v3159_v16  ;;  %v2956_v5 = vrot.slane %v2954_v11, 5  ;;  %v14951_v54 = vrot.slane %v2960_v35, 5  ;;  %v2966_v45 = vrot.slane %v2964_v39, 4  ;;  %v3136_v22 = vunpack.c.l.b16 %v2939_v62 }
 0x1dd   : > { %v2011_v60 = vadd.f32 %v1974_v34, %v1402_v0  ;;  %v14945_v34 = vld [vmem:[%s13563_s27 + $0x78] sm:$0xe]  ;;  %v3137_v38 = vunpack.c.l.b16 %v2949_v4  ;;  %v3534_v55 = vunpack.c.l.b16 %v3463_v59  ;;  %v3535_v2 = vunpack.c.l.b16 %v3466_v42 }
 0x1de   : > { %v3962_v18 = vshrl.u32 %v14945_v34, 16  ;;  %v3960_v14 = vsel %vm13875_vm11, %v3951_v23, %v3959_v12  ;;  %v2957_v11 = vor.u32 %v2956_v5, %v2953_v43  ;;  %v2970_v62 = vshll.u32 %v12193_v19, 16 }
 0x1df   : > { %v1368_v16 = vpop.f32.mrf.mxu2 }
 0x1e0   : > { %v1403_v0 = vadd.f32 %v1368_v16, %v1016_v40  ;;  %v3964_v59 = vrot.slane %v3962_v18, 5  ;;  %v2958_v12 = vrot.slane %v2957_v11, 4  ;;  %v2972_v5 = vrot.slane %v2970_v62, 5 }
 0x1e1   : > { %12269 = vmatmul.msk.bf16.gmra.mxu3 %vm658_vm4, %v3557_v61  ;;  %v14947_v61 = vadd.f32 %v2359_v49, %v2011_v60  ;;  %v3965_v49 = vshll.u32 %v14945_v34, 16  ;;  %v18930_v60 = vld [vmem:[#allocation13_spill] sm:$0xff]  ;;  %v3970_v18 = vrot.slane %v2964_v39, 5 }
 0x1e2   : > { %v1018_v40 = vadd.f32 %v1017_v21, %v18930_v60  ;;  %v3469_v21 = vrot.slane %v14927_v6, 5  ;;  %v2963_v39 = vsel %vm13590_vm3, %v2958_v12, %v14951_v54 }
 0x1e3   : > { %v2362_v30 = vpop.f32.mrf.mxu0  ;;  %v2574_v8 = vpop.f32.mrf.mxu1  ;;  %v3967_v42 = vrot.slane %v3965_v49, 6  ;;  %v14974_v49 = vld [vmem:[%s13563_s27 + $0x88] sm:$0xf] }
 0x1e4   : > { %v1977_v10 = vpop.f32.mrf.mxu3  ;;  %v2654_v24 = vadd.f32 %v2574_v8, %v14253_v28  ;;  %v3950_v28 = vsel %vm13875_vm11, %v3946_v37, %v3949_v48  ;;  %v3558_v8 = vpack.c.b16 %v3535_v2, %v3534_v55  ;;  %v4141_v48 = vunpack.c.l.b16 %v3960_v14  ;;  %v12287_v37 = vld [vmem:[%s13563_s27 + $0x80] sm:$0x3] }
 0x1e5   : > { %v2012_v51 = vadd.f32 %v1977_v10, %v1403_v0  ;;  %v2967_v0 = vor.u32 %v2966_v45, %v14951_v54  ;;  %v4140_v10 = vunpack.c.l.b16 %v3950_v28  ;;  %v12254_v45 = vrot.slane %v14945_v34, 9 }
 0x1e6   : > { %12302 = vmatmul.msk.bf16.gmra.mxu0 %vm658_vm4, %v4163_v47  ;;  %12156 = vmatmul.msk.bf16.gmra.mxu1 %vm658_vm4, %v13314_v1  ;;  %v3160_v47 = vpack.c.b16 %v3137_v38, %v3136_v22  ;;  %v3471_v38 = vrot.slane %v3469_v21, 4  ;;  %v3968_v2 = vor.u32 %v3967_v42, %v3964_v59  ;;  %v3971_v28 = vrot.slane %v2960_v35, 6 }
 0x1e7   : > { %v1370_v16 = vpop.f32.mrf.mxu2  ;;  %v14966_v1 = vadd.f32 %v2362_v30, %v2012_v51  ;;  %v2968_v43 = vrot.slane %v2967_v0, 4  ;;  %v3472_v51 = vrot.slane %v12193_v19, 5  ;;  %v3979_v14 = vshll.u32 %v12287_v37, 16 }
 0x1e8   : > { %v1404_v4 = vadd.f32 %v1370_v16, %v1018_v40  ;;  %v12194_v40 = vld [vmem:[%s13563_s27 + $0x84] sm:$0xf]  ;;  %v3976_v16 = vshrl.u32 %v12287_v37, 16  ;;  %v4164_v0 = vpack.c.b16 %v4141_v48, %v4140_v10  ;;  %v3470_v35 = vsel %vm13839_vm8, %v12254_v45, %v3469_v21  ;;  %v13315_v10 = vld [vmem:[%s13563_s27 + $0x78] sm:$0xff] }
 0x1e9   : > { %18931 = vst [vmem:[#allocation6_spill] sm:$0xff] %v14966_v1  ;;  %v2975_v34 = vshrl.u32 %v12194_v40, 16  ;;  %v2978_v11 = vshll.u32 %v12194_v40, 16  ;;  %v2973_v6 = vsel %vm13590_vm3, %v2968_v43, %v2972_v5  ;;  %v3969_v59 = vrot.slane %v3968_v2, 4  ;;  %v14996_v45 = vld [vmem:[%s13563_s27 + $0x84] sm:$0xe] }
 0x1ea   : > { %v3972_v42 = vor.u32 %v3971_v28, %v3970_v18  ;;  %v3981_v48 = vrot.slane %v3979_v14, 6  ;;  %v3536_v2 = vunpack.c.l.b16 %v3470_v35  ;;  %v15039_v1 = vld [vmem:[%s13563_s27 + $0x90] sm:$0xe] }
 0x1eb   : > { %v2364_v60 = vpop.f32.mrf.mxu0  ;;  %v2576_v23 = vpop.f32.mrf.mxu1  ;;  %v2977_v37 = vrot.slane %v2975_v34, 4  ;;  %v2980_v54 = vrot.slane %v2978_v11, 5 }
 0x1ec   : > { %v1979_v22 = vpop.f32.mrf.mxu3  ;;  %12221 = vmatmul.msk.bf16.gmra.mxu2 %vm658_vm4, %v3160_v47  ;;  %v2655_v30 = vadd.f32 %v2576_v23, %v14276_v26  ;;  %v2984_v47 = vshll.u32 %v14974_v49, 16  ;;  %v2988_v26 = vshrl.u32 %v14974_v49, 16 }
 0x1ed   : > { %v2013_v55 = vadd.f32 %v1979_v22, %v1404_v4  ;;  %v3473_v4 = vsel %vm13839_vm8, %v3471_v38, %v3472_v51  ;;  %v3138_v22 = vunpack.c.l.b16 %v2963_v39  ;;  %v3139_v38 = vunpack.c.l.b16 %v2973_v6  ;;  %v15000_v51 = vld [vmem:[%s13563_s27 + $0x8c] sm:$0x1] }
 0x1ee   : > { %v14993_v5 = vrot.slane %v2984_v47, 5  ;;  %v2990_v21 = vrot.slane %v2988_v26, 4  ;;  %v3537_v28 = vunpack.c.l.b16 %v3473_v4  ;;  %v2981_v14 = vor.u32 %v2980_v54, %v2977_v37  ;;  %v12197_v37 = vld [vmem:[%s13563_s27 + $0x90] sm:$0xf] }
 0x1ef   : > { %v3228_v62 = vpop.f32.mrf.mxu2  ;;  %v14991_v23 = vadd.f32 %v2364_v60, %v2013_v55  ;;  %v3973_v60 = vsel %vm13875_vm11, %v3969_v59, %v3972_v42  ;;  %v3161_v6 = vpack.c.b16 %v3139_v38, %v3138_v22  ;;  %v12288_v59 = vld [vmem:[%s13563_s27 + $0x8c] sm:$0x3]  ;;  %v3993_v22 = vrot.slane %v2988_v26, 5  ;;  %v15018_v38 = vld [vmem:[%s13563_s27 + $0x94] sm:$0xf] }
 0x1f0   : > { %v3308_v19 = vadd.f32 %v3228_v62, %v2654_v24  ;;  %v3978_v24 = vrot.slane %v3976_v16, 5  ;;  %v3974_v16 = vrot.slane %v3972_v42, 4  ;;  %v2991_v11 = vor.u32 %v2990_v21, %v14993_v5 }
 0x1f1   : > { %12270 = vmatmul.msk.bf16.gmra.mxu3 %vm658_vm4, %v3558_v8  ;;  %18932 = vst [vmem:[#allocation7_spill] sm:$0xff] %v14991_v23  ;;  %v2994_v62 = vshll.u32 %v15000_v51, 16  ;;  %v3559_v35 = vpack.c.b16 %v3537_v28, %v3536_v2  ;;  %v4142_v4 = vunpack.c.l.b16 %v3973_v60  ;;  %v3994_v2 = vrot.slane %v2984_v47, 6  ;;  %v15034_v23 = vld [vmem:[%s13563_s27 + $0x98] sm:$0x1] }
 0x1f2   : > { %v3982_v55 = vor.u32 %v3981_v48, %v3978_v24  ;;  %v2982_v24 = vrot.slane %v2981_v14, 4  ;;  %v2992_v21 = vrot.slane %v2991_v11, 4  ;;  %v3999_v28 = vshrl.u32 %v12288_v59, 16 }
 0x1f3   : > { %v4232_v12 = vpop.f32.mrf.mxu0  ;;  %v2579_v43 = vpop.f32.mrf.mxu1  ;;  %v3002_v14 = vshll.u32 %v12197_v37, 16  ;;  %v3008_v26 = vshll.u32 %v15018_v38, 16  ;;  %v3012_v11 = vshrl.u32 %v15018_v38, 16 }
 0x1f4   : > { %v3626_v8 = vpop.f32.mrf.mxu3  ;;  %v2656_v40 = vadd.f32 %v2579_v43, %v14295_v7  ;;  %v3985_v7 = vshrl.u32 %v14996_v45, 16  ;;  %v3983_v42 = vsel %vm13875_vm11, %v3974_v16, %v3982_v55  ;;  %v4002_v16 = vshll.u32 %v12288_v59, 16 }
 0x1f5   : > { %v3706_v18 = vadd.f32 %v3626_v8, %v3308_v19  ;;  %v3988_v19 = vshll.u32 %v14996_v45, 16  ;;  %v2996_v8 = vrot.slane %v2994_v62, 5  ;;  %v2999_v55 = vshrl.u32 %v12197_v37, 16  ;;  %v13316_v37 = vld [vmem:[%s13563_s27 + $0x84] sm:$0xff] }
 0x1f6   : > { %12303 = vmatmul.msk.bf16.gmra.mxu0 %vm658_vm4, %v4164_v0  ;;  %12157 = vmatmul.msk.bf16.gmra.mxu1 %vm658_vm4, %v13315_v10  ;;  %v3476_v10 = vrot.slane %v14974_v49, 5  ;;  %v3987_v48 = vrot.slane %v3985_v7, 5  ;;  %v4143_v49 = vunpack.c.l.b16 %v3983_v42  ;;  %v12255_v7 = vrot.slane %v14996_v45, 9 }
 0x1f7   : > { %v3230_v34 = vpop.f32.mrf.mxu2  ;;  %v15010_v0 = vadd.f32 %v4232_v12, %v3706_v18  ;;  %v2997_v47 = vsel %vm13590_vm3, %v2992_v21, %v2996_v8  ;;  %v3995_v45 = vor.u32 %v3994_v2, %v3993_v22  ;;  %v4001_v59 = vrot.slane %v3999_v28, 5 }
 0x1f8   : > { %v3309_v39 = vadd.f32 %v3230_v34, %v2655_v30  ;;  %v3990_v30 = vrot.slane %v3988_v19, 6  ;;  %v3478_v34 = vrot.slane %v3476_v10, 4  ;;  %v3479_v19 = vrot.slane %v15000_v51, 5 }
 0x1f9   : > { %18933 = vst [vmem:[#allocation9_spill] sm:$0xff] %v15010_v0  ;;  %v4004_v42 = vrot.slane %v4002_v16, 6  ;;  %v4165_v0 = vpack.c.b16 %v4143_v49, %v4142_v4  ;;  %v3141_v8 = vunpack.c.l.b16 %v2997_v47  ;;  %v3997_v28 = vrot.slane %v3995_v45, 4 }
 0x1fb   : > { %v4234_v54 = vpop.f32.mrf.mxu0  ;;  %v2581_v43 = vpop.f32.mrf.mxu1  ;;  %v4005_v16 = vor.u32 %v4004_v42, %v4001_v59  ;;  %v3483_v42 = vrot.slane %v15018_v38, 5  ;;  %v12200_v38 = vld [vmem:[%s13563_s27 + $0x9c] sm:$0xf] }
 0x1fc   : > { %v3628_v12 = vpop.f32.mrf.mxu3  ;;  %12222 = vmatmul.msk.bf16.gmra.mxu2 %vm658_vm4, %v3161_v6  ;;  %v2657_v18 = vadd.f32 %v2581_v43, %v14322_v31  ;;  %v2987_v31 = vsel %vm13590_vm3, %v2982_v24, %v14993_v5  ;;  %v3001_v43 = vrot.slane %v2999_v55, 4  ;;  %v15036_v5 = vrot.slane %v3008_v26, 5 }
 0x1fd   : > { %v3707_v60 = vadd.f32 %v3628_v12, %v3309_v39  ;;  %v3991_v39 = vor.u32 %v3990_v30, %v3987_v48  ;;  %v3004_v12 = vrot.slane %v3002_v14, 5  ;;  %v3014_v24 = vrot.slane %v3012_v11, 4 }
 0x1fe   : > { %v3140_v48 = vunpack.c.l.b16 %v2987_v31  ;;  %v3480_v30 = vsel %vm13839_vm8, %v3478_v34, %v3479_v19  ;;  %v4008_v55 = vshrl.u32 %v15039_v1, 16  ;;  %v4011_v14 = vshll.u32 %v15039_v1, 16 }
 0x1ff   : > { %v3233_v62 = vpop.f32.mrf.mxu2  ;;  %v15041_v21 = vadd.f32 %v4234_v54, %v3707_v60  ;;  %v3992_v2 = vrot.slane %v3991_v39, 4  ;;  %v3005_v54 = vor.u32 %v3004_v12, %v3001_v43  ;;  %v3018_v60 = vshll.u32 %v15034_v23, 16  ;;  %v12289_v39 = vld [vmem:[%s13563_s27 + $0x98] sm:$0x3] }
 0x200   : > { %v3310_v6 = vadd.f32 %v3233_v62, %v2656_v40  ;;  %v3539_v62 = vunpack.c.l.b16 %v3480_v30  ;;  %v4006_v19 = vsel %vm13875_vm11, %v3997_v28, %v4005_v16  ;;  %v4013_v12 = vrot.slane %v4011_v14, 6 }
 0x201   : > { %12271 = vmatmul.msk.bf16.gmra.mxu3 %vm658_vm4, %v3559_v35  ;;  %v3477_v35 = vsel %vm13839_vm8, %v12255_v7, %v3476_v10  ;;  %v3015_v10 = vor.u32 %v3014_v24, %v15036_v5  ;;  %v3996_v47 = vsel %vm13875_vm11, %v3992_v2, %v3995_v45  ;;  %v3020_v59 = vrot.slane %v3018_v60, 5 }
 0x202   : > { %v3538_v34 = vunpack.c.l.b16 %v3477_v35  ;;  %v4016_v24 = vrot.slane %v3012_v11, 5  ;;  %v4022_v45 = vshrl.u32 %v12289_v39, 16  ;;  %v4144_v30 = vunpack.c.l.b16 %v3996_v47  ;;  %v15068_v11 = vld [vmem:[%s13563_s27 + $0xa0] sm:$0xf] }
 0x203   : > { %v4237_v51 = vpop.f32.mrf.mxu0  ;;  %v2584_v40 = vpop.f32.mrf.mxu1  ;;  %v3016_v43 = vrot.slane %v3015_v10, 4  ;;  %v12256_v16 = vrot.slane %v15039_v1, 9  ;;  %v3026_v1 = vshll.u32 %v12200_v38, 16 }
 0x204   : > { %v3631_v4 = vpop.f32.mrf.mxu3  ;;  %v2658_v22 = vadd.f32 %v2584_v40, %v14341_v29  ;;  %v3162_v29 = vpack.c.b16 %v3141_v8, %v3140_v48  ;;  %v4017_v40 = vrot.slane %v3008_v26, 6  ;;  %v4025_v8 = vshll.u32 %v12289_v39, 16 }
 0x205   : > { %v3708_v49 = vadd.f32 %v3631_v4, %v3310_v6  ;;  %v4145_v4 = vunpack.c.l.b16 %v4006_v19  ;;  %v3486_v26 = vrot.slane %v15034_v23, 5  ;;  %v3021_v60 = vsel %vm13590_vm3, %v3016_v43, %v3020_v59  ;;  %v13317_v19 = vld [vmem:[%s13563_s27 + $0x90] sm:$0xff] }
 0x206   : > { %12304 = vmatmul.msk.bf16.gmra.mxu0 %vm658_vm4, %v4165_v0  ;;  %12158 = vmatmul.msk.bf16.gmra.mxu1 %vm658_vm4, %v13316_v37  ;;  %v3006_v0 = vrot.slane %v3005_v54, 4  ;;  %v4010_v37 = vrot.slane %v4008_v55, 5  ;;  %v4018_v10 = vor.u32 %v4017_v40, %v4016_v24  ;;  %v4024_v14 = vrot.slane %v4022_v45, 5 }
 0x207   : > { %v3235_v7 = vpop.f32.mrf.mxu2  ;;  %v15059_v6 = vadd.f32 %v4237_v51, %v3708_v49  ;;  %v3560_v51 = vpack.c.b16 %v3539_v62, %v3538_v34  ;;  %v3485_v49 = vrot.slane %v3483_v42, 4  ;;  %v3032_v23 = vshll.u32 %v15068_v11, 16 }
 0x208   : > { %v3311_v31 = vadd.f32 %v3235_v7, %v2657_v18  ;;  %v3011_v54 = vsel %vm13590_vm3, %v3006_v0, %v15036_v5  ;;  %v4014_v55 = vor.u32 %v4013_v12, %v4010_v37  ;;  %v4027_v7 = vrot.slane %v4025_v8, 6 }
 0x209   : > { %v3036_v62 = vshrl.u32 %v15068_v11, 16  ;;  %v3142_v5 = vunpack.c.l.b16 %v3011_v54  ;;  %v3484_v47 = vsel %vm13839_vm8, %v12256_v16, %v3483_v42  ;;  %v3143_v39 = vunpack.c.l.b16 %v3021_v60 }
 0x20a   : > { %v3487_v0 = vsel %vm13839_vm8, %v3485_v49, %v3486_v26  ;;  %v4015_v59 = vrot.slane %v4014_v55, 4  ;;  %v4020_v12 = vrot.slane %v4018_v10, 4  ;;  %v4028_v24 = vor.u32 %v4027_v7, %v4024_v14 }
 0x20b   : > { %v4239_v18 = vpop.f32.mrf.mxu0  ;;  %v2586_v48 = vpop.f32.mrf.mxu1  ;;  %v3034_v42 = vrot.slane %v3032_v23, 5 }
 0x20c   : > { %v3633_v35 = vpop.f32.mrf.mxu3  ;;  %12223 = vmatmul.msk.bf16.gmra.mxu2 %vm658_vm4, %v3162_v29  ;;  %v2659_v2 = vadd.f32 %v2586_v48, %v14367_v46  ;;  %v3023_v29 = vshrl.u32 %v12200_v38, 16  ;;  %v3028_v48 = vrot.slane %v3026_v1, 5  ;;  %v3540_v38 = vunpack.c.l.b16 %v3484_v47 }
 0x20d   : > { %v3709_v28 = vadd.f32 %v3633_v35, %v3311_v31  ;;  %v4166_v31 = vpack.c.b16 %v4145_v4, %v4144_v30  ;;  %v3038_v35 = vrot.slane %v3036_v62, 4  ;;  %v12202_v4 = vld [vmem:[%s13563_s27 + $0xa4] sm:$0x1]  ;;  %v4019_v16 = vsel %vm13875_vm11, %v4015_v59, %v4018_v10 }
 0x20e   : > { %v3025_v40 = vrot.slane %v3023_v29, 4  ;;  %v3042_v14 = vshll.u32 %v12202_v4, 16  ;;  %v4146_v1 = vunpack.c.l.b16 %v4019_v16 }
 0x20f   : > { %v3238_v46 = vpop.f32.mrf.mxu2 }
 0x210   : > { %v3312_v34 = vadd.f32 %v3238_v46, %v2658_v22  ;;  %v15083_v22 = vadd.f32 %v4239_v18, %v3709_v28  ;;  %v3163_v18 = vpack.c.b16 %v3143_v39, %v3142_v5  ;;  %v3541_v28 = vunpack.c.l.b16 %v3487_v0 }
 0x211   : > { %12272 = vmatmul.msk.bf16.gmra.mxu3 %vm658_vm4, %v3560_v51  ;;  %v12241_v51 = vld [vmem:[%s13563_s27 + $0x9c] sm:$0xe]  ;;  %v3029_v26 = vor.u32 %v3028_v48, %v3025_v40  ;;  %v3039_v46 = vor.u32 %v3038_v35, %v3034_v42  ;;  %v4040_v48 = vrot.slane %v3032_v23, 6  ;;  %v15102_v35 = vld [vmem:[%s13563_s27 + $0xac] sm:$0xf] }
 0x212   : > { %v4031_v54 = vshrl.u32 %v12241_v51, 16  ;;  %v4034_v60 = vshll.u32 %v12241_v51, 16  ;;  %v3561_v29 = vpack.c.b16 %v3541_v28, %v3540_v38  ;;  %v3493_v28 = vrot.slane %v12202_v4, 5 }
 0x213   : > { %v4242_v37 = vpop.f32.mrf.mxu0  ;;  %v2589_v43 = vpop.f32.mrf.mxu1  ;;  %v3056_v23 = vshll.u32 %v15102_v35, 16 }
 0x214   : > { %v3636_v45 = vpop.f32.mrf.mxu3  ;;  %v2660_v8 = vadd.f32 %v2589_v43, %v14382_v41  ;;  %v4029_v41 = vsel %vm13875_vm11, %v4020_v12, %v4028_v24  ;;  %v4033_v39 = vrot.slane %v4031_v54, 5  ;;  %v4036_v0 = vrot.slane %v4034_v60, 6  ;;  %v12203_v24 = vld [vmem:[%s13563_s27 + $0xa8] sm:$0xf] }
 0x215   : > { %v3710_v30 = vadd.f32 %v3636_v45, %v3312_v34  ;;  %v3490_v34 = vrot.slane %v15068_v11, 5  ;;  %v4147_v10 = vunpack.c.l.b16 %v4029_v41  ;;  %v3044_v43 = vrot.slane %v3042_v14, 5 }
 0x216   : > { %12305 = vmatmul.msk.bf16.gmra.mxu0 %vm658_vm4, %v4166_v31  ;;  %12159 = vmatmul.msk.bf16.gmra.mxu1 %vm658_vm4, %v13317_v19  ;;  %v12290_v31 = vld [vmem:[%s13563_s27 + $0xa4] sm:$0x3]  ;;  %v3030_v19 = vrot.slane %v3029_v26, 4  ;;  %v4039_v12 = vrot.slane %v3036_v62, 5  ;;  %v3050_v41 = vshll.u32 %v12203_v24, 16  ;;  %v3060_v54 = vshrl.u32 %v15102_v35, 16 }
 0x217   : > { %v3240_v49 = vpop.f32.mrf.mxu2  ;;  %v15094_v7 = vadd.f32 %v4242_v37, %v3710_v30  ;;  %v3040_v37 = vrot.slane %v3039_v46, 4  ;;  %v4045_v11 = vshrl.u32 %v12290_v31, 16  ;;  %v4048_v45 = vshll.u32 %v12290_v31, 16  ;;  %v13318_v46 = vld [vmem:[%s13563_s27 + $0x9c] sm:$0xff] }
 0x218   : > { %v3313_v55 = vadd.f32 %v3240_v49, %v2659_v2  ;;  %v12257_v30 = vrot.slane %v12241_v51, 9  ;;  %v3492_v38 = vrot.slane %v3490_v34, 4  ;;  %v4037_v49 = vor.u32 %v4036_v0, %v4033_v39 }
 0x219   : > { %v3045_v62 = vsel %vm13590_vm3, %v3040_v37, %v3044_v43  ;;  %v4167_v51 = vpack.c.b16 %v4147_v10, %v4146_v1  ;;  %v4041_v60 = vor.u32 %v4040_v48, %v4039_v12  ;;  %v4047_v4 = vrot.slane %v4045_v11, 5  ;;  %v12205_v37 = vld [vmem:[%s13563_s27 + $0xb0] sm:$0x1]  ;;  %v12242_v12 = vld [vmem:[%s13563_s27 + $0xa8] sm:$0xe] }
 0x21a   : > { %v3494_v14 = vsel %vm13839_vm8, %v3492_v38, %v3493_v28  ;;  %v3145_v39 = vunpack.c.l.b16 %v3045_v62  ;;  %v3052_v10 = vrot.slane %v3050_v41, 5  ;;  %v15122_v43 = vrot.slane %v3056_v23, 5 }
 0x21b   : > { %v4244_v5 = vpop.f32.mrf.mxu0  ;;  %v2591_v47 = vpop.f32.mrf.mxu1  ;;  %v4043_v48 = vrot.slane %v4041_v60, 4  ;;  %v3543_v11 = vunpack.c.l.b16 %v3494_v14  ;;  %v4054_v28 = vshrl.u32 %v12242_v12, 16  ;;  %v4057_v62 = vshll.u32 %v12242_v12, 16 }
 0x21c   : > { %v3638_v59 = vpop.f32.mrf.mxu3  ;;  %12224 = vmatmul.msk.bf16.gmra.mxu2 %vm658_vm4, %v3163_v18  ;;  %v2661_v2 = vadd.f32 %v2591_v47, %v14413_v58  ;;  %v3035_v18 = vsel %vm13590_vm3, %v3030_v19, %v3034_v42  ;;  %v3047_v58 = vshrl.u32 %v12203_v24, 16 }
 0x21d   : > { %v3711_v40 = vadd.f32 %v3638_v59, %v3313_v55  ;;  %v4050_v55 = vrot.slane %v4048_v45, 6  ;;  %v3144_v42 = vunpack.c.l.b16 %v3035_v18 }
 0x21e   : > { %v3049_v1 = vrot.slane %v3047_v58, 4 }
 0x21f   : > { %v3243_v16 = vpop.f32.mrf.mxu2  ;;  %v15116_v31 = vadd.f32 %v4244_v5, %v3711_v40  ;;  %v4051_v5 = vor.u32 %v4050_v55, %v4047_v4 }
 0x220   : > { %v3314_v26 = vadd.f32 %v3243_v16, %v2660_v8  ;;  %v3491_v8 = vsel %vm13839_vm8, %v12257_v30, %v3490_v34  ;;  %v3062_v34 = vrot.slane %v3060_v54, 4  ;;  %v3164_v30 = vpack.c.b16 %v3145_v39, %v3144_v42 }
 0x221   : > { %12273 = vmatmul.msk.bf16.gmra.mxu3 %vm658_vm4, %v3561_v29  ;;  %v4038_v29 = vrot.slane %v4037_v49, 4  ;;  %v3542_v40 = vunpack.c.l.b16 %v3491_v8  ;;  %v3053_v38 = vor.u32 %v3052_v10, %v3049_v1  ;;  %v4052_v41 = vsel %vm13875_vm11, %v4043_v48, %v4051_v5  ;;  %v12291_v8 = vld [vmem:[%s13563_s27 + $0xb0] sm:$0x3]  ;;  %v12206_v1 = vld [vmem:[%s13563_s27 + $0xb4] sm:$0xf] }
 0x222   : > { %v3063_v49 = vor.u32 %v3062_v34, %v15122_v43  ;;  %v15140_v10 = vld [vmem:[%s13563_s27 + $0xb8] sm:$0xf]  ;;  %v4059_v48 = vrot.slane %v4057_v62, 6  ;;  %v4062_v5 = vrot.slane %v3060_v54, 5 }
 0x223   : > { %v4247_v47 = vpop.f32.mrf.mxu0  ;;  %v2594_v19 = vpop.f32.mrf.mxu1  ;;  %v4042_v18 = vsel %vm13875_vm11, %v4038_v29, %v4041_v60  ;;  %v4056_v60 = vrot.slane %v4054_v28, 5  ;;  %v12258_v29 = vrot.slane %v12242_v12, 9  ;;  %v3084_v12 = vshrl.u32 %v15140_v10, 16 }
 0x224   : > { %v3641_v0 = vpop.f32.mrf.mxu3  ;;  %v2662_v59 = vadd.f32 %v2594_v19, %v14432_v50  ;;  %v3066_v50 = vshll.u32 %v12205_v37, 16  ;;  %v4148_v55 = vunpack.c.l.b16 %v4042_v18  ;;  %v3064_v39 = vrot.slane %v3063_v49, 4  ;;  %v13319_v49 = vld [vmem:[%s13563_s27 + $0xa8] sm:$0xff] }
 0x225   : > { %v3712_v24 = vadd.f32 %v3641_v0, %v3314_v26  ;;  %v3497_v26 = vrot.slane %v15102_v35, 5 }
 0x226   : > { %12306 = vmatmul.msk.bf16.gmra.mxu0 %vm658_vm4, %v4167_v51  ;;  %12160 = vmatmul.msk.bf16.gmra.mxu1 %vm658_vm4, %v13318_v46  ;;  %v3562_v51 = vpack.c.b16 %v3543_v11, %v3542_v40  ;;  %v3068_v42 = vrot.slane %v3066_v50, 5  ;;  %v4063_v40 = vrot.slane %v3056_v23, 6  ;;  %v4068_v11 = vshrl.u32 %v12291_v8, 16 }
 0x227   : > { %v3245_v45 = vpop.f32.mrf.mxu2  ;;  %v15130_v58 = vadd.f32 %v4247_v47, %v3712_v24  ;;  %v4149_v47 = vunpack.c.l.b16 %v4052_v41  ;;  %v3499_v34 = vrot.slane %v3497_v26, 4  ;;  %v3500_v24 = vrot.slane %v12205_v37, 5 }
 0x228   : > { %v3315_v16 = vadd.f32 %v3245_v45, %v2661_v2  ;;  %v3054_v2 = vrot.slane %v3053_v38, 4  ;;  %v4071_v45 = vshll.u32 %v12291_v8, 16  ;;  %v3071_v38 = vshrl.u32 %v12206_v1, 16 }
 0x229   : > { %v3074_v50 = vshll.u32 %v12206_v1, 16  ;;  %v4168_v28 = vpack.c.b16 %v4149_v47, %v4148_v55  ;;  %v3069_v35 = vsel %vm13590_vm3, %v3064_v39, %v3068_v42  ;;  %v3498_v23 = vsel %vm13839_vm8, %v12258_v29, %v3497_v26  ;;  %v15166_v29 = vld [vmem:[%s13563_s27 + $0xbc] sm:$0x1] }
 0x22a   : > { %v3059_v37 = vsel %vm13590_vm3, %v3054_v2, %v15122_v43  ;;  %v3501_v54 = vsel %vm13839_vm8, %v3499_v34, %v3500_v24  ;;  %v4070_v41 = vrot.slane %v4068_v11, 5  ;;  %v4073_v62 = vrot.slane %v4071_v45, 6 }
 0x22b   : > { %v4249_v4 = vpop.f32.mrf.mxu0  ;;  %v2596_v46 = vpop.f32.mrf.mxu1  ;;  %v3076_v2 = vrot.slane %v3074_v50, 5  ;;  %v3086_v42 = vrot.slane %v3084_v12, 4  ;;  %v3147_v39 = vunpack.c.l.b16 %v3069_v35  ;;  %v3544_v34 = vunpack.c.l.b16 %v3498_v23 }
 0x22c   : > { %v3643_v14 = vpop.f32.mrf.mxu3  ;;  %12225 = vmatmul.msk.bf16.gmra.mxu2 %vm658_vm4, %v3164_v30  ;;  %v2663_v19 = vadd.f32 %v2596_v46, %v14455_v20  ;;  %v3080_v20 = vshll.u32 %v15140_v10, 16  ;;  %v3073_v46 = vrot.slane %v3071_v38, 4  ;;  %v3090_v45 = vshll.u32 %v15166_v29, 16 }
 0x22d   : > { %v3713_v0 = vadd.f32 %v3643_v14, %v3315_v16  ;;  %v4060_v16 = vor.u32 %v4059_v48, %v4056_v60  ;;  %v15162_v14 = vld [vmem:[%s13563_s27 + $0xb4] sm:$0xe]  ;;  %v3146_v60 = vunpack.c.l.b16 %v3059_v37  ;;  %v4074_v48 = vor.u32 %v4073_v62, %v4070_v41  ;;  %v12292_v37 = vld [vmem:[%s13563_s27 + $0xbc] sm:$0x3] }
 0x22e   : > { %v15159_v8 = vrot.slane %v3080_v20, 5 }
 0x22f   : > { %v3248_v30 = vpop.f32.mrf.mxu2  ;;  %v15157_v55 = vadd.f32 %v4249_v4, %v3713_v0  ;;  %v3545_v4 = vunpack.c.l.b16 %v3501_v54  ;;  %v4061_v0 = vrot.slane %v4060_v16, 4  ;;  %v3165_v50 = vpack.c.b16 %v3147_v39, %v3146_v60 }
 0x230   : > { %v3316_v18 = vadd.f32 %v3248_v30, %v2662_v59  ;;  %v4064_v59 = vor.u32 %v4063_v40, %v4062_v5  ;;  %v4077_v5 = vshrl.u32 %v15162_v14, 16  ;;  %v3087_v11 = vor.u32 %v3086_v42, %v15159_v8 }
 0x231   : > { %12274 = vmatmul.msk.bf16.gmra.mxu3 %vm658_vm4, %v3562_v51  ;;  %v4080_v30 = vshll.u32 %v15162_v14, 16  ;;  %v3504_v54 = vrot.slane %v15140_v10, 5  ;;  %v4086_v60 = vrot.slane %v3080_v20, 6  ;;  %v4091_v39 = vshrl.u32 %v12292_v37, 16 }
 0x232   : > { %v4066_v24 = vrot.slane %v4064_v59, 4  ;;  %v4065_v35 = vsel %vm13875_vm11, %v4061_v0, %v4064_v59  ;;  %v4079_v16 = vrot.slane %v4077_v5, 5  ;;  %v4094_v10 = vshll.u32 %v12292_v37, 16 }
 0x233   : > { %v4252_v43 = vpop.f32.mrf.mxu0  ;;  %v2599_v51 = vpop.f32.mrf.mxu1  ;;  %v4150_v0 = vunpack.c.l.b16 %v4065_v35 }
 0x234   : > { %v3646_v26 = vpop.f32.mrf.mxu3  ;;  %v2664_v47 = vadd.f32 %v2599_v51, %v14475_v13  ;;  %v3077_v13 = vor.u32 %v3076_v2, %v3073_v46  ;;  %v4075_v23 = vsel %vm13875_vm11, %v4066_v24, %v4074_v48  ;;  %v3092_v46 = vrot.slane %v3090_v45, 5 }
 0x235   : > { %v3714_v1 = vadd.f32 %v3646_v26, %v3316_v18  ;;  %v3563_v18 = vpack.c.b16 %v3545_v4, %v3544_v34  ;;  %v4082_v2 = vrot.slane %v4080_v30, 6  ;;  %v4085_v26 = vrot.slane %v3084_v12, 5 }
 0x236   : > { %12307 = vmatmul.msk.bf16.gmra.mxu0 %vm658_vm4, %v4168_v28  ;;  %12161 = vmatmul.msk.bf16.gmra.mxu1 %vm658_vm4, %v13319_v49  ;;  %v12209_v49 = vld [vmem:[%s13563_s27 + $0xc0] sm:$0xf]  ;;  %v3078_v51 = vrot.slane %v3077_v13, 4  ;;  %v4151_v24 = vunpack.c.l.b16 %v4075_v23  ;;  %v12259_v13 = vrot.slane %v15162_v14, 9  ;;  %v4096_v37 = vrot.slane %v4094_v10, 6 }
 0x237   : > { %v3250_v40 = vpop.f32.mrf.mxu2  ;;  %v15174_v28 = vadd.f32 %v4252_v43, %v3714_v1  ;;  %v15184_v43 = vld [vmem:[%s13563_s27 + $0xc4] sm:$0xf]  ;;  %v3095_v34 = vshrl.u32 %v12209_v49, 16  ;;  %v3098_v4 = vshll.u32 %v12209_v49, 16  ;;  %v4083_v12 = vor.u32 %v4082_v2, %v4079_v16  ;;  %v13320_v49 = vld [vmem:[%s13563_s27 + $0xb4] sm:$0xff] }
 0x238   : > { %v3317_v38 = vadd.f32 %v3250_v40, %v2663_v19  ;;  %v3088_v19 = vrot.slane %v3087_v11, 4  ;;  %v3104_v48 = vshll.u32 %v15184_v43, 16  ;;  %v3108_v5 = vshrl.u32 %v15184_v43, 16 }
 0x239   : > { %v3506_v11 = vrot.slane %v3504_v54, 4  ;;  %v3083_v45 = vsel %vm13590_vm3, %v3078_v51, %v15159_v8  ;;  %v3097_v35 = vrot.slane %v3095_v34, 4  ;;  %v3100_v14 = vrot.slane %v3098_v4, 5  ;;  %v12244_v34 = vld [vmem:[%s13563_s27 + $0xc0] sm:$0xe] }
 0x23a   : > { %v3093_v30 = vsel %vm13590_vm3, %v3088_v19, %v3092_v46  ;;  %v4169_v23 = vpack.c.b16 %v4151_v24, %v4150_v0  ;;  %v3148_v51 = vunpack.c.l.b16 %v3083_v45  ;;  %v15206_v46 = vld [vmem:[%s13563_s27 + $0xc8] sm:$0x1] }
 0x23b   : > { %v4254_v41 = vpop.f32.mrf.mxu0  ;;  %v2601_v62 = vpop.f32.mrf.mxu1  ;;  %v3149_v19 = vunpack.c.l.b16 %v3093_v30  ;;  %v3114_v0 = vshll.u32 %v15206_v46, 16 }
 0x23c   : > { %v3648_v42 = vpop.f32.mrf.mxu3  ;;  %12226 = vmatmul.msk.bf16.gmra.mxu2 %vm658_vm4, %v3165_v50  ;;  %v2665_v59 = vadd.f32 %v2601_v62, %v14509_v52  ;;  %v3507_v52 = vrot.slane %v15166_v29, 5  ;;  %v4093_v50 = vrot.slane %v4091_v39, 5  ;;  %v3110_v29 = vrot.slane %v3108_v5, 4 }
 0x23d   : > { %v3715_v1 = vadd.f32 %v3648_v42, %v3317_v38  ;;  %v4087_v38 = vor.u32 %v4086_v60, %v4085_v26  ;;  %v3505_v26 = vsel %vm13839_vm8, %v12259_v13, %v3504_v54 }
 0x23e   : > { %v3508_v60 = vsel %vm13839_vm8, %v3506_v11, %v3507_v52  ;;  %v4100_v52 = vshrl.u32 %v12244_v34, 16 }
 0x23f   : > { %v3253_v40 = vpop.f32.mrf.mxu2  ;;  %v15203_v8 = vadd.f32 %v4254_v41, %v3715_v1  ;;  %v4089_v10 = vrot.slane %v4087_v38, 4  ;;  %v4097_v41 = vor.u32 %v4096_v37, %v4093_v50  ;;  %v3101_v1 = vor.u32 %v3100_v14, %v3097_v35 }
 0x240   : > { %v3318_v20 = vadd.f32 %v3253_v40, %v2664_v47  ;;  %v3106_v47 = vrot.slane %v3104_v48, 5  ;;  %v3546_v40 = vunpack.c.l.b16 %v3505_v26  ;;  %v3547_v54 = vunpack.c.l.b16 %v3508_v60 }
 0x241   : > { %12275 = vmatmul.msk.bf16.gmra.mxu3 %vm658_vm4, %v3563_v18  ;;  %v4084_v18 = vrot.slane %v4083_v12, 4  ;;  %v4103_v12 = vshll.u32 %v12244_v34, 16  ;;  %v4098_v45 = vsel %vm13875_vm11, %v4089_v10, %v4097_v41  ;;  %v3102_v30 = vrot.slane %v3101_v1, 4 }
 0x242   : > { %v3111_v4 = vor.u32 %v3110_v29, %v3106_v47  ;;  %v3116_v37 = vrot.slane %v3114_v0, 5  ;;  %v3564_v14 = vpack.c.b16 %v3547_v54, %v3546_v40  ;;  %v3511_v29 = vrot.slane %v15184_v43, 5  ;;  %v15243_v54 = vld [vmem:[%s13563_s27 + $0x1c] sm:$0xf] }
 0x243   : > { %v4257_v16 = vpop.f32.mrf.mxu0  ;;  %v2604_v62 = vpop.f32.mrf.mxu1  ;;  %v4088_v13 = vsel %vm13875_vm11, %v4084_v18, %v4087_v38  ;;  %v4108_v26 = vrot.slane %v3108_v5, 5  ;;  %v4109_v60 = vrot.slane %v3104_v48, 6 }
 0x244   : > { %v3651_v2 = vpop.f32.mrf.mxu3  ;;  %v2666_v42 = vadd.f32 %v2604_v62, %v14551_v27  ;;  %v3166_v27 = vpack.c.b16 %v3149_v19, %v3148_v51  ;;  %v3112_v50 = vrot.slane %v3111_v4, 4  ;;  %v12293_v62 = vld [vmem:[%s13563_s27 + $0xc8] sm:$0x3]  ;;  %v4102_v51 = vrot.slane %v4100_v52, 5 }
 0x245   : > { %v3716_v39 = vadd.f32 %v3651_v2, %v3318_v20  ;;  %v4105_v19 = vrot.slane %v4103_v12, 6  ;;  %v3107_v2 = vsel %vm13590_vm3, %v3102_v30, %v3106_v47  ;;  %v4114_v10 = vshrl.u32 %v12293_v62, 16 }
 0x246   : > { %12308 = vmatmul.msk.bf16.gmra.mxu0 %vm658_vm4, %v4169_v23  ;;  %12162 = vmatmul.msk.bf16.gmra.mxu1 %vm658_vm4, %v13320_v49  ;;  %v4152_v23 = vunpack.c.l.b16 %v4088_v13  ;;  %v4117_v41 = vshll.u32 %v12293_v62, 16  ;;  %v12260_v4 = vrot.slane %v12244_v34, 9  ;;  %v3513_v0 = vrot.slane %v3511_v29, 4 }
 0x247   : > { %v3255_v24 = vpop.f32.mrf.mxu2  ;;  %v15219_v20 = vadd.f32 %v4257_v16, %v3716_v39  ;;  %v3117_v39 = vsel %vm13590_vm3, %v3112_v50, %v3116_v37  ;;  %v15237_v40 = vunpack.c.l.b16 %v3107_v2  ;;  %v4106_v48 = vor.u32 %v4105_v19, %v4102_v51  ;;  %v12311_v37 = vld [vmem:[%s13563_s27 + $0xc] sm:$0xc] }
 0x248   : > { %v3319_v11 = vadd.f32 %v3255_v24, %v2665_v59  ;;  %v4153_v59 = vunpack.c.l.b16 %v4098_v45  ;;  %v3514_v24 = vrot.slane %v15206_v46, 5  ;;  %v3151_v43 = vunpack.c.l.b16 %v3117_v39 }
 0x249   : > { %v15240_v5 = vor.u32 %v4109_v60, %v4108_v26  ;;  %v4116_v34 = vrot.slane %v4114_v10, 5  ;;  %v4119_v52 = vrot.slane %v4117_v41, 6  ;;  %v3512_v30 = vsel %vm13839_vm8, %v12260_v4, %v3511_v29  ;;  %v12701_v10 = vld [vmem:[%s18757_s1 + $0x1e] sm:$0x3]  ;;  %v12603_v41 = vld [vmem:[%s18757_s1 + $0x1a] sm:$0x3] }
 0x24a   : > { %v4170_v47 = vpack.c.b16 %v4153_v59, %v4152_v23  ;;  %v3515_v50 = vsel %vm13839_vm8, %v3513_v0, %v3514_v24  ;;  %v18785_v59 = vshrl.u32 %v15243_v54, 16  ;;  %v4107_v19 = vrot.slane %v4106_v48, 4  ;;  %v13406_v4 = vld [vmem:[%s13563_s27 + $0x14] sm:$0x3] }
 0x24b   : > { %v4259_v35 = vpop.f32.mrf.mxu0  ;;  %v2606_v49 = vpop.f32.mrf.mxu1  ;;  %v3167_v26 = vpack.c.b16 %v3151_v43, %v15237_v40  ;;  %v12327_v60 = vrot.slane %v12311_v37, 10  ;;  %v4397_v0 = vrot.slane %v13406_v4, 6  ;;  %v7217_v24 = vsel %vm707_vm0, %v12701_v10, 0 }
 0x24c   : > { %v3653_v38 = vpop.f32.mrf.mxu3  ;;  %12227 = vmatmul.msk.bf16.gmra.mxu2 %vm658_vm4, %v3166_v27  ;;  %v2667_v16 = vadd.f32 %v2606_v49, %v14576_v32  ;;  %v12473_v32 = vld [vmem:[%s13563_s27 + $0x18] sm:$0xf]  ;;  %v12652_v49 = vld [vmem:[%s18757_s1 + $0x1c] sm:$0x3]  ;;  %v5077_v43 = vrot.slane %v18785_v59, 4  ;;  %7226 = vmatpush.bf16.msra.mxu3 %v7217_v24 }
 0x24d   : > { %v3717_v18 = vadd.f32 %v3653_v38, %v3319_v11  ;;  %v5062_v13 = vshrl.u32 %v12473_v32, 16  ;;  %v13321_v11 = vld [vmem:[%s13563_s27 + $0xc0] sm:$0xff]  ;;  %v5065_v12 = vshll.u32 %v12473_v32, 16  ;;  %v6930_v51 = vsel %vm707_vm0, %v12652_v49, 0  ;;  %v15304_v24 = vld [vmem:[%s13563_s27 + $0x28] sm:$0xf] }
 0x24e   : > { %6939 = vmatpush.bf16.msra.mxu2 %v6930_v51 }
 0x24f   : > { %v3258_v1 = vpop.f32.mrf.mxu2  ;;  %v15246_v46 = vadd.f32 %v4259_v35, %v3717_v18  ;;  %v18782_v35 = vshll.u32 %v15243_v54, 16  ;;  %v4112_v18 = vrot.slane %v15240_v5, 4  ;;  %v5064_v2 = vrot.slane %v5062_v13, 4 }
 0x250   : > { %v3320_v27 = vadd.f32 %v3258_v1, %v2666_v42  ;;  %v5067_v39 = vrot.slane %v5065_v12, 5  ;;  %v3548_v13 = vunpack.c.l.b16 %v3512_v30  ;;  %v12830_v30 = vld [vmem:[%s18757_s1 + $0x20] sm:$0x3] }
 0x251   : > { %12276 = vmatmul.msk.bf16.gmra.mxu3 %vm658_vm4, %v3564_v14  ;;  %v13405_v14 = vld [vmem:[%s13563_s27 + $0x10] sm:$0xf]  ;;  %v5073_v40 = vrot.slane %v18782_v35, 5  ;;  %v7871_v51 = vsel %vm707_vm0, %v12830_v30, 0 }
 0x252   : > { %v4394_v23 = vrot.slane %v13405_v14, 6  ;;  %v5068_v14 = vor.u32 %v5067_v39, %v5064_v2  ;;  %7880 = vmatpush.bf16.msra.mxu0 %v7871_v51 }
 0x253   : > { %v4262_v42 = vpop.f32.mrf.mxu0  ;;  %v2609_v45 = vpop.f32.mrf.mxu1  ;;  %v5078_v49 = vor.u32 %v5077_v43, %v5073_v40 }
 0x254   : > { %v3656_v62 = vpop.f32.mrf.mxu3  ;;  %v2668_v38 = vadd.f32 %v2609_v45, %v14597_v25  ;;  %v4120_v25 = vor.u32 %v4119_v52, %v4116_v34  ;;  %v4396_v1 = vrot.slane %v4394_v23, 4  ;;  %v15281_v34 = vld [vmem:[%s13563_s27 + $0x20] sm:$0x1]  ;;  %v4111_v52 = vsel %vm13875_vm11, %v4107_v19, %v15240_v5 }
 0x255   : > { %v3718_v29 = vadd.f32 %v3656_v62, %v3320_v27  ;;  %v4395_v37 = vsel %vm13882_vm12, %v12327_v60, %v4394_v23  ;;  %v5081_v62 = vshll.u32 %v15281_v34, 16  ;;  %v4154_v19 = vunpack.c.l.b16 %v4111_v52  ;;  %v13407_v52 = vld [vmem:[%s13563_s27 + $0x1c] sm:$0xf] }
 0x256   : > { %12309 = vmatmul.msk.bf16.gmra.mxu0 %vm658_vm4, %v4170_v47  ;;  %12163 = vmatmul.msk.bf16.gmra.mxu1 %vm658_vm4, %v13321_v11  ;;  %v6548_v47 = vsel %vm707_vm0, %v12603_v41, 0  ;;  %v3549_v11 = vunpack.c.l.b16 %v3515_v50  ;;  %v4506_v2 = vunpack.c.l.b16 %v4395_v37  ;;  %v5069_v39 = vrot.slane %v5068_v14, 4  ;;  %v12538_v41 = vld [vmem:[%s13563_s27 + $0x18] sm:$0xe] }
 0x257   : > { %v3260_v32 = vpop.f32.mrf.mxu2  ;;  %6557 = vmatpush.bf16.msra.mxu1 %v6548_v47  ;;  %v15278_v48 = vadd.f32 %v4262_v42, %v3718_v29  ;;  %v4398_v42 = vsel %vm13882_vm12, %v4396_v1, %v4397_v0  ;;  %v5083_v10 = vrot.slane %v5081_v62, 5  ;;  %v12476_v1 = vld [vmem:[%s13563_s27 + $0x24] sm:$0xf]  ;;  %v18781_v62 = vshrl.u32 %v15304_v24, 16 }
 0x258   : > { %v3321_v27 = vadd.f32 %v3260_v32, %v2667_v16  ;;  %v4121_v16 = vsel %vm13875_vm11, %v4112_v18, %v4120_v25  ;;  %v3565_v29 = vpack.c.b16 %v3549_v11, %v3548_v13  ;;  %v4507_v25 = vunpack.c.l.b16 %v4398_v42 }
 0x259   : > { %v4155_v18 = vunpack.c.l.b16 %v4121_v16  ;;  %v5733_v32 = vrot.slane %v15243_v54, 5  ;;  %v12554_v13 = vrot.slane %v12538_v41, 9  ;;  %v5736_v11 = vrot.slane %v15281_v34, 5 }
 0x25a   : > { %v4538_v0 = vpack.c.b16 %v4507_v25, %v4506_v2  ;;  %v4401_v16 = vrot.slane %v13407_v52, 6  ;;  %v5086_v30 = vshrl.u32 %v12476_v1, 16  ;;  %v13322_v25 = vld [vmem:[%s13563_s27 + $0x18] sm:$0xff] }
 0x25b   : > { %v4264_v12 = vpop.f32.mrf.mxu0  ;;  %v2611_v45 = vpop.f32.mrf.mxu1  ;;  %v4171_v4 = vpack.c.b16 %v4155_v18, %v4154_v19  ;;  %v5735_v14 = vrot.slane %v5733_v32, 4  ;;  %v5734_v51 = vsel %vm13839_vm8, %v12554_v13, %v5733_v32  ;;  %v13408_v19 = vld [vmem:[%s13563_s27 + $0x20] sm:$0x3]  ;;  %v5101_v32 = vrot.slane %v18781_v62, 4 }
 0x25c   : > { %v3658_v50 = vpop.f32.mrf.mxu3  ;;  %12228 = vmatmul.msk.bf16.gmra.mxu2 %vm658_vm4, %v3167_v26  ;;  %v2669_v5 = vadd.f32 %v2611_v45, %v14618_v44  ;;  %v5079_v44 = vrot.slane %v5078_v49, 4  ;;  %v5089_v49 = vshll.u32 %v12476_v1, 16  ;;  %v4404_v18 = vrot.slane %v13408_v19, 6  ;;  %v15335_v1 = vld [vmem:[%s13563_s27 + $0x2c] sm:$0x1] }
 0x25d   : > { %v3719_v23 = vadd.f32 %v3658_v50, %v3321_v27  ;;  %v5845_v13 = vunpack.c.l.b16 %v5734_v51 }
 0x25e   : > { %v5084_v42 = vsel %vm13590_vm3, %v5079_v44, %v5083_v10  ;;  %v5088_v44 = vrot.slane %v5086_v30, 4  ;;  %v5091_v10 = vrot.slane %v5089_v49, 5  ;;  %v12479_v49 = vld [vmem:[%s13563_s27 + $0x30] sm:$0xf] }
 0x25f   : > { %v3263_v60 = vpop.f32.mrf.mxu2  ;;  %v15306_v47 = vadd.f32 %v4264_v12, %v3719_v23  ;;  %v12312_v12 = vld [vmem:[%s13563_s27 + $0x18] sm:$0xc] }
 0x260   : > { %v3322_v26 = vadd.f32 %v3263_v60, %v2668_v38  ;;  %v5074_v38 = vsel %vm13590_vm3, %v5069_v39, %v5073_v40  ;;  %v18778_v40 = vshll.u32 %v15304_v24, 16  ;;  %v12328_v23 = vrot.slane %v12312_v12, 10 }
 0x261   : > { %12277 = vmatmul.msk.bf16.gmra.mxu3 %vm658_vm4, %v3565_v29  ;;  %v5447_v34 = vunpack.c.l.b16 %v5074_v38  ;;  %v4403_v29 = vrot.slane %v4401_v16, 4  ;;  %v5448_v60 = vunpack.c.l.b16 %v5084_v42  ;;  %v5737_v39 = vsel %vm13839_vm8, %v5735_v14, %v5736_v11 }
 0x262   : > { %v15330_v41 = vrot.slane %v18778_v40, 5  ;;  %v5846_v11 = vunpack.c.l.b16 %v5737_v39  ;;  %v5092_v42 = vor.u32 %v5091_v10, %v5088_v44  ;;  %v5105_v12 = vshll.u32 %v15335_v1, 16  ;;  %v13409_v10 = vld [vmem:[%s13563_s27 + $0x28] sm:$0xf]  ;;  %v15466_v40 = vld [vmem:[%s13563_s27 + $0x50] sm:$0x1] }
 0x263   : > { %v4267_v27 = vpop.f32.mrf.mxu0  ;;  %v2614_v43 = vpop.f32.mrf.mxu1  ;;  %v5479_v38 = vpack.c.b16 %v5448_v60, %v5447_v34 }
 0x264   : > { %v3661_v45 = vpop.f32.mrf.mxu3  ;;  %v2670_v37 = vadd.f32 %v2614_v43, %v14639_v17  ;;  %v5102_v14 = vor.u32 %v5101_v32, %v15330_v41  ;;  %v5877_v34 = vpack.c.b16 %v5846_v11, %v5845_v13  ;;  %v5093_v51 = vrot.slane %v5092_v42, 4 }
 0x265   : > { %v3720_v50 = vadd.f32 %v3661_v45, %v3322_v26  ;;  %v5113_v32 = vshll.u32 %v12479_v49, 16 }
 0x266   : > { %12310 = vmatmul.msk.bf16.gmra.mxu0 %vm658_vm4, %v4171_v4  ;;  %12344 = vmatmul.msk.bf16.vlgmr.msrb.gmra.mxu1 %vm658_vm4, %v4538_v0  ;;  %v4402_v0 = vsel %vm13882_vm12, %v12328_v23, %v4401_v16  ;;  %v5103_v23 = vrot.slane %v5102_v14, 4 }
 0x267   : > { %v3265_v17 = vpop.f32.mrf.mxu2  ;;  %v15326_v26 = vadd.f32 %v4267_v27, %v3720_v50  ;;  %v4405_v27 = vsel %vm13882_vm12, %v4403_v29, %v4404_v18  ;;  %v4508_v16 = vunpack.c.l.b16 %v4402_v0  ;;  %v15348_v29 = vld [vmem:[%s13563_s27 + $0x34] sm:$0xf]  ;;  %v12539_v18 = vld [vmem:[%s13563_s27 + $0x24] sm:$0xe] }
 0x268   : > { %v3323_v2 = vadd.f32 %v3265_v17, %v2669_v5  ;;  %v4509_v30 = vunpack.c.l.b16 %v4405_v27  ;;  %v12313_v27 = vld [vmem:[%s13563_s27 + $0x24] sm:$0xc]  ;;  %v12555_v11 = vrot.slane %v12539_v18, 9  ;;  %v15376_v18 = vld [vmem:[%s13563_s27 + $0x38] sm:$0x1] }
 0x26a   : > { %v4539_v19 = vpack.c.b16 %v4509_v30, %v4508_v16  ;;  %v12329_v16 = vrot.slane %v12313_v27, 10 }
 0x26b   : > { %v4269_v4 = vpop.f32.mrf.mxu0  ;;  %v2616_v5 = vpop.f32.mrf.mxu1 }
 0x26c   : > { %v3663_v43 = vpop.f32.mrf.mxu3  ;;  %12457 = vmatmul.msk.bf16.vlgmr.msrb.gmra.mxu2 %vm658_vm4, %v13322_v25  ;;  %v2671_v52 = vadd.f32 %v2616_v5, %v14669_v33  ;;  %v5107_v33 = vrot.slane %v5105_v12, 5  ;;  %v5110_v25 = vshrl.u32 %v12479_v49, 16 }
 0x26d   : > { %v3721_v45 = vadd.f32 %v3663_v43, %v3323_v2  ;;  %v5740_v2 = vrot.slane %v15304_v24, 5  ;;  %v18774_v43 = vshll.u32 %v15348_v29, 16 }
 0x26e   : > { %v5112_v14 = vrot.slane %v5110_v25, 4 }
 0x26f   : > { %v3268_v50 = vpop.f32.mrf.mxu2  ;;  %v15352_v60 = vadd.f32 %v4269_v4, %v3721_v45  ;;  %v5743_v4 = vrot.slane %v15335_v1, 5  ;;  %v5098_v45 = vsel %vm13590_vm3, %v5093_v51, %v15330_v41  ;;  %v5742_v42 = vrot.slane %v5740_v2, 4 }
 0x270   : > { %v3324_v17 = vadd.f32 %v3268_v50, %v2670_v37  ;;  %v4408_v37 = vrot.slane %v13409_v10, 6  ;;  %v13410_v50 = vld [vmem:[%s13563_s27 + $0x2c] sm:$0x3]  ;;  %v5115_v1 = vrot.slane %v5113_v32, 5  ;;  %v5741_v25 = vsel %vm13839_vm8, %v12555_v11, %v5740_v2 }
 0x271   : > { %12522 = vmatmul.msk.bf16.vlgmr.msrb.gmra.mxu3 %vm658_vm4, %v5479_v38  ;;  %v18777_v38 = vshrl.u32 %v15348_v29, 16  ;;  %v4411_v49 = vrot.slane %v13410_v50, 6  ;;  %v5129_v2 = vshll.u32 %v15376_v18, 16 }
 0x272   : > { %v4410_v30 = vrot.slane %v4408_v37, 4  ;;  %v4409_v32 = vsel %vm13882_vm12, %v12329_v16, %v4408_v37 }
 0x273   : > { %v4272_v39 = vpop.f32.mrf.mxu0  ;;  %v2619_v44 = vpop.f32.mrf.mxu1  ;;  %v5125_v41 = vrot.slane %v18777_v38, 4  ;;  %v4510_v37 = vunpack.c.l.b16 %v4409_v32 }
 0x274   : > { %v3666_v5 = vpop.f32.mrf.mxu3  ;;  %v2672_v0 = vadd.f32 %v2619_v44, %v14688_v57  ;;  %v5108_v57 = vsel %vm13590_vm3, %v5103_v23, %v5107_v33  ;;  %v5449_v23 = vunpack.c.l.b16 %v5098_v45 }
 0x275   : > { %v3722_v13 = vadd.f32 %v3666_v5, %v3324_v17  ;;  %v5450_v33 = vunpack.c.l.b16 %v5108_v57  ;;  %v4412_v5 = vsel %vm13882_vm12, %v4410_v30, %v4411_v49 }
 0x276   : > { %12571 = vmatmul.msk.bf16.vlgmr.msrb.gmra.mxu0 %vm658_vm4, %v5877_v34  ;;  %12345 = vmatmul.msk.bf16.gmra.mxu1 %vm658_vm4, %v4539_v19  ;;  %v13323_v34 = vld [vmem:[%s13563_s27 + $0x24] sm:$0xff]  ;;  %v5121_v19 = vrot.slane %v18774_v43, 5  ;;  %v4511_v16 = vunpack.c.l.b16 %v4412_v5 }
 0x277   : > { %v3270_v12 = vpop.f32.mrf.mxu2  ;;  %v15373_v51 = vadd.f32 %v4272_v39, %v3722_v13  ;;  %v5116_v39 = vor.u32 %v5115_v1, %v5112_v14  ;;  %v18934_v13 = vld [vmem:[#allocation14_spill] sm:$0xff]  ;;  %v5131_v1 = vrot.slane %v5129_v2, 5  ;;  %v18935_v2 = vld [vmem:[#allocation8_spill] sm:$0xff] }
 0x278   : > { %v3325_v17 = vadd.f32 %v3270_v12, %v2671_v52  ;;  %v5744_v52 = vsel %vm13839_vm8, %v5742_v42, %v5743_v4  ;;  %v5126_v57 = vor.u32 %v5125_v41, %v5121_v19  ;;  %v5480_v4 = vpack.c.b16 %v5450_v33, %v5449_v23  ;;  %v12482_v41 = vld [vmem:[%s13563_s27 + $0x3c] sm:$0xf]  ;;  %v15394_v33 = vld [vmem:[%s13563_s27 + $0x40] sm:$0xf] }
 0x279   : > { %v5847_v42 = vunpack.c.l.b16 %v5741_v25  ;;  %v5848_v12 = vunpack.c.l.b16 %v5744_v52  ;;  %v5117_v30 = vrot.slane %v5116_v39, 4  ;;  %v4540_v23 = vpack.c.b16 %v4511_v16, %v4510_v37 }
 0x27a   : > { %v5127_v49 = vrot.slane %v5126_v57, 4  ;;  %v5750_v39 = vrot.slane %v15376_v18, 5  ;;  %v5137_v16 = vshll.u32 %v12482_v41, 16 }
 0x27b   : > { %v4274_v44 = vpop.f32.mrf.mxu0  ;;  %v2621_v10 = vpop.f32.mrf.mxu1 }
 0x27c   : > { %v3668_v27 = vpop.f32.mrf.mxu3  ;;  %12458 = vmatmul.msk.bf16.gmra.mxu2 %vm658_vm4, %v13323_v34  ;;  %v2673_v45 = vadd.f32 %v2621_v10, %v18934_v13  ;;  %v12540_v34 = vld [vmem:[%s13563_s27 + $0x30] sm:$0xe]  ;;  %v5747_v10 = vrot.slane %v15348_v29, 5 }
 0x27d   : > { %v3723_v11 = vadd.f32 %v3668_v27, %v3325_v17  ;;  %v5878_v17 = vpack.c.b16 %v5848_v12, %v5847_v42  ;;  %v12556_v5 = vrot.slane %v12540_v34, 9  ;;  %v13411_v27 = vld [vmem:[%s13563_s27 + $0x34] sm:$0xf]  ;;  %v5132_v42 = vsel %vm13590_vm3, %v5127_v49, %v5131_v1 }
 0x27e   : > { %v4415_v13 = vrot.slane %v13411_v27, 6  ;;  %v5749_v12 = vrot.slane %v5747_v10, 4 }
 0x27f   : > { %v3273_v50 = vpop.f32.mrf.mxu2  ;;  %v15396_v25 = vadd.f32 %v4274_v44, %v3723_v11  ;;  %v12314_v44 = vld [vmem:[%s13563_s27 + $0x30] sm:$0xc]  ;;  %v5134_v11 = vshrl.u32 %v12482_v41, 16  ;;  %v5748_v49 = vsel %vm13839_vm8, %v12556_v5, %v5747_v10  ;;  %v15425_v5 = vld [vmem:[%s13563_s27 + $0x44] sm:$0x1] }
 0x280   : > { %v3326_v14 = vadd.f32 %v3273_v50, %v2672_v0  ;;  %v5122_v0 = vsel %vm13590_vm3, %v5117_v30, %v5121_v19  ;;  %v18775_v19 = vshll.u32 %v15394_v33, 16  ;;  %v18776_v50 = vshrl.u32 %v15394_v33, 16  ;;  %v13324_v41 = vld [vmem:[%s13563_s27 + $0x30] sm:$0xff] }
 0x281   : > { %12523 = vmatmul.msk.bf16.gmra.mxu3 %vm658_vm4, %v5480_v4  ;;  %v5451_v18 = vunpack.c.l.b16 %v5122_v0  ;;  %v12330_v1 = vrot.slane %v12314_v44, 10  ;;  %v4417_v34 = vrot.slane %v4415_v13, 4 }
 0x282   : > { %v15420_v0 = vrot.slane %v18775_v19, 5  ;;  %v5149_v10 = vrot.slane %v18776_v50, 4  ;;  %v5153_v50 = vshll.u32 %v15425_v5, 16 }
 0x283   : > { %v4277_v52 = vpop.f32.mrf.mxu0  ;;  %v2624_v32 = vpop.f32.mrf.mxu1 }
 0x284   : > { %v3671_v57 = vpop.f32.mrf.mxu3  ;;  %v2674_v4 = vadd.f32 %v2624_v32, %v18935_v2  ;;  %v13412_v32 = vld [vmem:[%s13563_s27 + $0x38] sm:$0x3]  ;;  %v5751_v2 = vsel %vm13839_vm8, %v5749_v12, %v5750_v39  ;;  %v5150_v19 = vor.u32 %v5149_v10, %v15420_v0 }
 0x285   : > { %v3724_v37 = vadd.f32 %v3671_v57, %v3326_v14  ;;  %v4418_v27 = vrot.slane %v13412_v32, 6  ;;  %v5452_v57 = vunpack.c.l.b16 %v5132_v42  ;;  %v4416_v42 = vsel %vm13882_vm12, %v12330_v1, %v4415_v13 }
 0x286   : > { %12572 = vmatmul.msk.bf16.gmra.mxu0 %vm658_vm4, %v5878_v17  ;;  %12346 = vmatmul.msk.bf16.gmra.mxu1 %vm658_vm4, %v4540_v23  ;;  %v5136_v17 = vrot.slane %v5134_v11, 4  ;;  %v5139_v23 = vrot.slane %v5137_v16, 5  ;;  %v5849_v11 = vunpack.c.l.b16 %v5748_v49  ;;  %v4512_v13 = vunpack.c.l.b16 %v4416_v42 }
 0x287   : > { %v3275_v30 = vpop.f32.mrf.mxu2  ;;  %v15416_v43 = vadd.f32 %v4277_v52, %v3724_v37  ;;  %v4419_v52 = vsel %vm13882_vm12, %v4417_v34, %v4418_v27  ;;  %v5481_v12 = vpack.c.b16 %v5452_v57, %v5451_v18  ;;  %v5850_v37 = vunpack.c.l.b16 %v5751_v2  ;;  %v12485_v34 = vld [vmem:[%s13563_s27 + $0x48] sm:$0xf]  ;;  %v12541_v2 = vld [vmem:[%s13563_s27 + $0x3c] sm:$0xe] }
 0x288   : > { %v3327_v14 = vadd.f32 %v3275_v30, %v2673_v45  ;;  %v5140_v32 = vor.u32 %v5139_v23, %v5136_v17  ;;  %v4513_v1 = vunpack.c.l.b16 %v4419_v52  ;;  %v5754_v17 = vrot.slane %v15394_v33, 5  ;;  %v13413_v52 = vld [vmem:[%s13563_s27 + $0x40] sm:$0xf] }
 0x289   : > { %v5879_v18 = vpack.c.b16 %v5850_v37, %v5849_v11  ;;  %v5158_v23 = vshrl.u32 %v12485_v34, 16 }
 0x28a   : > { %v5141_v49 = vrot.slane %v5140_v32, 4  ;;  %v4541_v57 = vpack.c.b16 %v4513_v1, %v4512_v13  ;;  %v12557_v32 = vrot.slane %v12541_v2, 9  ;;  %v5756_v13 = vrot.slane %v5754_v17, 4  ;;  %v13414_v2 = vld [vmem:[%s13563_s27 + $0x44] sm:$0x3] }
 0x28b   : > { %v4279_v44 = vpop.f32.mrf.mxu0  ;;  %v2626_v45 = vpop.f32.mrf.mxu1  ;;  %v5160_v1 = vrot.slane %v5158_v23, 4 }
 0x28c   : > { %v3673_v39 = vpop.f32.mrf.mxu3  ;;  %12459 = vmatmul.msk.bf16.gmra.mxu2 %vm658_vm4, %v13324_v41  ;;  %v2675_v16 = vadd.f32 %v2626_v45, %v14764_v9  ;;  %v5151_v41 = vrot.slane %v5150_v19, 4  ;;  %v5155_v9 = vrot.slane %v5153_v50, 5  ;;  %v12315_v19 = vld [vmem:[%s13563_s27 + $0x3c] sm:$0xc]  ;;  %v5755_v23 = vsel %vm13839_vm8, %v12557_v32, %v5754_v17 }
 0x28d   : > { %v3725_v30 = vadd.f32 %v3673_v39, %v3327_v14  ;;  %v15438_v14 = vld [vmem:[%s13563_s27 + $0x4c] sm:$0xf]  ;;  %v5177_v17 = vshll.u32 %v15466_v40, 16 }
 0x28e   : > { %v18779_v50 = vshll.u32 %v15438_v14, 16  ;;  %v18780_v11 = vshrl.u32 %v15438_v14, 16 }
 0x28f   : > { %v3278_v38 = vpop.f32.mrf.mxu2  ;;  %v15442_v10 = vadd.f32 %v4279_v44, %v3725_v30  ;;  %v5757_v44 = vrot.slane %v15425_v5, 5  ;;  %v5146_v30 = vsel %vm13590_vm3, %v5141_v49, %v15420_v0 }
 0x290   : > { %v3328_v27 = vadd.f32 %v3278_v38, %v2674_v4  ;;  %v4422_v38 = vrot.slane %v13413_v52, 6  ;;  %v5161_v4 = vshll.u32 %v12485_v34, 16  ;;  %v4425_v52 = vrot.slane %v13414_v2, 6 }
 0x291   : > { %12524 = vmatmul.msk.bf16.gmra.mxu3 %vm658_vm4, %v5481_v12  ;;  %v5173_v0 = vrot.slane %v18780_v11, 4 }
 0x292   : > { %v5163_v5 = vrot.slane %v5161_v4, 5 }
 0x293   : > { %v4282_v45 = vpop.f32.mrf.mxu0  ;;  %v2629_v42 = vpop.f32.mrf.mxu1 }
 0x294   : > { %v3676_v39 = vpop.f32.mrf.mxu3  ;;  %v2676_v12 = vadd.f32 %v2629_v42, %v14782_v3  ;;  %v5156_v3 = vsel %vm13590_vm3, %v5151_v41, %v5155_v9  ;;  %v4424_v42 = vrot.slane %v4422_v38, 4  ;;  %v5453_v41 = vunpack.c.l.b16 %v5146_v30  ;;  %v18936_v30 = vld [vmem:[#allocation10_spill] sm:$0xff] }
 0x295   : > { %v3726_v37 = vadd.f32 %v3676_v39, %v3328_v27  ;;  %v12331_v27 = vrot.slane %v12315_v19, 10  ;;  %v5454_v9 = vunpack.c.l.b16 %v5156_v3 }
 0x296   : > { %12573 = vmatmul.msk.bf16.gmra.mxu0 %vm658_vm4, %v5879_v18  ;;  %12347 = vmatmul.msk.bf16.gmra.mxu1 %vm658_vm4, %v4541_v57  ;;  %v13325_v18 = vld [vmem:[%s13563_s27 + $0x3c] sm:$0xff]  ;;  %v5169_v57 = vrot.slane %v18779_v50, 5  ;;  %v4426_v2 = vsel %vm13882_vm12, %v4424_v42, %v4425_v52 }
 0x297   : > { %v3280_v34 = vpop.f32.mrf.mxu2  ;;  %v15463_v49 = vadd.f32 %v4282_v45, %v3726_v37  ;;  %v5164_v45 = vor.u32 %v5163_v5, %v5160_v1  ;;  %v5179_v5 = vrot.slane %v5177_v17, 5 }
 0x298   : > { %v3329_v39 = vadd.f32 %v3280_v34, %v2675_v16  ;;  %v5758_v16 = vsel %vm13839_vm8, %v5756_v13, %v5757_v44  ;;  %v4423_v34 = vsel %vm13882_vm12, %v12331_v27, %v4422_v38  ;;  %v5174_v50 = vor.u32 %v5173_v0, %v5169_v57  ;;  %v12488_v0 = vld [vmem:[%s13563_s27 + $0x54] sm:$0xf] }
 0x299   : > { %v5482_v44 = vpack.c.b16 %v5454_v9, %v5453_v41  ;;  %v5851_v13 = vunpack.c.l.b16 %v5755_v23  ;;  %v5852_v11 = vunpack.c.l.b16 %v5758_v16  ;;  %v4514_v38 = vunpack.c.l.b16 %v4423_v34  ;;  %v15484_v9 = vld [vmem:[%s13563_s27 + $0x58] sm:$0xf] }
 0x29a   : > { %v4515_v27 = vunpack.c.l.b16 %v4426_v2  ;;  %v5165_v42 = vrot.slane %v5164_v45, 4  ;;  %v5175_v52 = vrot.slane %v5174_v50, 4  ;;  %18937 = vst [vmem:[#allocation11_spill] sm:$0xff] %v15484_v9  ;;  %v5764_v50 = vrot.slane %v15466_v40, 5  ;;  %v13415_v2 = vld [vmem:[%s13563_s27 + $0x4c] sm:$0xf] }
 0x29b   : > { %v4284_v19 = vpop.f32.mrf.mxu0  ;;  %v2631_v4 = vpop.f32.mrf.mxu1  ;;  %v4429_v45 = vrot.slane %v13415_v2, 6 }
 0x29c   : > { %v3678_v37 = vpop.f32.mrf.mxu3  ;;  %12460 = vmatmul.msk.bf16.gmra.mxu2 %vm658_vm4, %v13325_v18  ;;  %v2677_v3 = vadd.f32 %v2631_v4, %v18936_v30  ;;  %v12542_v18 = vld [vmem:[%s13563_s27 + $0x48] sm:$0xe]  ;;  %v5761_v4 = vrot.slane %v15438_v14, 5  ;;  %v4542_v41 = vpack.c.b16 %v4515_v27, %v4514_v38  ;;  %v18938_v30 = vld [vmem:[#allocation12_spill] sm:$0xff]  ;;  %v5185_v38 = vshll.u32 %v12488_v0, 16 }
 0x29d   : > { %v3727_v32 = vadd.f32 %v3678_v37, %v3329_v39  ;;  %v5880_v39 = vpack.c.b16 %v5852_v11, %v5851_v13  ;;  %v5180_v11 = vsel %vm13590_vm3, %v5175_v52, %v5179_v5  ;;  %v18784_v27 = vshrl.u32 %v15484_v9, 16 }
 0x29f   : > { %v3283_v62 = vpop.f32.mrf.mxu2  ;;  %v15486_v23 = vadd.f32 %v4284_v19, %v3727_v32  ;;  %v12316_v19 = vld [vmem:[%s13563_s27 + $0x48] sm:$0xc]  ;;  %v5182_v32 = vshrl.u32 %v12488_v0, 16 }
 0x2a0   : > { %v3330_v1 = vadd.f32 %v3283_v62, %v2676_v12  ;;  %v5170_v62 = vsel %vm13590_vm3, %v5165_v42, %v5169_v57  ;;  %v12558_v12 = vrot.slane %v12542_v18, 9  ;;  %v18783_v57 = vshll.u32 %v15484_v9, 16  ;;  %v13326_v0 = vld [vmem:[%s13563_s27 + $0x48] sm:$0xff] }
 0x2a1   : > { %12525 = vmatmul.msk.bf16.gmra.mxu3 %vm658_vm4, %v5482_v44  ;;  %v5763_v44 = vrot.slane %v5761_v4, 4  ;;  %v5455_v40 = vunpack.c.l.b16 %v5170_v62  ;;  %v12332_v5 = vrot.slane %v12316_v19, 10  ;;  %v4431_v18 = vrot.slane %v4429_v45, 4 }
 0x2a2   : > { %v5762_v52 = vsel %vm13839_vm8, %v12558_v12, %v5761_v4  ;;  %v15510_v62 = vrot.slane %v18783_v57, 5  ;;  %v5197_v4 = vrot.slane %v18784_v27, 4  ;;  %v15515_v12 = vld [vmem:[%s13563_s27 + $0x5c] sm:$0x1] }
 0x2a3   : > { %v4287_v16 = vpop.f32.mrf.mxu0  ;;  %v2634_v34 = vpop.f32.mrf.mxu1  ;;  %v5201_v27 = vshll.u32 %v15515_v12, 16 }
 0x2a4   : > { %v3681_v37 = vpop.f32.mrf.mxu3  ;;  %v2678_v17 = vadd.f32 %v2634_v34, %v18938_v30  ;;  %v13416_v34 = vld [vmem:[%s13563_s27 + $0x50] sm:$0x3]  ;;  %v5765_v30 = vsel %vm13839_vm8, %v5763_v44, %v5764_v50  ;;  %v5198_v57 = vor.u32 %v5197_v4, %v15510_v62 }
 0x2a5   : > { %v3728_v13 = vadd.f32 %v3681_v37, %v3330_v1  ;;  %v4432_v2 = vrot.slane %v13416_v34, 6  ;;  %v5456_v37 = vunpack.c.l.b16 %v5180_v11  ;;  %v4430_v11 = vsel %vm13882_vm12, %v12332_v5, %v4429_v45 }
 0x2a6   : > { %12574 = vmatmul.msk.bf16.gmra.mxu0 %vm658_vm4, %v5880_v39  ;;  %12348 = vmatmul.msk.bf16.gmra.mxu1 %vm658_vm4, %v4542_v41  ;;  %v5184_v39 = vrot.slane %v5182_v32, 4  ;;  %v5187_v41 = vrot.slane %v5185_v38, 5  ;;  %v5853_v32 = vunpack.c.l.b16 %v5762_v52  ;;  %v4516_v45 = vunpack.c.l.b16 %v4430_v11 }
 0x2a7   : > { %v3285_v42 = vpop.f32.mrf.mxu2  ;;  %v15506_v35 = vadd.f32 %v4287_v16, %v3728_v13  ;;  %v4433_v16 = vsel %vm13882_vm12, %v4431_v18, %v4432_v2  ;;  %v5483_v44 = vpack.c.b16 %v5456_v37, %v5455_v40  ;;  %v5854_v13 = vunpack.c.l.b16 %v5765_v30  ;;  %v12491_v18 = vld [vmem:[%s13563_s27 + $0x60] sm:$0xf]  ;;  %v12543_v30 = vld [vmem:[%s13563_s27 + $0x54] sm:$0xe] }
 0x2a8   : > { %v3331_v1 = vadd.f32 %v3285_v42, %v2677_v3  ;;  %v5188_v34 = vor.u32 %v5187_v41, %v5184_v39  ;;  %v4517_v5 = vunpack.c.l.b16 %v4433_v16  ;;  %v5768_v39 = vrot.slane %v15484_v9, 5  ;;  %v13417_v16 = vld [vmem:[%s13563_s27 + $0x58] sm:$0xf]  ;;  %v15556_v9 = vld [vmem:[%s13563_s27 + $0x68] sm:$0x1] }
 0x2a9   : > { %v5881_v40 = vpack.c.b16 %v5854_v13, %v5853_v32  ;;  %v5206_v41 = vshrl.u32 %v12491_v18, 16 }
 0x2aa   : > { %v5189_v52 = vrot.slane %v5188_v34, 4  ;;  %v4543_v37 = vpack.c.b16 %v4517_v5, %v4516_v45  ;;  %v12559_v45 = vrot.slane %v12543_v30, 9  ;;  %v13418_v30 = vld [vmem:[%s13563_s27 + $0x5c] sm:$0x3] }
 0x2ab   : > { %v4289_v19 = vpop.f32.mrf.mxu0  ;;  %v2636_v3 = vpop.f32.mrf.mxu1 }
 0x2ac   : > { %v3683_v50 = vpop.f32.mrf.mxu3  ;;  %12461 = vmatmul.msk.bf16.gmra.mxu2 %vm658_vm4, %v13326_v0  ;;  %v2679_v38 = vadd.f32 %v2636_v3, %v14848_v15  ;;  %v5199_v0 = vrot.slane %v5198_v57, 4  ;;  %v5203_v15 = vrot.slane %v5201_v27, 5  ;;  %v12317_v57 = vld [vmem:[%s13563_s27 + $0x54] sm:$0xc] }
 0x2ad   : > { %v3729_v42 = vadd.f32 %v3683_v50, %v3331_v1  ;;  %v15528_v1 = vld [vmem:[%s13563_s27 + $0x64] sm:$0xf] }
 0x2ae   : > { %18939 = vst [vmem:[#allocation13_spill] sm:$0xff] %v15528_v1  ;;  %v18788_v27 = vshll.u32 %v15528_v1, 16  ;;  %v5204_v5 = vsel %vm13590_vm3, %v5199_v0, %v5203_v15 }
 0x2af   : > { %v3288_v59 = vpop.f32.mrf.mxu2  ;;  %v15532_v4 = vadd.f32 %v4289_v19, %v3729_v42  ;;  %v5771_v19 = vrot.slane %v15515_v12, 5  ;;  %v5194_v42 = vsel %vm13590_vm3, %v5189_v52, %v15510_v62  ;;  %v5458_v15 = vunpack.c.l.b16 %v5204_v5 }
 0x2b0   : > { %v3332_v2 = vadd.f32 %v3288_v59, %v2678_v17  ;;  %v4436_v59 = vrot.slane %v13417_v16, 6  ;;  %v5209_v17 = vshll.u32 %v12491_v18, 16  ;;  %v5770_v18 = vrot.slane %v5768_v39, 4 }
 0x2b1   : > { %12526 = vmatmul.msk.bf16.gmra.mxu3 %vm658_vm4, %v5483_v44  ;;  %18940 = vst [vmem:[#allocation14_spill] sm:$0xff] %v15532_v4  ;;  %v18941_v44 = vld [vmem:[#allocation3_spill] sm:$0xff]  ;;  %v18942_v4 = vshrl.u32 %v15528_v1, 16  ;;  %v5457_v0 = vunpack.c.l.b16 %v5194_v42  ;;  %v18944_v42 = vld [vmem:[#allocation4_spill] sm:$0xff] }
 0x2b2   : > { %v5211_v12 = vrot.slane %v5209_v17, 5 }
 0x2b3   : > { %v4292_v3 = vpop.f32.mrf.mxu0  ;;  %v2639_v11 = vpop.f32.mrf.mxu1  ;;  %v5221_v62 = vrot.slane %v18942_v4, 4 }
 0x2b4   : > { %v3686_v50 = vpop.f32.mrf.mxu3  ;;  %v2680_v32 = vadd.f32 %v2639_v11, %v18941_v44  ;;  %v5208_v11 = vrot.slane %v5206_v41, 4  ;;  %v4439_v44 = vrot.slane %v13418_v30, 6  ;;  %v5769_v41 = vsel %vm13839_vm8, %v12559_v45, %v5768_v39 }
 0x2b5   : > { %v3730_v34 = vadd.f32 %v3686_v50, %v3332_v2  ;;  %v12333_v2 = vrot.slane %v12317_v57, 10  ;;  %v4438_v50 = vrot.slane %v4436_v59, 4  ;;  %v5225_v39 = vshll.u32 %v15556_v9, 16 }
 0x2b6   : > { %12575 = vmatmul.msk.bf16.gmra.mxu0 %vm658_vm4, %v5881_v40  ;;  %12349 = vmatmul.msk.bf16.gmra.mxu1 %vm658_vm4, %v4543_v37  ;;  %v13327_v40 = vld [vmem:[%s13563_s27 + $0x54] sm:$0xff]  ;;  %v5217_v37 = vrot.slane %v18788_v27, 5 }
 0x2b7   : > { %v3290_v16 = vpop.f32.mrf.mxu2  ;;  %v15553_v52 = vadd.f32 %v4292_v3, %v3730_v34  ;;  %v4440_v4 = vsel %vm13882_vm12, %v4438_v50, %v4439_v44  ;;  %v5212_v3 = vor.u32 %v5211_v12, %v5208_v11  ;;  %v5227_v12 = vrot.slane %v5225_v39, 5 }
 0x2b8   : > { %v3333_v13 = vadd.f32 %v3290_v16, %v2679_v38  ;;  %v5772_v38 = vsel %vm13839_vm8, %v5770_v18, %v5771_v19  ;;  %v4437_v16 = vsel %vm13882_vm12, %v12333_v2, %v4436_v59  ;;  %v5222_v30 = vor.u32 %v5221_v62, %v5217_v37  ;;  %v12494_v62 = vld [vmem:[%s13563_s27 + $0x6c] sm:$0xf] }
 0x2b9   : > { %18943 = vst [vmem:[#allocation8_spill] sm:$0xff] %v15553_v52  ;;  %v5484_v19 = vpack.c.b16 %v5458_v15, %v5457_v0  ;;  %v5855_v18 = vunpack.c.l.b16 %v5769_v41  ;;  %v5856_v27 = vunpack.c.l.b16 %v5772_v38  ;;  %v4518_v59 = vunpack.c.l.b16 %v4437_v16  ;;  %v15574_v15 = vld [vmem:[%s13563_s27 + $0x70] sm:$0xf] }
 0x2ba   : > { %v4519_v2 = vunpack.c.l.b16 %v4440_v4  ;;  %v5213_v50 = vrot.slane %v5212_v3, 4  ;;  %v5223_v44 = vrot.slane %v5222_v30, 4  ;;  %18945 = vst [vmem:[#allocation10_spill] sm:$0xff] %v15574_v15  ;;  %v5778_v4 = vrot.slane %v15556_v9, 5  ;;  %v13419_v3 = vld [vmem:[%s13563_s27 + $0x64] sm:$0xf] }
 0x2bb   : > { %v4294_v57 = vpop.f32.mrf.mxu0  ;;  %v2641_v17 = vpop.f32.mrf.mxu1  ;;  %v18946_v30 = vld [vmem:[#allocation5_spill] sm:$0xff] }
 0x2bc   : > { %v3688_v34 = vpop.f32.mrf.mxu3  ;;  %12462 = vmatmul.msk.bf16.gmra.mxu2 %vm658_vm4, %v13327_v40  ;;  %v2681_v5 = vadd.f32 %v2641_v17, %v18944_v42  ;;  %v12544_v40 = vld [vmem:[%s13563_s27 + $0x60] sm:$0xe]  ;;  %v5775_v17 = vrot.slane %v15528_v1, 5  ;;  %v4544_v0 = vpack.c.b16 %v4519_v2, %v4518_v59  ;;  %v5233_v59 = vshll.u32 %v12494_v62, 16 }
 0x2bd   : > { %v3731_v45 = vadd.f32 %v3688_v34, %v3333_v13  ;;  %v5882_v13 = vpack.c.b16 %v5856_v27, %v5855_v18  ;;  %v4443_v34 = vrot.slane %v13419_v3, 6  ;;  %v5228_v27 = vsel %vm13590_vm3, %v5223_v44, %v5227_v12 }
 0x2bf   : > { %v3293_v52 = vpop.f32.mrf.mxu2  ;;  %v15576_v41 = vadd.f32 %v4294_v57, %v3731_v45  ;;  %v12318_v57 = vld [vmem:[%s13563_s27 + $0x60] sm:$0xc]  ;;  %v5230_v45 = vshrl.u32 %v12494_v62, 16 }
 0x2c0   : > { %v3334_v11 = vadd.f32 %v3293_v52, %v2680_v32  ;;  %v5218_v32 = vsel %vm13590_vm3, %v5213_v50, %v5217_v37  ;;  %v12560_v52 = vrot.slane %v12544_v40, 9  ;;  %v18789_v37 = vshll.u32 %v15574_v15, 16  ;;  %v13328_v62 = vld [vmem:[%s13563_s27 + $0x60] sm:$0xff] }
 0x2c1   : > { %12527 = vmatmul.msk.bf16.gmra.mxu3 %vm658_vm4, %v5484_v19  ;;  %v5777_v19 = vrot.slane %v5775_v17, 4  ;;  %v5459_v9 = vunpack.c.l.b16 %v5218_v32  ;;  %v12334_v12 = vrot.slane %v12318_v57, 10  ;;  %v4445_v40 = vrot.slane %v4443_v34, 4  ;;  %v15605_v57 = vld [vmem:[%s13563_s27 + $0x74] sm:$0x1] }
 0x2c2   : > { %v5776_v44 = vsel %vm13839_vm8, %v12560_v52, %v5775_v17  ;;  %v15600_v32 = vrot.slane %v18789_v37, 5  ;;  %v18948_v17 = vshrl.u32 %v15574_v15, 16 }
 0x2c3   : > { %v4297_v38 = vpop.f32.mrf.mxu0  ;;  %v2644_v16 = vpop.f32.mrf.mxu1 }
 0x2c4   : > { %v3691_v42 = vpop.f32.mrf.mxu3  ;;  %v2682_v39 = vadd.f32 %v2644_v16, %v18946_v30  ;;  %v13420_v16 = vld [vmem:[%s13563_s27 + $0x68] sm:$0x3]  ;;  %v5779_v30 = vsel %vm13839_vm8, %v5777_v19, %v5778_v4  ;;  %v5245_v52 = vrot.slane %v18948_v17, 4 }
 0x2c5   : > { %v3732_v18 = vadd.f32 %v3691_v42, %v3334_v11  ;;  %v4446_v3 = vrot.slane %v13420_v16, 6  ;;  %v5460_v42 = vunpack.c.l.b16 %v5228_v27  ;;  %v4444_v27 = vsel %vm13882_vm12, %v12334_v12, %v4443_v34 }
 0x2c6   : > { %12576 = vmatmul.msk.bf16.gmra.mxu0 %vm658_vm4, %v5882_v13  ;;  %12350 = vmatmul.msk.bf16.gmra.mxu1 %vm658_vm4, %v4544_v0  ;;  %v5232_v13 = vrot.slane %v5230_v45, 4  ;;  %v5235_v0 = vrot.slane %v5233_v59, 5  ;;  %v5857_v45 = vunpack.c.l.b16 %v5776_v44  ;;  %v5246_v37 = vor.u32 %v5245_v52, %v15600_v32 }
 0x2c7   : > { %v3295_v50 = vpop.f32.mrf.mxu2  ;;  %v15596_v2 = vadd.f32 %v4297_v38, %v3732_v18  ;;  %v4447_v38 = vsel %vm13882_vm12, %v4445_v40, %v4446_v3  ;;  %v5485_v19 = vpack.c.b16 %v5460_v42, %v5459_v9  ;;  %v5858_v18 = vunpack.c.l.b16 %v5779_v30  ;;  %v12497_v40 = vld [vmem:[%s13563_s27 + $0x78] sm:$0xf]  ;;  %v12545_v30 = vld [vmem:[%s13563_s27 + $0x6c] sm:$0xe] }
 0x2c8   : > { %v3335_v11 = vadd.f32 %v3295_v50, %v2681_v5  ;;  %v5236_v17 = vor.u32 %v5235_v0, %v5232_v13  ;;  %v4520_v34 = vunpack.c.l.b16 %v4444_v27  ;;  %v4521_v12 = vunpack.c.l.b16 %v4447_v38  ;;  %v13421_v38 = vld [vmem:[%s13563_s27 + $0x70] sm:$0xf] }
 0x2c9   : > { %18947 = vst [vmem:[#allocation12_spill] sm:$0xff] %v15596_v2  ;;  %v5249_v2 = vshll.u32 %v15605_v57, 16  ;;  %v5883_v9 = vpack.c.b16 %v5858_v18, %v5857_v45  ;;  %v5782_v13 = vrot.slane %v15574_v15, 5  ;;  %v5254_v0 = vshrl.u32 %v12497_v40, 16 }
 0x2ca   : > { %v5237_v44 = vrot.slane %v5236_v17, 4  ;;  %v4545_v42 = vpack.c.b16 %v4521_v12, %v4520_v34  ;;  %v12561_v34 = vrot.slane %v12545_v30, 9  ;;  %v13422_v30 = vld [vmem:[%s13563_s27 + $0x74] sm:$0x3] }
 0x2cb   : > { %v4299_v16 = vpop.f32.mrf.mxu0  ;;  %v2646_v5 = vpop.f32.mrf.mxu1 }
 0x2cc   : > { %v3693_v4 = vpop.f32.mrf.mxu3  ;;  %12463 = vmatmul.msk.bf16.gmra.mxu2 %vm658_vm4, %v13328_v62  ;;  %v2683_v59 = vadd.f32 %v2646_v5, %v14947_v61  ;;  %v5247_v62 = vrot.slane %v5246_v37, 4  ;;  %v5251_v61 = vrot.slane %v5249_v2, 5  ;;  %v12319_v37 = vld [vmem:[%s13563_s27 + $0x6c] sm:$0xc] }
 0x2cd   : > { %v3733_v50 = vadd.f32 %v3693_v4, %v3335_v11  ;;  %v15618_v11 = vld [vmem:[%s13563_s27 + $0x7c] sm:$0xf] }
 0x2ce   : > { %v18794_v2 = vshll.u32 %v15618_v11, 16  ;;  %v5252_v12 = vsel %vm13590_vm3, %v5247_v62, %v5251_v61  ;;  %v18951_v15 = vshrl.u32 %v15618_v11, 16 }
 0x2cf   : > { %v3298_v1 = vpop.f32.mrf.mxu2  ;;  %v15622_v52 = vadd.f32 %v4299_v16, %v3733_v50  ;;  %v5785_v16 = vrot.slane %v15605_v57, 5  ;;  %v5242_v50 = vsel %vm13590_vm3, %v5237_v44, %v15600_v32  ;;  %v5462_v61 = vunpack.c.l.b16 %v5252_v12 }
 0x2d0   : > { %v3336_v3 = vadd.f32 %v3298_v1, %v2682_v39  ;;  %v4450_v1 = vrot.slane %v13421_v38, 6  ;;  %v5257_v39 = vshll.u32 %v12497_v40, 16  ;;  %v5784_v40 = vrot.slane %v5782_v13, 4 }
 0x2d1   : > { %12528 = vmatmul.msk.bf16.gmra.mxu3 %vm658_vm4, %v5485_v19  ;;  %18949 = vst [vmem:[#allocation3_spill] sm:$0xff] %v15622_v52  ;;  %v18950_v19 = vld [vmem:[#allocation6_spill] sm:$0xff]  ;;  %v5269_v32 = vrot.slane %v18951_v15, 4  ;;  %v5461_v62 = vunpack.c.l.b16 %v5242_v50  ;;  %v18953_v50 = vld [vmem:[#allocation7_spill] sm:$0xff] }
 0x2d2   : > { %v5259_v57 = vrot.slane %v5257_v39, 5  ;;  %v15646_v52 = vld [vmem:[%s13563_s27 + $0x80] sm:$0x1] }
 0x2d3   : > { %v4302_v5 = vpop.f32.mrf.mxu0  ;;  %v2649_v27 = vpop.f32.mrf.mxu1 }
 0x2d4   : > { %v3696_v4 = vpop.f32.mrf.mxu3  ;;  %v2684_v45 = vadd.f32 %v2649_v27, %v18950_v19  ;;  %v5256_v27 = vrot.slane %v5254_v0, 4  ;;  %v4453_v19 = vrot.slane %v13422_v30, 6  ;;  %v5783_v0 = vsel %vm13839_vm8, %v12561_v34, %v5782_v13 }
 0x2d5   : > { %v3734_v17 = vadd.f32 %v3696_v4, %v3336_v3  ;;  %v12335_v3 = vrot.slane %v12319_v37, 10  ;;  %v4452_v4 = vrot.slane %v4450_v1, 4  ;;  %v5273_v13 = vshll.u32 %v15646_v52, 16 }
 0x2d6   : > { %12577 = vmatmul.msk.bf16.gmra.mxu0 %vm658_vm4, %v5883_v9  ;;  %12351 = vmatmul.msk.bf16.gmra.mxu1 %vm658_vm4, %v4545_v42  ;;  %v13329_v9 = vld [vmem:[%s13563_s27 + $0x6c] sm:$0xff]  ;;  %v5265_v42 = vrot.slane %v18794_v2, 5 }
 0x2d7   : > { %v3300_v38 = vpop.f32.mrf.mxu2  ;;  %v15643_v44 = vadd.f32 %v4302_v5, %v3734_v17  ;;  %v4454_v15 = vsel %vm13882_vm12, %v4452_v4, %v4453_v19  ;;  %v5260_v5 = vor.u32 %v5259_v57, %v5256_v27  ;;  %v5275_v57 = vrot.slane %v5273_v13, 5 }
 0x2d8   : > { %v3337_v18 = vadd.f32 %v3300_v38, %v2683_v59  ;;  %v5786_v59 = vsel %vm13839_vm8, %v5784_v40, %v5785_v16  ;;  %v4451_v38 = vsel %vm13882_vm12, %v12335_v3, %v4450_v1  ;;  %v5270_v30 = vor.u32 %v5269_v32, %v5265_v42  ;;  %v12500_v32 = vld [vmem:[%s13563_s27 + $0x84] sm:$0xf] }
 0x2d9   : > { %18952 = vst [vmem:[#allocation4_spill] sm:$0xff] %v15643_v44  ;;  %v5486_v16 = vpack.c.b16 %v5462_v61, %v5461_v62  ;;  %v5859_v40 = vunpack.c.l.b16 %v5783_v0  ;;  %v5860_v2 = vunpack.c.l.b16 %v5786_v59  ;;  %v4522_v1 = vunpack.c.l.b16 %v4451_v38  ;;  %v15664_v61 = vld [vmem:[%s13563_s27 + $0x88] sm:$0xf] }
 0x2da   : > { %v4523_v3 = vunpack.c.l.b16 %v4454_v15  ;;  %v5261_v4 = vrot.slane %v5260_v5, 4  ;;  %v5271_v19 = vrot.slane %v5270_v30, 4  ;;  %18954 = vst [vmem:[#allocation5_spill] sm:$0xff] %v15664_v61  ;;  %v5792_v15 = vrot.slane %v15646_v52, 5  ;;  %v13423_v5 = vld [vmem:[%s13563_s27 + $0x7c] sm:$0xf] }
 0x2db   : > { %v4304_v37 = vpop.f32.mrf.mxu0  ;;  %v2651_v39 = vpop.f32.mrf.mxu1  ;;  %v18956_v30 = vld [vmem:[#allocation9_spill] sm:$0xff] }
 0x2dc   : > { %v3698_v17 = vpop.f32.mrf.mxu3  ;;  %12464 = vmatmul.msk.bf16.gmra.mxu2 %vm658_vm4, %v13329_v9  ;;  %v2685_v12 = vadd.f32 %v2651_v39, %v18953_v50  ;;  %v12546_v9 = vld [vmem:[%s13563_s27 + $0x78] sm:$0xe]  ;;  %v5789_v39 = vrot.slane %v15618_v11, 5  ;;  %v4546_v62 = vpack.c.b16 %v4523_v3, %v4522_v1  ;;  %v5281_v1 = vshll.u32 %v12500_v32, 16 }
 0x2dd   : > { %v3735_v34 = vadd.f32 %v3698_v17, %v3337_v18  ;;  %v5884_v18 = vpack.c.b16 %v5860_v2, %v5859_v40  ;;  %v4457_v17 = vrot.slane %v13423_v5, 6  ;;  %v5276_v2 = vsel %vm13590_vm3, %v5271_v19, %v5275_v57 }
 0x2df   : > { %v3303_v44 = vpop.f32.mrf.mxu2  ;;  %v15666_v0 = vadd.f32 %v4304_v37, %v3735_v34  ;;  %v12320_v37 = vld [vmem:[%s13563_s27 + $0x78] sm:$0xc]  ;;  %v5278_v34 = vshrl.u32 %v12500_v32, 16 }
 0x2e0   : > { %v3338_v27 = vadd.f32 %v3303_v44, %v2684_v45  ;;  %v5266_v45 = vsel %vm13590_vm3, %v5261_v4, %v5265_v42  ;;  %v12562_v44 = vrot.slane %v12546_v9, 9  ;;  %v18795_v42 = vshll.u32 %v15664_v61, 16  ;;  %v13330_v32 = vld [vmem:[%s13563_s27 + $0x78] sm:$0xff] }
 0x2e1   : > { %12529 = vmatmul.msk.bf16.gmra.mxu3 %vm658_vm4, %v5486_v16  ;;  %18955 = vst [vmem:[#allocation6_spill] sm:$0xff] %v15666_v0  ;;  %v5791_v16 = vrot.slane %v5789_v39, 4  ;;  %v5463_v52 = vunpack.c.l.b16 %v5266_v45  ;;  %v12336_v57 = vrot.slane %v12320_v37, 10  ;;  %v4459_v9 = vrot.slane %v4457_v17, 4  ;;  %v15695_v37 = vld [vmem:[%s13563_s27 + $0x8c] sm:$0x1] }
 0x2e2   : > { %v5790_v19 = vsel %vm13839_vm8, %v12562_v44, %v5789_v39  ;;  %v15690_v45 = vrot.slane %v18795_v42, 5  ;;  %v18958_v39 = vshrl.u32 %v15664_v61, 16 }
 0x2e3   : > { %v4307_v59 = vpop.f32.mrf.mxu0  ;;  %v4614_v38 = vpop.f32.mrf.mxu1 }
 0x2e4   : > { %v3701_v50 = vpop.f32.mrf.mxu3  ;;  %v4694_v13 = vadd.f32 %v4614_v38, %v18956_v30  ;;  %v13424_v38 = vld [vmem:[%s13563_s27 + $0x80] sm:$0x3]  ;;  %v5793_v30 = vsel %vm13839_vm8, %v5791_v16, %v5792_v15  ;;  %v5293_v44 = vrot.slane %v18958_v39, 4 }
 0x2e5   : > { %v3736_v40 = vadd.f32 %v3701_v50, %v3338_v27  ;;  %v4460_v5 = vrot.slane %v13424_v38, 6  ;;  %v5464_v50 = vunpack.c.l.b16 %v5276_v2  ;;  %v4458_v2 = vsel %vm13882_vm12, %v12336_v57, %v4457_v17 }
 0x2e6   : > { %12578 = vmatmul.msk.bf16.gmra.mxu0 %vm658_vm4, %v5884_v18  ;;  %12352 = vmatmul.msk.bf16.gmra.mxu1 %vm658_vm4, %v4546_v62  ;;  %v5280_v18 = vrot.slane %v5278_v34, 4  ;;  %v5283_v62 = vrot.slane %v5281_v1, 5  ;;  %v5861_v34 = vunpack.c.l.b16 %v5790_v19  ;;  %v5294_v42 = vor.u32 %v5293_v44, %v15690_v45 }
 0x2e7   : > { %v3305_v4 = vpop.f32.mrf.mxu2  ;;  %v15686_v3 = vadd.f32 %v4307_v59, %v3736_v40  ;;  %v4461_v59 = vsel %vm13882_vm12, %v4459_v9, %v4460_v5  ;;  %v5487_v16 = vpack.c.b16 %v5464_v50, %v5463_v52  ;;  %v5862_v40 = vunpack.c.l.b16 %v5793_v30  ;;  %v12503_v9 = vld [vmem:[%s13563_s27 + $0x90] sm:$0xf]  ;;  %v12547_v30 = vld [vmem:[%s13563_s27 + $0x84] sm:$0xe] }
 0x2e8   : > { %v3339_v27 = vadd.f32 %v3305_v4, %v2685_v12  ;;  %v5284_v39 = vor.u32 %v5283_v62, %v5280_v18  ;;  %v4524_v17 = vunpack.c.l.b16 %v4458_v2  ;;  %v4525_v57 = vunpack.c.l.b16 %v4461_v59  ;;  %v13425_v59 = vld [vmem:[%s13563_s27 + $0x88] sm:$0xf] }
 0x2e9   : > { %18957 = vst [vmem:[#allocation7_spill] sm:$0xff] %v15686_v3  ;;  %v5297_v3 = vshll.u32 %v15695_v37, 16  ;;  %v5885_v52 = vpack.c.b16 %v5862_v40, %v5861_v34  ;;  %v5796_v18 = vrot.slane %v15664_v61, 5  ;;  %v5302_v62 = vshrl.u32 %v12503_v9, 16  ;;  %v15736_v61 = vld [vmem:[%s13563_s27 + $0x98] sm:$0x1] }
 0x2ea   : > { %v5285_v19 = vrot.slane %v5284_v39, 4  ;;  %v4547_v50 = vpack.c.b16 %v4525_v57, %v4524_v17  ;;  %v12563_v39 = vrot.slane %v12547_v30, 9  ;;  %v13426_v30 = vld [vmem:[%s13563_s27 + $0x8c] sm:$0x3] }
 0x2eb   : > { %v4309_v38 = vpop.f32.mrf.mxu0  ;;  %v4616_v12 = vpop.f32.mrf.mxu1  ;;  %v5798_v17 = vrot.slane %v5796_v18, 4  ;;  %v5304_v57 = vrot.slane %v5302_v62, 4 }
 0x2ec   : > { %v3703_v15 = vpop.f32.mrf.mxu3  ;;  %12465 = vmatmul.msk.bf16.gmra.mxu2 %vm658_vm4, %v13330_v32  ;;  %v4695_v1 = vadd.f32 %v4616_v12, %v15041_v21  ;;  %v5295_v32 = vrot.slane %v5294_v42, 4  ;;  %v5299_v21 = vrot.slane %v5297_v3, 5  ;;  %v12321_v42 = vld [vmem:[%s13563_s27 + $0x84] sm:$0xc]  ;;  %v5797_v62 = vsel %vm13839_vm8, %v12563_v39, %v5796_v18 }
 0x2ed   : > { %v3737_v4 = vadd.f32 %v3703_v15, %v3339_v27  ;;  %v15708_v27 = vld [vmem:[%s13563_s27 + $0x94] sm:$0xf]  ;;  %v5321_v18 = vshll.u32 %v15736_v61, 16 }
 0x2ee   : > { %v18798_v3 = vshll.u32 %v15708_v27, 16  ;;  %v18799_v34 = vshrl.u32 %v15708_v27, 16 }
 0x2ef   : > { %v4901_v0 = vpop.f32.mrf.mxu2  ;;  %v15712_v44 = vadd.f32 %v4309_v38, %v3737_v4  ;;  %v5799_v38 = vrot.slane %v15695_v37, 5  ;;  %v5290_v4 = vsel %vm13590_vm3, %v5285_v19, %v15690_v45 }
 0x2f0   : > { %v4981_v5 = vadd.f32 %v4901_v0, %v4694_v13  ;;  %v4464_v0 = vrot.slane %v13425_v59, 6  ;;  %v5305_v13 = vshll.u32 %v12503_v9, 16  ;;  %v4467_v59 = vrot.slane %v13426_v30, 6 }
 0x2f1   : > { %12530 = vmatmul.msk.bf16.gmra.mxu3 %vm658_vm4, %v5487_v16  ;;  %v5317_v45 = vrot.slane %v18799_v34, 4 }
 0x2f2   : > { %v5307_v37 = vrot.slane %v5305_v13, 5 }
 0x2f3   : > { %v5953_v12 = vpop.f32.mrf.mxu0  ;;  %v4619_v2 = vpop.f32.mrf.mxu1 }
 0x2f4   : > { %v5555_v15 = vpop.f32.mrf.mxu3  ;;  %v4696_v16 = vadd.f32 %v4619_v2, %v15059_v6  ;;  %v5300_v6 = vsel %vm13590_vm3, %v5295_v32, %v5299_v21  ;;  %v4466_v2 = vrot.slane %v4464_v0, 4  ;;  %v5465_v32 = vunpack.c.l.b16 %v5290_v4 }
 0x2f5   : > { %v5635_v40 = vadd.f32 %v5555_v15, %v4981_v5  ;;  %v12337_v5 = vrot.slane %v12321_v42, 10  ;;  %v5466_v21 = vunpack.c.l.b16 %v5300_v6 }
 0x2f6   : > { %12579 = vmatmul.msk.bf16.gmra.mxu0 %vm658_vm4, %v5885_v52  ;;  %12353 = vmatmul.msk.bf16.gmra.mxu1 %vm658_vm4, %v4547_v50  ;;  %v13331_v52 = vld [vmem:[%s13563_s27 + $0x84] sm:$0xff]  ;;  %v5313_v50 = vrot.slane %v18798_v3, 5  ;;  %v4468_v30 = vsel %vm13882_vm12, %v4466_v2, %v4467_v59 }
 0x2f7   : > { %v4903_v9 = vpop.f32.mrf.mxu2  ;;  %v15733_v19 = vadd.f32 %v5953_v12, %v5635_v40  ;;  %v5308_v12 = vor.u32 %v5307_v37, %v5304_v57  ;;  %v5323_v37 = vrot.slane %v5321_v18, 5 }
 0x2f8   : > { %v4982_v15 = vadd.f32 %v4903_v9, %v4695_v1  ;;  %v5800_v1 = vsel %vm13839_vm8, %v5798_v17, %v5799_v38  ;;  %v4465_v9 = vsel %vm13882_vm12, %v12337_v5, %v4464_v0  ;;  %v5318_v6 = vor.u32 %v5317_v45, %v5313_v50  ;;  %v12506_v45 = vld [vmem:[%s13563_s27 + $0x9c] sm:$0xf] }
 0x2f9   : > { %v5488_v38 = vpack.c.b16 %v5466_v21, %v5465_v32  ;;  %v5863_v17 = vunpack.c.l.b16 %v5797_v62  ;;  %v5864_v3 = vunpack.c.l.b16 %v5800_v1  ;;  %v4526_v0 = vunpack.c.l.b16 %v4465_v9  ;;  %v15754_v21 = vld [vmem:[%s13563_s27 + $0xa0] sm:$0xf] }
 0x2fa   : > { %v4527_v5 = vunpack.c.l.b16 %v4468_v30  ;;  %v5309_v2 = vrot.slane %v5308_v12, 4  ;;  %v5319_v59 = vrot.slane %v5318_v6, 4  ;;  %18959 = vst [vmem:[#allocation9_spill] sm:$0xff] %v15754_v21  ;;  %v5806_v9 = vrot.slane %v15736_v61, 5  ;;  %v13427_v30 = vld [vmem:[%s13563_s27 + $0x94] sm:$0xf] }
 0x2fb   : > { %v5955_v42 = vpop.f32.mrf.mxu0  ;;  %v4621_v13 = vpop.f32.mrf.mxu1  ;;  %v4471_v12 = vrot.slane %v13427_v30, 6 }
 0x2fc   : > { %v5557_v40 = vpop.f32.mrf.mxu3  ;;  %12466 = vmatmul.msk.bf16.gmra.mxu2 %vm658_vm4, %v13331_v52  ;;  %v4697_v4 = vadd.f32 %v4621_v13, %v15083_v22  ;;  %v12548_v52 = vld [vmem:[%s13563_s27 + $0x90] sm:$0xe]  ;;  %v5803_v22 = vrot.slane %v15708_v27, 5  ;;  %v4548_v32 = vpack.c.b16 %v4527_v5, %v4526_v0  ;;  %v18801_v0 = vshrl.u32 %v15754_v21, 16 }
 0x2fd   : > { %v5636_v39 = vadd.f32 %v5557_v40, %v4982_v15  ;;  %v5886_v15 = vpack.c.b16 %v5864_v3, %v5863_v17  ;;  %v5324_v3 = vsel %vm13590_vm3, %v5319_v59, %v5323_v37  ;;  %v5329_v17 = vshll.u32 %v12506_v45, 16  ;;  %v13428_v37 = vld [vmem:[%s13563_s27 + $0x98] sm:$0x3] }
 0x2fe   : > { %v5805_v18 = vrot.slane %v5803_v22, 4  ;;  %v4473_v59 = vrot.slane %v4471_v12, 4 }
 0x2ff   : > { %v4906_v34 = vpop.f32.mrf.mxu2  ;;  %v15756_v62 = vadd.f32 %v5955_v42, %v5636_v39  ;;  %v12322_v42 = vld [vmem:[%s13563_s27 + $0x90] sm:$0xc]  ;;  %v5326_v39 = vshrl.u32 %v12506_v45, 16 }
 0x300   : > { %v4983_v57 = vadd.f32 %v4906_v34, %v4696_v16  ;;  %v5314_v16 = vsel %vm13590_vm3, %v5309_v2, %v5313_v50  ;;  %v12564_v34 = vrot.slane %v12548_v52, 9  ;;  %v18800_v50 = vshll.u32 %v15754_v21, 16  ;;  %v13332_v45 = vld [vmem:[%s13563_s27 + $0x90] sm:$0xff] }
 0x301   : > { %12531 = vmatmul.msk.bf16.gmra.mxu3 %vm658_vm4, %v5488_v38  ;;  %v5467_v61 = vunpack.c.l.b16 %v5314_v16  ;;  %v12338_v2 = vrot.slane %v12322_v42, 10  ;;  %v4474_v52 = vrot.slane %v13428_v37, 6  ;;  %v5807_v30 = vsel %vm13839_vm8, %v5805_v18, %v5806_v9 }
 0x302   : > { %v5804_v5 = vsel %vm13839_vm8, %v12564_v34, %v5803_v22  ;;  %v15780_v16 = vrot.slane %v18800_v50, 5  ;;  %v5341_v22 = vrot.slane %v18801_v0, 4  ;;  %v15785_v34 = vld [vmem:[%s13563_s27 + $0xa4] sm:$0x1] }
 0x303   : > { %v5958_v1 = vpop.f32.mrf.mxu0  ;;  %v4624_v13 = vpop.f32.mrf.mxu1  ;;  %v5345_v0 = vshll.u32 %v15785_v34, 16 }
 0x304   : > { %v5560_v40 = vpop.f32.mrf.mxu3  ;;  %v4698_v6 = vadd.f32 %v4624_v13, %v15094_v7  ;;  %v5468_v13 = vunpack.c.l.b16 %v5324_v3  ;;  %v4472_v3 = vsel %vm13882_vm12, %v12338_v2, %v4471_v12  ;;  %v5342_v50 = vor.u32 %v5341_v22, %v15780_v16 }
 0x305   : > { %v5637_v38 = vadd.f32 %v5560_v40, %v4983_v57  ;;  %v4528_v12 = vunpack.c.l.b16 %v4472_v3 }
 0x306   : > { %12580 = vmatmul.msk.bf16.gmra.mxu0 %vm658_vm4, %v5886_v15  ;;  %12354 = vmatmul.msk.bf16.gmra.mxu1 %vm658_vm4, %v4548_v32  ;;  %v5328_v15 = vrot.slane %v5326_v39, 4  ;;  %v5331_v32 = vrot.slane %v5329_v17, 5  ;;  %v5489_v18 = vpack.c.b16 %v5468_v13, %v5467_v61  ;;  %v5865_v39 = vunpack.c.l.b16 %v5804_v5 }
 0x307   : > { %v4908_v7 = vpop.f32.mrf.mxu2  ;;  %v15776_v40 = vadd.f32 %v5958_v1, %v5637_v38  ;;  %v4475_v1 = vsel %vm13882_vm12, %v4473_v59, %v4474_v52  ;;  %v5866_v38 = vunpack.c.l.b16 %v5807_v30  ;;  %v12509_v59 = vld [vmem:[%s13563_s27 + $0xa8] sm:$0xf]  ;;  %v12549_v30 = vld [vmem:[%s13563_s27 + $0x9c] sm:$0xe] }
 0x308   : > { %v4984_v57 = vadd.f32 %v4908_v7, %v4697_v4  ;;  %v5332_v37 = vor.u32 %v5331_v32, %v5328_v15  ;;  %v4529_v2 = vunpack.c.l.b16 %v4475_v1  ;;  %v5810_v15 = vrot.slane %v15754_v21, 5  ;;  %v13429_v1 = vld [vmem:[%s13563_s27 + $0xa0] sm:$0xf]  ;;  %v15826_v21 = vld [vmem:[%s13563_s27 + $0xb0] sm:$0x1] }
 0x309   : > { %18960 = vst [vmem:[#allocation15_spill] sm:$0xff] %v15776_v40  ;;  %v5887_v61 = vpack.c.b16 %v5866_v38, %v5865_v39  ;;  %v5350_v32 = vshrl.u32 %v12509_v59, 16 }
 0x30a   : > { %v5333_v5 = vrot.slane %v5332_v37, 4  ;;  %v4549_v13 = vpack.c.b16 %v4529_v2, %v4528_v12  ;;  %v12565_v37 = vrot.slane %v12549_v30, 9  ;;  %v5812_v12 = vrot.slane %v5810_v15, 4  ;;  %v13430_v30 = vld [vmem:[%s13563_s27 + $0xa4] sm:$0x3] }
 0x30b   : > { %v5960_v42 = vpop.f32.mrf.mxu0  ;;  %v4626_v4 = vpop.f32.mrf.mxu1  ;;  %v5352_v2 = vrot.slane %v5350_v32, 4 }
 0x30c   : > { %v5562_v9 = vpop.f32.mrf.mxu3  ;;  %12467 = vmatmul.msk.bf16.gmra.mxu2 %vm658_vm4, %v13332_v45  ;;  %v4699_v17 = vadd.f32 %v4626_v4, %v15116_v31  ;;  %v5343_v45 = vrot.slane %v5342_v50, 4  ;;  %v5347_v31 = vrot.slane %v5345_v0, 5  ;;  %v12323_v50 = vld [vmem:[%s13563_s27 + $0x9c] sm:$0xc]  ;;  %v5811_v32 = vsel %vm13839_vm8, %v12565_v37, %v5810_v15 }
 0x30d   : > { %v5638_v7 = vadd.f32 %v5562_v9, %v4984_v57  ;;  %v15798_v57 = vld [vmem:[%s13563_s27 + $0xac] sm:$0xf]  ;;  %v5369_v15 = vshll.u32 %v15826_v21, 16 }
 0x30e   : > { %18961 = vst [vmem:[#allocation16_spill] sm:$0xff] %v15798_v57  ;;  %v18804_v0 = vshll.u32 %v15798_v57, 16  ;;  %v18805_v39 = vshrl.u32 %v15798_v57, 16 }
 0x30f   : > { %v4911_v40 = vpop.f32.mrf.mxu2  ;;  %v15802_v22 = vadd.f32 %v5960_v42, %v5638_v7  ;;  %v5813_v42 = vrot.slane %v15785_v34, 5  ;;  %v5338_v7 = vsel %vm13590_vm3, %v5333_v5, %v15780_v16 }
 0x310   : > { %v4985_v52 = vadd.f32 %v4911_v40, %v4698_v6  ;;  %v4478_v6 = vrot.slane %v13429_v1, 6  ;;  %v5353_v40 = vshll.u32 %v12509_v59, 16  ;;  %v4481_v1 = vrot.slane %v13430_v30, 6 }
 0x311   : > { %12532 = vmatmul.msk.bf16.gmra.mxu3 %vm658_vm4, %v5489_v18  ;;  %v5365_v16 = vrot.slane %v18805_v39, 4 }
 0x312   : > { %v5355_v34 = vrot.slane %v5353_v40, 5 }
 0x313   : > { %v5963_v4 = vpop.f32.mrf.mxu0  ;;  %v4629_v3 = vpop.f32.mrf.mxu1 }
 0x314   : > { %v5565_v9 = vpop.f32.mrf.mxu3  ;;  %v4700_v18 = vadd.f32 %v4629_v3, %v15130_v58  ;;  %v5348_v58 = vsel %vm13590_vm3, %v5343_v45, %v5347_v31  ;;  %v4480_v3 = vrot.slane %v4478_v6, 4  ;;  %v5469_v45 = vunpack.c.l.b16 %v5338_v7 }
 0x315   : > { %v5639_v38 = vadd.f32 %v5565_v9, %v4985_v52  ;;  %v12339_v52 = vrot.slane %v12323_v50, 10  ;;  %v5470_v31 = vunpack.c.l.b16 %v5348_v58 }
 0x316   : > { %12581 = vmatmul.msk.bf16.gmra.mxu0 %vm658_vm4, %v5887_v61  ;;  %12355 = vmatmul.msk.bf16.gmra.mxu1 %vm658_vm4, %v4549_v13  ;;  %v13333_v61 = vld [vmem:[%s13563_s27 + $0x9c] sm:$0xff]  ;;  %v5361_v13 = vrot.slane %v18804_v0, 5  ;;  %v4482_v30 = vsel %vm13882_vm12, %v4480_v3, %v4481_v1 }
 0x317   : > { %v4913_v59 = vpop.f32.mrf.mxu2  ;;  %v15823_v5 = vadd.f32 %v5963_v4, %v5639_v38  ;;  %v5356_v4 = vor.u32 %v5355_v34, %v5352_v2  ;;  %v5371_v34 = vrot.slane %v5369_v15, 5 }
 0x318   : > { %v4986_v9 = vadd.f32 %v4913_v59, %v4699_v17  ;;  %v5814_v17 = vsel %vm13839_vm8, %v5812_v12, %v5813_v42  ;;  %v4479_v59 = vsel %vm13882_vm12, %v12339_v52, %v4478_v6  ;;  %v5366_v58 = vor.u32 %v5365_v16, %v5361_v13  ;;  %v12512_v16 = vld [vmem:[%s13563_s27 + $0xb4] sm:$0xf] }
 0x319   : > { %v5490_v42 = vpack.c.b16 %v5470_v31, %v5469_v45  ;;  %v5867_v12 = vunpack.c.l.b16 %v5811_v32  ;;  %v5868_v0 = vunpack.c.l.b16 %v5814_v17  ;;  %v4530_v6 = vunpack.c.l.b16 %v4479_v59  ;;  %v15844_v31 = vld [vmem:[%s13563_s27 + $0xb8] sm:$0xf] }
 0x31a   : > { %v4531_v52 = vunpack.c.l.b16 %v4482_v30  ;;  %v5357_v3 = vrot.slane %v5356_v4, 4  ;;  %v5367_v1 = vrot.slane %v5366_v58, 4  ;;  %18962 = vst [vmem:[#allocation17_spill] sm:$0xff] %v15844_v31  ;;  %v5820_v59 = vrot.slane %v15826_v21, 5  ;;  %v13431_v30 = vld [vmem:[%s13563_s27 + $0xac] sm:$0xf] }
 0x31b   : > { %v5965_v50 = vpop.f32.mrf.mxu0  ;;  %v4631_v40 = vpop.f32.mrf.mxu1  ;;  %v4485_v4 = vrot.slane %v13431_v30, 6 }
 0x31c   : > { %v5567_v38 = vpop.f32.mrf.mxu3  ;;  %12468 = vmatmul.msk.bf16.gmra.mxu2 %vm658_vm4, %v13333_v61  ;;  %v4701_v7 = vadd.f32 %v4631_v40, %v15157_v55  ;;  %v12550_v61 = vld [vmem:[%s13563_s27 + $0xa8] sm:$0xe]  ;;  %v5817_v55 = vrot.slane %v15798_v57, 5  ;;  %v4550_v45 = vpack.c.b16 %v4531_v52, %v4530_v6  ;;  %v18807_v6 = vshrl.u32 %v15844_v31, 16 }
 0x31d   : > { %v5640_v37 = vadd.f32 %v5567_v38, %v4986_v9  ;;  %v5888_v9 = vpack.c.b16 %v5868_v0, %v5867_v12  ;;  %v5372_v0 = vsel %vm13590_vm3, %v5367_v1, %v5371_v34  ;;  %v5377_v12 = vshll.u32 %v12512_v16, 16  ;;  %v13432_v34 = vld [vmem:[%s13563_s27 + $0xb0] sm:$0x3] }
 0x31e   : > { %v5819_v15 = vrot.slane %v5817_v55, 4  ;;  %v4487_v1 = vrot.slane %v4485_v4, 4 }
 0x31f   : > { %v4916_v39 = vpop.f32.mrf.mxu2  ;;  %v15846_v32 = vadd.f32 %v5965_v50, %v5640_v37  ;;  %v12324_v50 = vld [vmem:[%s13563_s27 + $0xa8] sm:$0xc]  ;;  %v5374_v37 = vshrl.u32 %v12512_v16, 16 }
 0x320   : > { %v4987_v2 = vadd.f32 %v4916_v39, %v4700_v18  ;;  %v5362_v18 = vsel %vm13590_vm3, %v5357_v3, %v5361_v13  ;;  %v12566_v39 = vrot.slane %v12550_v61, 9  ;;  %v18806_v13 = vshll.u32 %v15844_v31, 16  ;;  %v13334_v16 = vld [vmem:[%s13563_s27 + $0xa8] sm:$0xff] }
 0x321   : > { %12533 = vmatmul.msk.bf16.gmra.mxu3 %vm658_vm4, %v5490_v42  ;;  %v5471_v21 = vunpack.c.l.b16 %v5362_v18  ;;  %v12340_v3 = vrot.slane %v12324_v50, 10  ;;  %v4488_v61 = vrot.slane %v13432_v34, 6  ;;  %v5821_v30 = vsel %vm13839_vm8, %v5819_v15, %v5820_v59 }
 0x322   : > { %v5818_v52 = vsel %vm13839_vm8, %v12566_v39, %v5817_v55  ;;  %v15870_v18 = vrot.slane %v18806_v13, 5  ;;  %v5389_v55 = vrot.slane %v18807_v6, 4  ;;  %v15875_v39 = vld [vmem:[%s13563_s27 + $0xbc] sm:$0x1] }
 0x323   : > { %v5968_v17 = vpop.f32.mrf.mxu0  ;;  %v4634_v40 = vpop.f32.mrf.mxu1  ;;  %v5393_v6 = vshll.u32 %v15875_v39, 16 }
 0x324   : > { %v5570_v38 = vpop.f32.mrf.mxu3  ;;  %v4702_v58 = vadd.f32 %v4634_v40, %v15174_v28  ;;  %v5472_v40 = vunpack.c.l.b16 %v5372_v0  ;;  %v4486_v0 = vsel %vm13882_vm12, %v12340_v3, %v4485_v4  ;;  %v5390_v13 = vor.u32 %v5389_v55, %v15870_v18 }
 0x325   : > { %v5641_v42 = vadd.f32 %v5570_v38, %v4987_v2  ;;  %v4532_v4 = vunpack.c.l.b16 %v4486_v0 }
 0x326   : > { %12582 = vmatmul.msk.bf16.gmra.mxu0 %vm658_vm4, %v5888_v9  ;;  %12356 = vmatmul.msk.bf16.gmra.mxu1 %vm658_vm4, %v4550_v45  ;;  %v5376_v9 = vrot.slane %v5374_v37, 4  ;;  %v5379_v45 = vrot.slane %v5377_v12, 5  ;;  %v5491_v15 = vpack.c.b16 %v5472_v40, %v5471_v21  ;;  %v5869_v37 = vunpack.c.l.b16 %v5818_v52  ;;  %v15889_v40 = vld [vmem:[%s13563_s27 + $0xc4] sm:$0xf] }
 0x327   : > { %v4918_v28 = vpop.f32.mrf.mxu2  ;;  %v15866_v38 = vadd.f32 %v5968_v17, %v5641_v42  ;;  %v4489_v17 = vsel %vm13882_vm12, %v4487_v1, %v4488_v61  ;;  %v5870_v42 = vunpack.c.l.b16 %v5821_v30  ;;  %v12515_v1 = vld [vmem:[%s13563_s27 + $0xc0] sm:$0xf]  ;;  %v5395_v52 = vrot.slane %v5393_v6, 5 }
 0x328   : > { %v4988_v2 = vadd.f32 %v4918_v28, %v4701_v7  ;;  %v5380_v34 = vor.u32 %v5379_v45, %v5376_v9  ;;  %v4533_v3 = vunpack.c.l.b16 %v4489_v17  ;;  %v12551_v9 = vld [vmem:[%s13563_s27 + $0xb4] sm:$0xe]  ;;  %v5398_v45 = vshrl.u32 %v12515_v1, 16 }
 0x329   : > { %18963 = vst [vmem:[#allocation18_spill] sm:$0xff] %v15866_v38  ;;  %v5889_v61 = vpack.c.b16 %v5870_v42, %v5869_v37  ;;  %v5401_v55 = vshll.u32 %v12515_v1, 16  ;;  %v12325_v37 = vld [vmem:[%s13563_s27 + $0xb4] sm:$0xc] }
 0x32a   : > { %v5381_v21 = vrot.slane %v5380_v34, 4  ;;  %v4551_v30 = vpack.c.b16 %v4533_v3, %v4532_v4  ;;  %v5827_v34 = vrot.slane %v15875_v39, 5  ;;  %v5400_v3 = vrot.slane %v5398_v45, 4  ;;  %v15916_v45 = vld [vmem:[%s13563_s27 + $0xc8] sm:$0x1] }
 0x32b   : > { %v5970_v50 = vpop.f32.mrf.mxu0  ;;  %v4636_v7 = vpop.f32.mrf.mxu1  ;;  %v5403_v1 = vrot.slane %v5401_v55, 5 }
 0x32c   : > { %v5572_v59 = vpop.f32.mrf.mxu3  ;;  %12469 = vmatmul.msk.bf16.gmra.mxu2 %vm658_vm4, %v13334_v16  ;;  %v4703_v12 = vadd.f32 %v4636_v7, %v15203_v8  ;;  %v5391_v8 = vrot.slane %v5390_v13, 4  ;;  %v18808_v13 = vshll.u32 %v15889_v40, 16 }
 0x32d   : > { %v5642_v28 = vadd.f32 %v5572_v59, %v4988_v2  ;;  %v5824_v2 = vrot.slane %v15844_v31, 5  ;;  %v13433_v59 = vld [vmem:[%s13563_s27 + $0xb8] sm:$0xf] }
 0x32e   : > { %v5409_v39 = vrot.slane %v18808_v13, 5 }
 0x32f   : > { %v4921_v38 = vpop.f32.mrf.mxu2  ;;  %v15892_v7 = vadd.f32 %v5970_v50, %v5642_v28  ;;  %v5386_v50 = vsel %vm13590_vm3, %v5381_v21, %v15870_v18  ;;  %v12567_v28 = vrot.slane %v12551_v9, 9  ;;  %v5826_v4 = vrot.slane %v5824_v2, 4  ;;  %v13335_v21 = vld [vmem:[%s13563_s27 + $0xb4] sm:$0xff] }
 0x330   : > { %v4989_v16 = vadd.f32 %v4921_v38, %v4702_v58  ;;  %v4492_v58 = vrot.slane %v13433_v59, 6 }
 0x331   : > { %12534 = vmatmul.msk.bf16.gmra.mxu3 %vm658_vm4, %v5491_v15  ;;  %18964 = vst [vmem:[#allocation19_spill] sm:$0xff] %v15892_v7  ;;  %v5825_v55 = vsel %vm13839_vm8, %v12567_v28, %v5824_v2  ;;  %v5417_v2 = vshll.u32 %v15916_v45, 16  ;;  %v12518_v28 = vld [vmem:[%s13563_s27 + $0xcc] sm:$0xf] }
 0x332   : > { %v4494_v59 = vrot.slane %v4492_v58, 4  ;;  %v5425_v31 = vshll.u32 %v12518_v28, 16 }
 0x333   : > { %v5973_v0 = vpop.f32.mrf.mxu0  ;;  %v4639_v17 = vpop.f32.mrf.mxu1  ;;  %v5419_v57 = vrot.slane %v5417_v2, 5 }
 0x334   : > { %v5575_v38 = vpop.f32.mrf.mxu3  ;;  %v4704_v15 = vadd.f32 %v4639_v17, %v15219_v20  ;;  %v5396_v20 = vsel %vm13590_vm3, %v5391_v8, %v5395_v52  ;;  %v12341_v17 = vrot.slane %v12325_v37, 10  ;;  %v5473_v8 = vunpack.c.l.b16 %v5386_v50 }
 0x335   : > { %v5643_v42 = vadd.f32 %v5575_v38, %v4989_v16  ;;  %v13434_v38 = vld [vmem:[%s13563_s27 + $0xbc] sm:$0x3]  ;;  %v5474_v52 = vunpack.c.l.b16 %v5396_v20  ;;  %v5404_v37 = vor.u32 %v5403_v1, %v5400_v3  ;;  %v5871_v1 = vunpack.c.l.b16 %v5825_v55 }
 0x336   : > { %12583 = vmatmul.msk.bf16.gmra.mxu0 %vm658_vm4, %v5889_v61  ;;  %12357 = vmatmul.msk.bf16.gmra.mxu1 %vm658_vm4, %v4551_v30  ;;  %v4495_v6 = vrot.slane %v13434_v38, 6  ;;  %v18965_v61 = vshrl.u32 %v15889_v40, 16  ;;  %v5427_v2 = vrot.slane %v5425_v31, 5 }
 0x337   : > { %v4923_v16 = vpop.f32.mrf.mxu2  ;;  %v15913_v9 = vadd.f32 %v5973_v0, %v5643_v42  ;;  %v5492_v3 = vpack.c.b16 %v5474_v52, %v5473_v8 }
 0x338   : > { %v4990_v18 = vadd.f32 %v4923_v16, %v4703_v12  ;;  %v5413_v30 = vrot.slane %v18965_v61, 4  ;;  %v5828_v12 = vsel %vm13839_vm8, %v5826_v4, %v5827_v34  ;;  %v4493_v61 = vsel %vm13882_vm12, %v12341_v17, %v4492_v58  ;;  %v15931_v34 = vld [vmem:[%s13563_s27 + $0xd0] sm:$0xf] }
 0x339   : > { %18966 = vst [vmem:[#allocation20_spill] sm:$0xff] %v15913_v9  ;;  %v4496_v0 = vsel %vm13882_vm12, %v4494_v59, %v4495_v6  ;;  %v5872_v13 = vunpack.c.l.b16 %v5828_v12  ;;  %v4534_v58 = vunpack.c.l.b16 %v4493_v61  ;;  %v5405_v9 = vrot.slane %v5404_v37, 4  ;;  %v12552_v6 = vld [vmem:[%s13563_s27 + $0xc0] sm:$0xe]  ;;  %v13435_v61 = vld [vmem:[%s13563_s27 + $0xc4] sm:$0xf] }
 0x33a   : > { %v5414_v20 = vor.u32 %v5413_v30, %v5409_v39  ;;  %18967 = vst [vmem:[#allocation21_spill] sm:$0xff] %v15931_v34  ;;  %v4535_v17 = vunpack.c.l.b16 %v4496_v0  ;;  %v18814_v30 = vshrl.u32 %v15931_v34, 16  ;;  %v12568_v52 = vrot.slane %v12552_v6, 9  ;;  %v12326_v37 = vld [vmem:[%s13563_s27 + $0xc0] sm:$0xc] }
 0x33b   : > { %v5975_v16 = vpop.f32.mrf.mxu0  ;;  %v4641_v38 = vpop.f32.mrf.mxu1  ;;  %v5890_v8 = vpack.c.b16 %v5872_v13, %v5871_v1  ;;  %v5410_v12 = vsel %vm13590_vm3, %v5405_v9, %v5409_v39  ;;  %v4499_v0 = vrot.slane %v13435_v61, 6  ;;  %v12342_v31 = vrot.slane %v12326_v37, 10 }
 0x33c   : > { %v5577_v42 = vpop.f32.mrf.mxu3  ;;  %12470 = vmatmul.msk.bf16.gmra.mxu2 %vm658_vm4, %v13335_v21  ;;  %v4705_v50 = vadd.f32 %v4641_v38, %v15246_v46  ;;  %v5422_v21 = vshrl.u32 %v12518_v28, 16  ;;  %v18813_v46 = vshll.u32 %v15931_v34, 16  ;;  %v5415_v7 = vrot.slane %v5414_v20, 4 }
 0x33d   : > { %v5644_v4 = vadd.f32 %v5577_v42, %v4990_v18  ;;  %v5831_v18 = vrot.slane %v15889_v40, 5  ;;  %v4552_v55 = vpack.c.b16 %v4535_v17, %v4534_v58  ;;  %v5437_v13 = vrot.slane %v18814_v30, 4  ;;  %v15955_v17 = vld [vmem:[%s13563_s27 + $0xd4] sm:$0x1] }
 0x33e   : > { %v5424_v20 = vrot.slane %v5422_v21, 4  ;;  %v5420_v9 = vsel %vm13590_vm3, %v5415_v7, %v5419_v57  ;;  %v5475_v6 = vunpack.c.l.b16 %v5410_v12  ;;  %v13436_v21 = vld [vmem:[%s13563_s27 + $0xc8] sm:$0x3]  ;;  %v5441_v12 = vshll.u32 %v15955_v17, 16 }
 0x33f   : > { %v4926_v59 = vpop.f32.mrf.mxu2  ;;  %v15942_v42 = vadd.f32 %v5975_v16, %v5644_v4  ;;  %v5833_v16 = vrot.slane %v5831_v18, 4  ;;  %v5834_v4 = vrot.slane %v15916_v45, 5  ;;  %v4502_v57 = vrot.slane %v13436_v21, 6 }
 0x340   : > { %v4991_v38 = vadd.f32 %v4926_v59, %v4704_v15  ;;  %v4501_v59 = vrot.slane %v4499_v0, 4  ;;  %v5476_v61 = vunpack.c.l.b16 %v5420_v9  ;;  %v5428_v45 = vor.u32 %v5427_v2, %v5424_v20 }
 0x341   : > { %12535 = vmatmul.msk.bf16.gmra.mxu3 %vm658_vm4, %v5492_v3  ;;  %v15946_v3 = vrot.slane %v18813_v46, 5  ;;  %v12553_v46 = vld [vmem:[%s13563_s27 + $0xcc] sm:$0xe] }
 0x342   : > { %v4503_v20 = vsel %vm13882_vm12, %v4501_v59, %v4502_v57 }
 0x343   : > { %v5978_v28 = vpop.f32.mrf.mxu0  ;;  %v4644_v15 = vpop.f32.mrf.mxu1  ;;  %v4537_v57 = vunpack.c.l.b16 %v4503_v20  ;;  %v12782_v20 = vld [vmem:[%s13563_s27 + $0x24] sm:$0xf] }
 0x344   : > { %v5580_v1 = vpop.f32.mrf.mxu3  ;;  %v4706_v39 = vadd.f32 %v4644_v15, %v15278_v48  ;;  %v5832_v48 = vsel %vm13839_vm8, %v12568_v52, %v5831_v18  ;;  %v4500_v18 = vsel %vm13882_vm12, %v12342_v31, %v4499_v0  ;;  %v13437_v52 = vld [vmem:[%s13563_s27 + $0x18] sm:$0xe] }
 0x345   : > { %v5645_v58 = vadd.f32 %v5580_v1, %v4991_v38  ;;  %v5438_v38 = vor.u32 %v5437_v13, %v15946_v3  ;;  %v6082_v1 = vshrl.u32 %v13437_v52, 16  ;;  %v6085_v21 = vshll.u32 %v13437_v52, 16 }
 0x346   : > { %12584 = vmatmul.msk.bf16.gmra.mxu0 %vm658_vm4, %v5890_v8  ;;  %12358 = vmatmul.msk.bf16.gmra.mxu1 %vm658_vm4, %v4552_v55  ;;  %v13336_v8 = vld [vmem:[%s13563_s27 + $0xc0] sm:$0xff]  ;;  %v5835_v55 = vsel %vm13839_vm8, %v5833_v16, %v5834_v4  ;;  %v5873_v9 = vunpack.c.l.b16 %v5832_v48  ;;  %v4536_v31 = vunpack.c.l.b16 %v4500_v18  ;;  %v5443_v52 = vrot.slane %v5441_v12, 5 }
 0x347   : > { %v4928_v7 = vpop.f32.mrf.mxu2  ;;  %v15963_v37 = vadd.f32 %v5978_v28, %v5645_v58  ;;  %v5874_v2 = vunpack.c.l.b16 %v5835_v55  ;;  %v5429_v58 = vrot.slane %v5428_v45, 4  ;;  %v15975_v16 = vld [vmem:[%s13563_s27 + $0x20] sm:$0x3]  ;;  %v5838_v48 = vrot.slane %v15931_v34, 5 }
 0x348   : > { %v4992_v15 = vadd.f32 %v4928_v7, %v4705_v50  ;;  %v5493_v50 = vpack.c.b16 %v5476_v61, %v5475_v6  ;;  %v5439_v7 = vrot.slane %v5438_v38, 4  ;;  %v6084_v6 = vrot.slane %v6082_v1, 5 }
 0x349   : > { %v6087_v61 = vrot.slane %v6085_v21, 6  ;;  %v18968_v45 = vshrl.u32 %v15243_v54, 16  ;;  %v18969_v55 = vshll.u32 %v15243_v54, 16  ;;  %v5891_v12 = vpack.c.b16 %v5874_v2, %v5873_v9  ;;  %v15998_v2 = vld [vmem:[%s13563_s27 + $0x28] sm:$0xf] }
 0x34a   : > { %v12569_v1 = vrot.slane %v12553_v46, 9  ;;  %v5841_v21 = vrot.slane %v15955_v17, 5  ;;  %v4553_v54 = vpack.c.b16 %v4537_v57, %v4536_v31  ;;  %18970 = vst [vmem:[#allocation22_spill] sm:$0xff] %v15998_v2  ;;  %v7392_v31 = vshll.u32 %v12782_v20, 16 }
 0x34b   : > { %v5980_v28 = vpop.f32.mrf.mxu0  ;;  %v4646_v13 = vpop.f32.mrf.mxu1  ;;  %v6090_v38 = vrot.slane %v18968_v45, 5  ;;  %v6091_v30 = vrot.slane %v18969_v55, 6  ;;  %v5840_v45 = vrot.slane %v5838_v48, 4  ;;  %v6088_v55 = vor.u32 %v6087_v61, %v6084_v6  ;;  %v13438_v61 = vld [vmem:[%s13563_s27 + $0x1c] sm:$0xf] }
 0x34c   : > { %v5582_v4 = vpop.f32.mrf.mxu3  ;;  %12471 = vmatmul.msk.bf16.gmra.mxu2 %vm658_vm4, %v13336_v8  ;;  %v4707_v0 = vadd.f32 %v4646_v13, %v15306_v47  ;;  %v6096_v8 = vshrl.u32 %v15975_v16, 16  ;;  %v6099_v47 = vshll.u32 %v15975_v16, 16  ;;  %v16012_v57 = vsel %vm13839_vm8, %v12569_v1, %v5838_v48  ;;  %v12620_v1 = vld [vmem:[%s13563_s27 + $0x18] sm:$0xc] }
 0x34d   : > { %v5646_v59 = vadd.f32 %v5582_v4, %v4992_v15  ;;  %v5434_v15 = vsel %vm13590_vm3, %v5429_v58, %v15946_v3  ;;  %v5444_v4 = vsel %vm13590_vm3, %v5439_v7, %v5443_v52  ;;  %v15995_v34 = vor.u32 %v6091_v30, %v6090_v38 }
 0x34e   : > { %v6098_v9 = vrot.slane %v6096_v8, 5  ;;  %v7389_v58 = vshrl.u32 %v12782_v20, 16  ;;  %v16008_v30 = vunpack.c.l.b16 %v5434_v15  ;;  %v16015_v6 = vunpack.c.l.b16 %v5444_v4  ;;  %v12879_v15 = vld [vmem:[%s18757_s1 + $0x22] sm:$0x3] }
 0x34f   : > { %v4931_v18 = vpop.f32.mrf.mxu2  ;;  %v16000_v3 = vadd.f32 %v5980_v28, %v5646_v59  ;;  %v6721_v38 = vrot.slane %v13438_v61, 6  ;;  %v18817_v8 = vshll.u32 %v15998_v2, 16  ;;  %v6089_v48 = vrot.slane %v6088_v55, 4  ;;  %v13337_v55 = vld [vmem:[%s13563_s27 + $0xcc] sm:$0xff] }
 0x350   : > { %v4993_v13 = vadd.f32 %v4931_v18, %v4706_v39  ;;  %v6101_v39 = vrot.slane %v6099_v47, 6  ;;  %v6094_v47 = vrot.slane %v15995_v34, 4  ;;  %v7391_v20 = vrot.slane %v7389_v58, 4 }
 0x351   : > { %12536 = vmatmul.msk.bf16.gmra.mxu3 %vm658_vm4, %v5493_v50  ;;  %v12912_v50 = vld [vmem:[%s18757_s1 + $0x24] sm:$0x3]  ;;  %v8269_v4 = vsel %vm707_vm0, %v12879_v15, 0  ;;  %v5875_v58 = vunpack.c.l.b16 %v16012_v57  ;;  %v6723_v61 = vrot.slane %v6721_v38, 4  ;;  %v16052_v57 = vrot.slane %v18817_v8, 5 }
 0x352   : > { %v8875_v28 = vsel %vm707_vm0, %v12912_v50, 0  ;;  %v6102_v18 = vor.u32 %v6101_v39, %v6098_v9  ;;  %v18820_v9 = vshrl.u32 %v15998_v2, 16  ;;  %8278 = vmatpush.bf16.msrb.mxu1 %v8269_v4  ;;  %v13439_v39 = vld [vmem:[%s13563_s27 + $0x24] sm:$0xe] }
 0x353   : > { %v5983_v46 = vpop.f32.mrf.mxu0  ;;  %v4649_v17 = vpop.f32.mrf.mxu1  ;;  %8884 = vmatpush.bf16.msrb.mxu2 %v8875_v28 }
 0x354   : > { %v5585_v7 = vpop.f32.mrf.mxu3  ;;  %v16006_v52 = vadd.f32 %v4649_v17, %v15326_v26  ;;  %v16023_v26 = vsel %vm13839_vm8, %v5840_v45, %v5841_v21  ;;  %v6105_v17 = vshrl.u32 %v13439_v39, 16 }
 0x355   : > { %v5647_v59 = vadd.f32 %v5585_v7, %v4993_v13  ;;  %v12961_v13 = vld [vmem:[%s18757_s1 + $0x26] sm:$0x3]  ;;  %v5494_v7 = vpack.c.b16 %v16015_v6, %v16008_v30  ;;  %v5876_v28 = vunpack.c.l.b16 %v16023_v26  ;;  %v13010_v6 = vld [vmem:[%s18757_s1 + $0x28] sm:$0x3]  ;;  %v16058_v26 = vld [vmem:[%s13563_s27 + $0x2c] sm:$0x3] }
 0x356   : > { %12585 = vmatmul.msk.bf16.gmra.mxu0 %vm658_vm4, %v5891_v12  ;;  %12359 = vmatmul.msk.bf16.gmra.mxu1 %vm658_vm4, %v4553_v54  ;;  %v7394_v54 = vrot.slane %v7392_v31, 5  ;;  %v9257_v21 = vsel %vm707_vm0, %v12961_v13, 0  ;;  %v6108_v31 = vshll.u32 %v13439_v39, 16  ;;  %v6724_v13 = vrot.slane %v15975_v16, 6 }
 0x357   : > { %v4933_v12 = vpop.f32.mrf.mxu2  ;;  %9266 = vmatpush.bf16.msrb.mxu3 %v9257_v21  ;;  %v16038_v50 = vadd.f32 %v5983_v46, %v5647_v59  ;;  %v6093_v46 = vsel %vm13875_vm11, %v6089_v48, %v15995_v34  ;;  %v6103_v59 = vsel %vm13875_vm11, %v6094_v47, %v6102_v18  ;;  %v12784_v34 = vld [vmem:[%s13563_s27 + $0x2c] sm:$0x1]  ;;  %v7404_v48 = vrot.slane %v18820_v9, 4 }
 0x358   : > { %v4994_v45 = vadd.f32 %v4933_v12, %v4707_v0  ;;  %v12636_v0 = vrot.slane %v12620_v1, 10  ;;  %v7395_v30 = vor.u32 %v7394_v54, %v7391_v20  ;;  %v9544_v47 = vsel %vm707_vm0, %v13010_v6, 0 }
 0x359   : > { %v6107_v18 = vrot.slane %v6105_v17, 5  ;;  %9553 = vmatpush.bf16.msrb.mxu0 %v9544_v47  ;;  %v6110_v54 = vrot.slane %v6108_v31, 6  ;;  %v18971_v21 = vshrl.u32 %v15304_v24, 16  ;;  %v18972_v39 = vshll.u32 %v15304_v24, 16  ;;  %v12785_v47 = vld [vmem:[%s13563_s27 + $0x30] sm:$0xf] }
 0x35a   : > { %v6452_v63 = vunpack.c.l.b16 %v6103_v59  ;;  %v6722_v17 = vsel %vm13882_vm12, %v12636_v0, %v6721_v38  ;;  %v6725_v6 = vsel %vm13882_vm12, %v6723_v61, %v6724_v13  ;;  %v7396_v24 = vrot.slane %v7395_v30, 4  ;;  %v16083_v30 = vld [vmem:[%s13563_s27 + $0x34] sm:$0xf] }
 0x35b   : > { %v5985_v15 = vpop.f32.mrf.mxu0  ;;  %v4651_v12 = vpop.f32.mrf.mxu1  ;;  %v6113_v4 = vrot.slane %v18971_v21, 5  ;;  %v6114_v8 = vrot.slane %v18972_v39, 6  ;;  %v5892_v21 = vpack.c.b16 %v5876_v28, %v5875_v58  ;;  %v6834_v61 = vunpack.c.l.b16 %v6725_v6  ;;  %18973 = vst [vmem:[#allocation23_spill] sm:$0xff] %v16083_v30 }
 0x35c   : > { %v5587_v16 = vpop.f32.mrf.mxu3  ;;  %12472 = vmatmul.msk.bf16.gmra.mxu2 %vm658_vm4, %v13337_v55  ;;  %v4709_v1 = vadd.f32 %v4651_v12, %v15352_v60  ;;  %v6451_v55 = vunpack.c.l.b16 %v6093_v46  ;;  %v6119_v60 = vshrl.u32 %v16058_v26, 16  ;;  %v6122_v12 = vshll.u32 %v16058_v26, 16 }
 0x35d   : > { %v5648_v20 = vadd.f32 %v5587_v16, %v4994_v45  ;;  %v7408_v45 = vshll.u32 %v12784_v34, 16  ;;  %v7405_v16 = vor.u32 %v7404_v48, %v16052_v57  ;;  %v6111_v46 = vor.u32 %v6110_v54, %v6107_v18 }
 0x35e   : > { %v16079_v59 = vor.u32 %v6114_v8, %v6113_v4  ;;  %v6483_v39 = vpack.c.b16 %v6452_v63, %v6451_v55  ;;  %v6121_v2 = vrot.slane %v6119_v60, 5  ;;  %v6124_v38 = vrot.slane %v6122_v12, 6  ;;  %v12621_v4 = vld [vmem:[%s13563_s27 + $0x24] sm:$0xc]  ;;  %v13440_v55 = vld [vmem:[%s13563_s27 + $0x28] sm:$0xf] }
 0x35f   : > { %v4936_v9 = vpop.f32.mrf.mxu2  ;;  %v7410_v13 = vrot.slane %v7408_v45, 5  ;;  %v16085_v34 = vadd.f32 %v5985_v15, %v5648_v20  ;;  %v7401_v63 = vsel %vm13590_vm3, %v7396_v24, %v16052_v57  ;;  %v7406_v58 = vrot.slane %v7405_v16, 4  ;;  %v13441_v45 = vld [vmem:[%s13563_s27 + $0x30] sm:$0xe] }
 0x360   : > { %v4995_v31 = vadd.f32 %v4936_v9, %v16006_v52  ;;  %v6833_v9 = vunpack.c.l.b16 %v6722_v17  ;;  %v7413_v28 = vshrl.u32 %v12785_v47, 16  ;;  %v6112_v18 = vrot.slane %v6111_v46, 4 }
 0x361   : > { %12537 = vmatmul.msk.bf16.gmra.mxu3 %vm658_vm4, %v5494_v7  ;;  %v6117_v54 = vrot.slane %v16079_v59, 4  ;;  %v6728_v60 = vrot.slane %v13440_v55, 6  ;;  %v6125_v15 = vor.u32 %v6124_v38, %v6121_v2  ;;  %v18823_v20 = vshll.u32 %v16083_v30, 16 }
 0x362   : > { %v18824_v57 = vshrl.u32 %v16083_v30, 16  ;;  %v6865_v17 = vpack.c.b16 %v6834_v61, %v6833_v9  ;;  %v6131_v6 = vshll.u32 %v13441_v45, 16  ;;  %v7411_v46 = vsel %vm13590_vm3, %v7406_v58, %v7410_v13  ;;  %v16110_v9 = vld [vmem:[%s13563_s27 + $0x38] sm:$0x3] }
 0x363   : > { %v5988_v0 = vpop.f32.mrf.mxu0  ;;  %v4654_v52 = vpop.f32.mrf.mxu1  ;;  %v12637_v2 = vrot.slane %v12621_v4, 10  ;;  %v6731_v38 = vrot.slane %v16058_v26, 6  ;;  %v16116_v61 = vrot.slane %v18823_v20, 5  ;;  %v12787_v58 = vld [vmem:[%s13563_s27 + $0x38] sm:$0x1]  ;;  %v18975_v55 = vshll.u32 %v15348_v29, 16 }
 0x364   : > { %v5590_v7 = vpop.f32.mrf.mxu3  ;;  %v4710_v8 = vadd.f32 %v4654_v52, %v15373_v51  ;;  %v7416_v51 = vshll.u32 %v12785_v47, 16  ;;  %v6116_v47 = vsel %vm13875_vm11, %v6112_v18, %v16079_v59  ;;  %v7415_v52 = vrot.slane %v7413_v28, 4 }
 0x365   : > { %v5649_v48 = vadd.f32 %v5590_v7, %v4995_v31  ;;  %v6128_v31 = vshrl.u32 %v13441_v45, 16  ;;  %v7428_v13 = vrot.slane %v18824_v57, 4  ;;  %v7775_v59 = vunpack.c.l.b16 %v7411_v46  ;;  %v13338_v46 = vld [vmem:[%s13563_s27 + $0x24] sm:$0xff] }
 0x366   : > { %12586 = vmatmul.msk.bf16.gmra.mxu0 %vm658_vm4, %v5892_v21  ;;  %12604 = vmatmul.msk.bf16.vlgmr.msra.gmra.mxu1 %vm658_vm4, %v6483_v39  ;;  %v16103_v21 = vunpack.c.l.b16 %v7401_v63  ;;  %v6730_v39 = vrot.slane %v6728_v60, 4  ;;  %v6133_v28 = vrot.slane %v6131_v6, 6 }
 0x367   : > { %v4938_v12 = vpop.f32.mrf.mxu2  ;;  %v16099_v24 = vadd.f32 %v5988_v0, %v5649_v48  ;;  %v7418_v0 = vrot.slane %v7416_v51, 5  ;;  %v6130_v26 = vrot.slane %v6128_v31, 5  ;;  %v18974_v48 = vshrl.u32 %v15348_v29, 16 }
 0x368   : > { %v4996_v16 = vadd.f32 %v4938_v12, %v4709_v1  ;;  %v6126_v1 = vsel %vm13875_vm11, %v6117_v54, %v6125_v15  ;;  %v6137_v15 = vrot.slane %v18975_v55, 6  ;;  %v6142_v51 = vshrl.u32 %v16110_v9, 16 }
 0x369   : > { %v6136_v18 = vrot.slane %v18974_v48, 5  ;;  %v6145_v12 = vshll.u32 %v16110_v9, 16  ;;  %v6453_v31 = vunpack.c.l.b16 %v6116_v47  ;;  %v6454_v6 = vunpack.c.l.b16 %v6126_v1  ;;  %v12788_v1 = vld [vmem:[%s13563_s27 + $0x3c] sm:$0xf] }
 0x36a   : > { %v6729_v48 = vsel %vm13882_vm12, %v12637_v2, %v6728_v60  ;;  %v7419_v20 = vor.u32 %v7418_v0, %v7415_v52  ;;  %v7432_v29 = vshll.u32 %v12787_v58, 16  ;;  %v6134_v55 = vor.u32 %v6133_v28, %v6130_v26  ;;  %v16139_v58 = vld [vmem:[%s13563_s27 + $0x40] sm:$0xf]  ;;  %v12622_v28 = vld [vmem:[%s13563_s27 + $0x30] sm:$0xc] }
 0x36b   : > { %v5990_v7 = vpop.f32.mrf.mxu0  ;;  %v4656_v63 = vpop.f32.mrf.mxu1  ;;  %v6138_v30 = vor.u32 %v6137_v15, %v6136_v18  ;;  %v6147_v47 = vrot.slane %v6145_v12, 6  ;;  %v7806_v60 = vpack.c.b16 %v7775_v59, %v16103_v21  ;;  %v6835_v2 = vunpack.c.l.b16 %v6729_v48  ;;  %v13442_v18 = vld [vmem:[%s13563_s27 + $0x34] sm:$0xf] }
 0x36c   : > { %v5592_v4 = vpop.f32.mrf.mxu3  ;;  %12653 = vmatmul.msk.bf16.vlgmr.msra.gmra.mxu2 %vm658_vm4, %v6865_v17  ;;  %v4711_v54 = vadd.f32 %v4656_v63, %v15396_v25  ;;  %v6732_v17 = vsel %vm13882_vm12, %v6730_v39, %v6731_v38  ;;  %v7429_v25 = vor.u32 %v7428_v13, %v16116_v61  ;;  %v6484_v38 = vpack.c.b16 %v6454_v6, %v6453_v31 }
 0x36d   : > { %v5650_v45 = vadd.f32 %v5592_v4, %v4996_v16  ;;  %v6144_v16 = vrot.slane %v6142_v51, 5  ;;  %v6836_v39 = vunpack.c.l.b16 %v6732_v17  ;;  %v7420_v52 = vrot.slane %v7419_v20, 4 }
 0x36e   : > { %v7430_v0 = vrot.slane %v7429_v25, 4  ;;  %v7434_v13 = vrot.slane %v7432_v29, 5  ;;  %v6735_v4 = vrot.slane %v13442_v18, 6  ;;  %v7437_v15 = vshrl.u32 %v12788_v1, 16 }
 0x36f   : > { %v4941_v63 = vpop.f32.mrf.mxu2  ;;  %v16143_v51 = vadd.f32 %v5990_v7, %v5650_v45  ;;  %v6135_v21 = vrot.slane %v6134_v55, 4  ;;  %v6140_v59 = vrot.slane %v6138_v30, 4  ;;  %v6148_v31 = vor.u32 %v6147_v47, %v6144_v16 }
 0x370   : > { %v4997_v57 = vadd.f32 %v4941_v63, %v4710_v8  ;;  %v7440_v6 = vshll.u32 %v12788_v1, 16  ;;  %v18827_v48 = vshll.u32 %v16139_v58, 16  ;;  %v18828_v17 = vshrl.u32 %v16139_v58, 16  ;;  %v13443_v63 = vld [vmem:[%s13563_s27 + $0x3c] sm:$0xe] }
 0x371   : > { %12766 = vmatmul.msk.bf16.vlgmr.msra.gmra.mxu3 %vm658_vm4, %v13338_v46  ;;  %v6866_v25 = vpack.c.b16 %v6836_v39, %v6835_v2  ;;  %v7425_v7 = vsel %vm13590_vm3, %v7420_v52, %v16116_v61  ;;  %v12638_v45 = vrot.slane %v12622_v28, 10  ;;  %v6737_v29 = vrot.slane %v6735_v4, 4 }
 0x372   : > { %v6151_v55 = vshrl.u32 %v13443_v63, 16  ;;  %v6154_v16 = vshll.u32 %v13443_v63, 16  ;;  %v6738_v2 = vrot.slane %v16110_v9, 6  ;;  %v7439_v61 = vrot.slane %v7437_v15, 4  ;;  %v16171_v9 = vld [vmem:[%s13563_s27 + $0x44] sm:$0x3] }
 0x373   : > { %v5993_v26 = vpop.f32.mrf.mxu0  ;;  %v4659_v8 = vpop.f32.mrf.mxu1  ;;  %v6149_v39 = vsel %vm13875_vm11, %v6140_v59, %v6148_v31  ;;  %v16165_v52 = vrot.slane %v18827_v48, 5  ;;  %v6736_v31 = vsel %vm13882_vm12, %v12638_v45, %v6735_v4 }
 0x374   : > { %v5595_v12 = vpop.f32.mrf.mxu3  ;;  %v4712_v46 = vadd.f32 %v4659_v8, %v15416_v43  ;;  %v7435_v43 = vsel %vm13590_vm3, %v7430_v0, %v7434_v13  ;;  %v7452_v0 = vrot.slane %v18828_v17, 4  ;;  %v7776_v13 = vunpack.c.l.b16 %v7425_v7  ;;  %v13339_v7 = vld [vmem:[%s13563_s27 + $0x30] sm:$0xff] }
 0x375   : > { %v5651_v20 = vadd.f32 %v5595_v12, %v4997_v57  ;;  %v7777_v8 = vunpack.c.l.b16 %v7435_v43  ;;  %v6153_v18 = vrot.slane %v6151_v55, 5  ;;  %v6156_v15 = vrot.slane %v6154_v16, 6 }
 0x376   : > { %12831 = vmatmul.msk.bf16.vlgmr.msra.gmra.mxu0 %vm658_vm4, %v7806_v60  ;;  %12605 = vmatmul.msk.bf16.gmra.mxu1 %vm658_vm4, %v6484_v38  ;;  %v6139_v60 = vsel %vm13875_vm11, %v6135_v21, %v6138_v30  ;;  %v7442_v38 = vrot.slane %v7440_v6, 5  ;;  %v6456_v59 = vunpack.c.l.b16 %v6149_v39  ;;  %v18976_v55 = vshrl.u32 %v15394_v33, 16 }
 0x377   : > { %v4943_v57 = vpop.f32.mrf.mxu2  ;;  %v16156_v47 = vadd.f32 %v5993_v26, %v5651_v20  ;;  %v6455_v28 = vunpack.c.l.b16 %v6139_v60  ;;  %v6739_v20 = vsel %vm13882_vm12, %v6737_v29, %v6738_v2  ;;  %v6168_v39 = vshll.u32 %v16171_v9, 16 }
 0x378   : > { %v4998_v1 = vadd.f32 %v4943_v57, %v4711_v54  ;;  %v12790_v54 = vld [vmem:[%s13563_s27 + $0x44] sm:$0x1]  ;;  %v7443_v43 = vor.u32 %v7442_v38, %v7439_v61  ;;  %v7453_v57 = vor.u32 %v7452_v0, %v16165_v52  ;;  %v6159_v16 = vrot.slane %v18976_v55, 5 }
 0x379   : > { %v7456_v63 = vshll.u32 %v12790_v54, 16  ;;  %v6157_v45 = vor.u32 %v6156_v15, %v6153_v18  ;;  %v6485_v2 = vpack.c.b16 %v6456_v59, %v6455_v28  ;;  %v6838_v61 = vunpack.c.l.b16 %v6739_v20  ;;  %v16193_v59 = vld [vmem:[%s13563_s27 + $0x4c] sm:$0xf] }
 0x37a   : > { %v7444_v38 = vrot.slane %v7443_v43, 4  ;;  %v7454_v54 = vrot.slane %v7453_v57, 4  ;;  %v6170_v55 = vrot.slane %v6168_v39, 6  ;;  %18978 = vst [vmem:[#allocation24_spill] sm:$0xff] %v16193_v59  ;;  %v13444_v43 = vld [vmem:[%s13563_s27 + $0x40] sm:$0xf] }
 0x37b   : > { %v5995_v26 = vpop.f32.mrf.mxu0  ;;  %v4661_v30 = vpop.f32.mrf.mxu1  ;;  %v7458_v0 = vrot.slane %v7456_v63, 5  ;;  %v6158_v17 = vrot.slane %v6157_v45, 4  ;;  %v6742_v57 = vrot.slane %v13444_v43, 6  ;;  %v18830_v39 = vshrl.u32 %v16193_v59, 16 }
 0x37c   : > { %v5597_v12 = vpop.f32.mrf.mxu3  ;;  %12654 = vmatmul.msk.bf16.gmra.mxu2 %vm658_vm4, %v6866_v25  ;;  %v4713_v21 = vadd.f32 %v4661_v30, %v15442_v10  ;;  %v18977_v25 = vshll.u32 %v15394_v33, 16  ;;  %v6165_v10 = vshrl.u32 %v16171_v9, 16  ;;  %v7807_v30 = vpack.c.b16 %v7777_v8, %v7776_v13  ;;  %v12791_v8 = vld [vmem:[%s13563_s27 + $0x48] sm:$0xf] }
 0x37d   : > { %v5652_v6 = vadd.f32 %v5597_v12, %v4998_v1  ;;  %v6837_v1 = vunpack.c.l.b16 %v6736_v31  ;;  %v7449_v31 = vsel %vm13590_vm3, %v7444_v38, %v16165_v52  ;;  %v7461_v63 = vshrl.u32 %v12791_v8, 16 }
 0x37e   : > { %v6160_v60 = vrot.slane %v18977_v25, 6  ;;  %v6167_v12 = vrot.slane %v6165_v10, 5  ;;  %v7464_v10 = vshll.u32 %v12791_v8, 16  ;;  %v18829_v52 = vshll.u32 %v16193_v59, 16 }
 0x37f   : > { %v4946_v4 = vpop.f32.mrf.mxu2  ;;  %v16188_v18 = vadd.f32 %v5995_v26, %v5652_v6  ;;  %v6867_v15 = vpack.c.b16 %v6838_v61, %v6837_v1  ;;  %v7459_v26 = vsel %vm13590_vm3, %v7454_v54, %v7458_v0  ;;  %v6744_v0 = vrot.slane %v6742_v57, 4 }
 0x380   : > { %v4999_v29 = vadd.f32 %v4946_v4, %v4712_v46  ;;  %v6161_v33 = vor.u32 %v6160_v60, %v6159_v16  ;;  %v6171_v6 = vor.u32 %v6170_v55, %v6167_v12  ;;  %v13445_v4 = vld [vmem:[%s13563_s27 + $0x48] sm:$0xe]  ;;  %v7779_v1 = vunpack.c.l.b16 %v7459_v26  ;;  %v16215_v12 = vld [vmem:[%s13563_s27 + $0x50] sm:$0x3]  ;;  %v13340_v26 = vld [vmem:[%s13563_s27 + $0x3c] sm:$0xff] }
 0x381   : > { %12767 = vmatmul.msk.bf16.gmra.mxu3 %vm658_vm4, %v13339_v7  ;;  %v12623_v7 = vld [vmem:[%s13563_s27 + $0x3c] sm:$0xc]  ;;  %v6174_v45 = vshrl.u32 %v13445_v4, 16  ;;  %v6745_v54 = vrot.slane %v16171_v9, 6  ;;  %v16221_v8 = vrot.slane %v18829_v52, 5  ;;  %v6188_v43 = vshrl.u32 %v16215_v12, 16 }
 0x382   : > { %v6163_v20 = vrot.slane %v6161_v33, 4  ;;  %v12793_v9 = vld [vmem:[%s13563_s27 + $0x50] sm:$0x1] }
 0x383   : > { %v5998_v25 = vpop.f32.mrf.mxu0  ;;  %v4664_v48 = vpop.f32.mrf.mxu1  ;;  %v6190_v52 = vrot.slane %v6188_v43, 5 }
 0x384   : > { %v5600_v46 = vpop.f32.mrf.mxu3  ;;  %v4714_v13 = vadd.f32 %v4664_v48, %v15463_v49  ;;  %v6162_v48 = vsel %vm13875_vm11, %v6158_v17, %v6161_v33  ;;  %v6172_v17 = vsel %vm13875_vm11, %v6163_v20, %v6171_v6  ;;  %v7463_v33 = vrot.slane %v7461_v63, 4 }
 0x385   : > { %v5653_v28 = vadd.f32 %v5600_v46, %v4999_v29  ;;  %v7778_v29 = vunpack.c.l.b16 %v7449_v31  ;;  %v7466_v46 = vrot.slane %v7464_v10, 5  ;;  %v6458_v20 = vunpack.c.l.b16 %v6172_v17 }
 0x386   : > { %12832 = vmatmul.msk.bf16.gmra.mxu0 %vm658_vm4, %v7807_v30  ;;  %12606 = vmatmul.msk.bf16.gmra.mxu1 %vm658_vm4, %v6485_v2  ;;  %v6177_v30 = vshll.u32 %v13445_v4, 16  ;;  %v12639_v2 = vrot.slane %v12623_v7, 10  ;;  %v6176_v6 = vrot.slane %v6174_v45, 5  ;;  %v6191_v63 = vshll.u32 %v16215_v12, 16 }
 0x387   : > { %v4948_v49 = vpop.f32.mrf.mxu2  ;;  %v16206_v16 = vadd.f32 %v5998_v25, %v5653_v28  ;;  %v7476_v28 = vrot.slane %v18830_v39, 4  ;;  %v6746_v4 = vsel %vm13882_vm12, %v6744_v0, %v6745_v54  ;;  %v16243_v54 = vld [vmem:[%s13563_s27 + $0x58] sm:$0xf] }
 0x388   : > { %v5000_v60 = vadd.f32 %v4948_v49, %v4713_v21  ;;  %v6457_v21 = vunpack.c.l.b16 %v6162_v48  ;;  %v6179_v49 = vrot.slane %v6177_v30, 6  ;;  %v18979_v48 = vshrl.u32 %v15438_v14, 16  ;;  %18981 = vst [vmem:[#allocation25_spill] sm:$0xff] %v16243_v54 }
 0x389   : > { %v7467_v30 = vor.u32 %v7466_v46, %v7463_v33  ;;  %v7477_v17 = vor.u32 %v7476_v28, %v16221_v8  ;;  %v6193_v39 = vrot.slane %v6191_v63, 6  ;;  %v18834_v43 = vshrl.u32 %v16243_v54, 16  ;;  %v13447_v63 = vld [vmem:[%s13563_s27 + $0x54] sm:$0xe] }
 0x38a   : > { %v6182_v7 = vrot.slane %v18979_v48, 5  ;;  %v6486_v48 = vpack.c.b16 %v6458_v20, %v6457_v21 }
 0x38b   : > { %v6000_v61 = vpop.f32.mrf.mxu0  ;;  %v4666_v38 = vpop.f32.mrf.mxu1  ;;  %v7478_v21 = vrot.slane %v7477_v17, 4 }
 0x38c   : > { %v5602_v55 = vpop.f32.mrf.mxu3  ;;  %12655 = vmatmul.msk.bf16.gmra.mxu2 %vm658_vm4, %v6867_v15  ;;  %v4715_v25 = vadd.f32 %v4666_v38, %v15486_v23  ;;  %v18980_v15 = vshll.u32 %v15438_v14, 16  ;;  %v7480_v38 = vshll.u32 %v12793_v9, 16  ;;  %v7808_v14 = vpack.c.b16 %v7779_v1, %v7778_v29  ;;  %v13446_v9 = vld [vmem:[%s13563_s27 + $0x4c] sm:$0xf] }
 0x38d   : > { %v5654_v31 = vadd.f32 %v5602_v55, %v5000_v60  ;;  %v6743_v60 = vsel %vm13882_vm12, %v12639_v2, %v6742_v57  ;;  %v6180_v55 = vor.u32 %v6179_v49, %v6176_v6  ;;  %v12794_v57 = vld [vmem:[%s13563_s27 + $0x54] sm:$0xf]  ;;  %v7468_v1 = vrot.slane %v7467_v30, 4 }
 0x38e   : > { %v6183_v23 = vrot.slane %v18980_v15, 6  ;;  %v6839_v0 = vunpack.c.l.b16 %v6743_v60  ;;  %v7482_v28 = vrot.slane %v7480_v38, 5  ;;  %v6749_v6 = vrot.slane %v13446_v9, 6  ;;  %v18985_v9 = vld [vmem:[#allocation14_spill] sm:$0xff] }
 0x38f   : > { %v4951_v10 = vpop.f32.mrf.mxu2  ;;  %v16245_v33 = vadd.f32 %v6000_v61, %v5654_v31  ;;  %v6181_v20 = vrot.slane %v6180_v55, 4  ;;  %v7485_v49 = vshrl.u32 %v12794_v57, 16  ;;  %v6194_v61 = vor.u32 %v6193_v39, %v6190_v52  ;;  %v12624_v31 = vld [vmem:[%s13563_s27 + $0x48] sm:$0xc] }
 0x390   : > { %v5001_v45 = vadd.f32 %v4951_v10, %v4714_v13  ;;  %v16239_v15 = vor.u32 %v6183_v23, %v6182_v7  ;;  %v6840_v13 = vunpack.c.l.b16 %v6746_v4  ;;  %v7488_v23 = vshll.u32 %v12794_v57, 16 }
 0x391   : > { %12768 = vmatmul.msk.bf16.gmra.mxu3 %vm658_vm4, %v13340_v26  ;;  %v6197_v10 = vshrl.u32 %v13447_v63, 16  ;;  %v6200_v60 = vshll.u32 %v13447_v63, 16  ;;  %v7473_v52 = vsel %vm13590_vm3, %v7468_v1, %v16221_v8  ;;  %v7483_v39 = vsel %vm13590_vm3, %v7478_v21, %v7482_v28  ;;  %v18983_v21 = vld [vmem:[#allocation11_spill] sm:$0xff] }
 0x392   : > { %v6186_v7 = vrot.slane %v16239_v15, 4  ;;  %v6868_v30 = vpack.c.b16 %v6840_v13, %v6839_v0  ;;  %v6185_v17 = vsel %vm13875_vm11, %v6181_v20, %v16239_v15  ;;  %v12640_v38 = vrot.slane %v12624_v31, 10  ;;  %v13341_v63 = vld [vmem:[%s13563_s27 + $0x48] sm:$0xff] }
 0x393   : > { %v6003_v2 = vpop.f32.mrf.mxu0  ;;  %v4669_v59 = vpop.f32.mrf.mxu1  ;;  %v6752_v55 = vrot.slane %v16215_v12, 6  ;;  %v7487_v57 = vrot.slane %v7485_v49, 4  ;;  %v7500_v15 = vrot.slane %v18834_v43, 4  ;;  %v6199_v1 = vrot.slane %v6197_v10, 5 }
 0x394   : > { %v5605_v46 = vpop.f32.mrf.mxu3  ;;  %v4716_v29 = vadd.f32 %v4669_v59, %v15506_v35  ;;  %v18833_v35 = vshll.u32 %v16243_v54, 16  ;;  %v6202_v12 = vrot.slane %v6200_v60, 6  ;;  %v18984_v28 = vshrl.u32 %v18983_v21, 16 }
 0x395   : > { %v5655_v26 = vadd.f32 %v5605_v46, %v5001_v45  ;;  %v12796_v46 = vld [vmem:[%s13563_s27 + $0x5c] sm:$0x1]  ;;  %v7780_v10 = vunpack.c.l.b16 %v7473_v52  ;;  %v7781_v60 = vunpack.c.l.b16 %v7483_v39 }
 0x396   : > { %12833 = vmatmul.msk.bf16.gmra.mxu0 %vm658_vm4, %v7808_v14  ;;  %12607 = vmatmul.msk.bf16.gmra.mxu1 %vm658_vm4, %v6486_v48  ;;  %v6751_v14 = vrot.slane %v6749_v6, 4  ;;  %v16268_v48 = vld [vmem:[%s13563_s27 + $0x5c] sm:$0x3]  ;;  %v16274_v8 = vrot.slane %v18833_v35, 5  ;;  %v6459_v35 = vunpack.c.l.b16 %v6185_v17  ;;  %v7504_v54 = vshll.u32 %v12796_v46, 16 }
 0x397   : > { %v4953_v59 = vpop.f32.mrf.mxu2  ;;  %v16256_v4 = vadd.f32 %v6003_v2, %v5655_v26  ;;  %v7490_v2 = vrot.slane %v7488_v23, 5  ;;  %v6205_v26 = vrot.slane %v18984_v28, 5  ;;  %v6211_v31 = vshrl.u32 %v16268_v48, 16  ;;  %v12797_v17 = vld [vmem:[%s13563_s27 + $0x60] sm:$0xf] }
 0x398   : > { %v5002_v45 = vadd.f32 %v4953_v59, %v4715_v25  ;;  %v6195_v25 = vsel %vm13875_vm11, %v6186_v7, %v6194_v61  ;;  %v18986_v7 = vshll.u32 %v18983_v21, 16  ;;  %v6214_v23 = vshll.u32 %v16268_v48, 16 }
 0x399   : > { %18982 = vst [vmem:[#allocation26_spill] sm:$0xff] %v16256_v4  ;;  %v6460_v43 = vunpack.c.l.b16 %v6195_v25  ;;  %v6750_v28 = vsel %vm13882_vm12, %v12640_v38, %v6749_v6  ;;  %v6753_v21 = vsel %vm13882_vm12, %v6751_v14, %v6752_v55  ;;  %v6213_v52 = vrot.slane %v6211_v31, 5  ;;  %v16296_v4 = vld [vmem:[%s13563_s27 + $0x64] sm:$0xf]  ;;  %v18988_v31 = vld [vmem:[#allocation8_spill] sm:$0xff] }
 0x39a   : > { %v6206_v61 = vrot.slane %v18986_v7, 6  ;;  %v6203_v7 = vor.u32 %v6202_v12, %v6199_v1  ;;  %v6216_v39 = vrot.slane %v6214_v23, 6  ;;  %v7809_v25 = vpack.c.b16 %v7781_v60, %v7780_v10  ;;  %18987 = vst [vmem:[#allocation11_spill] sm:$0xff] %v16296_v4 }
 0x39b   : > { %v6005_v0 = vpop.f32.mrf.mxu0  ;;  %v4671_v13 = vpop.f32.mrf.mxu1  ;;  %v6841_v6 = vunpack.c.l.b16 %v6750_v28  ;;  %v6487_v38 = vpack.c.b16 %v6460_v43, %v6459_v35  ;;  %v7506_v46 = vrot.slane %v7504_v54, 5  ;;  %v7509_v12 = vshrl.u32 %v12797_v17, 16  ;;  %v12625_v43 = vld [vmem:[%s13563_s27 + $0x54] sm:$0xc] }
 0x39c   : > { %v5607_v20 = vpop.f32.mrf.mxu3  ;;  %12656 = vmatmul.msk.bf16.gmra.mxu2 %vm658_vm4, %v6868_v30  ;;  %v4717_v49 = vadd.f32 %v4671_v13, %v18985_v9  ;;  %v7491_v30 = vor.u32 %v7490_v2, %v7487_v57  ;;  %v7501_v9 = vor.u32 %v7500_v15, %v16274_v8  ;;  %v6842_v57 = vunpack.c.l.b16 %v6753_v21 }
 0x39d   : > { %v5656_v59 = vadd.f32 %v5607_v20, %v5002_v45  ;;  %v6207_v20 = vor.u32 %v6206_v61, %v6205_v26  ;;  %v6217_v35 = vor.u32 %v6216_v39, %v6213_v52  ;;  %v7512_v28 = vshll.u32 %v12797_v17, 16 }
 0x39e   : > { %v7492_v2 = vrot.slane %v7491_v30, 4  ;;  %v7502_v15 = vrot.slane %v7501_v9, 4  ;;  %v18837_v54 = vshll.u32 %v16296_v4, 16  ;;  %v18838_v30 = vshrl.u32 %v16296_v4, 16 }
 0x39f   : > { %v4956_v13 = vpop.f32.mrf.mxu2  ;;  %v16299_v26 = vadd.f32 %v6005_v0, %v5656_v59  ;;  %v6209_v10 = vrot.slane %v6207_v20, 4  ;;  %v6869_v0 = vpack.c.b16 %v6842_v57, %v6841_v6  ;;  %v12641_v9 = vrot.slane %v12625_v43, 10 }
 0x3a0   : > { %v5003_v45 = vadd.f32 %v4956_v13, %v4716_v29  ;;  %v13448_v29 = vld [vmem:[%s13563_s27 + $0x58] sm:$0xf]  ;;  %v7497_v59 = vsel %vm13590_vm3, %v7492_v2, %v16274_v8  ;;  %v7507_v21 = vsel %vm13590_vm3, %v7502_v15, %v7506_v46  ;;  %v6759_v17 = vrot.slane %v16268_v48, 6  ;;  %v12799_v2 = vld [vmem:[%s13563_s27 + $0x68] sm:$0x1] }
 0x3a1   : > { %12769 = vmatmul.msk.bf16.gmra.mxu3 %vm658_vm4, %v13341_v63  ;;  %v6756_v1 = vrot.slane %v13448_v29, 6  ;;  %v6204_v63 = vrot.slane %v6203_v7, 4  ;;  %v6218_v6 = vsel %vm13875_vm11, %v6209_v10, %v6217_v35  ;;  %v16321_v8 = vrot.slane %v18837_v54, 5  ;;  %v16334_v35 = vld [vmem:[%s13563_s27 + $0x68] sm:$0x3] }
 0x3a2   : > { %v7524_v57 = vrot.slane %v18838_v30, 4  ;;  %v7782_v48 = vunpack.c.l.b16 %v7497_v59 }
 0x3a3   : > { %v6008_v14 = vpop.f32.mrf.mxu0  ;;  %v4674_v55 = vpop.f32.mrf.mxu1  ;;  %v6758_v7 = vrot.slane %v6756_v1, 4  ;;  %v6208_v39 = vsel %vm13875_vm11, %v6204_v63, %v6207_v20  ;;  %v6757_v63 = vsel %vm13882_vm12, %v12641_v9, %v6756_v1 }
 0x3a4   : > { %v5610_v61 = vpop.f32.mrf.mxu3  ;;  %v4718_v23 = vadd.f32 %v4674_v55, %v18988_v31  ;;  %v7783_v55 = vunpack.c.l.b16 %v7507_v21  ;;  %v6461_v29 = vunpack.c.l.b16 %v6208_v39  ;;  %v6462_v31 = vunpack.c.l.b16 %v6218_v6  ;;  %v18990_v39 = vld [vmem:[#allocation13_spill] sm:$0xff] }
 0x3a5   : > { %v5657_v60 = vadd.f32 %v5610_v61, %v5003_v45  ;;  %v6760_v10 = vsel %vm13882_vm12, %v6758_v7, %v6759_v17  ;;  %v7525_v59 = vor.u32 %v7524_v57, %v16321_v8  ;;  %v6234_v7 = vshrl.u32 %v16334_v35, 16 }
 0x3a6   : > { %12834 = vmatmul.msk.bf16.gmra.mxu0 %vm658_vm4, %v7809_v25  ;;  %12608 = vmatmul.msk.bf16.gmra.mxu1 %vm658_vm4, %v6487_v38  ;;  %v7511_v25 = vrot.slane %v7509_v12, 4  ;;  %v7514_v38 = vrot.slane %v7512_v28, 5  ;;  %v6237_v17 = vshll.u32 %v16334_v35, 16  ;;  %v6844_v57 = vunpack.c.l.b16 %v6760_v10 }
 0x3a7   : > { %v4958_v13 = vpop.f32.mrf.mxu2  ;;  %v16312_v45 = vadd.f32 %v6008_v14, %v5657_v60  ;;  %v13342_v60 = vld [vmem:[%s13563_s27 + $0x54] sm:$0xff]  ;;  %v6236_v30 = vrot.slane %v6234_v7, 5 }
 0x3a8   : > { %v5004_v52 = vadd.f32 %v4958_v13, %v4717_v49  ;;  %v13449_v49 = vld [vmem:[%s13563_s27 + $0x60] sm:$0xe]  ;;  %v7515_v28 = vor.u32 %v7514_v38, %v7511_v25  ;;  %v7528_v13 = vshll.u32 %v12799_v2, 16  ;;  %v6488_v25 = vpack.c.b16 %v6462_v31, %v6461_v29  ;;  %v16350_v31 = vld [vmem:[%s13563_s27 + $0x70] sm:$0xf] }
 0x3a9   : > { %18989 = vst [vmem:[#allocation14_spill] sm:$0xff] %v16312_v45  ;;  %v6220_v46 = vshrl.u32 %v13449_v49, 16  ;;  %v6223_v20 = vshll.u32 %v13449_v49, 16  ;;  %v18992_v49 = vshll.u32 %v18990_v39, 16  ;;  %v6843_v38 = vunpack.c.l.b16 %v6757_v63 }
 0x3aa   : > { %v7516_v2 = vrot.slane %v7515_v28, 4  ;;  %v6239_v4 = vrot.slane %v6237_v17, 6  ;;  %18994 = vst [vmem:[#allocation8_spill] sm:$0xff] %v16350_v31 }
 0x3ab   : > { %v6010_v14 = vpop.f32.mrf.mxu0  ;;  %v4676_v15 = vpop.f32.mrf.mxu1  ;;  %v6222_v21 = vrot.slane %v6220_v46, 5  ;;  %v6229_v1 = vrot.slane %v18992_v49, 6  ;;  %v7526_v46 = vrot.slane %v7525_v59, 4 }
 0x3ac   : > { %v5612_v12 = vpop.f32.mrf.mxu3  ;;  %12657 = vmatmul.msk.bf16.gmra.mxu2 %vm658_vm4, %v6869_v0  ;;  %v4719_v61 = vadd.f32 %v4676_v15, %v15576_v41  ;;  %v6225_v0 = vrot.slane %v6223_v20, 6  ;;  %v18991_v41 = vshrl.u32 %v18990_v39, 16  ;;  %v7810_v15 = vpack.c.b16 %v7783_v55, %v7782_v48  ;;  %v18993_v55 = vld [vmem:[#allocation12_spill] sm:$0xff] }
 0x3ad   : > { %v5658_v43 = vadd.f32 %v5612_v12, %v5004_v52  ;;  %v12800_v12 = vld [vmem:[%s13563_s27 + $0x6c] sm:$0xf]  ;;  %v7530_v20 = vrot.slane %v7528_v13, 5  ;;  %v7521_v28 = vsel %vm13590_vm3, %v7516_v2, %v16321_v8 }
 0x3ae   : > { %v6228_v6 = vrot.slane %v18991_v41, 5  ;;  %v6226_v41 = vor.u32 %v6225_v0, %v6222_v21  ;;  %v7533_v45 = vshrl.u32 %v12800_v12, 16  ;;  %v7536_v63 = vshll.u32 %v12800_v12, 16 }
 0x3af   : > { %v4961_v9 = vpop.f32.mrf.mxu2  ;;  %v16346_v48 = vadd.f32 %v6010_v14, %v5658_v43  ;;  %v7531_v14 = vsel %vm13590_vm3, %v7526_v46, %v7530_v20  ;;  %v6240_v0 = vor.u32 %v6239_v4, %v6236_v30  ;;  %v6766_v20 = vrot.slane %v16334_v35, 6 }
 0x3b0   : > { %v5005_v52 = vadd.f32 %v4961_v9, %v4718_v23  ;;  %v6230_v39 = vor.u32 %v6229_v1, %v6228_v6  ;;  %v6227_v43 = vrot.slane %v6226_v41, 4  ;;  %v12626_v6 = vld [vmem:[%s13563_s27 + $0x60] sm:$0xc]  ;;  %v7535_v1 = vrot.slane %v7533_v45, 4 }
 0x3b1   : > { %12770 = vmatmul.msk.bf16.gmra.mxu3 %vm658_vm4, %v13342_v60  ;;  %v6870_v60 = vpack.c.b16 %v6844_v57, %v6843_v38  ;;  %v18841_v9 = vshll.u32 %v16350_v31, 16  ;;  %v7538_v17 = vrot.slane %v7536_v63, 5  ;;  %v7784_v38 = vunpack.c.l.b16 %v7521_v28 }
 0x3b2   : > { %v6232_v59 = vrot.slane %v6230_v39, 4  ;;  %v7785_v57 = vunpack.c.l.b16 %v7531_v14  ;;  %v12642_v2 = vrot.slane %v12626_v6, 10  ;;  %v6231_v45 = vsel %vm13875_vm11, %v6227_v43, %v6230_v39 }
 0x3b3   : > { %v6013_v49 = vpop.f32.mrf.mxu0  ;;  %v4679_v54 = vpop.f32.mrf.mxu1  ;;  %v16373_v41 = vrot.slane %v18841_v9, 5  ;;  %v7539_v28 = vor.u32 %v7538_v17, %v7535_v1  ;;  %v6463_v9 = vunpack.c.l.b16 %v6231_v45 }
 0x3b4   : > { %v5615_v23 = vpop.f32.mrf.mxu3  ;;  %v4720_v29 = vadd.f32 %v4679_v54, %v18993_v55  ;;  %v13450_v54 = vld [vmem:[%s13563_s27 + $0x64] sm:$0xf]  ;;  %v18996_v55 = vld [vmem:[#allocation3_spill] sm:$0xff] }
 0x3b5   : > { %v5659_v10 = vadd.f32 %v5615_v23, %v5005_v52  ;;  %v6763_v13 = vrot.slane %v13450_v54, 6  ;;  %v13451_v52 = vld [vmem:[%s13563_s27 + $0x6c] sm:$0xe]  ;;  %v18997_v54 = vld [vmem:[#allocation10_spill] sm:$0xff] }
 0x3b6   : > { %12835 = vmatmul.msk.bf16.gmra.mxu0 %vm658_vm4, %v7810_v15  ;;  %12609 = vmatmul.msk.bf16.gmra.mxu1 %vm658_vm4, %v6488_v25  ;;  %v18842_v15 = vshrl.u32 %v16350_v31, 16  ;;  %v6243_v12 = vshrl.u32 %v13451_v52, 16  ;;  %v6246_v25 = vshll.u32 %v13451_v52, 16  ;;  %v18999_v6 = vshll.u32 %v18997_v54, 16 }
 0x3b7   : > { %v4963_v21 = vpop.f32.mrf.mxu2  ;;  %v16362_v7 = vadd.f32 %v6013_v49, %v5659_v10  ;;  %v6765_v46 = vrot.slane %v6763_v13, 4  ;;  %v16376_v49 = vld [vmem:[%s13563_s27 + $0x74] sm:$0x3] }
 0x3b8   : > { %v5006_v8 = vadd.f32 %v4963_v21, %v4719_v61  ;;  %v6241_v61 = vsel %vm13875_vm11, %v6232_v59, %v6240_v0  ;;  %v12802_v10 = vld [vmem:[%s13563_s27 + $0x74] sm:$0x1]  ;;  %v7548_v39 = vrot.slane %v18842_v15, 4  ;;  %v6245_v14 = vrot.slane %v6243_v12, 5  ;;  %v13343_v59 = vld [vmem:[%s13563_s27 + $0x60] sm:$0xff] }
 0x3b9   : > { %18995 = vst [vmem:[#allocation13_spill] sm:$0xff] %v16362_v7  ;;  %v6248_v35 = vrot.slane %v6246_v25, 6  ;;  %v18998_v21 = vshrl.u32 %v18997_v54, 16  ;;  %v6252_v52 = vrot.slane %v18999_v6, 6  ;;  %v6260_v1 = vshll.u32 %v16376_v49, 16 }
 0x3ba   : > { %v6764_v12 = vsel %vm13882_vm12, %v12642_v2, %v6763_v13  ;;  %v6767_v25 = vsel %vm13882_vm12, %v6765_v46, %v6766_v20  ;;  %v7549_v54 = vor.u32 %v7548_v39, %v16373_v41  ;;  %v7811_v6 = vpack.c.b16 %v7785_v57, %v7784_v38 }
 0x3bb   : > { %v6015_v4 = vpop.f32.mrf.mxu0  ;;  %v4681_v30 = vpop.f32.mrf.mxu1  ;;  %v6251_v0 = vrot.slane %v18998_v21, 5  ;;  %v6249_v45 = vor.u32 %v6248_v35, %v6245_v14  ;;  %v12803_v21 = vld [vmem:[%s13563_s27 + $0x78] sm:$0xf]  ;;  %v6262_v7 = vrot.slane %v6260_v1, 6  ;;  %v6845_v2 = vunpack.c.l.b16 %v6764_v12  ;;  %v19001_v14 = vld [vmem:[#allocation4_spill] sm:$0xff] }
 0x3bc   : > { %v5617_v23 = vpop.f32.mrf.mxu3  ;;  %12658 = vmatmul.msk.bf16.gmra.mxu2 %vm658_vm4, %v6870_v60  ;;  %v4721_v63 = vadd.f32 %v4681_v30, %v18996_v55  ;;  %v6464_v60 = vunpack.c.l.b16 %v6241_v61  ;;  %v6257_v30 = vshrl.u32 %v16376_v49, 16  ;;  %v7540_v55 = vrot.slane %v7539_v28, 4 }
 0x3bd   : > { %v5660_v43 = vadd.f32 %v5617_v23, %v5006_v8  ;;  %v7552_v8 = vshll.u32 %v12802_v10, 16  ;;  %v16396_v61 = vor.u32 %v6252_v52, %v6251_v0  ;;  %v6846_v46 = vunpack.c.l.b16 %v6767_v25  ;;  %v16400_v10 = vld [vmem:[%s13563_s27 + $0x7c] sm:$0xf] }
 0x3be   : > { %v6489_v15 = vpack.c.b16 %v6464_v60, %v6463_v9  ;;  %v6259_v31 = vrot.slane %v6257_v30, 5  ;;  %19000 = vst [vmem:[#allocation12_spill] sm:$0xff] %v16400_v10  ;;  %v7545_v9 = vsel %vm13590_vm3, %v7540_v55, %v16373_v41  ;;  %v7550_v38 = vrot.slane %v7549_v54, 4  ;;  %v12627_v60 = vld [vmem:[%s13563_s27 + $0x6c] sm:$0xc] }
 0x3bf   : > { %v4966_v17 = vpop.f32.mrf.mxu2  ;;  %v7554_v20 = vrot.slane %v7552_v8, 5  ;;  %v16402_v28 = vadd.f32 %v6015_v4, %v5660_v43  ;;  %v7557_v57 = vshrl.u32 %v12803_v21, 16  ;;  %v6250_v0 = vrot.slane %v6249_v45, 4  ;;  %v13452_v30 = vld [vmem:[%s13563_s27 + $0x70] sm:$0xf] }
 0x3c0   : > { %v5007_v23 = vadd.f32 %v4966_v17, %v4720_v29  ;;  %v6255_v52 = vrot.slane %v16396_v61, 4  ;;  %v6770_v1 = vrot.slane %v13452_v30, 6  ;;  %v6263_v4 = vor.u32 %v6262_v7, %v6259_v31 }
 0x3c1   : > { %12771 = vmatmul.msk.bf16.gmra.mxu3 %vm658_vm4, %v13343_v59  ;;  %v7560_v43 = vshll.u32 %v12803_v21, 16  ;;  %v18845_v17 = vshll.u32 %v16400_v10, 16  ;;  %v18846_v41 = vshrl.u32 %v16400_v10, 16  ;;  %v6871_v8 = vpack.c.b16 %v6846_v46, %v6845_v2  ;;  %v16427_v46 = vld [vmem:[%s13563_s27 + $0x80] sm:$0x3] }
 0x3c2   : > { %v12643_v31 = vrot.slane %v12627_v60, 10  ;;  %v6254_v7 = vsel %vm13875_vm11, %v6250_v0, %v16396_v61  ;;  %v6772_v21 = vrot.slane %v6770_v1, 4  ;;  %v7559_v2 = vrot.slane %v7557_v57, 4 }
 0x3c3   : > { %v6018_v13 = vpop.f32.mrf.mxu0  ;;  %v4684_v29 = vpop.f32.mrf.mxu1 }
 0x3c4   : > { %v5620_v39 = vpop.f32.mrf.mxu3  ;;  %v4722_v59 = vadd.f32 %v4684_v29, %v19001_v14  ;;  %v6773_v29 = vrot.slane %v16376_v49, 6 }
 0x3c5   : > { %v5661_v35 = vadd.f32 %v5620_v39, %v5007_v23  ;;  %v13453_v23 = vld [vmem:[%s13563_s27 + $0x78] sm:$0xe]  ;;  %v7572_v39 = vrot.slane %v18846_v41, 4 }
 0x3c6   : > { %12836 = vmatmul.msk.bf16.gmra.mxu0 %vm658_vm4, %v7811_v6  ;;  %12610 = vmatmul.msk.bf16.gmra.mxu1 %vm658_vm4, %v6489_v15  ;;  %v6266_v25 = vshrl.u32 %v13453_v23, 16  ;;  %v6269_v55 = vshll.u32 %v13453_v23, 16  ;;  %v7555_v6 = vsel %vm13590_vm3, %v7550_v38, %v7554_v20  ;;  %v16420_v15 = vunpack.c.l.b16 %v7545_v9  ;;  %v12805_v38 = vld [vmem:[%s13563_s27 + $0x80] sm:$0x1] }
 0x3c7   : > { %v4968_v12 = vpop.f32.mrf.mxu2  ;;  %v16416_v54 = vadd.f32 %v6018_v13, %v5661_v35  ;;  %v7562_v13 = vrot.slane %v7560_v43, 5  ;;  %v16433_v20 = vrot.slane %v18845_v17, 5  ;;  %v7787_v61 = vunpack.c.l.b16 %v7555_v6  ;;  %v13344_v17 = vld [vmem:[%s13563_s27 + $0x6c] sm:$0xff] }
 0x3c8   : > { %v5008_v45 = vadd.f32 %v4968_v12, %v4721_v63  ;;  %v6264_v63 = vsel %vm13875_vm11, %v6255_v52, %v6263_v4  ;;  %v6268_v49 = vrot.slane %v6266_v25, 5  ;;  %v6271_v57 = vrot.slane %v6269_v55, 6  ;;  %v19004_v52 = vld [vmem:[#allocation6_spill] sm:$0xff] }
 0x3c9   : > { %19002 = vst [vmem:[#allocation3_spill] sm:$0xff] %v16416_v54  ;;  %v19003_v35 = vshrl.u32 %v15618_v11, 16  ;;  %v19005_v4 = vshll.u32 %v15618_v11, 16  ;;  %v6280_v12 = vshrl.u32 %v16427_v46, 16  ;;  %v6283_v23 = vshll.u32 %v16427_v46, 16 }
 0x3ca   : > { %v6465_v25 = vunpack.c.l.b16 %v6254_v7  ;;  %v6466_v55 = vunpack.c.l.b16 %v6264_v63  ;;  %v7563_v41 = vor.u32 %v7562_v13, %v7559_v2  ;;  %v7576_v11 = vshll.u32 %v12805_v38, 16  ;;  %v12806_v63 = vld [vmem:[%s13563_s27 + $0x84] sm:$0xf]  ;;  %v16456_v38 = vld [vmem:[%s13563_s27 + $0x88] sm:$0xf] }
 0x3cb   : > { %v6020_v14 = vpop.f32.mrf.mxu0  ;;  %v4686_v9 = vpop.f32.mrf.mxu1  ;;  %v6274_v0 = vrot.slane %v19003_v35, 5  ;;  %v6275_v43 = vrot.slane %v19005_v4, 6  ;;  %v6771_v35 = vsel %vm13882_vm12, %v12643_v31, %v6770_v1  ;;  %v6272_v4 = vor.u32 %v6271_v57, %v6268_v49  ;;  %19006 = vst [vmem:[#allocation10_spill] sm:$0xff] %v16456_v38  ;;  %v12628_v57 = vld [vmem:[%s13563_s27 + $0x78] sm:$0xc] }
 0x3cc   : > { %v5622_v60 = vpop.f32.mrf.mxu3  ;;  %12659 = vmatmul.msk.bf16.gmra.mxu2 %vm658_vm4, %v6871_v8  ;;  %v4723_v30 = vadd.f32 %v4686_v9, %v19004_v52  ;;  %v6774_v8 = vsel %vm13882_vm12, %v6772_v21, %v6773_v29  ;;  %v7573_v9 = vor.u32 %v7572_v39, %v16433_v20  ;;  %v6285_v7 = vrot.slane %v6283_v23, 6 }
 0x3cd   : > { %v5662_v6 = vadd.f32 %v5622_v60, %v5008_v45  ;;  %v6276_v54 = vor.u32 %v6275_v43, %v6274_v0  ;;  %v6282_v45 = vrot.slane %v6280_v12, 5  ;;  %v7812_v1 = vpack.c.b16 %v7787_v61, %v16420_v15  ;;  %v13454_v0 = vld [vmem:[%s13563_s27 + $0x7c] sm:$0xf] }
 0x3ce   : > { %v6847_v31 = vunpack.c.l.b16 %v6771_v35  ;;  %v6848_v21 = vunpack.c.l.b16 %v6774_v8  ;;  %v6490_v29 = vpack.c.b16 %v6466_v55, %v6465_v25  ;;  %v7564_v2 = vrot.slane %v7563_v41, 4 }
 0x3cf   : > { %v4971_v52 = vpop.f32.mrf.mxu2  ;;  %v7574_v13 = vrot.slane %v7573_v9, 4  ;;  %v7578_v39 = vrot.slane %v7576_v11, 5  ;;  %v6777_v60 = vrot.slane %v13454_v0, 6  ;;  %v7581_v43 = vshrl.u32 %v12806_v63, 16 }
 0x3d0   : > { %v5009_v10 = vadd.f32 %v4971_v52, %v4722_v59  ;;  %v16460_v12 = vadd.f32 %v6020_v14, %v5662_v6  ;;  %v6273_v15 = vrot.slane %v6272_v4, 4  ;;  %v6278_v61 = vrot.slane %v6276_v54, 4 }
 0x3d1   : > { %12772 = vmatmul.msk.bf16.gmra.mxu3 %vm658_vm4, %v13344_v17  ;;  %v19007_v17 = vld [vmem:[#allocation7_spill] sm:$0xff]  ;;  %v6286_v25 = vor.u32 %v6285_v7, %v6282_v45  ;;  %v7584_v55 = vshll.u32 %v12806_v63, 16  ;;  %v18849_v35 = vshll.u32 %v16456_v38, 16  ;;  %v18850_v8 = vshrl.u32 %v16456_v38, 16  ;;  %v13455_v45 = vld [vmem:[%s13563_s27 + $0x84] sm:$0xe] }
 0x3d2   : > { %v6872_v9 = vpack.c.b16 %v6848_v21, %v6847_v31  ;;  %v7569_v14 = vsel %vm13590_vm3, %v7564_v2, %v16433_v20  ;;  %v7579_v6 = vsel %vm13590_vm3, %v7574_v13, %v7578_v39  ;;  %v12644_v11 = vrot.slane %v12628_v57, 10 }
 0x3d3   : > { %v6023_v49 = vpop.f32.mrf.mxu0  ;;  %v4689_v59 = vpop.f32.mrf.mxu1  ;;  %v6779_v4 = vrot.slane %v6777_v60, 4  ;;  %v6289_v7 = vshrl.u32 %v13455_v45, 16  ;;  %v6292_v63 = vshll.u32 %v13455_v45, 16  ;;  %v6277_v31 = vsel %vm13875_vm11, %v6273_v15, %v6276_v54 }
 0x3d4   : > { %v5625_v23 = vpop.f32.mrf.mxu3  ;;  %v4724_v52 = vadd.f32 %v4689_v59, %v19007_v17  ;;  %v6780_v21 = vrot.slane %v16427_v46, 6  ;;  %v7583_v20 = vrot.slane %v7581_v43, 4  ;;  %v7586_v2 = vrot.slane %v7584_v55, 5  ;;  %v16488_v46 = vld [vmem:[%s13563_s27 + $0x8c] sm:$0x3] }
 0x3d5   : > { %v5663_v41 = vadd.f32 %v5625_v23, %v5009_v10  ;;  %v16482_v13 = vrot.slane %v18849_v35, 5  ;;  %v7596_v39 = vrot.slane %v18850_v8, 4  ;;  %v7789_v0 = vunpack.c.l.b16 %v7579_v6  ;;  %v13345_v6 = vld [vmem:[%s13563_s27 + $0x78] sm:$0xff] }
 0x3d6   : > { %12837 = vmatmul.msk.bf16.gmra.mxu0 %vm658_vm4, %v7812_v1  ;;  %12611 = vmatmul.msk.bf16.gmra.mxu1 %vm658_vm4, %v6490_v29  ;;  %v6287_v29 = vsel %vm13875_vm11, %v6278_v61, %v6286_v25  ;;  %v6467_v23 = vunpack.c.l.b16 %v6277_v31  ;;  %v6291_v43 = vrot.slane %v6289_v7, 5  ;;  %v6294_v17 = vrot.slane %v6292_v63, 6  ;;  %v19009_v7 = vld [vmem:[#allocation5_spill] sm:$0xff] }
 0x3d7   : > { %v4973_v10 = vpop.f32.mrf.mxu2  ;;  %v16473_v59 = vadd.f32 %v6023_v49, %v5663_v41  ;;  %v7788_v49 = vunpack.c.l.b16 %v7569_v14  ;;  %v6468_v25 = vunpack.c.l.b16 %v6287_v29  ;;  %v6778_v41 = vsel %vm13882_vm12, %v12644_v11, %v6777_v60 }
 0x3d8   : > { %v5010_v1 = vadd.f32 %v4973_v10, %v4723_v30  ;;  %v12808_v30 = vld [vmem:[%s13563_s27 + $0x8c] sm:$0x1]  ;;  %v6781_v55 = vsel %vm13882_vm12, %v6779_v4, %v6780_v21  ;;  %v7587_v10 = vor.u32 %v7586_v2, %v7583_v20  ;;  %v7597_v45 = vor.u32 %v7596_v39, %v16482_v13 }
 0x3d9   : > { %19008 = vst [vmem:[#allocation4_spill] sm:$0xff] %v16473_v59  ;;  %v7600_v31 = vshll.u32 %v12808_v30, 16  ;;  %v19010_v63 = vshrl.u32 %v19009_v7, 16  ;;  %v6306_v29 = vshll.u32 %v16488_v46, 16  ;;  %v6295_v11 = vor.u32 %v6294_v17, %v6291_v43 }
 0x3da   : > { %v6491_v21 = vpack.c.b16 %v6468_v25, %v6467_v23  ;;  %v6850_v20 = vunpack.c.l.b16 %v6781_v55  ;;  %v7588_v2 = vrot.slane %v7587_v10, 4  ;;  %v7598_v30 = vrot.slane %v7597_v45, 4  ;;  %v16510_v25 = vld [vmem:[%s13563_s27 + $0x94] sm:$0xf]  ;;  %v12629_v55 = vld [vmem:[%s13563_s27 + $0x84] sm:$0xc] }
 0x3db   : > { %v6025_v57 = vpop.f32.mrf.mxu0  ;;  %v4691_v54 = vpop.f32.mrf.mxu1  ;;  %v6297_v35 = vrot.slane %v19010_v63, 5  ;;  %v7602_v39 = vrot.slane %v7600_v31, 5  ;;  %v6308_v63 = vrot.slane %v6306_v29, 6  ;;  %v6296_v59 = vrot.slane %v6295_v11, 4  ;;  %19012 = vst [vmem:[#allocation6_spill] sm:$0xff] %v16510_v25 }
 0x3dc   : > { %v5627_v15 = vpop.f32.mrf.mxu3  ;;  %12660 = vmatmul.msk.bf16.gmra.mxu2 %vm658_vm4, %v6872_v9  ;;  %v4725_v61 = vadd.f32 %v4691_v54, %v15712_v44  ;;  %v19011_v9 = vshll.u32 %v19009_v7, 16  ;;  %v6303_v44 = vshrl.u32 %v16488_v46, 16  ;;  %v7813_v54 = vpack.c.b16 %v7789_v0, %v7788_v49  ;;  %v12809_v0 = vld [vmem:[%s13563_s27 + $0x90] sm:$0xf] }
 0x3dd   : > { %v5664_v14 = vadd.f32 %v5627_v15, %v5010_v1  ;;  %v6849_v1 = vunpack.c.l.b16 %v6778_v41  ;;  %v7605_v10 = vshrl.u32 %v12809_v0, 16  ;;  %v18854_v29 = vshrl.u32 %v16510_v25, 16 }
 0x3de   : > { %v6298_v8 = vrot.slane %v19011_v9, 6  ;;  %v6305_v7 = vrot.slane %v6303_v44, 5  ;;  %v7608_v44 = vshll.u32 %v12809_v0, 16 }
 0x3df   : > { %v4976_v60 = vpop.f32.mrf.mxu2  ;;  %v16505_v43 = vadd.f32 %v6025_v57, %v5664_v14  ;;  %v6873_v17 = vpack.c.b16 %v6850_v20, %v6849_v1  ;;  %v13456_v14 = vld [vmem:[%s13563_s27 + $0x88] sm:$0xf] }
 0x3e0   : > { %v5011_v4 = vadd.f32 %v4976_v60, %v4724_v52  ;;  %v6299_v15 = vor.u32 %v6298_v8, %v6297_v35  ;;  %v7593_v35 = vsel %vm13590_vm3, %v7588_v2, %v16482_v13  ;;  %v7603_v8 = vsel %vm13590_vm3, %v7598_v30, %v7602_v39  ;;  %v13457_v60 = vld [vmem:[%s13563_s27 + $0x90] sm:$0xe] }
 0x3e1   : > { %12773 = vmatmul.msk.bf16.gmra.mxu3 %vm658_vm4, %v13345_v6  ;;  %v6309_v41 = vor.u32 %v6308_v63, %v6305_v7  ;;  %v6784_v6 = vrot.slane %v13456_v14, 6  ;;  %v18853_v13 = vshll.u32 %v16510_v25, 16  ;;  %v6312_v11 = vshrl.u32 %v13457_v60, 16  ;;  %v16532_v7 = vld [vmem:[%s13563_s27 + $0x98] sm:$0x3] }
 0x3e2   : > { %v6301_v57 = vrot.slane %v6299_v15, 4  ;;  %v7791_v1 = vunpack.c.l.b16 %v7603_v8  ;;  %v6787_v30 = vrot.slane %v16488_v46, 6  ;;  %v13346_v8 = vld [vmem:[%s13563_s27 + $0x84] sm:$0xff]  ;;  %v12811_v46 = vld [vmem:[%s13563_s27 + $0x98] sm:$0x1]  ;;  %v6326_v14 = vshrl.u32 %v16532_v7, 16 }
 0x3e3   : > { %v6028_v9 = vpop.f32.mrf.mxu0  ;;  %v6559_v38 = vpop.f32.mrf.mxu1  ;;  %v6786_v39 = vrot.slane %v6784_v6, 4  ;;  %v16538_v0 = vrot.slane %v18853_v13, 5 }
 0x3e4   : > { %v5630_v52 = vpop.f32.mrf.mxu3  ;;  %v6639_v49 = vadd.f32 %v6559_v38, %v15733_v19  ;;  %v6300_v38 = vsel %vm13875_vm11, %v6296_v59, %v6299_v15  ;;  %v6310_v59 = vsel %vm13875_vm11, %v6301_v57, %v6309_v41  ;;  %v7607_v15 = vrot.slane %v7605_v10, 4 }
 0x3e5   : > { %v5665_v23 = vadd.f32 %v5630_v52, %v5011_v4  ;;  %v7790_v4 = vunpack.c.l.b16 %v7593_v35  ;;  %v7610_v52 = vrot.slane %v7608_v44, 5  ;;  %v6470_v57 = vunpack.c.l.b16 %v6310_v59 }
 0x3e6   : > { %12838 = vmatmul.msk.bf16.gmra.mxu0 %vm658_vm4, %v7813_v54  ;;  %12612 = vmatmul.msk.bf16.gmra.mxu1 %vm658_vm4, %v6491_v21  ;;  %v6315_v54 = vshll.u32 %v13457_v60, 16  ;;  %v12645_v21 = vrot.slane %v12629_v55, 10  ;;  %v6314_v41 = vrot.slane %v6312_v11, 5  ;;  %v6329_v10 = vshll.u32 %v16532_v7, 16 }
 0x3e7   : > { %v4978_v19 = vpop.f32.mrf.mxu2  ;;  %v16523_v45 = vadd.f32 %v6028_v9, %v5665_v23  ;;  %v7620_v23 = vrot.slane %v18854_v29, 4  ;;  %v6788_v60 = vsel %vm13882_vm12, %v6786_v39, %v6787_v30  ;;  %v6328_v13 = vrot.slane %v6326_v14, 5  ;;  %v16560_v30 = vld [vmem:[%s13563_s27 + $0xa0] sm:$0xf] }
 0x3e8   : > { %v5012_v31 = vadd.f32 %v4978_v19, %v4725_v61  ;;  %v6469_v61 = vunpack.c.l.b16 %v6300_v38  ;;  %v6317_v19 = vrot.slane %v6315_v54, 6  ;;  %v19013_v38 = vshrl.u32 %v15708_v27, 16  ;;  %19015 = vst [vmem:[#allocation7_spill] sm:$0xff] %v16560_v30 }
 0x3e9   : > { %v7611_v54 = vor.u32 %v7610_v52, %v7607_v15  ;;  %v7621_v59 = vor.u32 %v7620_v23, %v16538_v0  ;;  %v6331_v29 = vrot.slane %v6329_v10, 6  ;;  %v19017_v23 = vld [vmem:[#allocation15_spill] sm:$0xff] }
 0x3ea   : > { %v6320_v55 = vrot.slane %v19013_v38, 5  ;;  %v6492_v38 = vpack.c.b16 %v6470_v57, %v6469_v61 }
 0x3eb   : > { %v6030_v20 = vpop.f32.mrf.mxu0  ;;  %v6561_v2 = vpop.f32.mrf.mxu1  ;;  %v7622_v61 = vrot.slane %v7621_v59, 4 }
 0x3ec   : > { %v5632_v63 = vpop.f32.mrf.mxu3  ;;  %12661 = vmatmul.msk.bf16.gmra.mxu2 %vm658_vm4, %v6873_v17  ;;  %v6640_v9 = vadd.f32 %v6561_v2, %v15756_v62  ;;  %v19014_v17 = vshll.u32 %v15708_v27, 16  ;;  %v7624_v2 = vshll.u32 %v12811_v46, 16  ;;  %v7814_v27 = vpack.c.b16 %v7791_v1, %v7790_v4 }
 0x3ed   : > { %v5666_v35 = vadd.f32 %v5632_v63, %v5012_v31  ;;  %v6785_v31 = vsel %vm13882_vm12, %v12645_v21, %v6784_v6  ;;  %v6318_v63 = vor.u32 %v6317_v19, %v6314_v41  ;;  %v12812_v6 = vld [vmem:[%s13563_s27 + $0x9c] sm:$0xf]  ;;  %v7612_v1 = vrot.slane %v7611_v54, 4  ;;  %v13458_v41 = vld [vmem:[%s13563_s27 + $0x94] sm:$0xf] }
 0x3ee   : > { %v6321_v62 = vrot.slane %v19014_v17, 6  ;;  %v6851_v39 = vunpack.c.l.b16 %v6785_v31  ;;  %v6791_v19 = vrot.slane %v13458_v41, 6  ;;  %v7632_v14 = vshll.u32 %v12812_v6, 16  ;;  %v13459_v31 = vld [vmem:[%s13563_s27 + $0x9c] sm:$0xe] }
 0x3ef   : > { %v6941_v44 = vpop.f32.mrf.mxu2  ;;  %v16562_v15 = vadd.f32 %v6030_v20, %v5666_v35  ;;  %v6319_v46 = vrot.slane %v6318_v63, 4  ;;  %v6332_v20 = vor.u32 %v6331_v29, %v6328_v13  ;;  %v12630_v35 = vld [vmem:[%s13563_s27 + $0x90] sm:$0xc]  ;;  %v12814_v41 = vld [vmem:[%s13563_s27 + $0xa4] sm:$0x1] }
 0x3f0   : > { %v7021_v11 = vadd.f32 %v6941_v44, %v6639_v49  ;;  %v16556_v17 = vor.u32 %v6321_v62, %v6320_v55  ;;  %v6852_v49 = vunpack.c.l.b16 %v6788_v60  ;;  %v7629_v55 = vshrl.u32 %v12812_v6, 16 }
 0x3f1   : > { %12774 = vmatmul.msk.bf16.gmra.mxu3 %vm658_vm4, %v13346_v8  ;;  %19016 = vst [vmem:[#allocation5_spill] sm:$0xff] %v16562_v15  ;;  %v7626_v8 = vrot.slane %v7624_v2, 5  ;;  %v18858_v44 = vshrl.u32 %v16560_v30, 16  ;;  %v6335_v60 = vshrl.u32 %v13459_v31, 16  ;;  %v12646_v29 = vrot.slane %v12630_v35, 10 }
 0x3f2   : > { %v6324_v62 = vrot.slane %v16556_v17, 4  ;;  %v6874_v2 = vpack.c.b16 %v6852_v49, %v6851_v39  ;;  %v6793_v63 = vrot.slane %v6791_v19, 4  ;;  %v6323_v6 = vsel %vm13875_vm11, %v6319_v46, %v16556_v17  ;;  %v16587_v49 = vld [vmem:[%s13563_s27 + $0xa4] sm:$0x3] }
 0x3f3   : > { %v7882_v21 = vpop.f32.mrf.mxu0  ;;  %v6564_v25 = vpop.f32.mrf.mxu1  ;;  %v7627_v13 = vsel %vm13590_vm3, %v7622_v61, %v7626_v8  ;;  %v7634_v39 = vrot.slane %v7632_v14, 5  ;;  %v13347_v14 = vld [vmem:[%s13563_s27 + $0x90] sm:$0xff] }
 0x3f4   : > { %v7228_v52 = vpop.f32.mrf.mxu3  ;;  %v6641_v4 = vadd.f32 %v6564_v25, %v19017_v23  ;;  %v18857_v25 = vshll.u32 %v16560_v30, 16 }
 0x3f5   : > { %v7308_v57 = vadd.f32 %v7228_v52, %v7021_v11  ;;  %v6338_v11 = vshll.u32 %v13459_v31, 16 }
 0x3f6   : > { %12839 = vmatmul.msk.bf16.gmra.mxu0 %vm658_vm4, %v7814_v27  ;;  %12613 = vmatmul.msk.bf16.gmra.mxu1 %vm658_vm4, %v6492_v38  ;;  %v7617_v27 = vsel %vm13590_vm3, %v7612_v1, %v16538_v0  ;;  %v6794_v38 = vrot.slane %v16532_v7, 6  ;;  %v16591_v23 = vrot.slane %v18857_v25, 5  ;;  %v7644_v7 = vrot.slane %v18858_v44, 4 }
 0x3f7   : > { %v6943_v10 = vpop.f32.mrf.mxu2  ;;  %v16573_v54 = vadd.f32 %v7882_v21, %v7308_v57  ;;  %v7631_v21 = vrot.slane %v7629_v55, 4  ;;  %v6337_v1 = vrot.slane %v6335_v60, 5  ;;  %v6340_v17 = vrot.slane %v6338_v11, 6  ;;  %v19019_v55 = vld [vmem:[#allocation9_spill] sm:$0xff] }
 0x3f8   : > { %v7022_v59 = vadd.f32 %v6943_v10, %v6640_v9  ;;  %v6333_v9 = vsel %vm13875_vm11, %v6324_v62, %v6332_v20  ;;  %v7792_v8 = vunpack.c.l.b16 %v7617_v27  ;;  %v7793_v57 = vunpack.c.l.b16 %v7627_v13 }
 0x3f9   : > { %19018 = vst [vmem:[#allocation15_spill] sm:$0xff] %v16573_v54  ;;  %v19020_v62 = vshrl.u32 %v19019_v55, 16  ;;  %v19021_v10 = vshll.u32 %v19019_v55, 16  ;;  %v6349_v25 = vshrl.u32 %v16587_v49, 16  ;;  %v6352_v60 = vshll.u32 %v16587_v49, 16 }
 0x3fa   : > { %v6471_v11 = vunpack.c.l.b16 %v6323_v6  ;;  %v6792_v27 = vsel %vm13882_vm12, %v12646_v29, %v6791_v19  ;;  %v6341_v55 = vor.u32 %v6340_v17, %v6337_v1 }
 0x3fb   : > { %v7884_v0 = vpop.f32.mrf.mxu0  ;;  %v6566_v52 = vpop.f32.mrf.mxu1  ;;  %v6343_v20 = vrot.slane %v19020_v62, 5  ;;  %v6344_v31 = vrot.slane %v19021_v10, 6  ;;  %v7815_v10 = vpack.c.b16 %v7793_v57, %v7792_v8  ;;  %v6351_v30 = vrot.slane %v6349_v25, 5 }
 0x3fc   : > { %v7230_v61 = vpop.f32.mrf.mxu3  ;;  %12662 = vmatmul.msk.bf16.gmra.mxu2 %vm658_vm4, %v6874_v2  ;;  %v6642_v46 = vadd.f32 %v6566_v52, %v15802_v22  ;;  %v6472_v2 = vunpack.c.l.b16 %v6333_v9  ;;  %v7635_v22 = vor.u32 %v7634_v39, %v7631_v21  ;;  %v6795_v52 = vsel %vm13882_vm12, %v6793_v63, %v6794_v38  ;;  %v12815_v9 = vld [vmem:[%s13563_s27 + $0xa8] sm:$0xf] }
 0x3fd   : > { %v7309_v35 = vadd.f32 %v7230_v61, %v7022_v59  ;;  %v7645_v59 = vor.u32 %v7644_v7, %v16591_v23  ;;  %v7648_v61 = vshll.u32 %v12814_v41, 16  ;;  %v6345_v44 = vor.u32 %v6344_v31, %v6343_v20 }
 0x3fe   : > { %v6354_v6 = vrot.slane %v6352_v60, 6  ;;  %v6493_v54 = vpack.c.b16 %v6472_v2, %v6471_v11  ;;  %v6853_v15 = vunpack.c.l.b16 %v6792_v27  ;;  %v6854_v19 = vunpack.c.l.b16 %v6795_v52 }
 0x3ff   : > { %v6946_v13 = vpop.f32.mrf.mxu2  ;;  %v7636_v29 = vrot.slane %v7635_v22, 4  ;;  %v7646_v63 = vrot.slane %v7645_v59, 4  ;;  %v7650_v38 = vrot.slane %v7648_v61, 5  ;;  %v6342_v7 = vrot.slane %v6341_v55, 4  ;;  %v12631_v22 = vld [vmem:[%s13563_s27 + $0x9c] sm:$0xc] }
 0x400   : > { %v7023_v62 = vadd.f32 %v6946_v13, %v6641_v4  ;;  %v16612_v41 = vadd.f32 %v7884_v0, %v7309_v35  ;;  %v7653_v17 = vshrl.u32 %v12815_v9, 16  ;;  %v7656_v25 = vshll.u32 %v12815_v9, 16  ;;  %v13461_v59 = vld [vmem:[%s13563_s27 + $0xa8] sm:$0xe] }
 0x401   : > { %12775 = vmatmul.msk.bf16.gmra.mxu3 %vm658_vm4, %v13347_v14  ;;  %v6347_v57 = vrot.slane %v6345_v44, 4  ;;  %v6355_v20 = vor.u32 %v6354_v6, %v6351_v30  ;;  %v16616_v14 = vld [vmem:[%s13563_s27 + $0xac] sm:$0xf]  ;;  %v6875_v31 = vpack.c.b16 %v6854_v19, %v6853_v15  ;;  %v7641_v0 = vsel %vm13590_vm3, %v7636_v29, %v16591_v23  ;;  %v13460_v30 = vld [vmem:[%s13563_s27 + $0xa0] sm:$0xf] }
 0x402   : > { %19022 = vst [vmem:[#allocation9_spill] sm:$0xff] %v16616_v14  ;;  %v6346_v60 = vsel %vm13875_vm11, %v6342_v7, %v6345_v44  ;;  %v6798_v11 = vrot.slane %v13460_v30, 6  ;;  %v7658_v15 = vrot.slane %v7656_v25, 5  ;;  %v18861_v13 = vshll.u32 %v16616_v14, 16  ;;  %v13348_v25 = vld [vmem:[%s13563_s27 + $0x9c] sm:$0xff] }
 0x403   : > { %v7887_v21 = vpop.f32.mrf.mxu0  ;;  %v6569_v39 = vpop.f32.mrf.mxu1  ;;  %v6356_v23 = vsel %vm13875_vm11, %v6347_v57, %v6355_v20  ;;  %v18864_v52 = vshrl.u32 %v16616_v14, 16  ;;  %v6358_v61 = vshrl.u32 %v13461_v59, 16  ;;  %v6361_v55 = vshll.u32 %v13461_v59, 16 }
 0x404   : > { %v7233_v4 = vpop.f32.mrf.mxu3  ;;  %v6643_v1 = vadd.f32 %v6569_v39, %v15823_v5  ;;  %v7651_v5 = vsel %vm13590_vm3, %v7646_v63, %v7650_v38  ;;  %v7794_v44 = vunpack.c.l.b16 %v7641_v0  ;;  %v6473_v6 = vunpack.c.l.b16 %v6346_v60  ;;  %v19023_v0 = vld [vmem:[#allocation16_spill] sm:$0xff] }
 0x405   : > { %v7310_v8 = vadd.f32 %v7233_v4, %v7023_v62  ;;  %v7795_v62 = vunpack.c.l.b16 %v7651_v5  ;;  %v12647_v9 = vrot.slane %v12631_v22, 10  ;;  %v6800_v19 = vrot.slane %v6798_v11, 4 }
 0x406   : > { %12840 = vmatmul.msk.bf16.gmra.mxu0 %vm658_vm4, %v7815_v10  ;;  %12614 = vmatmul.msk.bf16.gmra.mxu1 %vm658_vm4, %v6493_v54  ;;  %v7655_v54 = vrot.slane %v7653_v17, 4  ;;  %v6801_v29 = vrot.slane %v16587_v49, 6  ;;  %v6474_v38 = vunpack.c.l.b16 %v6356_v23  ;;  %v7664_v4 = vrot.slane %v18861_v13, 5  ;;  %v12818_v13 = vld [vmem:[%s13563_s27 + $0xb4] sm:$0xf] }
 0x407   : > { %v6948_v35 = vpop.f32.mrf.mxu2  ;;  %v16628_v2 = vadd.f32 %v7887_v21, %v7310_v8  ;;  %v16638_v21 = vld [vmem:[%s13563_s27 + $0xb0] sm:$0x3]  ;;  %v7668_v57 = vrot.slane %v18864_v52, 4  ;;  %v6360_v20 = vrot.slane %v6358_v61, 5  ;;  %v6363_v49 = vrot.slane %v6361_v55, 6 }
 0x408   : > { %v7024_v27 = vadd.f32 %v6948_v35, %v6642_v46  ;;  %v7659_v7 = vor.u32 %v7658_v15, %v7655_v54  ;;  %v12817_v8 = vld [vmem:[%s13563_s27 + $0xb0] sm:$0x1]  ;;  %v19024_v35 = vshrl.u32 %v19023_v0, 16  ;;  %v6375_v30 = vshll.u32 %v16638_v21, 16 }
 0x409   : > { %v6799_v15 = vsel %vm13882_vm12, %v12647_v9, %v6798_v11  ;;  %v7672_v23 = vshll.u32 %v12817_v8, 16  ;;  %v6494_v59 = vpack.c.b16 %v6474_v38, %v6473_v6  ;;  %v6802_v61 = vsel %vm13882_vm12, %v6800_v19, %v6801_v29  ;;  %v19026_v9 = vld [vmem:[#allocation18_spill] sm:$0xff]  ;;  %v16664_v29 = vld [vmem:[%s13563_s27 + $0xb8] sm:$0xf] }
 0x40a   : > { %v6366_v5 = vrot.slane %v19024_v35, 5  ;;  %v7660_v55 = vrot.slane %v7659_v7, 4  ;;  %v6855_v38 = vunpack.c.l.b16 %v6799_v15  ;;  %19027 = vst [vmem:[#allocation16_spill] sm:$0xff] %v16664_v29 }
 0x40b   : > { %v7889_v10 = vpop.f32.mrf.mxu0  ;;  %v6571_v46 = vpop.f32.mrf.mxu1  ;;  %v7674_v19 = vrot.slane %v7672_v23, 5 }
 0x40c   : > { %v7235_v39 = vpop.f32.mrf.mxu3  ;;  %12663 = vmatmul.msk.bf16.gmra.mxu2 %vm658_vm4, %v6875_v31  ;;  %v6644_v63 = vadd.f32 %v6571_v46, %v15846_v32  ;;  %v19025_v31 = vshll.u32 %v19023_v0, 16  ;;  %v6372_v32 = vshrl.u32 %v16638_v21, 16  ;;  %v7669_v46 = vor.u32 %v7668_v57, %v7664_v4 }
 0x40d   : > { %v7311_v17 = vadd.f32 %v7235_v39, %v7024_v27  ;;  %v7816_v27 = vpack.c.b16 %v7795_v62, %v7794_v44  ;;  %v6364_v39 = vor.u32 %v6363_v49, %v6360_v20  ;;  %v7665_v8 = vsel %vm13590_vm3, %v7660_v55, %v7664_v4 }
 0x40e   : > { %v6367_v60 = vrot.slane %v19025_v31, 6  ;;  %v6374_v35 = vrot.slane %v6372_v32, 5  ;;  %v6377_v31 = vrot.slane %v6375_v30, 6  ;;  %v7670_v57 = vrot.slane %v7669_v46, 4 }
 0x40f   : > { %v6951_v22 = vpop.f32.mrf.mxu2  ;;  %v16660_v62 = vadd.f32 %v7889_v10, %v7311_v17  ;;  %v7677_v20 = vshrl.u32 %v12818_v13, 16  ;;  %v6365_v10 = vrot.slane %v6364_v39, 4  ;;  %v18863_v4 = vshrl.u32 %v16664_v29, 16 }
 0x410   : > { %v7025_v54 = vadd.f32 %v6951_v22, %v6643_v1  ;;  %v6368_v0 = vor.u32 %v6367_v60, %v6366_v5  ;;  %v6378_v49 = vor.u32 %v6377_v31, %v6374_v35  ;;  %v12632_v5 = vld [vmem:[%s13563_s27 + $0xa8] sm:$0xc]  ;;  %v13462_v60 = vld [vmem:[%s13563_s27 + $0xac] sm:$0xf]  ;;  %v7680_v22 = vshll.u32 %v12818_v13, 16 }
 0x411   : > { %12776 = vmatmul.msk.bf16.gmra.mxu3 %vm658_vm4, %v13348_v25  ;;  %v6856_v25 = vunpack.c.l.b16 %v6802_v61  ;;  %v6805_v32 = vrot.slane %v13462_v60, 6  ;;  %v7675_v46 = vsel %vm13590_vm3, %v7670_v57, %v7674_v19  ;;  %v16679_v39 = vunpack.c.l.b16 %v7665_v8  ;;  %v12820_v57 = vld [vmem:[%s13563_s27 + $0xbc] sm:$0x1] }
 0x412   : > { %v6370_v17 = vrot.slane %v6368_v0, 4  ;;  %v12648_v35 = vrot.slane %v12632_v5, 10  ;;  %v6369_v13 = vsel %vm13875_vm11, %v6365_v10, %v6368_v0  ;;  %v7692_v0 = vrot.slane %v18863_v4, 4  ;;  %v19030_v5 = vld [vmem:[#allocation17_spill] sm:$0xff] }
 0x413   : > { %v7892_v44 = vpop.f32.mrf.mxu0  ;;  %v6574_v1 = vpop.f32.mrf.mxu1  ;;  %v6876_v61 = vpack.c.b16 %v6856_v25, %v6855_v38  ;;  %v6807_v31 = vrot.slane %v6805_v32, 4  ;;  %v7682_v25 = vrot.slane %v7680_v22, 5  ;;  %v19031_v60 = vshrl.u32 %v19030_v5, 16 }
 0x414   : > { %v7238_v11 = vpop.f32.mrf.mxu3  ;;  %v6645_v6 = vadd.f32 %v6574_v1, %v19026_v9  ;;  %v6808_v1 = vrot.slane %v16638_v21, 6  ;;  %v6379_v38 = vsel %vm13875_vm11, %v6370_v17, %v6378_v49  ;;  %v19029_v21 = vld [vmem:[#allocation19_spill] sm:$0xff]  ;;  %v19032_v22 = vshll.u32 %v19030_v5, 16 }
 0x415   : > { %v7312_v7 = vadd.f32 %v7238_v11, %v7025_v54  ;;  %v18862_v54 = vshll.u32 %v16664_v29, 16  ;;  %v13349_v49 = vld [vmem:[%s13563_s27 + $0xa8] sm:$0xff]  ;;  %v7797_v52 = vunpack.c.l.b16 %v7675_v46  ;;  %v6476_v29 = vunpack.c.l.b16 %v6379_v38  ;;  %v12821_v38 = vld [vmem:[%s13563_s27 + $0xc0] sm:$0xf] }
 0x416   : > { %12841 = vmatmul.msk.bf16.gmra.mxu0 %vm658_vm4, %v7816_v27  ;;  %12615 = vmatmul.msk.bf16.gmra.mxu1 %vm658_vm4, %v6494_v59  ;;  %v13463_v27 = vld [vmem:[%s13563_s27 + $0xb4] sm:$0xe] }
 0x417   : > { %v6953_v30 = vpop.f32.mrf.mxu2  ;;  %v16674_v15 = vadd.f32 %v7892_v44, %v7312_v7  ;;  %v6381_v55 = vshrl.u32 %v13463_v27, 16  ;;  %v6384_v59 = vshll.u32 %v13463_v27, 16  ;;  %v7679_v44 = vrot.slane %v7677_v20, 4 }
 0x418   : > { %v7026_v23 = vadd.f32 %v6953_v30, %v6644_v63  ;;  %v16685_v63 = vld [vmem:[%s13563_s27 + $0xbc] sm:$0x3]  ;;  %v16691_v19 = vrot.slane %v18862_v54, 5  ;;  %v6389_v30 = vrot.slane %v19031_v60, 5  ;;  %v6390_v27 = vrot.slane %v19032_v22, 6 }
 0x419   : > { %19028 = vst [vmem:[#allocation18_spill] sm:$0xff] %v16674_v15  ;;  %v6383_v20 = vrot.slane %v6381_v55, 5  ;;  %v6386_v10 = vrot.slane %v6384_v59, 6  ;;  %v6395_v54 = vshrl.u32 %v16685_v63, 16  ;;  %v6398_v4 = vshll.u32 %v16685_v63, 16 }
 0x41a   : > { %v6806_v55 = vsel %vm13882_vm12, %v12648_v35, %v6805_v32  ;;  %v6391_v22 = vor.u32 %v6390_v27, %v6389_v30  ;;  %v7817_v32 = vpack.c.b16 %v7797_v52, %v16679_v39  ;;  %v13464_v30 = vld [vmem:[%s13563_s27 + $0xb8] sm:$0xf]  ;;  %v7701_v52 = vshrl.u32 %v12821_v38, 16 }
 0x41b   : > { %v7894_v11 = vpop.f32.mrf.mxu0  ;;  %v6576_v9 = vpop.f32.mrf.mxu1  ;;  %v6387_v60 = vor.u32 %v6386_v10, %v6383_v20  ;;  %v6397_v46 = vrot.slane %v6395_v54, 5  ;;  %v6857_v15 = vunpack.c.l.b16 %v6806_v55  ;;  %v19034_v54 = vld [vmem:[#allocation20_spill] sm:$0xff]  ;;  %v7704_v55 = vshll.u32 %v12821_v38, 16 }
 0x41c   : > { %v7240_v7 = vpop.f32.mrf.mxu3  ;;  %12664 = vmatmul.msk.bf16.gmra.mxu2 %vm658_vm4, %v6876_v61  ;;  %v6646_v8 = vadd.f32 %v6576_v9, %v19029_v21  ;;  %v6475_v61 = vunpack.c.l.b16 %v6369_v13  ;;  %v6809_v9 = vsel %vm13882_vm12, %v6807_v31, %v6808_v1  ;;  %v7696_v21 = vshll.u32 %v12820_v57, 16 }
 0x41d   : > { %v7313_v17 = vadd.f32 %v7240_v7, %v7026_v23  ;;  %v7683_v23 = vor.u32 %v7682_v25, %v7679_v44  ;;  %v7693_v7 = vor.u32 %v7692_v0, %v16691_v19  ;;  %v6400_v13 = vrot.slane %v6398_v4, 6  ;;  %v16714_v0 = vld [vmem:[%s13563_s27 + $0xc4] sm:$0xf] }
 0x41e   : > { %v6495_v35 = vpack.c.b16 %v6476_v29, %v6475_v61  ;;  %v6858_v14 = vunpack.c.l.b16 %v6809_v9  ;;  %19033 = vst [vmem:[#allocation19_spill] sm:$0xff] %v16714_v0  ;;  %v6388_v10 = vrot.slane %v6387_v60, 4  ;;  %v6393_v39 = vrot.slane %v6391_v22, 4  ;;  %v12633_v61 = vld [vmem:[%s13563_s27 + $0xb4] sm:$0xc] }
 0x41f   : > { %v6956_v59 = vpop.f32.mrf.mxu2  ;;  %v7684_v44 = vrot.slane %v7683_v23, 4  ;;  %v7694_v25 = vrot.slane %v7693_v7, 4  ;;  %v16716_v57 = vadd.f32 %v7894_v11, %v7313_v17  ;;  %v6401_v27 = vor.u32 %v6400_v13, %v6397_v46 }
 0x420   : > { %v7027_v5 = vadd.f32 %v6956_v59, %v6645_v6  ;;  %v7698_v6 = vrot.slane %v7696_v21, 5  ;;  %v18869_v59 = vshll.u32 %v16714_v0, 16  ;;  %v18870_v11 = vshrl.u32 %v16714_v0, 16 }
 0x421   : > { %12777 = vmatmul.msk.bf16.gmra.mxu3 %vm658_vm4, %v13349_v49  ;;  %v6812_v49 = vrot.slane %v13464_v30, 6  ;;  %v6877_v9 = vpack.c.b16 %v6858_v14, %v6857_v15  ;;  %v7689_v23 = vsel %vm13590_vm3, %v7684_v44, %v16691_v19  ;;  %v12649_v60 = vrot.slane %v12633_v61, 10 }
 0x422   : > { %v7699_v7 = vsel %vm13590_vm3, %v7694_v25, %v7698_v6  ;;  %v6815_v13 = vrot.slane %v16685_v63, 6  ;;  %v6392_v38 = vsel %vm13875_vm11, %v6388_v10, %v6391_v22  ;;  %v6402_v14 = vsel %vm13875_vm11, %v6393_v39, %v6401_v27  ;;  %v12823_v25 = vld [vmem:[%s13563_s27 + $0xc8] sm:$0x1]  ;;  %v13350_v39 = vld [vmem:[%s13563_s27 + $0xb4] sm:$0xff] }
 0x423   : > { %v7897_v31 = vpop.f32.mrf.mxu0  ;;  %v6579_v1 = vpop.f32.mrf.mxu1  ;;  %v6814_v46 = vrot.slane %v6812_v49, 4  ;;  %v7703_v15 = vrot.slane %v7701_v52, 4  ;;  %v16739_v19 = vrot.slane %v18869_v59, 5  ;;  %v7798_v44 = vunpack.c.l.b16 %v7689_v23  ;;  %v16750_v52 = vld [vmem:[%s13563_s27 + $0xc8] sm:$0x3] }
 0x424   : > { %v7243_v20 = vpop.f32.mrf.mxu3  ;;  %v6647_v4 = vadd.f32 %v6579_v1, %v19034_v54  ;;  %v6477_v10 = vunpack.c.l.b16 %v6392_v38  ;;  %v6813_v30 = vsel %vm13882_vm12, %v12649_v60, %v6812_v49  ;;  %v6478_v27 = vunpack.c.l.b16 %v6402_v14 }
 0x425   : > { %v7314_v29 = vadd.f32 %v7243_v20, %v7027_v5  ;;  %v7799_v20 = vunpack.c.l.b16 %v7699_v7  ;;  %v6816_v61 = vsel %vm13882_vm12, %v6814_v46, %v6815_v13  ;;  %v7720_v23 = vshll.u32 %v12823_v25, 16 }
 0x426   : > { %12842 = vmatmul.msk.bf16.gmra.mxu0 %vm658_vm4, %v7817_v32  ;;  %12616 = vmatmul.msk.bf16.gmra.mxu1 %vm658_vm4, %v6495_v35  ;;  %v7706_v32 = vrot.slane %v7704_v55, 5  ;;  %v13465_v35 = vld [vmem:[%s13563_s27 + $0xc0] sm:$0xe]  ;;  %v19036_v49 = vshll.u32 %v15889_v40, 16  ;;  %v6421_v14 = vshll.u32 %v16750_v52, 16  ;;  %v6859_v13 = vunpack.c.l.b16 %v6813_v30 }
 0x427   : > { %v6958_v17 = vpop.f32.mrf.mxu2  ;;  %v16730_v21 = vadd.f32 %v7897_v31, %v7314_v29  ;;  %v6404_v31 = vshrl.u32 %v13465_v35, 16  ;;  %v6407_v63 = vshll.u32 %v13465_v35, 16  ;;  %v7818_v46 = vpack.c.b16 %v7799_v20, %v7798_v44 }
 0x428   : > { %v7028_v5 = vadd.f32 %v6958_v17, %v6646_v8  ;;  %v7716_v8 = vrot.slane %v18870_v11, 4  ;;  %v7707_v55 = vor.u32 %v7706_v32, %v7703_v15  ;;  %v6413_v60 = vrot.slane %v19036_v49, 6  ;;  %v12824_v11 = vld [vmem:[%s13563_s27 + $0xcc] sm:$0xf] }
 0x429   : > { %v6409_v7 = vrot.slane %v6407_v63, 6  ;;  %v6860_v15 = vunpack.c.l.b16 %v6816_v61  ;;  %v7722_v63 = vrot.slane %v7720_v23, 5  ;;  %v6423_v59 = vrot.slane %v6421_v14, 6 }
 0x42a   : > { %v7717_v17 = vor.u32 %v7716_v8, %v16739_v19  ;;  %v7708_v32 = vrot.slane %v7707_v55, 4  ;;  %v6496_v8 = vpack.c.b16 %v6478_v27, %v6477_v10  ;;  %v13466_v27 = vld [vmem:[%s13563_s27 + $0xc4] sm:$0xf] }
 0x42b   : > { %v7899_v1 = vpop.f32.mrf.mxu0  ;;  %v6581_v22 = vpop.f32.mrf.mxu1  ;;  %v6878_v30 = vpack.c.b16 %v6860_v15, %v6859_v13  ;;  %v6819_v61 = vrot.slane %v13466_v27, 6  ;;  %v19038_v27 = vld [vmem:[#allocation21_spill] sm:$0xff] }
 0x42c   : > { %v7245_v6 = vpop.f32.mrf.mxu3  ;;  %12665 = vmatmul.msk.bf16.gmra.mxu2 %vm658_vm4, %v6877_v9  ;;  %v6648_v54 = vadd.f32 %v6581_v22, %v15942_v42  ;;  %v6406_v9 = vrot.slane %v6404_v31, 5  ;;  %v19035_v42 = vshrl.u32 %v15889_v40, 16  ;;  %v7718_v31 = vrot.slane %v7717_v17, 4 }
 0x42d   : > { %v7315_v29 = vadd.f32 %v7245_v6, %v7028_v5  ;;  %v6418_v5 = vshrl.u32 %v16750_v52, 16  ;;  %v7713_v10 = vsel %vm13590_vm3, %v7708_v32, %v16739_v19  ;;  %v6821_v32 = vrot.slane %v6819_v61, 4 }
 0x42e   : > { %v6412_v38 = vrot.slane %v19035_v42, 5  ;;  %v6410_v25 = vor.u32 %v6409_v7, %v6406_v9  ;;  %v12634_v9 = vld [vmem:[%s13563_s27 + $0xc0] sm:$0xc]  ;;  %v7728_v7 = vshll.u32 %v12824_v11, 16 }
 0x42f   : > { %v6961_v35 = vpop.f32.mrf.mxu2  ;;  %v6420_v49 = vrot.slane %v6418_v5, 5  ;;  %v16764_v0 = vadd.f32 %v7899_v1, %v7315_v29  ;;  %v7723_v1 = vsel %vm13590_vm3, %v7718_v31, %v7722_v63  ;;  %v13467_v5 = vld [vmem:[%s13563_s27 + $0xcc] sm:$0xe]  ;;  %v12650_v15 = vrot.slane %v12634_v9, 10 }
 0x430   : > { %v7029_v22 = vadd.f32 %v6961_v35, %v6647_v4  ;;  %v6414_v42 = vor.u32 %v6413_v60, %v6412_v38  ;;  %v6411_v29 = vrot.slane %v6410_v25, 4  ;;  %v6427_v14 = vshrl.u32 %v13467_v5, 16 }
 0x431   : > { %12778 = vmatmul.msk.bf16.gmra.mxu3 %vm658_vm4, %v13350_v39  ;;  %v16771_v39 = vld [vmem:[%s13563_s27 + $0xd0] sm:$0xf]  ;;  %v6424_v23 = vor.u32 %v6423_v59, %v6420_v49  ;;  %v7801_v13 = vunpack.c.l.b16 %v7723_v1  ;;  %v6822_v59 = vrot.slane %v16750_v52, 6  ;;  %v7730_v25 = vrot.slane %v7728_v7, 5  ;;  %v13351_v1 = vld [vmem:[%s13563_s27 + $0xc0] sm:$0xff] }
 0x432   : > { %19037 = vst [vmem:[#allocation17_spill] sm:$0xff] %v16771_v39  ;;  %v6416_v17 = vrot.slane %v6414_v42, 4  ;;  %v18873_v38 = vshll.u32 %v16771_v39, 16  ;;  %v18874_v60 = vshrl.u32 %v16771_v39, 16 }
 0x433   : > { %v7902_v6 = vpop.f32.mrf.mxu0  ;;  %v6584_v40 = vpop.f32.mrf.mxu1 }
 0x434   : > { %v7248_v4 = vpop.f32.mrf.mxu3  ;;  %v6649_v44 = vadd.f32 %v6584_v40, %v15963_v37  ;;  %v7725_v37 = vshrl.u32 %v12824_v11, 16  ;;  %v6425_v31 = vsel %vm13875_vm11, %v6416_v17, %v6424_v23  ;;  %v16799_v52 = vrot.slane %v18873_v38, 5 }
 0x435   : > { %v7316_v20 = vadd.f32 %v7248_v4, %v7029_v22  ;;  %v16784_v22 = vunpack.c.l.b16 %v7713_v10  ;;  %v12826_v4 = vld [vmem:[%s13563_s27 + $0xd4] sm:$0x1]  ;;  %v19040_v17 = vshll.u32 %v19038_v27, 16  ;;  %v6480_v23 = vunpack.c.l.b16 %v6425_v31 }
 0x436   : > { %12843 = vmatmul.msk.bf16.gmra.mxu0 %vm658_vm4, %v7818_v46  ;;  %12617 = vmatmul.msk.bf16.gmra.mxu1 %vm658_vm4, %v6496_v8  ;;  %v6430_v46 = vshll.u32 %v13467_v5, 16  ;;  %v7727_v63 = vrot.slane %v7725_v37, 4  ;;  %v19039_v37 = vshrl.u32 %v19038_v27, 16 }
 0x437   : > { %v6963_v55 = vpop.f32.mrf.mxu2  ;;  %v16779_v19 = vadd.f32 %v7902_v6, %v7316_v20  ;;  %v16792_v6 = vld [vmem:[%s13563_s27 + $0xd4] sm:$0x3]  ;;  %v6429_v20 = vrot.slane %v6427_v14, 5  ;;  %v6820_v14 = vsel %vm13882_vm12, %v12650_v15, %v6819_v61 }
 0x438   : > { %v7030_v35 = vadd.f32 %v6963_v55, %v6648_v54  ;;  %v6415_v54 = vsel %vm13875_vm11, %v6411_v29, %v6414_v42  ;;  %v7740_v42 = vrot.slane %v18874_v60, 4  ;;  %v6432_v29 = vrot.slane %v6430_v46, 6 }
 0x439   : > { %v6435_v55 = vrot.slane %v19039_v37, 5  ;;  %v6441_v9 = vshrl.u32 %v16792_v6, 16  ;;  %v6444_v7 = vshll.u32 %v16792_v6, 16  ;;  %v6823_v46 = vsel %vm13882_vm12, %v6821_v32, %v6822_v59  ;;  %v12827_v37 = vld [vmem:[%s13563_s27 + $0xd8] sm:$0xf] }
 0x43a   : > { %v7741_v27 = vor.u32 %v7740_v42, %v16799_v52  ;;  %v6861_v15 = vunpack.c.l.b16 %v6820_v14  ;;  %v6862_v32 = vunpack.c.l.b16 %v6823_v46 }
 0x43b   : > { %v7904_v11 = vpop.f32.mrf.mxu0  ;;  %v6586_v8 = vpop.f32.mrf.mxu1  ;;  %v6443_v60 = vrot.slane %v6441_v9, 5  ;;  %v6446_v39 = vrot.slane %v6444_v7, 6 }
 0x43c   : > { %v7250_v40 = vpop.f32.mrf.mxu3  ;;  %12666 = vmatmul.msk.bf16.gmra.mxu2 %vm658_vm4, %v6878_v30  ;;  %v6650_v49 = vadd.f32 %v6586_v8, %v16000_v3  ;;  %v6436_v30 = vrot.slane %v19040_v17, 6  ;;  %v6479_v3 = vunpack.c.l.b16 %v6415_v54  ;;  %v6433_v54 = vor.u32 %v6432_v29, %v6429_v20 }
 0x43d   : > { %v7317_v10 = vadd.f32 %v7250_v40, %v7030_v35  ;;  %v7744_v35 = vshll.u32 %v12826_v4, 16  ;;  %v7731_v40 = vor.u32 %v7730_v25, %v7727_v63  ;;  %v7819_v17 = vpack.c.b16 %v7801_v13, %v16784_v22  ;;  %v16819_v63 = vld [vmem:[%s13563_s27 + $0xdc] sm:$0xf] }
 0x43e   : > { %v6437_v31 = vor.u32 %v6436_v30, %v6435_v55  ;;  %v6497_v38 = vpack.c.b16 %v6480_v23, %v6479_v3  ;;  %v7749_v22 = vshrl.u32 %v12827_v37, 16  ;;  %v6434_v29 = vrot.slane %v6433_v54, 4  ;;  %v12635_v30 = vld [vmem:[%s13563_s27 + $0xcc] sm:$0xc]  ;;  %v13468_v3 = vld [vmem:[%s13563_s27 + $0xd0] sm:$0xf] }
 0x43f   : > { %v6966_v5 = vpop.f32.mrf.mxu2  ;;  %v7746_v59 = vrot.slane %v7744_v35, 5  ;;  %v16821_v25 = vadd.f32 %v7904_v11, %v7317_v10  ;;  %v7732_v20 = vrot.slane %v7731_v40, 4  ;;  %v6826_v23 = vrot.slane %v13468_v3, 6  ;;  %v12829_v54 = vld [vmem:[%s13563_s27 + $0xe0] sm:$0x1] }
 0x440   : > { %v7031_v8 = vadd.f32 %v6966_v5, %v6649_v44  ;;  %v6439_v55 = vrot.slane %v6437_v31, 4  ;;  %v6447_v9 = vor.u32 %v6446_v39, %v6443_v60  ;;  %v7752_v11 = vshll.u32 %v12827_v37, 16 }
 0x441   : > { %12779 = vmatmul.msk.bf16.gmra.mxu3 %vm658_vm4, %v13351_v1  ;;  %v7742_v1 = vrot.slane %v7741_v27, 4  ;;  %v18877_v10 = vshll.u32 %v16819_v63, 16  ;;  %v6879_v5 = vpack.c.b16 %v6862_v32, %v6861_v15  ;;  %v6438_v39 = vsel %vm13875_vm11, %v6434_v29, %v6437_v31 }
 0x442   : > { %v6828_v60 = vrot.slane %v6826_v23, 4  ;;  %v6829_v40 = vrot.slane %v16792_v6, 6  ;;  %v7751_v27 = vrot.slane %v7749_v22, 4  ;;  %v7754_v37 = vrot.slane %v7752_v11, 5 }
 0x443   : > { %v7907_v61 = vpop.f32.mrf.mxu0  ;;  %v6589_v44 = vpop.f32.mrf.mxu1  ;;  %v7747_v46 = vsel %vm13590_vm3, %v7742_v1, %v7746_v59  ;;  %v16852_v59 = vld [vmem:[%s13563_s27 + $0x24] sm:$0xe]  ;;  %v6481_v1 = vunpack.c.l.b16 %v6438_v39 }
 0x444   : > { %v7253_v4 = vpop.f32.mrf.mxu3  ;;  %v6651_v42 = vadd.f32 %v6589_v44, %v16038_v50  ;;  %v18878_v50 = vshrl.u32 %v16819_v63, 16  ;;  %v7803_v15 = vunpack.c.l.b16 %v7747_v46  ;;  %v8412_v11 = vshll.u32 %v16852_v59, 16 }
 0x445   : > { %v7318_v13 = vadd.f32 %v7253_v4, %v7031_v8  ;;  %v7737_v8 = vsel %vm13590_vm3, %v7732_v20, %v16799_v52  ;;  %v16845_v52 = vrot.slane %v18877_v10, 5  ;;  %v13352_v20 = vld [vmem:[%s13563_s27 + $0xcc] sm:$0xff] }
 0x446   : > { %12844 = vmatmul.msk.bf16.gmra.mxu0 %vm658_vm4, %v7819_v17  ;;  %12618 = vmatmul.msk.bf16.gmra.mxu1 %vm658_vm4, %v6497_v38  ;;  %v12651_v38 = vrot.slane %v12635_v30, 10  ;;  %v7764_v17 = vrot.slane %v18878_v50, 4  ;;  %v7802_v6 = vunpack.c.l.b16 %v7737_v8  ;;  %v7755_v30 = vor.u32 %v7754_v37, %v7751_v27 }
 0x447   : > { %v6968_v7 = vpop.f32.mrf.mxu2  ;;  %v16830_v14 = vadd.f32 %v7907_v61, %v7318_v13  ;;  %v7768_v13 = vshll.u32 %v12829_v54, 16 }
 0x448   : > { %v7032_v35 = vadd.f32 %v6968_v7, %v6650_v49  ;;  %v6448_v49 = vsel %vm13875_vm11, %v6439_v55, %v6447_v9  ;;  %v6827_v29 = vsel %vm13882_vm12, %v12651_v38, %v6826_v23  ;;  %v6830_v55 = vsel %vm13882_vm12, %v6828_v60, %v6829_v40  ;;  %v16864_v38 = vld [vmem:[%s13563_s27 + $0x2c] sm:$0x3]  ;;  %v16867_v40 = vld [vmem:[%s13563_s27 + $0x28] sm:$0xf] }
 0x449   : > { %v6482_v22 = vunpack.c.l.b16 %v6448_v49  ;;  %v7765_v3 = vor.u32 %v7764_v17, %v16845_v52  ;;  %v7820_v7 = vpack.c.b16 %v7803_v15, %v7802_v6  ;;  %v6863_v8 = vunpack.c.l.b16 %v6827_v29 }
 0x44a   : > { %v6864_v46 = vunpack.c.l.b16 %v6830_v55  ;;  %v7770_v23 = vrot.slane %v7768_v13, 5  ;;  %v7756_v39 = vrot.slane %v7755_v30, 4  ;;  %v8060_v27 = vrot.slane %v16867_v40, 5 }
 0x44b   : > { %v7909_v61 = vpop.f32.mrf.mxu0  ;;  %v6591_v31 = vpop.f32.mrf.mxu1  ;;  %v7766_v60 = vrot.slane %v7765_v3, 4  ;;  %v12863_v3 = vrot.slane %v16852_v59, 9 }
 0x44c   : > { %v7255_v44 = vpop.f32.mrf.mxu3  ;;  %12667 = vmatmul.msk.bf16.gmra.mxu2 %vm658_vm4, %v6879_v5  ;;  %v6652_v32 = vadd.f32 %v6591_v31, %v16085_v34  ;;  %v8409_v34 = vshrl.u32 %v16852_v59, 16  ;;  %v19041_v31 = vld [vmem:[#allocation22_spill] sm:$0xff]  ;;  %v6880_v30 = vpack.c.b16 %v6864_v46, %v6863_v8  ;;  %v13139_v59 = vld [vmem:[%s18757_s1 + $0x2a] sm:$0x3] }
 0x44d   : > { %v7319_v4 = vadd.f32 %v7255_v44, %v7032_v35  ;;  %v6498_v35 = vpack.c.b16 %v6482_v22, %v6481_v1  ;;  %v19042_v44 = vshrl.u32 %v19041_v31, 16  ;;  %v19043_v15 = vshll.u32 %v19041_v31, 16  ;;  %v13188_v1 = vld [vmem:[%s18757_s1 + $0x2c] sm:$0x3] }
 0x44e   : > { %v8411_v17 = vrot.slane %v8409_v34, 5  ;;  %v10596_v29 = vsel %vm707_vm0, %v13188_v1, 0  ;;  %v8062_v34 = vrot.slane %v8060_v27, 4  ;;  %v10198_v46 = vsel %vm707_vm0, %v13139_v59, 0 }
 0x44f   : > { %v6971_v9 = vpop.f32.mrf.mxu2  ;;  %v16870_v49 = vadd.f32 %v7909_v61, %v7319_v4  ;;  %v8417_v6 = vrot.slane %v19042_v44, 5  ;;  %v8423_v61 = vshrl.u32 %v16864_v38, 16  ;;  %v8426_v4 = vshll.u32 %v16864_v38, 16  ;;  %10605 = vmatpush.bf16.msra.mxu2 %v10596_v29  ;;  %10207 = vmatpush.bf16.msra.mxu1 %v10198_v46 }
 0x450   : > { %v7033_v5 = vadd.f32 %v6971_v9, %v6651_v42  ;;  %v8414_v42 = vrot.slane %v8412_v11, 6  ;;  %v7761_v9 = vsel %vm13590_vm3, %v7756_v39, %v16845_v52  ;;  %v13470_v11 = vld [vmem:[%s13563_s27 + $0x2c] sm:$0x1] }
 0x451   : > { %12780 = vmatmul.msk.bf16.gmra.mxu3 %vm658_vm4, %v13352_v20  ;;  %v8418_v20 = vrot.slane %v19043_v15, 6  ;;  %v8425_v39 = vrot.slane %v8423_v61, 5  ;;  %v8061_v15 = vsel %vm13839_vm8, %v12863_v3, %v8060_v27  ;;  %v7804_v1 = vunpack.c.l.b16 %v7761_v9  ;;  %v12929_v9 = vld [vmem:[%s13563_s27 + $0x24] sm:$0xc] }
 0x453   : > { %v7912_v54 = vpop.f32.mrf.mxu0  ;;  %v6594_v37 = vpop.f32.mrf.mxu1  ;;  %v8419_v8 = vor.u32 %v8418_v20, %v8417_v6 }
 0x454   : > { %v7258_v22 = vpop.f32.mrf.mxu3  ;;  %v6653_v13 = vadd.f32 %v6594_v37, %v16099_v24  ;;  %v7771_v24 = vsel %vm13590_vm3, %v7766_v60, %v7770_v23  ;;  %v8063_v37 = vrot.slane %v13470_v11, 5  ;;  %v8428_v60 = vrot.slane %v8426_v4, 6  ;;  %v13353_v11 = vld [vmem:[%s13563_s27 + $0xd8] sm:$0xff] }
 0x455   : > { %v7320_v55 = vadd.f32 %v7258_v22, %v7033_v5  ;;  %v13221_v5 = vld [vmem:[%s18757_s1 + $0x2e] sm:$0x3]  ;;  %v7805_v20 = vunpack.c.l.b16 %v7771_v24  ;;  %v8421_v61 = vrot.slane %v8419_v8, 4  ;;  %v9048_v4 = vrot.slane %v16867_v40, 6 }
 0x456   : > { %12845 = vmatmul.msk.bf16.gmra.mxu0 %vm658_vm4, %v7820_v7  ;;  %12619 = vmatmul.msk.bf16.gmra.mxu1 %vm658_vm4, %v6498_v35  ;;  %v8415_v35 = vor.u32 %v8414_v42, %v8411_v17  ;;  %v11202_v52 = vsel %vm707_vm0, %v13221_v5, 0  ;;  %v8064_v17 = vsel %vm13839_vm8, %v8062_v34, %v8063_v37  ;;  %v16907_v42 = vld [vmem:[%s13563_s27 + $0x30] sm:$0xe]  ;;  %v8429_v3 = vor.u32 %v8428_v60, %v8425_v39 }
 0x457   : > { %v6973_v7 = vpop.f32.mrf.mxu2  ;;  %11211 = vmatpush.bf16.msra.mxu3 %v11202_v52  ;;  %v16900_v31 = vadd.f32 %v7912_v54, %v7320_v55  ;;  %v13270_v54 = vld [vmem:[%s18757_s1 + $0x30] sm:$0x3]  ;;  %v8172_v55 = vunpack.c.l.b16 %v8061_v15  ;;  %v8173_v37 = vunpack.c.l.b16 %v8064_v17  ;;  %v8432_v40 = vshrl.u32 %v16907_v42, 16  ;;  %v16921_v52 = vld [vmem:[%s13563_s27 + $0x38] sm:$0x3]  ;;  %v19045_v17 = vld [vmem:[#allocation23_spill] sm:$0xff] }
 0x458   : > { %v7034_v23 = vadd.f32 %v6973_v7, %v6652_v32  ;;  %v8416_v22 = vrot.slane %v8415_v35, 4  ;;  %v11584_v24 = vsel %vm707_vm0, %v13270_v54, 0  ;;  %v8435_v5 = vshll.u32 %v16907_v42, 16 }
 0x459   : > { %11593 = vmatpush.bf16.msra.mxu0 %v11584_v24  ;;  %v7821_v59 = vpack.c.b16 %v7805_v20, %v7804_v1  ;;  %v12945_v35 = vrot.slane %v12929_v9, 10  ;;  %v9050_v46 = vrot.slane %v9048_v4, 4  ;;  %v8204_v39 = vpack.c.b16 %v8173_v37, %v8172_v55  ;;  %v13471_v9 = vld [vmem:[%s13563_s27 + $0x34] sm:$0xf] }
 0x45a   : > { %v8430_v60 = vsel %vm13875_vm11, %v8421_v61, %v8429_v3  ;;  %v8434_v15 = vrot.slane %v8432_v40, 5  ;;  %v8437_v1 = vrot.slane %v8435_v5, 6  ;;  %v19046_v20 = vshrl.u32 %v19045_v17, 16 }
 0x45b   : > { %v7914_v6 = vpop.f32.mrf.mxu0  ;;  %v6596_v32 = vpop.f32.mrf.mxu1  ;;  %v19047_v54 = vshll.u32 %v19045_v17, 16  ;;  %v8067_v24 = vrot.slane %v13471_v9, 5  ;;  %v8779_v37 = vunpack.c.l.b16 %v8430_v60  ;;  %v9049_v5 = vsel %vm13882_vm12, %v12945_v35, %v9048_v4 }
 0x45c   : > { %v7260_v27 = vpop.f32.mrf.mxu3  ;;  %12668 = vmatmul.msk.bf16.gmra.mxu2 %vm658_vm4, %v6880_v30  ;;  %v6654_v29 = vadd.f32 %v6596_v32, %v16143_v51  ;;  %v8420_v30 = vsel %vm13875_vm11, %v8416_v22, %v8419_v8  ;;  %v8440_v32 = vrot.slane %v19046_v20, 5  ;;  %v8449_v8 = vshll.u32 %v16921_v52, 16 }
 0x45d   : > { %v7321_v34 = vadd.f32 %v7260_v27, %v7034_v23  ;;  %v9051_v23 = vrot.slane %v16864_v38, 6  ;;  %v8446_v27 = vshrl.u32 %v16921_v52, 16  ;;  %v8778_v3 = vunpack.c.l.b16 %v8420_v30 }
 0x45e   : > { %v8438_v17 = vor.u32 %v8437_v1, %v8434_v15  ;;  %v8451_v20 = vrot.slane %v8449_v8, 6  ;;  %v8069_v30 = vrot.slane %v8067_v24, 4  ;;  %v12930_v15 = vld [vmem:[%s13563_s27 + $0x30] sm:$0xc] }
 0x45f   : > { %v6976_v7 = vpop.f32.mrf.mxu2  ;;  %v16936_v55 = vadd.f32 %v7914_v6, %v7321_v34  ;;  %v8448_v34 = vrot.slane %v8446_v27, 5  ;;  %v8810_v35 = vpack.c.b16 %v8779_v37, %v8778_v3  ;;  %v12946_v37 = vrot.slane %v12930_v15, 10 }
 0x460   : > { %v7035_v51 = vadd.f32 %v6976_v7, %v6653_v13  ;;  %v8441_v13 = vrot.slane %v19047_v54, 6  ;;  %v9052_v7 = vsel %vm13882_vm12, %v9050_v46, %v9051_v23  ;;  %v9160_v46 = vunpack.c.l.b16 %v9049_v5 }
 0x461   : > { %12781 = vmatmul.msk.bf16.gmra.mxu3 %vm658_vm4, %v13353_v11  ;;  %v9055_v23 = vrot.slane %v13471_v9, 6  ;;  %v8452_v8 = vor.u32 %v8451_v20, %v8448_v34 }
 0x462   : > { %v8442_v6 = vor.u32 %v8441_v13, %v8440_v32 }
 0x463   : > { %v7917_v22 = vpop.f32.mrf.mxu0  ;;  %v6599_v38 = vpop.f32.mrf.mxu1 }
 0x464   : > { %v7263_v11 = vpop.f32.mrf.mxu3  ;;  %v6655_v61 = vadd.f32 %v6599_v38, %v16156_v47  ;;  %v12864_v47 = vrot.slane %v16907_v42, 9  ;;  %v8444_v27 = vrot.slane %v8442_v6, 4 }
 0x465   : > { %v7322_v40 = vadd.f32 %v7263_v11, %v7035_v51  ;;  %v13472_v51 = vld [vmem:[%s13563_s27 + $0x38] sm:$0x1]  ;;  %v12849_v11 = vld [vmem:[%s13563_s27 + $0x3c] sm:$0xe] }
 0x466   : > { %12846 = vmatmul.msk.bf16.gmra.mxu0 %vm658_vm4, %v7821_v59  ;;  %12880 = vmatmul.msk.bf16.vlgmr.msrb.gmra.mxu1 %vm658_vm4, %v8204_v39  ;;  %v8070_v60 = vrot.slane %v13472_v51, 5  ;;  %v9161_v59 = vunpack.c.l.b16 %v9052_v7  ;;  %v8439_v39 = vrot.slane %v8438_v17, 4  ;;  %v8068_v13 = vsel %vm13839_vm8, %v12864_v47, %v8067_v24 }
 0x467   : > { %v6978_v54 = vpop.f32.mrf.mxu2  ;;  %v16947_v38 = vadd.f32 %v7917_v22, %v7322_v40  ;;  %v9057_v40 = vrot.slane %v9055_v23, 4  ;;  %v8174_v5 = vunpack.c.l.b16 %v8068_v13  ;;  %v9058_v17 = vrot.slane %v16921_v52, 6 }
 0x468   : > { %v7036_v4 = vadd.f32 %v6978_v54, %v6654_v29  ;;  %v8071_v42 = vsel %vm13839_vm8, %v8069_v30, %v8070_v60  ;;  %v9192_v9 = vpack.c.b16 %v9161_v59, %v9160_v46  ;;  %v8443_v24 = vsel %vm13875_vm11, %v8439_v39, %v8442_v6  ;;  %v16966_v60 = vld [vmem:[%s13563_s27 + $0x44] sm:$0x3]  ;;  %v16972_v46 = vld [vmem:[%s13563_s27 + $0x40] sm:$0xf] }
 0x469   : > { %v8175_v7 = vunpack.c.l.b16 %v8071_v42  ;;  %v8453_v20 = vsel %vm13875_vm11, %v8444_v27, %v8452_v8  ;;  %v8458_v54 = vshll.u32 %v12849_v11, 16  ;;  %v8780_v30 = vunpack.c.l.b16 %v8443_v24 }
 0x46a   : > { %v9056_v51 = vsel %vm13882_vm12, %v12946_v37, %v9055_v23  ;;  %v8781_v6 = vunpack.c.l.b16 %v8453_v20  ;;  %v9059_v52 = vsel %vm13882_vm12, %v9057_v40, %v9058_v17  ;;  %v8074_v59 = vrot.slane %v16972_v46, 5 }
 0x46b   : > { %v7919_v1 = vpop.f32.mrf.mxu0  ;;  %v6601_v32 = vpop.f32.mrf.mxu1  ;;  %v19048_v13 = vshrl.u32 %v16139_v58, 16  ;;  %v8469_v37 = vshrl.u32 %v16966_v60, 16  ;;  %v8472_v40 = vshll.u32 %v16966_v60, 16  ;;  %v9162_v24 = vunpack.c.l.b16 %v9056_v51 }
 0x46c   : > { %v7265_v22 = vpop.f32.mrf.mxu3  ;;  %12913 = vmatmul.msk.bf16.vlgmr.msrb.gmra.mxu2 %vm658_vm4, %v8810_v35  ;;  %v6656_v29 = vadd.f32 %v6601_v32, %v16188_v18  ;;  %v8455_v18 = vshrl.u32 %v12849_v11, 16  ;;  %v8205_v35 = vpack.c.b16 %v8175_v7, %v8174_v5  ;;  %v8460_v32 = vrot.slane %v8458_v54, 6 }
 0x46d   : > { %v7323_v3 = vadd.f32 %v7265_v22, %v7036_v4  ;;  %v13354_v4 = vld [vmem:[%s13563_s27 + $0x30] sm:$0xff]  ;;  %v8463_v23 = vrot.slane %v19048_v13, 5  ;;  %v19049_v22 = vshll.u32 %v16139_v58, 16  ;;  %v12865_v7 = vrot.slane %v12849_v11, 9 }
 0x46e   : > { %v8457_v15 = vrot.slane %v8455_v18, 5  ;;  %v9163_v20 = vunpack.c.l.b16 %v9059_v52  ;;  %v8471_v13 = vrot.slane %v8469_v37, 5  ;;  %v8474_v11 = vrot.slane %v8472_v40, 6 }
 0x46f   : > { %v6981_v34 = vpop.f32.mrf.mxu2  ;;  %v16977_v42 = vadd.f32 %v7919_v1, %v7323_v3  ;;  %v8076_v1 = vrot.slane %v8074_v59, 4  ;;  %v13474_v3 = vld [vmem:[%s13563_s27 + $0x44] sm:$0x1]  ;;  %v9062_v52 = vrot.slane %v16972_v46, 6 }
 0x470   : > { %v7037_v47 = vadd.f32 %v6981_v34, %v6655_v61  ;;  %v8077_v17 = vrot.slane %v13474_v3, 5  ;;  %v8461_v58 = vor.u32 %v8460_v32, %v8457_v15  ;;  %v9065_v3 = vrot.slane %v16966_v60, 6 }
 0x471   : > { %12962 = vmatmul.msk.bf16.vlgmr.msrb.gmra.mxu3 %vm658_vm4, %v9192_v9  ;;  %v8464_v9 = vrot.slane %v19049_v22, 6 }
 0x472   : > { %v8078_v51 = vsel %vm13839_vm8, %v8076_v1, %v8077_v17  ;;  %v9064_v1 = vrot.slane %v9062_v52, 4 }
 0x473   : > { %v7922_v39 = vpop.f32.mrf.mxu0  ;;  %v6604_v61 = vpop.f32.mrf.mxu1 }
 0x474   : > { %v7268_v27 = vpop.f32.mrf.mxu3  ;;  %v6657_v8 = vadd.f32 %v6604_v61, %v16206_v16  ;;  %v8811_v16 = vpack.c.b16 %v8781_v6, %v8780_v30  ;;  %v8465_v61 = vor.u32 %v8464_v9, %v8463_v23  ;;  %v8462_v6 = vrot.slane %v8461_v58, 4  ;;  %v12931_v23 = vld [vmem:[%s13563_s27 + $0x3c] sm:$0xc] }
 0x475   : > { %v7324_v5 = vadd.f32 %v7268_v27, %v7037_v47  ;;  %v8075_v47 = vsel %vm13839_vm8, %v12865_v7, %v8074_v59  ;;  %v9193_v27 = vpack.c.b16 %v9163_v20, %v9162_v24  ;;  %v8475_v59 = vor.u32 %v8474_v11, %v8471_v13  ;;  %v17003_v24 = vld [vmem:[%s13563_s27 + $0x50] sm:$0x3]  ;;  %v13355_v58 = vld [vmem:[%s13563_s27 + $0x3c] sm:$0xff] }
 0x476   : > { %13075 = vmatmul.msk.bf16.vlgmr.msrb.gmra.mxu0 %vm658_vm4, %v13354_v4  ;;  %12881 = vmatmul.msk.bf16.gmra.mxu1 %vm658_vm4, %v8205_v35  ;;  %v16994_v4 = vld [vmem:[%s13563_s27 + $0x48] sm:$0xe]  ;;  %v8176_v15 = vunpack.c.l.b16 %v8075_v47  ;;  %v8467_v32 = vrot.slane %v8465_v61, 4  ;;  %v8177_v9 = vunpack.c.l.b16 %v8078_v51  ;;  %v12947_v7 = vrot.slane %v12931_v23, 10 }
 0x477   : > { %v6983_v34 = vpop.f32.mrf.mxu2  ;;  %v16987_v18 = vadd.f32 %v7922_v39, %v7324_v5  ;;  %v8478_v37 = vshrl.u32 %v16994_v4, 16  ;;  %v8481_v40 = vshll.u32 %v16994_v4, 16  ;;  %v8495_v51 = vshll.u32 %v17003_v24, 16 }
 0x478   : > { %v7038_v54 = vadd.f32 %v6983_v34, %v6656_v29  ;;  %v8206_v17 = vpack.c.b16 %v8177_v9, %v8176_v15  ;;  %v8476_v34 = vsel %vm13875_vm11, %v8467_v32, %v8475_v59  ;;  %v19053_v32 = vld [vmem:[#allocation26_spill] sm:$0xff] }
 0x479   : > { %v8483_v20 = vrot.slane %v8481_v40, 6  ;;  %v8783_v9 = vunpack.c.l.b16 %v8476_v34  ;;  %v9063_v40 = vsel %vm13882_vm12, %v12947_v7, %v9062_v52 }
 0x47b   : > { %v7924_v35 = vpop.f32.mrf.mxu0  ;;  %v6606_v30 = vpop.f32.mrf.mxu1 }
 0x47c   : > { %v7270_v29 = vpop.f32.mrf.mxu3  ;;  %12914 = vmatmul.msk.bf16.gmra.mxu2 %vm658_vm4, %v8811_v16  ;;  %v6658_v39 = vadd.f32 %v6606_v30, %v16245_v33  ;;  %v8466_v33 = vsel %vm13875_vm11, %v8462_v6, %v8465_v61  ;;  %v8480_v16 = vrot.slane %v8478_v37, 5  ;;  %v8492_v61 = vshrl.u32 %v17003_v24, 16 }
 0x47d   : > { %v7325_v22 = vadd.f32 %v7270_v29, %v7038_v54  ;;  %v19050_v54 = vld [vmem:[#allocation24_spill] sm:$0xff]  ;;  %v8782_v23 = vunpack.c.l.b16 %v8466_v33  ;;  %v12866_v33 = vrot.slane %v16994_v4, 9 }
 0x47e   : > { %v19051_v13 = vshrl.u32 %v19050_v54, 16 }
 0x47f   : > { %v6986_v5 = vpop.f32.mrf.mxu2  ;;  %v17019_v29 = vadd.f32 %v7924_v35, %v7325_v22  ;;  %v8494_v22 = vrot.slane %v8492_v61, 5  ;;  %v8812_v7 = vpack.c.b16 %v8783_v9, %v8782_v23 }
 0x480   : > { %v7039_v46 = vadd.f32 %v6986_v5, %v6657_v8  ;;  %v8486_v11 = vrot.slane %v19051_v13, 5  ;;  %v19052_v8 = vshll.u32 %v19050_v54, 16  ;;  %v9066_v5 = vsel %vm13882_vm12, %v9064_v1, %v9065_v3 }
 0x481   : > { %12963 = vmatmul.msk.bf16.gmra.mxu3 %vm658_vm4, %v9193_v27  ;;  %v13475_v27 = vld [vmem:[%s13563_s27 + $0x4c] sm:$0xf]  ;;  %v8484_v54 = vor.u32 %v8483_v20, %v8480_v16  ;;  %v8497_v13 = vrot.slane %v8495_v51, 6  ;;  %v9164_v1 = vunpack.c.l.b16 %v9063_v40  ;;  %v9165_v3 = vunpack.c.l.b16 %v9066_v5  ;;  %v12932_v16 = vld [vmem:[%s13563_s27 + $0x48] sm:$0xc] }
 0x482   : > { %v8487_v47 = vrot.slane %v19052_v8, 6  ;;  %v8081_v6 = vrot.slane %v13475_v27, 5  ;;  %v12948_v9 = vrot.slane %v12932_v16, 10 }
 0x483   : > { %v7927_v60 = vpop.f32.mrf.mxu0  ;;  %v6609_v30 = vpop.f32.mrf.mxu1  ;;  %v8498_v51 = vor.u32 %v8497_v13, %v8494_v22 }
 0x484   : > { %v7273_v15 = vpop.f32.mrf.mxu3  ;;  %v6659_v59 = vadd.f32 %v6609_v30, %v19053_v32  ;;  %v8488_v35 = vor.u32 %v8487_v47, %v8486_v11  ;;  %v8083_v34 = vrot.slane %v8081_v6, 4  ;;  %v8082_v47 = vsel %vm13839_vm8, %v12866_v33, %v8081_v6  ;;  %v12851_v32 = vld [vmem:[%s13563_s27 + $0x54] sm:$0xe] }
 0x485   : > { %v7326_v37 = vadd.f32 %v7273_v15, %v7039_v46  ;;  %v13476_v46 = vld [vmem:[%s13563_s27 + $0x50] sm:$0x1]  ;;  %v8178_v40 = vunpack.c.l.b16 %v8082_v47  ;;  %v19054_v47 = vld [vmem:[#allocation25_spill] sm:$0xff] }
 0x486   : > { %13076 = vmatmul.msk.bf16.gmra.mxu0 %vm658_vm4, %v13355_v58  ;;  %12882 = vmatmul.msk.bf16.gmra.mxu1 %vm658_vm4, %v8206_v17  ;;  %v8084_v30 = vrot.slane %v13476_v46, 5  ;;  %v9069_v58 = vrot.slane %v13475_v27, 6  ;;  %v8485_v17 = vrot.slane %v8484_v54, 4  ;;  %v8490_v61 = vrot.slane %v8488_v35, 4 }
 0x487   : > { %v6988_v8 = vpop.f32.mrf.mxu2  ;;  %v17030_v15 = vadd.f32 %v7927_v60, %v7326_v37  ;;  %v9194_v27 = vpack.c.b16 %v9165_v3, %v9164_v1  ;;  %v9072_v54 = vrot.slane %v17003_v24, 6  ;;  %v17055_v1 = vld [vmem:[%s13563_s27 + $0x58] sm:$0xf] }
 0x488   : > { %v7040_v52 = vadd.f32 %v6988_v8, %v6658_v39  ;;  %v8085_v4 = vsel %vm13839_vm8, %v8083_v34, %v8084_v30  ;;  %v9071_v37 = vrot.slane %v9069_v58, 4  ;;  %v8489_v6 = vsel %vm13875_vm11, %v8485_v17, %v8488_v35  ;;  %v17049_v30 = vld [vmem:[%s13563_s27 + $0x5c] sm:$0x3] }
 0x489   : > { %v8179_v5 = vunpack.c.l.b16 %v8085_v4  ;;  %v8499_v13 = vsel %vm13875_vm11, %v8490_v61, %v8498_v51  ;;  %v8504_v8 = vshll.u32 %v12851_v32, 16  ;;  %v8784_v34 = vunpack.c.l.b16 %v8489_v6 }
 0x48a   : > { %v9070_v46 = vsel %vm13882_vm12, %v12948_v9, %v9069_v58  ;;  %v8785_v35 = vunpack.c.l.b16 %v8499_v13  ;;  %v9073_v24 = vsel %vm13882_vm12, %v9071_v37, %v9072_v54  ;;  %v8088_v3 = vrot.slane %v17055_v1, 5 }
 0x48b   : > { %v7929_v20 = vpop.f32.mrf.mxu0  ;;  %v6611_v11 = vpop.f32.mrf.mxu1  ;;  %v19055_v4 = vshrl.u32 %v19054_v47, 16  ;;  %v19057_v9 = vshll.u32 %v19054_v47, 16  ;;  %v12867_v54 = vrot.slane %v12851_v32, 9 }
 0x48c   : > { %v7275_v60 = vpop.f32.mrf.mxu3  ;;  %12915 = vmatmul.msk.bf16.gmra.mxu2 %vm658_vm4, %v8812_v7  ;;  %v6660_v39 = vadd.f32 %v6611_v11, %v16299_v26  ;;  %v8501_v26 = vshrl.u32 %v12851_v32, 16  ;;  %v8207_v7 = vpack.c.b16 %v8179_v5, %v8178_v40  ;;  %v8506_v11 = vrot.slane %v8504_v8, 6 }
 0x48d   : > { %v7327_v23 = vadd.f32 %v7275_v60, %v7040_v52  ;;  %v13356_v52 = vld [vmem:[%s13563_s27 + $0x48] sm:$0xff]  ;;  %v8509_v58 = vrot.slane %v19055_v4, 5  ;;  %v19056_v60 = vld [vmem:[#allocation14_spill] sm:$0xff]  ;;  %v8510_v37 = vrot.slane %v19057_v9, 6  ;;  %v8515_v40 = vshrl.u32 %v17049_v30, 16 }
 0x48e   : > { %v8503_v16 = vrot.slane %v8501_v26, 5  ;;  %v8518_v5 = vshll.u32 %v17049_v30, 16  ;;  %v8813_v8 = vpack.c.b16 %v8785_v35, %v8784_v34 }
 0x48f   : > { %v6991_v22 = vpop.f32.mrf.mxu2  ;;  %v17060_v61 = vadd.f32 %v7929_v20, %v7327_v23  ;;  %v8090_v20 = vrot.slane %v8088_v3, 4  ;;  %v13478_v23 = vld [vmem:[%s13563_s27 + $0x5c] sm:$0x1]  ;;  %v8511_v9 = vor.u32 %v8510_v37, %v8509_v58  ;;  %v8517_v10 = vrot.slane %v8515_v40, 5  ;;  %v12933_v58 = vld [vmem:[%s13563_s27 + $0x54] sm:$0xc] }
 0x490   : > { %v7041_v33 = vadd.f32 %v6991_v22, %v6659_v59  ;;  %v9166_v22 = vunpack.c.l.b16 %v9070_v46  ;;  %v8091_v13 = vrot.slane %v13478_v23, 5  ;;  %v8507_v47 = vor.u32 %v8506_v11, %v8503_v16 }
 0x491   : > { %12964 = vmatmul.msk.bf16.gmra.mxu3 %vm658_vm4, %v9194_v27  ;;  %v8520_v32 = vrot.slane %v8518_v5, 6  ;;  %v8513_v11 = vrot.slane %v8511_v9, 4 }
 0x492   : > { %v8092_v46 = vsel %vm13839_vm8, %v8090_v20, %v8091_v13  ;;  %v8508_v35 = vrot.slane %v8507_v47, 4  ;;  %v17086_v20 = vld [vmem:[%s13563_s27 + $0x68] sm:$0x3]  ;;  %v13357_v47 = vld [vmem:[%s13563_s27 + $0x54] sm:$0xff] }
 0x493   : > { %v7932_v17 = vpop.f32.mrf.mxu0  ;;  %v6614_v59 = vpop.f32.mrf.mxu1  ;;  %v8181_v40 = vunpack.c.l.b16 %v8092_v46 }
 0x494   : > { %v7278_v51 = vpop.f32.mrf.mxu3  ;;  %v6661_v27 = vadd.f32 %v6614_v59, %v19056_v60  ;;  %v9167_v59 = vunpack.c.l.b16 %v9073_v24  ;;  %v9076_v24 = vrot.slane %v17055_v1, 6 }
 0x495   : > { %v7328_v6 = vadd.f32 %v7278_v51, %v7041_v33  ;;  %v8089_v33 = vsel %vm13839_vm8, %v12867_v54, %v8088_v3  ;;  %v8521_v3 = vor.u32 %v8520_v32, %v8517_v10  ;;  %v9079_v10 = vrot.slane %v17049_v30, 6 }
 0x496   : > { %13077 = vmatmul.msk.bf16.gmra.mxu0 %vm658_vm4, %v13356_v52  ;;  %12883 = vmatmul.msk.bf16.gmra.mxu1 %vm658_vm4, %v8207_v7  ;;  %v17077_v52 = vld [vmem:[%s13563_s27 + $0x60] sm:$0xe]  ;;  %v9195_v51 = vpack.c.b16 %v9167_v59, %v9166_v22  ;;  %v8180_v16 = vunpack.c.l.b16 %v8089_v33  ;;  %v12949_v22 = vrot.slane %v12933_v58, 10  ;;  %v9078_v23 = vrot.slane %v9076_v24, 4 }
 0x497   : > { %v6993_v26 = vpop.f32.mrf.mxu2  ;;  %v17070_v4 = vadd.f32 %v7932_v17, %v7328_v6  ;;  %v8524_v5 = vshrl.u32 %v17077_v52, 16  ;;  %v8527_v6 = vshll.u32 %v17077_v52, 16 }
 0x498   : > { %v7042_v60 = vadd.f32 %v6993_v26, %v6660_v39  ;;  %v8208_v13 = vpack.c.b16 %v8181_v40, %v8180_v16  ;;  %v8522_v26 = vsel %vm13875_vm11, %v8513_v11, %v8521_v3  ;;  %v19061_v3 = vld [vmem:[#allocation13_spill] sm:$0xff] }
 0x499   : > { %v8529_v59 = vrot.slane %v8527_v6, 6 }
 0x49b   : > { %v7934_v7 = vpop.f32.mrf.mxu0  ;;  %v6616_v34 = vpop.f32.mrf.mxu1 }
 0x49c   : > { %v7280_v39 = vpop.f32.mrf.mxu3  ;;  %12916 = vmatmul.msk.bf16.gmra.mxu2 %vm658_vm4, %v8813_v8  ;;  %v6662_v17 = vadd.f32 %v6616_v34, %v16346_v48  ;;  %v8512_v48 = vsel %vm13875_vm11, %v8508_v35, %v8511_v9  ;;  %v8526_v8 = vrot.slane %v8524_v5, 5  ;;  %v8538_v9 = vshrl.u32 %v17086_v20, 16 }
 0x49d   : > { %v7329_v37 = vadd.f32 %v7280_v39, %v7042_v60  ;;  %v19058_v60 = vld [vmem:[#allocation11_spill] sm:$0xff]  ;;  %v8541_v34 = vshll.u32 %v17086_v20, 16  ;;  %v8786_v40 = vunpack.c.l.b16 %v8512_v48  ;;  %v8787_v5 = vunpack.c.l.b16 %v8522_v26 }
 0x49e   : > { %v19059_v32 = vshrl.u32 %v19058_v60, 16  ;;  %v12868_v48 = vrot.slane %v17077_v52, 9 }
 0x49f   : > { %v6996_v54 = vpop.f32.mrf.mxu2  ;;  %v17102_v16 = vadd.f32 %v7934_v7, %v7329_v37  ;;  %v8540_v37 = vrot.slane %v8538_v9, 5 }
 0x4a0   : > { %v7043_v1 = vadd.f32 %v6996_v54, %v6661_v27  ;;  %v8532_v33 = vrot.slane %v19059_v32, 5  ;;  %v19060_v27 = vshll.u32 %v19058_v60, 16  ;;  %v9077_v54 = vsel %vm13882_vm12, %v12949_v22, %v9076_v24 }
 0x4a1   : > { %12965 = vmatmul.msk.bf16.gmra.mxu3 %vm658_vm4, %v9195_v51  ;;  %v13479_v51 = vld [vmem:[%s13563_s27 + $0x64] sm:$0xf]  ;;  %v9080_v60 = vsel %vm13882_vm12, %v9078_v23, %v9079_v10  ;;  %v8530_v32 = vor.u32 %v8529_v59, %v8526_v8  ;;  %v8814_v22 = vpack.c.b16 %v8787_v5, %v8786_v40  ;;  %v9168_v23 = vunpack.c.l.b16 %v9077_v54  ;;  %v12934_v8 = vld [vmem:[%s13563_s27 + $0x60] sm:$0xc] }
 0x4a2   : > { %v8533_v46 = vrot.slane %v19060_v27, 6  ;;  %v8095_v39 = vrot.slane %v13479_v51, 5  ;;  %v8543_v27 = vrot.slane %v8541_v34, 6  ;;  %v9169_v10 = vunpack.c.l.b16 %v9080_v60 }
 0x4a3   : > { %v7937_v30 = vpop.f32.mrf.mxu0  ;;  %v6619_v35 = vpop.f32.mrf.mxu1  ;;  %v12950_v40 = vrot.slane %v12934_v8, 10  ;;  %v9086_v60 = vrot.slane %v17086_v20, 6 }
 0x4a4   : > { %v7283_v11 = vpop.f32.mrf.mxu3  ;;  %v6663_v58 = vadd.f32 %v6619_v35, %v19061_v3  ;;  %v8534_v7 = vor.u32 %v8533_v46, %v8532_v33  ;;  %v8097_v26 = vrot.slane %v8095_v39, 4  ;;  %v8096_v46 = vsel %vm13839_vm8, %v12868_v48, %v8095_v39 }
 0x4a5   : > { %v7330_v6 = vadd.f32 %v7283_v11, %v7043_v1  ;;  %v13480_v1 = vld [vmem:[%s13563_s27 + $0x68] sm:$0x1]  ;;  %v8544_v34 = vor.u32 %v8543_v27, %v8540_v37 }
 0x4a6   : > { %13078 = vmatmul.msk.bf16.gmra.mxu0 %vm658_vm4, %v13357_v47  ;;  %12884 = vmatmul.msk.bf16.gmra.mxu1 %vm658_vm4, %v8208_v13  ;;  %v8098_v35 = vrot.slane %v13480_v1, 5  ;;  %v9083_v47 = vrot.slane %v13479_v51, 6  ;;  %v8531_v13 = vrot.slane %v8530_v32, 4  ;;  %v8536_v9 = vrot.slane %v8534_v7, 4 }
 0x4a7   : > { %v6998_v50 = vpop.f32.mrf.mxu2  ;;  %v17113_v11 = vadd.f32 %v7937_v30, %v7330_v6  ;;  %v9196_v51 = vpack.c.b16 %v9169_v10, %v9168_v23  ;;  %v8182_v6 = vunpack.c.l.b16 %v8096_v46  ;;  %v17138_v23 = vld [vmem:[%s13563_s27 + $0x70] sm:$0xf] }
 0x4a8   : > { %v7044_v24 = vadd.f32 %v6998_v50, %v6662_v17  ;;  %v8099_v52 = vsel %vm13839_vm8, %v8097_v26, %v8098_v35  ;;  %v12853_v17 = vld [vmem:[%s13563_s27 + $0x6c] sm:$0xe]  ;;  %v9085_v5 = vrot.slane %v9083_v47, 4  ;;  %v8535_v39 = vsel %vm13875_vm11, %v8531_v13, %v8534_v7  ;;  %v17132_v35 = vld [vmem:[%s13563_s27 + $0x74] sm:$0x3] }
 0x4a9   : > { %v8183_v54 = vunpack.c.l.b16 %v8099_v52  ;;  %v8545_v37 = vsel %vm13875_vm11, %v8536_v9, %v8544_v34  ;;  %v8550_v27 = vshll.u32 %v12853_v17, 16  ;;  %v8788_v26 = vunpack.c.l.b16 %v8535_v39  ;;  %v19062_v46 = vld [vmem:[#allocation8_spill] sm:$0xff] }
 0x4aa   : > { %v9084_v1 = vsel %vm13882_vm12, %v12950_v40, %v9083_v47  ;;  %v8789_v7 = vunpack.c.l.b16 %v8545_v37  ;;  %v9087_v20 = vsel %vm13882_vm12, %v9085_v5, %v9086_v60  ;;  %v8102_v10 = vrot.slane %v17138_v23, 5 }
 0x4ab   : > { %v7939_v59 = vpop.f32.mrf.mxu0  ;;  %v6621_v33 = vpop.f32.mrf.mxu1  ;;  %v19063_v52 = vshrl.u32 %v19062_v46, 16  ;;  %v19066_v40 = vshll.u32 %v19062_v46, 16  ;;  %v12869_v60 = vrot.slane %v12853_v17, 9 }
 0x4ac   : > { %v7285_v30 = vpop.f32.mrf.mxu3  ;;  %12917 = vmatmul.msk.bf16.gmra.mxu2 %vm658_vm4, %v8814_v22  ;;  %v6664_v50 = vadd.f32 %v6621_v33, %v16402_v28  ;;  %v8547_v28 = vshrl.u32 %v12853_v17, 16  ;;  %v8209_v22 = vpack.c.b16 %v8183_v54, %v8182_v6  ;;  %v8552_v33 = vrot.slane %v8550_v27, 6 }
 0x4ad   : > { %v7331_v3 = vadd.f32 %v7285_v30, %v7044_v24  ;;  %v13358_v24 = vld [vmem:[%s13563_s27 + $0x60] sm:$0xff]  ;;  %v8555_v47 = vrot.slane %v19063_v52, 5  ;;  %v19065_v30 = vld [vmem:[#allocation3_spill] sm:$0xff]  ;;  %v8556_v5 = vrot.slane %v19066_v40, 6  ;;  %v8561_v6 = vshrl.u32 %v17132_v35, 16 }
 0x4ae   : > { %v8549_v8 = vrot.slane %v8547_v28, 5  ;;  %v8564_v54 = vshll.u32 %v17132_v35, 16  ;;  %v8815_v27 = vpack.c.b16 %v8789_v7, %v8788_v26 }
 0x4af   : > { %v7001_v32 = vpop.f32.mrf.mxu2  ;;  %v17143_v9 = vadd.f32 %v7939_v59, %v7331_v3  ;;  %v8104_v59 = vrot.slane %v8102_v10, 4  ;;  %v13482_v3 = vld [vmem:[%s13563_s27 + $0x74] sm:$0x1]  ;;  %v8557_v40 = vor.u32 %v8556_v5, %v8555_v47  ;;  %v12935_v47 = vld [vmem:[%s13563_s27 + $0x6c] sm:$0xc] }
 0x4b0   : > { %v7045_v48 = vadd.f32 %v7001_v32, %v6663_v58  ;;  %v9170_v32 = vunpack.c.l.b16 %v9084_v1  ;;  %v8105_v37 = vrot.slane %v13482_v3, 5  ;;  %v8553_v46 = vor.u32 %v8552_v33, %v8549_v8 }
 0x4b1   : > { %12966 = vmatmul.msk.bf16.gmra.mxu3 %vm658_vm4, %v9196_v51  ;;  %19064 = vst [vmem:[#allocation20_spill] sm:$0xff] %v17143_v9  ;;  %v8563_v9 = vrot.slane %v8561_v6, 5  ;;  %v8566_v17 = vrot.slane %v8564_v54, 6  ;;  %v8559_v33 = vrot.slane %v8557_v40, 4 }
 0x4b2   : > { %v8106_v1 = vsel %vm13839_vm8, %v8104_v59, %v8105_v37  ;;  %v8554_v7 = vrot.slane %v8553_v46, 4  ;;  %v17169_v59 = vld [vmem:[%s13563_s27 + $0x80] sm:$0x3]  ;;  %v13359_v46 = vld [vmem:[%s13563_s27 + $0x6c] sm:$0xff] }
 0x4b3   : > { %v7942_v13 = vpop.f32.mrf.mxu0  ;;  %v6624_v58 = vpop.f32.mrf.mxu1  ;;  %v8185_v6 = vunpack.c.l.b16 %v8106_v1 }
 0x4b4   : > { %v7288_v34 = vpop.f32.mrf.mxu3  ;;  %v6665_v51 = vadd.f32 %v6624_v58, %v19065_v30  ;;  %v9171_v58 = vunpack.c.l.b16 %v9087_v20  ;;  %v9090_v20 = vrot.slane %v17138_v23, 6 }
 0x4b5   : > { %v7332_v39 = vadd.f32 %v7288_v34, %v7045_v48  ;;  %v8103_v48 = vsel %vm13839_vm8, %v12869_v60, %v8102_v10  ;;  %v8567_v10 = vor.u32 %v8566_v17, %v8563_v9  ;;  %v9093_v9 = vrot.slane %v17132_v35, 6 }
 0x4b6   : > { %13079 = vmatmul.msk.bf16.gmra.mxu0 %vm658_vm4, %v13358_v24  ;;  %12885 = vmatmul.msk.bf16.gmra.mxu1 %vm658_vm4, %v8209_v22  ;;  %v17160_v24 = vld [vmem:[%s13563_s27 + $0x78] sm:$0xe]  ;;  %v9197_v34 = vpack.c.b16 %v9171_v58, %v9170_v32  ;;  %v8184_v8 = vunpack.c.l.b16 %v8103_v48  ;;  %v12951_v32 = vrot.slane %v12935_v47, 10  ;;  %v9092_v3 = vrot.slane %v9090_v20, 4 }
 0x4b7   : > { %v7003_v28 = vpop.f32.mrf.mxu2  ;;  %v17153_v52 = vadd.f32 %v7942_v13, %v7332_v39  ;;  %v8570_v54 = vshrl.u32 %v17160_v24, 16  ;;  %v8573_v39 = vshll.u32 %v17160_v24, 16 }
 0x4b8   : > { %v7046_v30 = vadd.f32 %v7003_v28, %v6664_v50  ;;  %v8210_v37 = vpack.c.b16 %v8185_v6, %v8184_v8  ;;  %v8568_v28 = vsel %vm13875_vm11, %v8559_v33, %v8567_v10  ;;  %v19071_v10 = vld [vmem:[#allocation4_spill] sm:$0xff] }
 0x4b9   : > { %v8575_v58 = vrot.slane %v8573_v39, 6 }
 0x4bb   : > { %v7944_v22 = vpop.f32.mrf.mxu0  ;;  %v6626_v26 = vpop.f32.mrf.mxu1 }
 0x4bc   : > { %v7290_v50 = vpop.f32.mrf.mxu3  ;;  %12918 = vmatmul.msk.bf16.gmra.mxu2 %vm658_vm4, %v8815_v27  ;;  %v6666_v13 = vadd.f32 %v6626_v26, %v16460_v12  ;;  %v8558_v12 = vsel %vm13875_vm11, %v8554_v7, %v8557_v40  ;;  %v8572_v27 = vrot.slane %v8570_v54, 5  ;;  %v8584_v40 = vshrl.u32 %v17169_v59, 16 }
 0x4bd   : > { %v7333_v5 = vadd.f32 %v7290_v50, %v7046_v30  ;;  %v19067_v30 = vld [vmem:[#allocation12_spill] sm:$0xff]  ;;  %v8587_v26 = vshll.u32 %v17169_v59, 16  ;;  %v8790_v6 = vunpack.c.l.b16 %v8558_v12  ;;  %v8791_v54 = vunpack.c.l.b16 %v8568_v28 }
 0x4be   : > { %v19068_v17 = vshrl.u32 %v19067_v30, 16  ;;  %v12870_v12 = vrot.slane %v17160_v24, 9 }
 0x4bf   : > { %v7006_v60 = vpop.f32.mrf.mxu2  ;;  %v17185_v8 = vadd.f32 %v7944_v22, %v7333_v5  ;;  %v8586_v5 = vrot.slane %v8584_v40, 5 }
 0x4c0   : > { %v7047_v23 = vadd.f32 %v7006_v60, %v6665_v51  ;;  %v8578_v48 = vrot.slane %v19068_v17, 5  ;;  %v19069_v51 = vshll.u32 %v19067_v30, 16  ;;  %v9091_v60 = vsel %vm13882_vm12, %v12951_v32, %v9090_v20 }
 0x4c1   : > { %12967 = vmatmul.msk.bf16.gmra.mxu3 %vm658_vm4, %v9197_v34  ;;  %v13483_v34 = vld [vmem:[%s13563_s27 + $0x7c] sm:$0xf]  ;;  %19070 = vst [vmem:[#allocation21_spill] sm:$0xff] %v17185_v8  ;;  %v9094_v30 = vsel %vm13882_vm12, %v9092_v3, %v9093_v9  ;;  %v8576_v17 = vor.u32 %v8575_v58, %v8572_v27  ;;  %v8816_v32 = vpack.c.b16 %v8791_v54, %v8790_v6  ;;  %v9172_v3 = vunpack.c.l.b16 %v9091_v60  ;;  %v12936_v27 = vld [vmem:[%s13563_s27 + $0x78] sm:$0xc] }
 0x4c2   : > { %v8579_v1 = vrot.slane %v19069_v51, 6  ;;  %v8109_v50 = vrot.slane %v13483_v34, 5  ;;  %v8589_v51 = vrot.slane %v8587_v26, 6  ;;  %v9173_v9 = vunpack.c.l.b16 %v9094_v30 }
 0x4c3   : > { %v7947_v35 = vpop.f32.mrf.mxu0  ;;  %v6629_v7 = vpop.f32.mrf.mxu1  ;;  %v12952_v6 = vrot.slane %v12936_v27, 10  ;;  %v9100_v30 = vrot.slane %v17169_v59, 6 }
 0x4c4   : > { %v7293_v33 = vpop.f32.mrf.mxu3  ;;  %v6667_v47 = vadd.f32 %v6629_v7, %v19071_v10  ;;  %v8580_v22 = vor.u32 %v8579_v1, %v8578_v48  ;;  %v8111_v28 = vrot.slane %v8109_v50, 4  ;;  %v8110_v1 = vsel %vm13839_vm8, %v12870_v12, %v8109_v50 }
 0x4c5   : > { %v7334_v39 = vadd.f32 %v7293_v33, %v7047_v23  ;;  %v13484_v23 = vld [vmem:[%s13563_s27 + $0x80] sm:$0x1]  ;;  %v8590_v26 = vor.u32 %v8589_v51, %v8586_v5 }
 0x4c6   : > { %13080 = vmatmul.msk.bf16.gmra.mxu0 %vm658_vm4, %v13359_v46  ;;  %12886 = vmatmul.msk.bf16.gmra.mxu1 %vm658_vm4, %v8210_v37  ;;  %v8112_v7 = vrot.slane %v13484_v23, 5  ;;  %v9097_v46 = vrot.slane %v13483_v34, 6  ;;  %v8577_v37 = vrot.slane %v8576_v17, 4  ;;  %v8582_v40 = vrot.slane %v8580_v22, 4 }
 0x4c7   : > { %v7008_v8 = vpop.f32.mrf.mxu2  ;;  %v17196_v33 = vadd.f32 %v7947_v35, %v7334_v39  ;;  %v9198_v34 = vpack.c.b16 %v9173_v9, %v9172_v3  ;;  %v8186_v39 = vunpack.c.l.b16 %v8110_v1  ;;  %v17221_v3 = vld [vmem:[%s13563_s27 + $0x88] sm:$0xf]  ;;  %v19072_v1 = vld [vmem:[#allocation10_spill] sm:$0xff] }
 0x4c8   : > { %v7048_v20 = vadd.f32 %v7008_v8, %v6666_v13  ;;  %v8113_v24 = vsel %vm13839_vm8, %v8111_v28, %v8112_v7  ;;  %v12855_v8 = vld [vmem:[%s13563_s27 + $0x84] sm:$0xe]  ;;  %v9099_v54 = vrot.slane %v9097_v46, 4  ;;  %v8581_v50 = vsel %vm13875_vm11, %v8577_v37, %v8580_v22  ;;  %v17215_v7 = vld [vmem:[%s13563_s27 + $0x8c] sm:$0x3] }
 0x4c9   : > { %v8187_v60 = vunpack.c.l.b16 %v8113_v24  ;;  %v8591_v5 = vsel %vm13875_vm11, %v8582_v40, %v8590_v26  ;;  %v8596_v51 = vshll.u32 %v12855_v8, 16  ;;  %v8792_v28 = vunpack.c.l.b16 %v8581_v50 }
 0x4ca   : > { %v9098_v23 = vsel %vm13882_vm12, %v12952_v6, %v9097_v46  ;;  %v8793_v22 = vunpack.c.l.b16 %v8591_v5  ;;  %v9101_v59 = vsel %vm13882_vm12, %v9099_v54, %v9100_v30  ;;  %v8116_v9 = vrot.slane %v17221_v3, 5 }
 0x4cb   : > { %v7949_v58 = vpop.f32.mrf.mxu0  ;;  %v6631_v48 = vpop.f32.mrf.mxu1  ;;  %v19073_v24 = vshrl.u32 %v19072_v1, 16  ;;  %v8607_v54 = vshrl.u32 %v17215_v7, 16  ;;  %v12871_v50 = vrot.slane %v12855_v8, 9  ;;  %v9174_v30 = vunpack.c.l.b16 %v9098_v23 }
 0x4cc   : > { %v7295_v35 = vpop.f32.mrf.mxu3  ;;  %12919 = vmatmul.msk.bf16.gmra.mxu2 %vm658_vm4, %v8816_v32  ;;  %v6668_v13 = vadd.f32 %v6631_v48, %v16505_v43  ;;  %v8593_v43 = vshrl.u32 %v12855_v8, 16  ;;  %v8211_v32 = vpack.c.b16 %v8187_v60, %v8186_v39  ;;  %v8598_v48 = vrot.slane %v8596_v51, 6 }
 0x4cd   : > { %v7335_v10 = vadd.f32 %v7295_v35, %v7048_v20  ;;  %v13360_v20 = vld [vmem:[%s13563_s27 + $0x78] sm:$0xff]  ;;  %v8601_v46 = vrot.slane %v19073_v24, 5  ;;  %v8610_v39 = vshll.u32 %v17215_v7, 16 }
 0x4ce   : > { %v8595_v27 = vrot.slane %v8593_v43, 5  ;;  %v9175_v43 = vunpack.c.l.b16 %v9101_v59  ;;  %v9104_v59 = vrot.slane %v17221_v3, 6 }
 0x4cf   : > { %v7011_v17 = vpop.f32.mrf.mxu2  ;;  %v17226_v40 = vadd.f32 %v7949_v58, %v7335_v10  ;;  %v8118_v58 = vrot.slane %v8116_v9, 4  ;;  %v13486_v10 = vld [vmem:[%s13563_s27 + $0x8c] sm:$0x1]  ;;  %v8612_v8 = vrot.slane %v8610_v39, 6 }
 0x4d0   : > { %v7049_v12 = vadd.f32 %v7011_v17, %v6667_v47  ;;  %v8119_v17 = vrot.slane %v13486_v10, 5  ;;  %v8599_v51 = vor.u32 %v8598_v48, %v8595_v27  ;;  %v17252_v10 = vld [vmem:[%s13563_s27 + $0x98] sm:$0x3] }
 0x4d1   : > { %12968 = vmatmul.msk.bf16.gmra.mxu3 %vm658_vm4, %v9198_v34  ;;  %v19074_v34 = vshll.u32 %v19072_v1, 16 }
 0x4d2   : > { %v8120_v23 = vsel %vm13839_vm8, %v8118_v58, %v8119_v17 }
 0x4d3   : > { %v7952_v37 = vpop.f32.mrf.mxu0  ;;  %v6634_v47 = vpop.f32.mrf.mxu1  ;;  %v8602_v6 = vrot.slane %v19074_v34, 6  ;;  %v8609_v34 = vrot.slane %v8607_v54, 5  ;;  %v8189_v39 = vunpack.c.l.b16 %v8120_v23 }
 0x4d4   : > { %v7298_v26 = vpop.f32.mrf.mxu3  ;;  %v6669_v35 = vadd.f32 %v6634_v47, %v16523_v45  ;;  %v8817_v45 = vpack.c.b16 %v8793_v22, %v8792_v28  ;;  %v8600_v22 = vrot.slane %v8599_v51, 4 }
 0x4d5   : > { %v7336_v60 = vadd.f32 %v7298_v26, %v7049_v12  ;;  %v8603_v24 = vor.u32 %v8602_v6, %v8601_v46  ;;  %v8117_v12 = vsel %vm13839_vm8, %v12871_v50, %v8116_v9  ;;  %v9199_v26 = vpack.c.b16 %v9175_v43, %v9174_v30  ;;  %v12937_v6 = vld [vmem:[%s13563_s27 + $0x84] sm:$0xc] }
 0x4d6   : > { %13081 = vmatmul.msk.bf16.gmra.mxu0 %vm658_vm4, %v13360_v20  ;;  %12887 = vmatmul.msk.bf16.gmra.mxu1 %vm658_vm4, %v8211_v32  ;;  %v17243_v20 = vld [vmem:[%s13563_s27 + $0x90] sm:$0xe]  ;;  %v8188_v48 = vunpack.c.l.b16 %v8117_v12  ;;  %v8613_v9 = vor.u32 %v8612_v8, %v8609_v34  ;;  %v12953_v58 = vrot.slane %v12937_v6, 10  ;;  %v13361_v8 = vld [vmem:[%s13563_s27 + $0x84] sm:$0xff] }
 0x4d7   : > { %v7013_v5 = vpop.f32.mrf.mxu2  ;;  %v17236_v47 = vadd.f32 %v7952_v37, %v7336_v60  ;;  %v19076_v37 = vld [vmem:[#allocation5_spill] sm:$0xff]  ;;  %v8605_v46 = vrot.slane %v8603_v24, 4  ;;  %v8616_v60 = vshrl.u32 %v17243_v20, 16  ;;  %v8619_v50 = vshll.u32 %v17243_v20, 16  ;;  %v19077_v12 = vld [vmem:[#allocation6_spill] sm:$0xff] }
 0x4d8   : > { %v7050_v1 = vadd.f32 %v7013_v5, %v6668_v13  ;;  %v8604_v17 = vsel %vm13875_vm11, %v8600_v22, %v8603_v24  ;;  %v9106_v5 = vrot.slane %v9104_v59, 4  ;;  %v8212_v43 = vpack.c.b16 %v8189_v39, %v8188_v48 }
 0x4d9   : > { %19075 = vst [vmem:[#allocation22_spill] sm:$0xff] %v17236_v47  ;;  %v8614_v51 = vsel %vm13875_vm11, %v8605_v46, %v8613_v9  ;;  %v8621_v34 = vrot.slane %v8619_v50, 6  ;;  %v19078_v23 = vshrl.u32 %v19077_v12, 16  ;;  %v8630_v24 = vshrl.u32 %v17252_v10, 16  ;;  %v19081_v9 = vld [vmem:[#allocation15_spill] sm:$0xff] }
 0x4da   : > { %v8633_v22 = vshll.u32 %v17252_v10, 16  ;;  %v8795_v50 = vunpack.c.l.b16 %v8614_v51 }
 0x4db   : > { %v7954_v32 = vpop.f32.mrf.mxu0  ;;  %v6636_v28 = vpop.f32.mrf.mxu1 }
 0x4dc   : > { %v7300_v13 = vpop.f32.mrf.mxu3  ;;  %12920 = vmatmul.msk.bf16.gmra.mxu2 %vm658_vm4, %v8817_v45  ;;  %v6670_v27 = vadd.f32 %v6636_v28, %v19076_v37  ;;  %v9107_v45 = vrot.slane %v17215_v7, 6  ;;  %v8624_v28 = vrot.slane %v19078_v23, 5 }
 0x4dd   : > { %v7337_v54 = vadd.f32 %v7300_v13, %v7050_v1  ;;  %v8618_v1 = vrot.slane %v8616_v60, 5  ;;  %v8794_v60 = vunpack.c.l.b16 %v8604_v17  ;;  %v12872_v17 = vrot.slane %v17243_v20, 9 }
 0x4de   : > { %v9108_v23 = vsel %vm13882_vm12, %v9106_v5, %v9107_v45 }
 0x4df   : > { %v7016_v30 = vpop.f32.mrf.mxu2  ;;  %v17268_v6 = vadd.f32 %v7954_v32, %v7337_v54  ;;  %v8632_v54 = vrot.slane %v8630_v24, 5  ;;  %v9177_v45 = vunpack.c.l.b16 %v9108_v23 }
 0x4e0   : > { %v7051_v3 = vadd.f32 %v7016_v30, %v6669_v35  ;;  %v19079_v35 = vshll.u32 %v19077_v12, 16  ;;  %v9105_v12 = vsel %vm13882_vm12, %v12953_v58, %v9104_v59  ;;  %v8818_v58 = vpack.c.b16 %v8795_v50, %v8794_v60 }
 0x4e1   : > { %12969 = vmatmul.msk.bf16.gmra.mxu3 %vm658_vm4, %v9199_v26  ;;  %v13487_v26 = vld [vmem:[%s13563_s27 + $0x94] sm:$0xf]  ;;  %19080 = vst [vmem:[#allocation2_spill] sm:$0xff] %v17268_v6  ;;  %v8635_v6 = vrot.slane %v8633_v22, 6  ;;  %v9176_v5 = vunpack.c.l.b16 %v9105_v12 }
 0x4e2   : > { %v8625_v13 = vrot.slane %v19079_v35, 6  ;;  %v8123_v48 = vrot.slane %v13487_v26, 5  ;;  %v8622_v35 = vor.u32 %v8621_v34, %v8618_v1  ;;  %v12938_v1 = vld [vmem:[%s13563_s27 + $0x90] sm:$0xc] }
 0x4e3   : > { %v7957_v7 = vpop.f32.mrf.mxu0  ;;  %v8280_v37 = vpop.f32.mrf.mxu1  ;;  %v8636_v22 = vor.u32 %v8635_v6, %v8632_v54  ;;  %v12954_v60 = vrot.slane %v12938_v1, 10  ;;  %v9114_v6 = vrot.slane %v17252_v10, 6 }
 0x4e4   : > { %v7303_v46 = vpop.f32.mrf.mxu3  ;;  %v8360_v39 = vadd.f32 %v8280_v37, %v19081_v9  ;;  %v8626_v32 = vor.u32 %v8625_v13, %v8624_v28  ;;  %v8125_v51 = vrot.slane %v8123_v48, 4  ;;  %v8124_v13 = vsel %vm13839_vm8, %v12872_v17, %v8123_v48 }
 0x4e5   : > { %v7338_v30 = vadd.f32 %v7303_v46, %v7051_v3  ;;  %v13488_v3 = vld [vmem:[%s13563_s27 + $0x98] sm:$0x1] }
 0x4e6   : > { %13082 = vmatmul.msk.bf16.gmra.mxu0 %vm658_vm4, %v13361_v8  ;;  %12888 = vmatmul.msk.bf16.gmra.mxu1 %vm658_vm4, %v8212_v43  ;;  %v8126_v37 = vrot.slane %v13488_v3, 5  ;;  %v9111_v8 = vrot.slane %v13487_v26, 6  ;;  %v8623_v43 = vrot.slane %v8622_v35, 4  ;;  %v8628_v24 = vrot.slane %v8626_v32, 4 }
 0x4e7   : > { %v7018_v47 = vpop.f32.mrf.mxu2  ;;  %v17279_v46 = vadd.f32 %v7957_v7, %v7338_v30  ;;  %v9200_v26 = vpack.c.b16 %v9177_v45, %v9176_v5  ;;  %v8190_v30 = vunpack.c.l.b16 %v8124_v13  ;;  %v17304_v5 = vld [vmem:[%s13563_s27 + $0xa0] sm:$0xf]  ;;  %v19082_v13 = vld [vmem:[#allocation7_spill] sm:$0xff] }
 0x4e8   : > { %v7052_v59 = vadd.f32 %v7018_v47, %v6670_v27  ;;  %v8127_v20 = vsel %vm13839_vm8, %v8125_v51, %v8126_v37  ;;  %v12857_v27 = vld [vmem:[%s13563_s27 + $0x9c] sm:$0xe]  ;;  %v9113_v50 = vrot.slane %v9111_v8, 4  ;;  %v8627_v48 = vsel %vm13875_vm11, %v8623_v43, %v8626_v32  ;;  %v17298_v37 = vld [vmem:[%s13563_s27 + $0xa4] sm:$0x3] }
 0x4e9   : > { %v8191_v12 = vunpack.c.l.b16 %v8127_v20  ;;  %v8637_v35 = vsel %vm13875_vm11, %v8628_v24, %v8636_v22  ;;  %v8642_v54 = vshll.u32 %v12857_v27, 16  ;;  %v8796_v51 = vunpack.c.l.b16 %v8627_v48 }
 0x4ea   : > { %v9112_v3 = vsel %vm13882_vm12, %v12954_v60, %v9111_v8  ;;  %v8797_v32 = vunpack.c.l.b16 %v8637_v35  ;;  %v9115_v10 = vsel %vm13882_vm12, %v9113_v50, %v9114_v6  ;;  %v8130_v45 = vrot.slane %v17304_v5, 5 }
 0x4eb   : > { %v7959_v34 = vpop.f32.mrf.mxu0  ;;  %v8282_v28 = vpop.f32.mrf.mxu1  ;;  %v19083_v20 = vshrl.u32 %v19082_v13, 16  ;;  %v8653_v50 = vshrl.u32 %v17298_v37, 16  ;;  %v9178_v48 = vunpack.c.l.b16 %v9112_v3  ;;  %v12873_v6 = vrot.slane %v12857_v27, 9  ;;  %v17326_v3 = vld [vmem:[%s13563_s27 + $0xa8] sm:$0xe] }
 0x4ec   : > { %v7305_v7 = vpop.f32.mrf.mxu3  ;;  %12921 = vmatmul.msk.bf16.gmra.mxu2 %vm658_vm4, %v8818_v58  ;;  %v8361_v47 = vadd.f32 %v8282_v28, %v16612_v41  ;;  %v8639_v41 = vshrl.u32 %v12857_v27, 16  ;;  %v8213_v58 = vpack.c.b16 %v8191_v12, %v8190_v30  ;;  %v8644_v28 = vrot.slane %v8642_v54, 6 }
 0x4ed   : > { %v7339_v9 = vadd.f32 %v7305_v7, %v7052_v59  ;;  %v13362_v59 = vld [vmem:[%s13563_s27 + $0x90] sm:$0xff]  ;;  %v8647_v8 = vrot.slane %v19083_v20, 5  ;;  %v8656_v30 = vshll.u32 %v17298_v37, 16 }
 0x4ee   : > { %v8641_v1 = vrot.slane %v8639_v41, 5  ;;  %v9179_v41 = vunpack.c.l.b16 %v9115_v10 }
 0x4ef   : > { %v8886_v23 = vpop.f32.mrf.mxu2  ;;  %v17309_v24 = vadd.f32 %v7959_v34, %v7339_v9  ;;  %v8132_v34 = vrot.slane %v8130_v45, 4  ;;  %v13490_v9 = vld [vmem:[%s13563_s27 + $0xa4] sm:$0x1] }
 0x4f0   : > { %v8966_v17 = vadd.f32 %v8886_v23, %v8360_v39  ;;  %v8133_v23 = vrot.slane %v13490_v9, 5  ;;  %v8645_v54 = vor.u32 %v8644_v28, %v8641_v1 }
 0x4f1   : > { %12970 = vmatmul.msk.bf16.gmra.mxu3 %vm658_vm4, %v9200_v26  ;;  %v19084_v26 = vshll.u32 %v19082_v13, 16 }
 0x4f2   : > { %v8134_v27 = vsel %vm13839_vm8, %v8132_v34, %v8133_v23 }
 0x4f3   : > { %v9555_v43 = vpop.f32.mrf.mxu0  ;;  %v8285_v39 = vpop.f32.mrf.mxu1  ;;  %v8648_v60 = vrot.slane %v19084_v26, 6  ;;  %v8655_v26 = vrot.slane %v8653_v50, 5  ;;  %v12939_v50 = vld [vmem:[%s13563_s27 + $0x9c] sm:$0xc] }
 0x4f4   : > { %v9268_v22 = vpop.f32.mrf.mxu3  ;;  %v8362_v7 = vadd.f32 %v8285_v39, %v16628_v2  ;;  %v8819_v2 = vpack.c.b16 %v8797_v32, %v8796_v51  ;;  %v9118_v32 = vrot.slane %v17304_v5, 6  ;;  %v12955_v34 = vrot.slane %v12939_v50, 10 }
 0x4f5   : > { %v9348_v12 = vadd.f32 %v9268_v22, %v8966_v17  ;;  %v8649_v20 = vor.u32 %v8648_v60, %v8647_v8  ;;  %v8658_v17 = vrot.slane %v8656_v30, 6  ;;  %v9201_v22 = vpack.c.b16 %v9179_v41, %v9178_v48 }
 0x4f6   : > { %13083 = vmatmul.msk.bf16.gmra.mxu0 %vm658_vm4, %v13362_v59  ;;  %12889 = vmatmul.msk.bf16.gmra.mxu1 %vm658_vm4, %v8213_v58  ;;  %v8131_v59 = vsel %vm13839_vm8, %v12873_v6, %v8130_v45  ;;  %v8193_v60 = vunpack.c.l.b16 %v8134_v27  ;;  %v8662_v30 = vshrl.u32 %v17326_v3, 16  ;;  %v17335_v6 = vld [vmem:[%s13563_s27 + $0xb0] sm:$0x3]  ;;  %v9120_v9 = vrot.slane %v9118_v32, 4 }
 0x4f7   : > { %v8888_v35 = vpop.f32.mrf.mxu2  ;;  %v17319_v39 = vadd.f32 %v9555_v43, %v9348_v12  ;;  %v8646_v43 = vrot.slane %v8645_v54, 4  ;;  %v8651_v1 = vrot.slane %v8649_v20, 4  ;;  %v8659_v45 = vor.u32 %v8658_v17, %v8655_v26  ;;  %v13363_v54 = vld [vmem:[%s13563_s27 + $0x9c] sm:$0xff] }
 0x4f8   : > { %v8967_v13 = vadd.f32 %v8888_v35, %v8361_v47  ;;  %v8192_v8 = vunpack.c.l.b16 %v8131_v59  ;;  %v8665_v12 = vshll.u32 %v17326_v3, 16  ;;  %v8664_v41 = vrot.slane %v8662_v30, 5  ;;  %v19085_v26 = vld [vmem:[#allocation9_spill] sm:$0xff] }
 0x4f9   : > { %v8650_v35 = vsel %vm13875_vm11, %v8646_v43, %v8649_v20  ;;  %v19086_v17 = vshrl.u32 %v19085_v26, 16  ;;  %v19087_v59 = vshll.u32 %v19085_v26, 16  ;;  %v8679_v43 = vshll.u32 %v17335_v6, 16 }
 0x4fa   : > { %v8214_v23 = vpack.c.b16 %v8193_v60, %v8192_v8  ;;  %v19089_v8 = vld [vmem:[#allocation18_spill] sm:$0xff]  ;;  %v8798_v50 = vunpack.c.l.b16 %v8650_v35  ;;  %v13492_v35 = vld [vmem:[%s13563_s27 + $0xb0] sm:$0x1] }
 0x4fb   : > { %v9557_v58 = vpop.f32.mrf.mxu0  ;;  %v8287_v51 = vpop.f32.mrf.mxu1  ;;  %v8671_v27 = vrot.slane %v19087_v59, 6 }
 0x4fc   : > { %v9270_v10 = vpop.f32.mrf.mxu3  ;;  %12922 = vmatmul.msk.bf16.gmra.mxu2 %vm658_vm4, %v8819_v2  ;;  %v8363_v47 = vadd.f32 %v8287_v51, %v16660_v62  ;;  %v9121_v62 = vrot.slane %v17298_v37, 6  ;;  %v8660_v2 = vsel %vm13875_vm11, %v8651_v1, %v8659_v45  ;;  %v8676_v37 = vshrl.u32 %v17335_v6, 16 }
 0x4fd   : > { %v9349_v28 = vadd.f32 %v9270_v10, %v8967_v13  ;;  %v8667_v13 = vrot.slane %v8665_v12, 6  ;;  %v17350_v10 = vld [vmem:[%s13563_s27 + $0xac] sm:$0xf]  ;;  %v8799_v30 = vunpack.c.l.b16 %v8660_v2  ;;  %v8681_v2 = vrot.slane %v8679_v43, 6 }
 0x4fe   : > { %v8137_v20 = vrot.slane %v17350_v10, 5  ;;  %v9122_v26 = vsel %vm13882_vm12, %v9120_v9, %v9121_v62  ;;  %v8678_v59 = vrot.slane %v8676_v37, 5  ;;  %v12859_v37 = vld [vmem:[%s13563_s27 + $0xb4] sm:$0xe] }
 0x4ff   : > { %v8891_v48 = vpop.f32.mrf.mxu2  ;;  %v17354_v1 = vadd.f32 %v9557_v58, %v9349_v28  ;;  %v12874_v58 = vrot.slane %v17326_v3, 9  ;;  %v8668_v28 = vor.u32 %v8667_v13, %v8664_v41  ;;  %v9181_v62 = vunpack.c.l.b16 %v9122_v26 }
 0x500   : > { %v8968_v5 = vadd.f32 %v8891_v48, %v8362_v7  ;;  %v8670_v7 = vrot.slane %v19086_v17, 5  ;;  %v9119_v48 = vsel %vm13882_vm12, %v12955_v34, %v9118_v32  ;;  %v8820_v34 = vpack.c.b16 %v8799_v30, %v8798_v50 }
 0x501   : > { %12971 = vmatmul.msk.bf16.gmra.mxu3 %vm658_vm4, %v9201_v22  ;;  %19088 = vst [vmem:[#allocation23_spill] sm:$0xff] %v17354_v1  ;;  %v9180_v9 = vunpack.c.l.b16 %v9119_v48  ;;  %v8685_v48 = vshrl.u32 %v12859_v37, 16  ;;  %v8688_v26 = vshll.u32 %v12859_v37, 16 }
 0x502   : > { %v8672_v17 = vor.u32 %v8671_v27, %v8670_v7  ;;  %v8682_v27 = vor.u32 %v8681_v2, %v8678_v59  ;;  %v13364_v2 = vld [vmem:[%s13563_s27 + $0xa8] sm:$0xff] }
 0x503   : > { %v9560_v51 = vpop.f32.mrf.mxu0  ;;  %v8290_v22 = vpop.f32.mrf.mxu1 }
 0x504   : > { %v9273_v45 = vpop.f32.mrf.mxu3  ;;  %v8364_v60 = vadd.f32 %v8290_v22, %v19089_v8  ;;  %v8139_v22 = vrot.slane %v8137_v20, 4  ;;  %v8674_v7 = vrot.slane %v8672_v17, 4 }
 0x505   : > { %v9350_v12 = vadd.f32 %v9273_v45, %v8968_v5  ;;  %v8140_v5 = vrot.slane %v13492_v35, 5 }
 0x506   : > { %13084 = vmatmul.msk.bf16.gmra.mxu0 %vm658_vm4, %v13363_v54  ;;  %12890 = vmatmul.msk.bf16.gmra.mxu1 %vm658_vm4, %v8214_v23  ;;  %v8138_v23 = vsel %vm13839_vm8, %v12874_v58, %v8137_v20  ;;  %v8669_v54 = vrot.slane %v8668_v28, 4  ;;  %v9125_v20 = vrot.slane %v17350_v10, 6  ;;  %v8683_v28 = vsel %vm13875_vm11, %v8674_v7, %v8682_v27 }
 0x507   : > { %v8893_v1 = vpop.f32.mrf.mxu2  ;;  %v17365_v45 = vadd.f32 %v9560_v51, %v9350_v12  ;;  %v8141_v13 = vsel %vm13839_vm8, %v8139_v22, %v8140_v5  ;;  %v8194_v8 = vunpack.c.l.b16 %v8138_v23  ;;  %v12940_v12 = vld [vmem:[%s13563_s27 + $0xa8] sm:$0xc]  ;;  %v9128_v10 = vrot.slane %v17335_v6, 6  ;;  %v17383_v5 = vld [vmem:[%s13563_s27 + $0xbc] sm:$0x3] }
 0x508   : > { %v8969_v32 = vadd.f32 %v8893_v1, %v8363_v47  ;;  %v9202_v1 = vpack.c.b16 %v9181_v62, %v9180_v9  ;;  %v8195_v50 = vunpack.c.l.b16 %v8141_v13  ;;  %v8673_v30 = vsel %vm13875_vm11, %v8669_v54, %v8672_v17  ;;  %v13493_v54 = vld [vmem:[%s13563_s27 + $0xb8] sm:$0xf]  ;;  %v19090_v13 = vld [vmem:[#allocation16_spill] sm:$0xff] }
 0x509   : > { %v8800_v59 = vunpack.c.l.b16 %v8673_v30  ;;  %v12956_v22 = vrot.slane %v12940_v12, 10  ;;  %v9127_v35 = vrot.slane %v9125_v20, 4  ;;  %v8690_v9 = vrot.slane %v8688_v26, 6 }
 0x50a   : > { %v8215_v17 = vpack.c.b16 %v8195_v50, %v8194_v8  ;;  %v8699_v8 = vshrl.u32 %v17383_v5, 16  ;;  %v8702_v50 = vshll.u32 %v17383_v5, 16 }
 0x50b   : > { %v9562_v3 = vpop.f32.mrf.mxu0  ;;  %v8292_v41 = vpop.f32.mrf.mxu1 }
 0x50c   : > { %v9275_v43 = vpop.f32.mrf.mxu3  ;;  %12923 = vmatmul.msk.bf16.gmra.mxu2 %vm658_vm4, %v8820_v34  ;;  %v8365_v47 = vadd.f32 %v8292_v41, %v16716_v57  ;;  %v8687_v34 = vrot.slane %v8685_v48, 5  ;;  %v8144_v41 = vrot.slane %v13493_v54, 5  ;;  %v9126_v48 = vsel %vm13882_vm12, %v12956_v22, %v9125_v20 }
 0x50d   : > { %v9351_v51 = vadd.f32 %v9275_v43, %v8969_v32  ;;  %v8801_v32 = vunpack.c.l.b16 %v8683_v28  ;;  %v8701_v20 = vrot.slane %v8699_v8, 5  ;;  %v8704_v22 = vrot.slane %v8702_v50, 6 }
 0x50e   : > { %v8146_v28 = vrot.slane %v8144_v41, 4 }
 0x50f   : > { %v8896_v58 = vpop.f32.mrf.mxu2  ;;  %v17389_v27 = vadd.f32 %v9562_v3, %v9351_v51  ;;  %v8821_v3 = vpack.c.b16 %v8801_v32, %v8800_v59  ;;  %v9129_v51 = vsel %vm13882_vm12, %v9127_v35, %v9128_v10 }
 0x510   : > { %v8970_v57 = vadd.f32 %v8896_v58, %v8364_v60  ;;  %v19091_v60 = vshrl.u32 %v19090_v13, 16  ;;  %v12875_v58 = vrot.slane %v12859_v37, 9 }
 0x511   : > { %12972 = vmatmul.msk.bf16.gmra.mxu3 %vm658_vm4, %v9202_v1  ;;  %v19092_v1 = vshll.u32 %v19090_v13, 16 }
 0x512   : > { %v8693_v7 = vrot.slane %v19091_v60, 5  ;;  %v8145_v35 = vsel %vm13839_vm8, %v12875_v58, %v8144_v41 }
 0x513   : > { %v9565_v62 = vpop.f32.mrf.mxu0  ;;  %v8295_v23 = vpop.f32.mrf.mxu1  ;;  %v8694_v30 = vrot.slane %v19092_v1, 6  ;;  %v8705_v1 = vor.u32 %v8704_v22, %v8701_v20  ;;  %v17423_v22 = vld [vmem:[%s13563_s27 + $0xc4] sm:$0xf] }
 0x514   : > { %v9278_v43 = vpop.f32.mrf.mxu3  ;;  %v8366_v6 = vadd.f32 %v8295_v23, %v16730_v21  ;;  %v8691_v21 = vor.u32 %v8690_v9, %v8687_v34  ;;  %v13494_v23 = vld [vmem:[%s13563_s27 + $0xbc] sm:$0x1]  ;;  %v12941_v34 = vld [vmem:[%s13563_s27 + $0xb4] sm:$0xc]  ;;  %v9132_v9 = vrot.slane %v13493_v54, 6 }
 0x515   : > { %v9352_v12 = vadd.f32 %v9278_v43, %v8970_v57  ;;  %v8147_v13 = vrot.slane %v13494_v23, 5  ;;  %v8695_v43 = vor.u32 %v8694_v30, %v8693_v7  ;;  %v12860_v30 = vld [vmem:[%s13563_s27 + $0xc0] sm:$0xe]  ;;  %v13365_v23 = vld [vmem:[%s13563_s27 + $0xb4] sm:$0xff] }
 0x516   : > { %13085 = vmatmul.msk.bf16.gmra.mxu0 %vm658_vm4, %v13364_v2  ;;  %12891 = vmatmul.msk.bf16.gmra.mxu1 %vm658_vm4, %v8215_v17  ;;  %v9182_v2 = vunpack.c.l.b16 %v9126_v48  ;;  %v9183_v17 = vunpack.c.l.b16 %v9129_v51  ;;  %v8692_v10 = vrot.slane %v8691_v21, 4  ;;  %v12957_v48 = vrot.slane %v12941_v34, 10 }
 0x517   : > { %v8898_v26 = vpop.f32.mrf.mxu2  ;;  %v17403_v60 = vadd.f32 %v9565_v62, %v9352_v12  ;;  %v8148_v37 = vsel %vm13839_vm8, %v8146_v28, %v8147_v13  ;;  %v8697_v7 = vrot.slane %v8695_v43, 4  ;;  %v8196_v12 = vunpack.c.l.b16 %v8145_v35 }
 0x518   : > { %v8971_v57 = vadd.f32 %v8898_v26, %v8365_v47  ;;  %v9203_v50 = vpack.c.b16 %v9183_v17, %v9182_v2  ;;  %v8197_v41 = vunpack.c.l.b16 %v8148_v37  ;;  %v8696_v54 = vsel %vm13875_vm11, %v8692_v10, %v8695_v43  ;;  %v17427_v2 = vld [vmem:[%s13563_s27 + $0xc8] sm:$0x3] }
 0x519   : > { %19093 = vst [vmem:[#allocation24_spill] sm:$0xff] %v17403_v60  ;;  %v9134_v21 = vrot.slane %v9132_v9, 4  ;;  %v8708_v26 = vshrl.u32 %v12860_v30, 16  ;;  %v8706_v58 = vsel %vm13875_vm11, %v8697_v7, %v8705_v1  ;;  %v8711_v28 = vshll.u32 %v12860_v30, 16 }
 0x51a   : > { %v8216_v13 = vpack.c.b16 %v8197_v41, %v8196_v12  ;;  %v9133_v20 = vsel %vm13882_vm12, %v12957_v48, %v9132_v9  ;;  %v8151_v43 = vrot.slane %v17423_v22, 5  ;;  %v8803_v17 = vunpack.c.l.b16 %v8706_v58  ;;  %v17444_v58 = vld [vmem:[%s13563_s27 + $0xcc] sm:$0xe] }
 0x51b   : > { %v9567_v59 = vpop.f32.mrf.mxu0  ;;  %v8297_v32 = vpop.f32.mrf.mxu1  ;;  %v8710_v35 = vrot.slane %v8708_v26, 5  ;;  %v8713_v9 = vrot.slane %v8711_v28, 6  ;;  %v8722_v48 = vshrl.u32 %v17427_v2, 16 }
 0x51c   : > { %v9280_v62 = vpop.f32.mrf.mxu3  ;;  %12924 = vmatmul.msk.bf16.gmra.mxu2 %vm658_vm4, %v8821_v3  ;;  %v8367_v47 = vadd.f32 %v8297_v32, %v16764_v0  ;;  %v9135_v3 = vrot.slane %v17383_v5, 6 }
 0x51d   : > { %v9353_v8 = vadd.f32 %v9280_v62, %v8971_v57  ;;  %v8802_v57 = vunpack.c.l.b16 %v8696_v54  ;;  %v19095_v62 = vld [vmem:[#allocation19_spill] sm:$0xff] }
 0x51e   : > { %v9136_v32 = vsel %vm13882_vm12, %v9134_v21, %v9135_v3  ;;  %v19096_v7 = vshrl.u32 %v19095_v62, 16  ;;  %v9184_v3 = vunpack.c.l.b16 %v9133_v20  ;;  %v8731_v20 = vshrl.u32 %v17444_v58, 16 }
 0x51f   : > { %v8901_v51 = vpop.f32.mrf.mxu2  ;;  %v17431_v37 = vadd.f32 %v9567_v59, %v9353_v8  ;;  %v12876_v59 = vrot.slane %v12860_v30, 9  ;;  %v8153_v8 = vrot.slane %v8151_v43, 4  ;;  %v9185_v26 = vunpack.c.l.b16 %v9136_v32 }
 0x520   : > { %v8972_v0 = vadd.f32 %v8901_v51, %v8366_v6  ;;  %v8716_v1 = vrot.slane %v19096_v7, 5  ;;  %v8725_v51 = vshll.u32 %v17427_v2, 16  ;;  %v8724_v7 = vrot.slane %v8722_v48, 5 }
 0x521   : > { %12973 = vmatmul.msk.bf16.gmra.mxu3 %vm658_vm4, %v9203_v50  ;;  %19094 = vst [vmem:[#allocation26_spill] sm:$0xff] %v17431_v37  ;;  %v19097_v50 = vshll.u32 %v19095_v62, 16  ;;  %v8152_v30 = vsel %vm13839_vm8, %v12876_v59, %v8151_v43  ;;  %v8734_v32 = vshll.u32 %v17444_v58, 16  ;;  %v9139_v43 = vrot.slane %v17423_v22, 6  ;;  %v12942_v59 = vld [vmem:[%s13563_s27 + $0xc0] sm:$0xc] }
 0x523   : > { %v9570_v5 = vpop.f32.mrf.mxu0  ;;  %v8300_v6 = vpop.f32.mrf.mxu1  ;;  %v8717_v12 = vrot.slane %v19097_v50, 6  ;;  %v9204_v50 = vpack.c.b16 %v9185_v26, %v9184_v3 }
 0x524   : > { %v9283_v10 = vpop.f32.mrf.mxu3  ;;  %v8368_v34 = vadd.f32 %v8300_v6, %v16779_v19  ;;  %v13496_v19 = vld [vmem:[%s13563_s27 + $0xc8] sm:$0x1]  ;;  %v8822_v6 = vpack.c.b16 %v8803_v17, %v8802_v57 }
 0x525   : > { %v9354_v41 = vadd.f32 %v9283_v10, %v8972_v0  ;;  %v8154_v54 = vrot.slane %v13496_v19, 5  ;;  %v8714_v10 = vor.u32 %v8713_v9, %v8710_v35  ;;  %v8718_v62 = vor.u32 %v8717_v12, %v8716_v1  ;;  %v17458_v1 = vld [vmem:[%s13563_s27 + $0xd4] sm:$0x3] }
 0x526   : > { %13086 = vmatmul.msk.bf16.gmra.mxu0 %vm658_vm4, %v13365_v23  ;;  %12892 = vmatmul.msk.bf16.gmra.mxu1 %vm658_vm4, %v8216_v13  ;;  %v8727_v23 = vrot.slane %v8725_v51, 6  ;;  %v8736_v19 = vrot.slane %v8734_v32, 6  ;;  %v8745_v22 = vshrl.u32 %v17458_v1, 16  ;;  %v13366_v32 = vld [vmem:[%s13563_s27 + $0xc0] sm:$0xff] }
 0x527   : > { %v8903_v21 = vpop.f32.mrf.mxu2  ;;  %v17446_v28 = vadd.f32 %v9570_v5, %v9354_v41  ;;  %v8155_v13 = vsel %vm13839_vm8, %v8153_v8, %v8154_v54  ;;  %v8715_v35 = vrot.slane %v8714_v10, 4  ;;  %v8720_v9 = vrot.slane %v8718_v62, 4  ;;  %v19099_v54 = vld [vmem:[#allocation17_spill] sm:$0xff] }
 0x528   : > { %v8973_v0 = vadd.f32 %v8903_v21, %v8367_v47  ;;  %v8198_v41 = vunpack.c.l.b16 %v8152_v30  ;;  %v8199_v48 = vunpack.c.l.b16 %v8155_v13  ;;  %v8728_v51 = vor.u32 %v8727_v23, %v8724_v7 }
 0x529   : > { %19098 = vst [vmem:[#allocation25_spill] sm:$0xff] %v17446_v28  ;;  %v8733_v8 = vrot.slane %v8731_v20, 5  ;;  %v19100_v21 = vshrl.u32 %v19099_v54, 16  ;;  %v8748_v10 = vshll.u32 %v17458_v1, 16  ;;  %v12958_v30 = vrot.slane %v12942_v59, 10 }
 0x52a   : > { %v8719_v7 = vsel %vm13875_vm11, %v8715_v35, %v8718_v62  ;;  %v8729_v23 = vsel %vm13875_vm11, %v8720_v9, %v8728_v51  ;;  %v9141_v13 = vrot.slane %v9139_v43, 4  ;;  %v9142_v20 = vrot.slane %v17427_v2, 6 }
 0x52b   : > { %v9572_v5 = vpop.f32.mrf.mxu0  ;;  %v8302_v47 = vpop.f32.mrf.mxu1  ;;  %v8739_v3 = vrot.slane %v19100_v21, 5  ;;  %v8737_v21 = vor.u32 %v8736_v19, %v8733_v8  ;;  %v8804_v2 = vunpack.c.l.b16 %v8719_v7  ;;  %v8805_v51 = vunpack.c.l.b16 %v8729_v23 }
 0x52c   : > { %v9285_v57 = vpop.f32.mrf.mxu3  ;;  %12925 = vmatmul.msk.bf16.gmra.mxu2 %vm658_vm4, %v8822_v6  ;;  %v8369_v17 = vadd.f32 %v8302_v47, %v16821_v25  ;;  %v19101_v25 = vshll.u32 %v19099_v54, 16  ;;  %v8217_v47 = vpack.c.b16 %v8199_v48, %v8198_v41  ;;  %v9140_v48 = vsel %vm13882_vm12, %v12958_v30, %v9139_v43 }
 0x52d   : > { %v9355_v12 = vadd.f32 %v9285_v57, %v8973_v0  ;;  %v17475_v57 = vld [vmem:[%s13563_s27 + $0xd0] sm:$0xf]  ;;  %v9143_v8 = vsel %vm13882_vm12, %v9141_v13, %v9142_v20  ;;  %v12877_v19 = vrot.slane %v17444_v58, 9  ;;  %v8823_v23 = vpack.c.b16 %v8805_v51, %v8804_v2  ;;  %v12943_v13 = vld [vmem:[%s13563_s27 + $0xcc] sm:$0xc] }
 0x52e   : > { %v8740_v26 = vrot.slane %v19101_v25, 6  ;;  %v8158_v54 = vrot.slane %v17475_v57, 5  ;;  %v8747_v25 = vrot.slane %v8745_v22, 5  ;;  %v17490_v22 = vld [vmem:[%s13563_s27 + $0xd8] sm:$0xe]  ;;  %v9186_v20 = vunpack.c.l.b16 %v9140_v48 }
 0x52f   : > { %v8906_v6 = vpop.f32.mrf.mxu2  ;;  %v17478_v62 = vadd.f32 %v9572_v5, %v9355_v12  ;;  %v13498_v12 = vld [vmem:[%s13563_s27 + $0xd4] sm:$0x1]  ;;  %v8757_v30 = vshll.u32 %v17490_v22, 16  ;;  %v19104_v51 = vshrl.u32 %v16819_v63, 16 }
 0x530   : > { %v8974_v0 = vadd.f32 %v8906_v6, %v8368_v34  ;;  %v8741_v34 = vor.u32 %v8740_v26, %v8739_v3  ;;  %v8750_v6 = vrot.slane %v8748_v10, 6  ;;  %v8160_v5 = vrot.slane %v8158_v54, 4 }
 0x531   : > { %12974 = vmatmul.msk.bf16.gmra.mxu3 %vm658_vm4, %v9204_v50  ;;  %19102 = vst [vmem:[#allocation14_spill] sm:$0xff] %v17478_v62  ;;  %v8738_v3 = vrot.slane %v8737_v21, 4  ;;  %v8159_v21 = vsel %vm13839_vm8, %v12877_v19, %v8158_v54  ;;  %v12944_v62 = vld [vmem:[%s13563_s27 + $0xd8] sm:$0xc] }
 0x532   : > { %v8743_v26 = vrot.slane %v8741_v34, 4  ;;  %v8751_v43 = vor.u32 %v8750_v6, %v8747_v25 }
 0x533   : > { %v9575_v59 = vpop.f32.mrf.mxu0  ;;  %v8305_v50 = vpop.f32.mrf.mxu1 }
 0x534   : > { %v9288_v35 = vpop.f32.mrf.mxu3  ;;  %v8370_v9 = vadd.f32 %v8305_v50, %v16830_v14  ;;  %v8161_v14 = vrot.slane %v13498_v12, 5  ;;  %v17499_v50 = vld [vmem:[%s13563_s27 + $0xe0] sm:$0x3]  ;;  %v8752_v2 = vsel %vm13875_vm11, %v8743_v26, %v8751_v43 }
 0x535   : > { %v9356_v41 = vadd.f32 %v9288_v35, %v8974_v0  ;;  %v8754_v0 = vshrl.u32 %v17490_v22, 16  ;;  %v8759_v35 = vrot.slane %v8757_v30, 6 }
 0x536   : > { %13087 = vmatmul.msk.bf16.gmra.mxu0 %vm658_vm4, %v13366_v32  ;;  %12893 = vmatmul.msk.bf16.gmra.mxu1 %vm658_vm4, %v8217_v47  ;;  %v9187_v32 = vunpack.c.l.b16 %v9143_v8  ;;  %v9146_v47 = vrot.slane %v17475_v57, 6  ;;  %v8162_v25 = vsel %vm13839_vm8, %v8160_v5, %v8161_v14  ;;  %v12959_v57 = vrot.slane %v12943_v13, 10 }
 0x537   : > { %v8908_v10 = vpop.f32.mrf.mxu2  ;;  %v17494_v58 = vadd.f32 %v9575_v59, %v9356_v41  ;;  %v8756_v6 = vrot.slane %v8754_v0, 5  ;;  %v8762_v41 = vrot.slane %v19104_v51, 5  ;;  %v19105_v8 = vshll.u32 %v16819_v63, 16  ;;  %v13499_v0 = vld [vmem:[%s13563_s27 + $0xdc] sm:$0xf] }
 0x538   : > { %v8975_v7 = vadd.f32 %v8908_v10, %v8369_v17  ;;  %v8742_v17 = vsel %vm13875_vm11, %v8738_v3, %v8741_v34  ;;  %v8768_v5 = vshrl.u32 %v17499_v50, 16  ;;  %v8771_v14 = vshll.u32 %v17499_v50, 16 }
 0x539   : > { %19103 = vst [vmem:[#allocation11_spill] sm:$0xff] %v17494_v58  ;;  %v8763_v19 = vrot.slane %v19105_v8, 6  ;;  %v9205_v3 = vpack.c.b16 %v9187_v32, %v9186_v20  ;;  %v8200_v10 = vunpack.c.l.b16 %v8159_v21  ;;  %v8201_v26 = vunpack.c.l.b16 %v8162_v25  ;;  %v13367_v21 = vld [vmem:[%s13563_s27 + $0xcc] sm:$0xff] }
 0x53a   : > { %v9148_v43 = vrot.slane %v9146_v47, 4  ;;  %v8165_v30 = vrot.slane %v13499_v0, 5  ;;  %v8760_v13 = vor.u32 %v8759_v35, %v8756_v6  ;;  %v8806_v51 = vunpack.c.l.b16 %v8742_v17 }
 0x53b   : > { %v9577_v12 = vpop.f32.mrf.mxu0  ;;  %v8307_v59 = vpop.f32.mrf.mxu1  ;;  %v9147_v63 = vsel %vm13882_vm12, %v12959_v57, %v9146_v47  ;;  %v8770_v20 = vrot.slane %v8768_v5, 5  ;;  %v8773_v32 = vrot.slane %v8771_v14, 6  ;;  %v8218_v25 = vpack.c.b16 %v8201_v26, %v8200_v10 }
 0x53c   : > { %v9290_v48 = vpop.f32.mrf.mxu3  ;;  %12926 = vmatmul.msk.bf16.gmra.mxu2 %vm658_vm4, %v8823_v23  ;;  %v8371_v54 = vadd.f32 %v8307_v59, %v16870_v49  ;;  %v8807_v49 = vunpack.c.l.b16 %v8752_v2  ;;  %v9149_v59 = vrot.slane %v17458_v1, 6  ;;  %v9153_v6 = vrot.slane %v13499_v0, 6  ;;  %v13500_v2 = vld [vmem:[%s13563_s27 + $0xe0] sm:$0x1] }
 0x53d   : > { %v9357_v34 = vadd.f32 %v9290_v48, %v8975_v7  ;;  %v17521_v7 = vor.u32 %v8763_v19, %v8762_v41  ;;  %v12878_v35 = vrot.slane %v17490_v22, 9  ;;  %v8167_v17 = vrot.slane %v8165_v30, 4 }
 0x53e   : > { %v8168_v48 = vrot.slane %v13500_v2, 5  ;;  %v8761_v58 = vrot.slane %v8760_v13, 4  ;;  %v9150_v1 = vsel %vm13882_vm12, %v9148_v43, %v9149_v59  ;;  %v8824_v22 = vpack.c.b16 %v8807_v49, %v8806_v51  ;;  %v17549_v51 = vld [vmem:[%s13563_s27 + $0x30] sm:$0xe] }
 0x53f   : > { %v8911_v23 = vpop.f32.mrf.mxu2  ;;  %v17530_v41 = vadd.f32 %v9577_v12, %v9357_v34  ;;  %v8766_v14 = vrot.slane %v17521_v7, 4  ;;  %v12960_v26 = vrot.slane %v12944_v62, 10  ;;  %v9155_v0 = vrot.slane %v9153_v6, 4  ;;  %v17546_v62 = vld [vmem:[%s13563_s27 + $0x34] sm:$0xf] }
 0x540   : > { %v8976_v8 = vadd.f32 %v8911_v23, %v8370_v9  ;;  %v9188_v9 = vunpack.c.l.b16 %v9147_v63  ;;  %v9156_v13 = vrot.slane %v17499_v50, 6  ;;  %v9189_v12 = vunpack.c.l.b16 %v9150_v1  ;;  %v13091_v23 = vld [vmem:[%s13563_s27 + $0x30] sm:$0xf] }
 0x541   : > { %12975 = vmatmul.msk.bf16.gmra.mxu3 %vm658_vm4, %v9205_v3  ;;  %19106 = vst [vmem:[#allocation13_spill] sm:$0xff] %v17530_v41  ;;  %v8774_v3 = vor.u32 %v8773_v32, %v8770_v20  ;;  %v8166_v34 = vsel %vm13839_vm8, %v12878_v35, %v8165_v30  ;;  %v8765_v43 = vsel %vm13875_vm11, %v8761_v58, %v17521_v7  ;;  %v9716_v49 = vshrl.u32 %v13091_v23, 16 }
 0x542   : > { %v9719_v63 = vshll.u32 %v13091_v23, 16  ;;  %v9725_v59 = vshll.u32 %v17546_v62, 16  ;;  %v9729_v30 = vshrl.u32 %v17546_v62, 16  ;;  %v10736_v20 = vshrl.u32 %v17549_v51, 16 }
 0x543   : > { %v9580_v47 = vpop.f32.mrf.mxu0  ;;  %v8310_v57 = vpop.f32.mrf.mxu1  ;;  %v10739_v32 = vshll.u32 %v17549_v51, 16  ;;  %v9718_v58 = vrot.slane %v9716_v49, 4  ;;  %v8775_v2 = vsel %vm13875_vm11, %v8766_v14, %v8774_v3  ;;  %v8202_v14 = vunpack.c.l.b16 %v8166_v34  ;;  %v17570_v49 = vld [vmem:[%s13563_s27 + $0x38] sm:$0x3] }
 0x544   : > { %v9293_v19 = vpop.f32.mrf.mxu3  ;;  %v8372_v5 = vadd.f32 %v8310_v57, %v16900_v31  ;;  %v8169_v31 = vsel %vm13839_vm8, %v8167_v17, %v8168_v48  ;;  %v9721_v7 = vrot.slane %v9719_v63, 5  ;;  %v9731_v35 = vrot.slane %v9729_v30, 4  ;;  %v17562_v57 = vld [vmem:[%s13563_s27 + $0x38] sm:$0x1] }
 0x545   : > { %v9358_v10 = vadd.f32 %v9293_v19, %v8976_v8  ;;  %v9206_v17 = vpack.c.b16 %v9189_v12, %v9188_v9  ;;  %v9154_v48 = vsel %vm13882_vm12, %v12960_v26, %v9153_v6  ;;  %v9735_v23 = vshll.u32 %v17562_v57, 16 }
 0x546   : > { %13088 = vmatmul.msk.bf16.gmra.mxu0 %vm658_vm4, %v13367_v21  ;;  %12894 = vmatmul.msk.bf16.gmra.mxu1 %vm658_vm4, %v8218_v25  ;;  %v9727_v25 = vrot.slane %v9725_v59, 5  ;;  %v9722_v19 = vor.u32 %v9721_v7, %v9718_v58  ;;  %v8203_v3 = vunpack.c.l.b16 %v8169_v31  ;;  %v8808_v6 = vunpack.c.l.b16 %v8765_v43 }
 0x547   : > { %v8913_v50 = vpop.f32.mrf.mxu2  ;;  %v17555_v21 = vadd.f32 %v9580_v47, %v9358_v10  ;;  %v9157_v47 = vsel %vm13882_vm12, %v9155_v0, %v9156_v13  ;;  %v8809_v12 = vunpack.c.l.b16 %v8775_v2  ;;  %v10738_v63 = vrot.slane %v10736_v20, 5 }
 0x548   : > { %v8977_v8 = vadd.f32 %v8913_v50, %v8371_v54  ;;  %v9732_v10 = vor.u32 %v9731_v35, %v9727_v25  ;;  %v9190_v0 = vunpack.c.l.b16 %v9154_v48  ;;  %v9191_v13 = vunpack.c.l.b16 %v9157_v47 }
 0x549   : > { %19107 = vst [vmem:[#allocation8_spill] sm:$0xff] %v17555_v21  ;;  %v10741_v21 = vrot.slane %v10739_v32, 6  ;;  %v10744_v58 = vrot.slane %v9729_v30, 5  ;;  %v10745_v7 = vrot.slane %v9725_v59, 6  ;;  %v9723_v41 = vrot.slane %v9722_v19, 4 }
 0x54a   : > { %v9733_v28 = vrot.slane %v9732_v10, 4  ;;  %v10387_v34 = vrot.slane %v17546_v62, 5  ;;  %v10753_v43 = vshll.u32 %v17570_v49, 16  ;;  %v8219_v20 = vpack.c.b16 %v8203_v3, %v8202_v14 }
 0x54b   : > { %v9582_v54 = vpop.f32.mrf.mxu0  ;;  %v8312_v1 = vpop.f32.mrf.mxu1  ;;  %v10742_v31 = vor.u32 %v10741_v21, %v10738_v63  ;;  %v8825_v32 = vpack.c.b16 %v8809_v12, %v8808_v6  ;;  %v17577_v30 = vpack.c.b16 %v9191_v13, %v9190_v0  ;;  %v10746_v59 = vor.u32 %v10745_v7, %v10744_v58  ;;  %v13238_v21 = vld [vmem:[%s13563_s27 + $0x30] sm:$0xc]  ;;  %v17602_v12 = vld [vmem:[%s13563_s27 + $0x40] sm:$0xf] }
 0x54c   : > { %v9295_v50 = vpop.f32.mrf.mxu3  ;;  %12927 = vmatmul.msk.bf16.gmra.mxu2 %vm658_vm4, %v8824_v22  ;;  %v8373_v9 = vadd.f32 %v8312_v1, %v16936_v55  ;;  %v9737_v22 = vrot.slane %v9735_v23, 5  ;;  %v10750_v55 = vshrl.u32 %v17570_v49, 16  ;;  %v13172_v1 = vrot.slane %v17549_v51, 9 }
 0x54d   : > { %v9359_v26 = vadd.f32 %v9295_v50, %v8977_v8  ;;  %v13368_v8 = vld [vmem:[%s13563_s27 + $0xd8] sm:$0xff]  ;;  %v10755_v50 = vrot.slane %v10753_v43, 6  ;;  %v11375_v14 = vrot.slane %v17546_v62, 6  ;;  %v13254_v6 = vrot.slane %v13238_v21, 10 }
 0x54e   : > { %v10752_v23 = vrot.slane %v10750_v55, 5  ;;  %v10388_v62 = vsel %vm13839_vm8, %v13172_v1, %v10387_v34 }
 0x54f   : > { %v8916_v35 = vpop.f32.mrf.mxu2  ;;  %v17587_v47 = vadd.f32 %v9582_v54, %v9359_v26  ;;  %v13094_v26 = vld [vmem:[%s13563_s27 + $0x3c] sm:$0xf]  ;;  %v11377_v7 = vrot.slane %v11375_v14, 4 }
 0x550   : > { %v8978_v37 = vadd.f32 %v8916_v35, %v8372_v5  ;;  %v9728_v5 = vsel %vm13590_vm3, %v9723_v41, %v9727_v25  ;;  %v10389_v41 = vrot.slane %v10387_v34, 4  ;;  %v10390_v25 = vrot.slane %v17562_v57, 5 }
 0x551   : > { %12976 = vmatmul.msk.bf16.gmra.mxu3 %vm658_vm4, %v9206_v17  ;;  %v9738_v17 = vsel %vm13590_vm3, %v9733_v28, %v9737_v22  ;;  %19108 = vst [vmem:[#allocation3_spill] sm:$0xff] %v17587_v47  ;;  %v10743_v28 = vrot.slane %v10742_v31, 4  ;;  %v17596_v51 = vunpack.c.l.b16 %v9728_v5  ;;  %v11378_v57 = vrot.slane %v17570_v49, 6  ;;  %v13157_v22 = vld [vmem:[%s13563_s27 + $0x3c] sm:$0xe] }
 0x552   : > { %v17598_v54 = vunpack.c.l.b16 %v9738_v17  ;;  %v9740_v63 = vshrl.u32 %v13094_v26, 16  ;;  %v9743_v0 = vshll.u32 %v13094_v26, 16  ;;  %v10756_v58 = vor.u32 %v10755_v50, %v10752_v23 }
 0x553   : > { %v17579_v2 = vpop.f32.mrf.mxu0  ;;  %v8315_v48 = vpop.f32.mrf.mxu1  ;;  %v9749_v35 = vshll.u32 %v17602_v12, 16  ;;  %v10391_v55 = vsel %vm13839_vm8, %v10389_v41, %v10390_v25  ;;  %v10747_v34 = vsel %vm13875_vm11, %v10743_v28, %v10746_v59  ;;  %v11376_v49 = vsel %vm13882_vm12, %v13254_v6, %v11375_v14 }
 0x554   : > { %v9298_v19 = vpop.f32.mrf.mxu3  ;;  %v8374_v10 = vadd.f32 %v8315_v48, %v16947_v38  ;;  %v10748_v38 = vrot.slane %v10746_v59, 4  ;;  %v9742_v31 = vrot.slane %v9740_v63, 4  ;;  %v9745_v43 = vrot.slane %v9743_v0, 5 }
 0x555   : > { %v17591_v3 = vadd.f32 %v9298_v19, %v8978_v37  ;;  %v9751_v48 = vrot.slane %v9749_v35, 5  ;;  %v10759_v19 = vshrl.u32 %v13157_v22, 16  ;;  %v10762_v23 = vshll.u32 %v13157_v22, 16 }
 0x556   : > { %13089 = vmatmul.msk.bf16.gmra.mxu0 %vm658_vm4, %v13368_v8  ;;  %12895 = vmatmul.msk.bf16.gmra.mxu1 %vm658_vm4, %v8219_v20  ;;  %v9753_v8 = vshrl.u32 %v17602_v12, 16  ;;  %v10499_v20 = vunpack.c.l.b16 %v10388_v62  ;;  %v9746_v1 = vor.u32 %v9745_v43, %v9742_v31  ;;  %v10757_v59 = vsel %vm13875_vm11, %v10748_v38, %v10756_v58 }
 0x557   : > { %v8918_v37 = vpop.f32.mrf.mxu2  ;;  %v11379_v14 = vsel %vm13882_vm12, %v11377_v7, %v11378_v57  ;;  %v10394_v25 = vrot.slane %v17602_v12, 5  ;;  %v10500_v62 = vunpack.c.l.b16 %v10391_v55  ;;  %v11105_v63 = vunpack.c.l.b16 %v10747_v34 }
 0x558   : > { %v8979_v13 = vadd.f32 %v8918_v37, %v8373_v9  ;;  %v13096_v9 = vld [vmem:[%s13563_s27 + $0x44] sm:$0x1]  ;;  %v9755_v21 = vrot.slane %v9753_v8, 4  ;;  %v9747_v6 = vrot.slane %v9746_v1, 4  ;;  %v11487_v0 = vunpack.c.l.b16 %v11376_v49 }
 0x559   : > { %v9759_v37 = vshll.u32 %v13096_v9, 16  ;;  %v13173_v31 = vrot.slane %v13157_v22, 9  ;;  %v11106_v43 = vunpack.c.l.b16 %v10757_v59  ;;  %v10761_v38 = vrot.slane %v10759_v19, 5  ;;  %v13369_v49 = vld [vmem:[%s13563_s27 + $0xe4] sm:$0xff] }
 0x55a   : > { %v9756_v26 = vor.u32 %v9755_v21, %v9751_v48  ;;  %v10764_v58 = vrot.slane %v10762_v23, 6  ;;  %v10396_v57 = vrot.slane %v10394_v25, 4  ;;  %v10397_v7 = vrot.slane %v13096_v9, 5 }
 0x55b   : > { %v17617_v5 = vpop.f32.mrf.mxu0  ;;  %v8317_v17 = vpop.f32.mrf.mxu1  ;;  %v10767_v60 = vrot.slane %v9753_v8, 5  ;;  %v9761_v22 = vrot.slane %v9759_v37, 5  ;;  %v10768_v34 = vrot.slane %v9749_v35, 6  ;;  %v10133_v1 = vpack.c.b16 %v17598_v54, %v17596_v51 }
 0x55c   : > { %v9300_v50 = vpop.f32.mrf.mxu3  ;;  %12928 = vmatmul.msk.bf16.gmra.mxu2 %vm658_vm4, %v8825_v32  ;;  %v8375_v41 = vadd.f32 %v8317_v17, %v16977_v42  ;;  %v11488_v42 = vunpack.c.l.b16 %v11379_v14  ;;  %v17627_v17 = vld [vmem:[%s13563_s27 + $0x44] sm:$0x3]  ;;  %v9757_v55 = vrot.slane %v9756_v26, 4  ;;  %v17644_v19 = vpack.c.b16 %v11106_v43, %v11105_v63  ;;  %v13239_v14 = vld [vmem:[%s13563_s27 + $0x3c] sm:$0xc] }
 0x55d   : > { %v9361_v28 = vadd.f32 %v9300_v50, %v8979_v13  ;;  %v9752_v13 = vsel %vm13590_vm3, %v9747_v6, %v9751_v48  ;;  %v10773_v8 = vshrl.u32 %v17627_v17, 16  ;;  %v10776_v9 = vshll.u32 %v17627_v17, 16  ;;  %v13097_v63 = vld [vmem:[%s13563_s27 + $0x48] sm:$0xf] }
 0x55e   : > { %v10531_v48 = vpack.c.b16 %v10500_v62, %v10499_v20  ;;  %v17646_v35 = vpack.c.b16 %v11488_v42, %v11487_v0  ;;  %v10765_v23 = vor.u32 %v10764_v58, %v10761_v38  ;;  %v17649_v50 = vunpack.c.l.b16 %v9752_v13  ;;  %v17666_v0 = vld [vmem:[%s13563_s27 + $0x4c] sm:$0xf]  ;;  %v17677_v38 = vld [vmem:[%s13563_s27 + $0x48] sm:$0xe] }
 0x55f   : > { %v8921_v32 = vpop.f32.mrf.mxu2  ;;  %v17653_v59 = vsel %vm13839_vm8, %v10396_v57, %v10397_v7  ;;  %v9762_v6 = vsel %vm13590_vm3, %v9757_v55, %v9761_v22  ;;  %v10769_v37 = vor.u32 %v10768_v34, %v10767_v60  ;;  %v10778_v62 = vrot.slane %v10776_v9, 6  ;;  %v17682_v22 = vld [vmem:[%s13563_s27 + $0x50] sm:$0x1] }
 0x560   : > { %v8980_v47 = vadd.f32 %v8921_v32, %v8374_v10  ;;  %v17638_v10 = vsel %vm13839_vm8, %v13173_v31, %v10394_v25  ;;  %v11382_v25 = vrot.slane %v17602_v12, 6  ;;  %v17673_v12 = vadd.f32 %v17617_v5, %v9361_v28 }
 0x561   : > { %12977 = vmatmul.msk.bf16.gmra.mxu3 %vm658_vm4, %v17577_v30  ;;  %v10501_v26 = vunpack.c.l.b16 %v17638_v10  ;;  %v13255_v32 = vrot.slane %v13239_v14, 10  ;;  %v9764_v60 = vshrl.u32 %v13097_v63, 16  ;;  %v9767_v43 = vshll.u32 %v13097_v63, 16 }
 0x562   : > { %19109 = vst [vmem:[#allocation12_spill] sm:$0xff] %v17673_v12  ;;  %v9773_v42 = vshll.u32 %v17666_v0, 16  ;;  %v11384_v57 = vrot.slane %v11382_v25, 4  ;;  %v11385_v7 = vrot.slane %v17627_v17, 6  ;;  %v9777_v13 = vshrl.u32 %v17666_v0, 16 }
 0x563   : > { %v17642_v30 = vpop.f32.mrf.mxu0  ;;  %v8320_v21 = vpop.f32.mrf.mxu1  ;;  %v9766_v55 = vrot.slane %v9764_v60, 4  ;;  %v9769_v5 = vrot.slane %v9767_v43, 5  ;;  %v11383_v17 = vsel %vm13882_vm12, %v13255_v32, %v11382_v25  ;;  %v10785_v63 = vshll.u32 %v17677_v38, 16 }
 0x564   : > { %v9303_v51 = vpop.f32.mrf.mxu3  ;;  %v8376_v54 = vadd.f32 %v8320_v21, %v16987_v18  ;;  %v10775_v18 = vrot.slane %v10773_v8, 5  ;;  %v9775_v34 = vrot.slane %v9773_v42, 5  ;;  %v10401_v32 = vrot.slane %v17666_v0, 5 }
 0x565   : > { %v17657_v20 = vadd.f32 %v9303_v51, %v8980_v47  ;;  %v17670_v47 = vadd.f32 %v17579_v2, %v17591_v3  ;;  %v10766_v2 = vrot.slane %v10765_v23, 4  ;;  %v10771_v3 = vrot.slane %v10769_v37, 4 }
 0x566   : > { %13090 = vmatmul.msk.bf16.gmra.mxu0 %vm658_vm4, %v13369_v49  ;;  %13140 = vmatmul.msk.bf16.vlgmr.msra.gmra.mxu1 %vm658_vm4, %v10133_v1  ;;  %v10779_v28 = vor.u32 %v10778_v62, %v10775_v18  ;;  %v9779_v49 = vrot.slane %v9777_v13, 4  ;;  %v10782_v1 = vshrl.u32 %v17677_v38, 16  ;;  %v9770_v21 = vor.u32 %v9769_v5, %v9766_v55 }
 0x567   : > { %v8923_v31 = vpop.f32.mrf.mxu2  ;;  %v9783_v23 = vshll.u32 %v17682_v22, 16  ;;  %v11386_v18 = vsel %vm13882_vm12, %v11384_v57, %v11385_v7  ;;  %v10770_v25 = vsel %vm13875_vm11, %v10766_v2, %v10769_v37  ;;  %v10787_v43 = vrot.slane %v10785_v63, 6 }
 0x568   : > { %v8981_v58 = vadd.f32 %v8923_v31, %v8375_v41  ;;  %v10104_v41 = vunpack.c.l.b16 %v9762_v6  ;;  %v9780_v62 = vor.u32 %v9779_v49, %v9775_v34  ;;  %v10502_v6 = vunpack.c.l.b16 %v17653_v59 }
 0x569   : > { %v10784_v60 = vrot.slane %v10782_v1, 5  ;;  %v11490_v7 = vunpack.c.l.b16 %v11386_v18  ;;  %v9771_v55 = vrot.slane %v9770_v21, 4  ;;  %v9785_v49 = vrot.slane %v9783_v23, 5 }
 0x56a   : > { %v9781_v5 = vrot.slane %v9780_v62, 4  ;;  %v10134_v59 = vpack.c.b16 %v10104_v41, %v17649_v50  ;;  %v10791_v37 = vrot.slane %v9773_v42, 6  ;;  %v11107_v2 = vunpack.c.l.b16 %v10770_v25 }
 0x56b   : > { %v17685_v8 = vpop.f32.mrf.mxu0  ;;  %v8322_v9 = vpop.f32.mrf.mxu1  ;;  %v10403_v1 = vrot.slane %v10401_v32, 4  ;;  %v10788_v21 = vor.u32 %v10787_v43, %v10784_v60  ;;  %v10532_v42 = vpack.c.b16 %v10502_v6, %v10501_v26  ;;  %v13240_v6 = vld [vmem:[%s13563_s27 + $0x48] sm:$0xc] }
 0x56c   : > { %v9305_v51 = vpop.f32.mrf.mxu3  ;;  %13189 = vmatmul.msk.bf16.vlgmr.msra.gmra.mxu2 %vm658_vm4, %v10531_v48  ;;  %v8377_v14 = vadd.f32 %v8322_v9, %v17019_v29  ;;  %v10780_v48 = vsel %vm13875_vm11, %v10771_v3, %v10779_v28  ;;  %v11489_v29 = vunpack.c.l.b16 %v11383_v17  ;;  %v13174_v28 = vrot.slane %v17677_v38, 9 }
 0x56d   : > { %v17695_v31 = vadd.f32 %v9305_v51, %v8981_v58  ;;  %v17704_v58 = vld [vmem:[%s13563_s27 + $0x50] sm:$0x3]  ;;  %v10790_v51 = vrot.slane %v9777_v13, 5  ;;  %v11108_v3 = vunpack.c.l.b16 %v10780_v48  ;;  %v10404_v17 = vrot.slane %v17682_v22, 5 }
 0x56e   : > { %v10796_v23 = vshrl.u32 %v17704_v58, 16  ;;  %v9776_v38 = vsel %vm13590_vm3, %v9771_v55, %v9775_v34  ;;  %v9786_v13 = vsel %vm13590_vm3, %v9781_v5, %v9785_v49  ;;  %v10402_v26 = vsel %vm13839_vm8, %v13174_v28, %v10401_v32  ;;  %v13159_v49 = vld [vmem:[%s13563_s27 + $0x54] sm:$0xe] }
 0x56f   : > { %v8926_v57 = vpop.f32.mrf.mxu2  ;;  %v10792_v62 = vor.u32 %v10791_v37, %v10790_v51  ;;  %v11138_v10 = vpack.c.b16 %v11108_v3, %v11107_v2  ;;  %v11389_v34 = vrot.slane %v17666_v0, 6  ;;  %v10405_v60 = vsel %vm13839_vm8, %v10403_v1, %v10404_v17 }
 0x570   : > { %v8982_v9 = vadd.f32 %v8926_v57, %v8376_v54  ;;  %v10799_v54 = vshll.u32 %v17704_v58, 16  ;;  %v10798_v63 = vrot.slane %v10796_v23, 5  ;;  %v10789_v43 = vrot.slane %v10788_v21, 4  ;;  %v13100_v57 = vld [vmem:[%s13563_s27 + $0x54] sm:$0xf] }
 0x571   : > { %13222 = vmatmul.msk.bf16.vlgmr.msra.gmra.mxu3 %vm658_vm4, %v17644_v19  ;;  %v17717_v19 = vpack.c.b16 %v11490_v7, %v11489_v29  ;;  %v17735_v29 = vunpack.c.l.b16 %v9786_v13  ;;  %v17741_v7 = vld [vmem:[%s13563_s27 + $0x58] sm:$0xf]  ;;  %v9788_v55 = vshrl.u32 %v13100_v57, 16  ;;  %v9791_v0 = vshll.u32 %v13100_v57, 16  ;;  %v13102_v21 = vld [vmem:[%s13563_s27 + $0x5c] sm:$0x1] }
 0x572   : > { %v10801_v25 = vrot.slane %v10799_v54, 6  ;;  %v9797_v5 = vshll.u32 %v17741_v7, 16  ;;  %v13256_v37 = vrot.slane %v13240_v6, 10  ;;  %v11391_v2 = vrot.slane %v11389_v34, 4 }
 0x573   : > { %v17713_v18 = vpop.f32.mrf.mxu0  ;;  %v8325_v50 = vpop.f32.mrf.mxu1  ;;  %v9790_v3 = vrot.slane %v9788_v55, 4  ;;  %v9793_v28 = vrot.slane %v9791_v0, 5  ;;  %v10805_v1 = vshrl.u32 %v13159_v49, 16  ;;  %v11392_v17 = vrot.slane %v17704_v58, 6 }
 0x574   : > { %v9308_v22 = vpop.f32.mrf.mxu3  ;;  %v8378_v41 = vadd.f32 %v8325_v50, %v17030_v15  ;;  %v17733_v15 = vunpack.c.l.b16 %v9776_v38  ;;  %v10802_v51 = vor.u32 %v10801_v25, %v10798_v63  ;;  %v17748_v23 = vrot.slane %v9797_v5, 5 }
 0x575   : > { %v17724_v48 = vadd.f32 %v9308_v22, %v8982_v9  ;;  %v10808_v50 = vshll.u32 %v13159_v49, 16  ;;  %v10503_v22 = vunpack.c.l.b16 %v10402_v26  ;;  %v9794_v63 = vor.u32 %v9793_v28, %v9790_v3 }
 0x576   : > { %13271 = vmatmul.msk.bf16.vlgmr.msra.gmra.mxu0 %vm658_vm4, %v17646_v35  ;;  %13141 = vmatmul.msk.bf16.gmra.mxu1 %vm658_vm4, %v10134_v59  ;;  %v9801_v35 = vshrl.u32 %v17741_v7, 16  ;;  %v10794_v59 = vrot.slane %v10792_v62, 4  ;;  %v9807_v25 = vshll.u32 %v13102_v21, 16  ;;  %v10504_v58 = vunpack.c.l.b16 %v10405_v60 }
 0x577   : > { %v8928_v32 = vpop.f32.mrf.mxu2  ;;  %v10408_v26 = vrot.slane %v17741_v7, 5  ;;  %v10807_v12 = vrot.slane %v10805_v1, 5  ;;  %v13175_v28 = vrot.slane %v13159_v49, 9 }
 0x578   : > { %v8983_v9 = vadd.f32 %v8928_v32, %v8377_v14  ;;  %v9803_v54 = vrot.slane %v9801_v35, 4  ;;  %v10793_v14 = vsel %vm13875_vm11, %v10789_v43, %v10792_v62  ;;  %v10803_v32 = vsel %vm13875_vm11, %v10794_v59, %v10802_v51 }
 0x579   : > { %v10810_v62 = vrot.slane %v10808_v50, 6  ;;  %v10135_v43 = vpack.c.b16 %v17735_v29, %v17733_v15  ;;  %v11109_v3 = vunpack.c.l.b16 %v10793_v14  ;;  %v11110_v59 = vunpack.c.l.b16 %v10803_v32 }
 0x57a   : > { %v9804_v55 = vor.u32 %v9803_v54, %v17748_v23  ;;  %v9809_v51 = vrot.slane %v9807_v25, 5  ;;  %v17773_v54 = vld [vmem:[%s13563_s27 + $0x5c] sm:$0x3]  ;;  %v10814_v15 = vrot.slane %v9797_v5, 6  ;;  %v10410_v29 = vrot.slane %v10408_v26, 4 }
 0x57b   : > { %v17750_v38 = vpop.f32.mrf.mxu0  ;;  %v8327_v13 = vpop.f32.mrf.mxu1  ;;  %v10811_v14 = vor.u32 %v10810_v62, %v10807_v12  ;;  %v10822_v49 = vshll.u32 %v17773_v54, 16  ;;  %v17789_v12 = vsel %vm13839_vm8, %v13175_v28, %v10408_v26  ;;  %v13241_v5 = vld [vmem:[%s13563_s27 + $0x54] sm:$0xc] }
 0x57c   : > { %v9310_v6 = vpop.f32.mrf.mxu3  ;;  %13190 = vmatmul.msk.bf16.gmra.mxu2 %vm658_vm4, %v10532_v42  ;;  %v8379_v57 = vadd.f32 %v8327_v13, %v17060_v61  ;;  %v17766_v61 = vsel %vm13882_vm12, %v13256_v37, %v11389_v34  ;;  %v17770_v42 = vsel %vm13882_vm12, %v11391_v2, %v11392_v17  ;;  %v9805_v50 = vrot.slane %v9804_v55, 4 }
 0x57d   : > { %v17759_v0 = vadd.f32 %v9310_v6, %v8983_v9  ;;  %v9795_v9 = vrot.slane %v9794_v63, 4  ;;  %v10813_v13 = vrot.slane %v9801_v35, 5  ;;  %v10533_v34 = vpack.c.b16 %v10504_v58, %v10503_v22 }
 0x57e   : > { %v10411_v37 = vrot.slane %v13102_v21, 5  ;;  %v10819_v63 = vshrl.u32 %v17773_v54, 16  ;;  %v17782_v35 = vpack.c.b16 %v11110_v59, %v11109_v3  ;;  %v11396_v21 = vrot.slane %v17741_v7, 6  ;;  %v17808_v59 = vld [vmem:[%s13563_s27 + $0x64] sm:$0xf] }
 0x57f   : > { %v8931_v60 = vpop.f32.mrf.mxu2  ;;  %v9810_v58 = vsel %vm13590_vm3, %v9805_v50, %v9809_v51  ;;  %v10815_v32 = vor.u32 %v10814_v15, %v10813_v13  ;;  %v10812_v26 = vrot.slane %v10811_v14, 4  ;;  %v10824_v3 = vrot.slane %v10822_v49, 6  ;;  %v17820_v13 = vld [vmem:[%s13563_s27 + $0x60] sm:$0xe] }
 0x580   : > { %v8984_v1 = vadd.f32 %v8931_v60, %v8378_v41  ;;  %v10821_v55 = vrot.slane %v10819_v63, 5  ;;  %v11399_v7 = vrot.slane %v17773_v54, 6  ;;  %v13103_v60 = vld [vmem:[%s13563_s27 + $0x60] sm:$0xf]  ;;  %v17816_v51 = vadd.f32 %v17685_v8, %v17695_v31  ;;  %v17828_v63 = vld [vmem:[%s13563_s27 + $0x68] sm:$0x1] }
 0x581   : > { %13223 = vmatmul.msk.bf16.gmra.mxu3 %vm658_vm4, %v11138_v10  ;;  %v9800_v10 = vsel %vm13590_vm3, %v9795_v9, %v17748_v23  ;;  %v17800_v23 = vsel %vm13839_vm8, %v10410_v29, %v10411_v37  ;;  %v17812_v9 = vadd.f32 %v17642_v30, %v17657_v20  ;;  %v9815_v50 = vshll.u32 %v13103_v60, 16 }
 0x582   : > { %19111 = vst [vmem:[#allocation10_spill] sm:$0xff] %v17816_v51  ;;  %v10817_v15 = vrot.slane %v10815_v32, 4  ;;  %v10825_v29 = vor.u32 %v10824_v3, %v10821_v55  ;;  %v9825_v37 = vshrl.u32 %v17808_v59, 16  ;;  %v17823_v30 = vunpack.c.l.b16 %v9800_v10 }
 0x583   : > { %v17780_v25 = vpop.f32.mrf.mxu0  ;;  %v8330_v41 = vpop.f32.mrf.mxu1  ;;  %19110 = vst [vmem:[#allocation4_spill] sm:$0xff] %v17812_v9  ;;  %v10816_v20 = vsel %vm13875_vm11, %v10812_v26, %v10815_v32  ;;  %v9817_v31 = vrot.slane %v9815_v50, 5  ;;  %v10108_v14 = vunpack.c.l.b16 %v9810_v58  ;;  %v10505_v55 = vunpack.c.l.b16 %v17789_v12 }
 0x584   : > { %v9313_v22 = vpop.f32.mrf.mxu3  ;;  %v8380_v6 = vadd.f32 %v8330_v41, %v17070_v4  ;;  %v13257_v4 = vrot.slane %v13241_v5, 10  ;;  %v9827_v41 = vrot.slane %v9825_v37, 4  ;;  %v10828_v5 = vshrl.u32 %v17820_v13, 16 }
 0x585   : > { %v17796_v62 = vadd.f32 %v9313_v22, %v8984_v1  ;;  %v11398_v1 = vrot.slane %v11396_v21, 4  ;;  %v10506_v10 = vunpack.c.l.b16 %v17800_v23  ;;  %v10831_v12 = vshll.u32 %v17820_v13, 16 }
 0x586   : > { %13272 = vmatmul.msk.bf16.gmra.mxu0 %vm658_vm4, %v17717_v19  ;;  %13142 = vmatmul.msk.bf16.gmra.mxu1 %vm658_vm4, %v10135_v43  ;;  %v9812_v19 = vshrl.u32 %v13103_v60, 16  ;;  %v9821_v43 = vshll.u32 %v17808_v59, 16  ;;  %v11397_v32 = vsel %vm13882_vm12, %v13257_v4, %v11396_v21  ;;  %v10826_v60 = vsel %vm13875_vm11, %v10817_v15, %v10825_v29  ;;  %v17852_v15 = vld [vmem:[%s13563_s27 + $0x68] sm:$0x3] }
 0x587   : > { %v8933_v28 = vpop.f32.mrf.mxu2  ;;  %v11400_v58 = vsel %vm13882_vm12, %v11398_v1, %v11399_v7  ;;  %v9831_v4 = vshll.u32 %v17828_v63, 16  ;;  %v11493_v7 = vunpack.c.l.b16 %v11397_v32  ;;  %v10830_v50 = vrot.slane %v10828_v5, 5 }
 0x588   : > { %v8985_v54 = vadd.f32 %v8933_v28, %v8379_v57  ;;  %v9814_v8 = vrot.slane %v9812_v19, 4  ;;  %v17830_v49 = vrot.slane %v9821_v43, 5  ;;  %v11111_v28 = vunpack.c.l.b16 %v10816_v20 }
 0x589   : > { %v11494_v1 = vunpack.c.l.b16 %v11400_v58  ;;  %v11112_v2 = vunpack.c.l.b16 %v10826_v60  ;;  %v10836_v29 = vrot.slane %v9825_v37, 5  ;;  %v10837_v20 = vrot.slane %v9821_v43, 6 }
 0x58a   : > { %v9818_v23 = vor.u32 %v9817_v31, %v9814_v8  ;;  %v9828_v21 = vor.u32 %v9827_v41, %v17830_v49  ;;  %v19113_v8 = vunpack.c.l.b16 %v17770_v42  ;;  %v9833_v58 = vrot.slane %v9831_v4, 5  ;;  %v13242_v42 = vld [vmem:[%s13563_s27 + $0x60] sm:$0xc] }
 0x58b   : > { %v17833_v57 = vpop.f32.mrf.mxu0  ;;  %v8332_v22 = vpop.f32.mrf.mxu1  ;;  %v10842_v43 = vshrl.u32 %v17852_v15, 16 }
 0x58c   : > { %v9315_v26 = vpop.f32.mrf.mxu3  ;;  %13191 = vmatmul.msk.bf16.gmra.mxu2 %vm658_vm4, %v10533_v34  ;;  %v8381_v3 = vadd.f32 %v8332_v22, %v17102_v16  ;;  %v10833_v34 = vrot.slane %v10831_v12, 6  ;;  %v10415_v16 = vrot.slane %v17808_v59, 5  ;;  %v10136_v22 = vpack.c.b16 %v10108_v14, %v17823_v30 }
 0x58d   : > { %v17846_v19 = vadd.f32 %v9315_v26, %v8985_v54  ;;  %v19112_v54 = vunpack.c.l.b16 %v17766_v61  ;;  %v9819_v5 = vrot.slane %v9818_v23, 4  ;;  %v9829_v32 = vrot.slane %v9828_v21, 4 }
 0x58e   : > { %v13176_v26 = vrot.slane %v17820_v13, 9  ;;  %v10834_v60 = vor.u32 %v10833_v34, %v10830_v50  ;;  %v17862_v12 = vor.u32 %v10837_v20, %v10836_v29  ;;  %v10845_v61 = vshll.u32 %v17852_v15, 16 }
 0x58f   : > { %v8936_v17 = vpop.f32.mrf.mxu2  ;;  %v11521_v31 = vpack.c.b16 %v19113_v8, %v19112_v54  ;;  %v17869_v30 = vpack.c.b16 %v11112_v2, %v11111_v28  ;;  %v10417_v14 = vrot.slane %v10415_v16, 4  ;;  %v10844_v21 = vrot.slane %v10842_v43, 5  ;;  %v13108_v43 = vld [vmem:[%s13563_s27 + $0x74] sm:$0x1] }
 0x590   : > { %v8986_v41 = vadd.f32 %v8936_v17, %v8380_v6  ;;  %v10534_v6 = vpack.c.b16 %v10506_v10, %v10505_v55  ;;  %v10847_v4 = vrot.slane %v10845_v61, 6  ;;  %v11403_v50 = vrot.slane %v17808_v59, 6 }
 0x591   : > { %13224 = vmatmul.msk.bf16.gmra.mxu3 %vm658_vm4, %v17782_v35  ;;  %v17871_v35 = vpack.c.b16 %v11494_v1, %v11493_v7  ;;  %v9824_v55 = vsel %vm13590_vm3, %v9819_v5, %v17830_v49  ;;  %v10418_v2 = vrot.slane %v17828_v63, 5  ;;  %v13258_v10 = vrot.slane %v13242_v42, 10  ;;  %v13106_v1 = vld [vmem:[%s13563_s27 + $0x6c] sm:$0xf]  ;;  %v17892_v49 = vld [vmem:[%s13563_s27 + $0x70] sm:$0xf] }
 0x592   : > { %v17887_v59 = vsel %vm13839_vm8, %v13176_v26, %v10415_v16  ;;  %v10835_v28 = vrot.slane %v10834_v60, 4  ;;  %v10840_v7 = vrot.slane %v17862_v12, 4  ;;  %v9836_v29 = vshrl.u32 %v13106_v1, 16 }
 0x593   : > { %v17867_v37 = vpop.f32.mrf.mxu0  ;;  %v8335_v17 = vpop.f32.mrf.mxu1  ;;  %v9839_v20 = vshll.u32 %v13106_v1, 16  ;;  %v9845_v54 = vshll.u32 %v17892_v49, 16  ;;  %v9849_v8 = vshrl.u32 %v17892_v49, 16  ;;  %v11405_v16 = vrot.slane %v11403_v50, 4 }
 0x594   : > { %v9318_v23 = vpop.f32.mrf.mxu3  ;;  %v8382_v13 = vadd.f32 %v8335_v17, %v17113_v11  ;;  %v9834_v11 = vsel %vm13590_vm3, %v9829_v32, %v9833_v58  ;;  %v11406_v5 = vrot.slane %v17852_v15, 6  ;;  %v17900_v32 = vunpack.c.l.b16 %v9824_v55 }
 0x595   : > { %v17875_v34 = vadd.f32 %v9318_v23, %v8986_v41  ;;  %v17902_v58 = vunpack.c.l.b16 %v9834_v11  ;;  %v9838_v26 = vrot.slane %v9836_v29, 4  ;;  %v9841_v60 = vrot.slane %v9839_v20, 5 }
 0x596   : > { %13273 = vmatmul.msk.bf16.gmra.mxu0 %vm658_vm4, %v11521_v31  ;;  %13143 = vmatmul.msk.bf16.gmra.mxu1 %vm658_vm4, %v10136_v22  ;;  %v17897_v31 = vld [vmem:[%s13563_s27 + $0x6c] sm:$0xe]  ;;  %v10848_v22 = vor.u32 %v10847_v4, %v10844_v21  ;;  %v17905_v61 = vrot.slane %v9845_v54, 5  ;;  %v9851_v42 = vrot.slane %v9849_v8, 4  ;;  %v10419_v15 = vsel %vm13839_vm8, %v10417_v14, %v10418_v2 }
 0x597   : > { %v8938_v63 = vpop.f32.mrf.mxu2  ;;  %v10851_v17 = vshrl.u32 %v17897_v31, 16  ;;  %v10854_v23 = vshll.u32 %v17897_v31, 16  ;;  %v10507_v21 = vunpack.c.l.b16 %v17887_v59  ;;  %v10839_v4 = vsel %vm13875_vm11, %v10835_v28, %v17862_v12 }
 0x598   : > { %v8987_v41 = vadd.f32 %v8938_v63, %v8381_v3  ;;  %v11404_v55 = vsel %vm13882_vm12, %v13258_v10, %v11403_v50  ;;  %v19115_v63 = vld [vmem:[#allocation20_spill] sm:$0xff]  ;;  %v10849_v20 = vsel %vm13875_vm11, %v10840_v7, %v10848_v22  ;;  %v11407_v14 = vsel %vm13882_vm12, %v11405_v16, %v11406_v5 }
 0x599   : > { %v9842_v2 = vor.u32 %v9841_v60, %v9838_v26  ;;  %v9852_v12 = vor.u32 %v9851_v42, %v17905_v61  ;;  %v9855_v28 = vshll.u32 %v13108_v43, 16  ;;  %v10422_v50 = vrot.slane %v17892_v49, 5  ;;  %v17932_v16 = vld [vmem:[%s13563_s27 + $0x74] sm:$0x3] }
 0x59a   : > { %v10508_v10 = vunpack.c.l.b16 %v10419_v15  ;;  %v11113_v7 = vunpack.c.l.b16 %v10839_v4  ;;  %v11114_v22 = vunpack.c.l.b16 %v10849_v20  ;;  %v11495_v51 = vunpack.c.l.b16 %v11404_v55 }
 0x59b   : > { %v17909_v1 = vpop.f32.mrf.mxu0  ;;  %v8337_v3 = vpop.f32.mrf.mxu1  ;;  %v11496_v9 = vunpack.c.l.b16 %v11407_v14  ;;  %v9843_v5 = vrot.slane %v9842_v2, 4  ;;  %v10859_v26 = vrot.slane %v9849_v8, 5  ;;  %v10860_v60 = vrot.slane %v9845_v54, 6 }
 0x59c   : > { %19114 = vst [vmem:[#allocation5_spill] sm:$0xff] %v17909_v1  ;;  %v9320_v11 = vpop.f32.mrf.mxu3  ;;  %13192 = vmatmul.msk.bf16.gmra.mxu2 %vm658_vm4, %v10534_v6  ;;  %v8383_v29 = vadd.f32 %v8337_v3, %v19115_v63  ;;  %v10137_v6 = vpack.c.b16 %v17902_v58, %v17900_v32  ;;  %v10853_v3 = vrot.slane %v10851_v17, 5  ;;  %v10856_v63 = vrot.slane %v10854_v23, 6 }
 0x59d   : > { %v17925_v59 = vadd.f32 %v9320_v11, %v8987_v41  ;;  %v9853_v42 = vrot.slane %v9852_v12, 4  ;;  %v9857_v11 = vrot.slane %v9855_v28, 5  ;;  %v13177_v32 = vrot.slane %v17897_v31, 9  ;;  %v17962_v28 = vld [vmem:[%s13563_s27 + $0x7c] sm:$0xf] }
 0x59e   : > { %v10424_v58 = vrot.slane %v10422_v50, 4  ;;  %v10425_v17 = vrot.slane %v13108_v43, 5  ;;  %v10857_v23 = vor.u32 %v10856_v63, %v10853_v3  ;;  %v10865_v15 = vshrl.u32 %v17932_v16, 16 }
 0x59f   : > { %v8941_v1 = vpop.f32.mrf.mxu2  ;;  %v10868_v4 = vshll.u32 %v17932_v16, 16  ;;  %v17941_v54 = vpack.c.b16 %v11114_v22, %v11113_v7  ;;  %v9848_v43 = vsel %vm13590_vm3, %v9843_v5, %v17905_v61  ;;  %v10861_v20 = vor.u32 %v10860_v60, %v10859_v26  ;;  %v13109_v61 = vld [vmem:[%s13563_s27 + $0x78] sm:$0xf]  ;;  %v13243_v60 = vld [vmem:[%s13563_s27 + $0x6c] sm:$0xc] }
 0x5a0   : > { %v8988_v41 = vadd.f32 %v8941_v1, %v8382_v13  ;;  %v10535_v1 = vpack.c.b16 %v10508_v10, %v10507_v21  ;;  %v10867_v14 = vrot.slane %v10865_v15, 5  ;;  %v9858_v21 = vsel %vm13590_vm3, %v9853_v42, %v9857_v11  ;;  %v17975_v22 = vld [vmem:[%s13563_s27 + $0x78] sm:$0xe] }
 0x5a1   : > { %13225 = vmatmul.msk.bf16.gmra.mxu3 %vm658_vm4, %v17869_v30  ;;  %v17943_v30 = vpack.c.b16 %v11496_v9, %v11495_v51  ;;  %v10423_v12 = vsel %vm13839_vm8, %v13177_v32, %v10422_v50  ;;  %v10870_v9 = vrot.slane %v10868_v4, 6  ;;  %v10858_v51 = vrot.slane %v10857_v23, 4  ;;  %v17983_v32 = vld [vmem:[%s13563_s27 + $0x80] sm:$0x1] }
 0x5a2   : > { %v17966_v10 = vadd.f32 %v17713_v18, %v17724_v48  ;;  %v17970_v50 = vadd.f32 %v17750_v38, %v17759_v0  ;;  %v9863_v63 = vshll.u32 %v13109_v61, 16  ;;  %v9869_v7 = vshll.u32 %v17962_v28, 16 }
 0x5a3   : > { %v17939_v55 = vpop.f32.mrf.mxu0  ;;  %v8340_v13 = vpop.f32.mrf.mxu1  ;;  %v10863_v5 = vrot.slane %v10861_v20, 4  ;;  %v10871_v26 = vor.u32 %v10870_v9, %v10867_v14  ;;  %v9873_v18 = vshrl.u32 %v17962_v28, 16  ;;  %v17979_v48 = vunpack.c.l.b16 %v9848_v43  ;;  %v19117_v14 = vld [vmem:[#allocation21_spill] sm:$0xff] }
 0x5a4   : > { %v9323_v8 = vpop.f32.mrf.mxu3  ;;  %v8384_v31 = vadd.f32 %v8340_v13, %v17153_v52  ;;  %v10426_v52 = vsel %vm13839_vm8, %v10424_v58, %v10425_v17  ;;  %v9865_v0 = vrot.slane %v9863_v63, 5  ;;  %v10874_v42 = vshrl.u32 %v17975_v22, 16 }
 0x5a5   : > { %v17949_v2 = vadd.f32 %v9323_v8, %v8988_v41  ;;  %v10509_v11 = vunpack.c.l.b16 %v10423_v12  ;;  %v17985_v58 = vrot.slane %v9869_v7, 5  ;;  %v9875_v17 = vrot.slane %v9873_v18, 4 }
 0x5a6   : > { %13274 = vmatmul.msk.bf16.gmra.mxu0 %vm658_vm4, %v17871_v35  ;;  %13144 = vmatmul.msk.bf16.gmra.mxu1 %vm658_vm4, %v10137_v6  ;;  %v11410_v35 = vrot.slane %v17892_v49, 6  ;;  %v9860_v6 = vshrl.u32 %v13109_v61, 16  ;;  %v10112_v49 = vunpack.c.l.b16 %v9858_v21  ;;  %v10510_v15 = vunpack.c.l.b16 %v10426_v52 }
 0x5a7   : > { %v8943_v3 = vpop.f32.mrf.mxu2  ;;  %v10862_v4 = vsel %vm13875_vm11, %v10858_v51, %v10861_v20  ;;  %v13259_v13 = vrot.slane %v13243_v60, 10  ;;  %v11413_v8 = vrot.slane %v17932_v16, 6  ;;  %v10872_v12 = vsel %vm13875_vm11, %v10863_v5, %v10871_v26  ;;  %v18004_v5 = vld [vmem:[%s13563_s27 + $0x80] sm:$0x3] }
 0x5a8   : > { %v8989_v41 = vadd.f32 %v8943_v3, %v8383_v29  ;;  %v9862_v38 = vrot.slane %v9860_v6, 4  ;;  %v11412_v9 = vrot.slane %v11410_v35, 4  ;;  %v10877_v61 = vshll.u32 %v17975_v22, 16 }
 0x5a9   : > { %v9879_v20 = vshll.u32 %v17983_v32, 16  ;;  %v10876_v51 = vrot.slane %v10874_v42, 5  ;;  %v10138_v16 = vpack.c.b16 %v10112_v49, %v17979_v48  ;;  %v11115_v6 = vunpack.c.l.b16 %v10862_v4 }
 0x5aa   : > { %v9866_v52 = vor.u32 %v9865_v0, %v9862_v38  ;;  %v10879_v63 = vrot.slane %v10877_v61, 6  ;;  %v10882_v26 = vrot.slane %v9873_v18, 5  ;;  %v18008_v38 = vsel %vm13882_vm12, %v13259_v13, %v11410_v35 }
 0x5ab   : > { %v17987_v23 = vpop.f32.mrf.mxu0  ;;  %v8342_v29 = vpop.f32.mrf.mxu1  ;;  %v18012_v48 = vsel %vm13882_vm12, %v11412_v9, %v11413_v8  ;;  %v9881_v42 = vrot.slane %v9879_v20, 5  ;;  %v13178_v49 = vrot.slane %v17975_v22, 9  ;;  %v10891_v35 = vshll.u32 %v18004_v5, 16 }
 0x5ac   : > { %19116 = vst [vmem:[#allocation6_spill] sm:$0xff] %v17987_v23  ;;  %v9325_v43 = vpop.f32.mrf.mxu3  ;;  %13193 = vmatmul.msk.bf16.gmra.mxu2 %vm658_vm4, %v10535_v1  ;;  %v8385_v21 = vadd.f32 %v8342_v29, %v19117_v14  ;;  %v9876_v1 = vor.u32 %v9875_v17, %v17985_v58  ;;  %v11116_v29 = vunpack.c.l.b16 %v10872_v12  ;;  %v10429_v14 = vrot.slane %v17962_v28, 5 }
 0x5ad   : > { %v17997_v3 = vadd.f32 %v9325_v43, %v8989_v41  ;;  %v10883_v23 = vrot.slane %v9869_v7, 6  ;;  %v10536_v43 = vpack.c.b16 %v10510_v15, %v10509_v11  ;;  %v9867_v0 = vrot.slane %v9866_v52, 4 }
 0x5ae   : > { %v10880_v17 = vor.u32 %v10879_v63, %v10876_v51  ;;  %v9877_v18 = vrot.slane %v9876_v1, 4  ;;  %v18023_v4 = vpack.c.b16 %v11116_v29, %v11115_v6  ;;  %v11498_v13 = vunpack.c.l.b16 %v18012_v48  ;;  %v13244_v1 = vld [vmem:[%s13563_s27 + $0x78] sm:$0xc]  ;;  %v18046_v29 = vld [vmem:[%s13563_s27 + $0x88] sm:$0xf] }
 0x5af   : > { %v8946_v60 = vpop.f32.mrf.mxu2  ;;  %v18017_v7 = vor.u32 %v10883_v23, %v10882_v26  ;;  %v10431_v8 = vrot.slane %v10429_v14, 4  ;;  %v10432_v12 = vrot.slane %v17983_v32, 5  ;;  %v10893_v61 = vrot.slane %v10891_v35, 6 }
 0x5b0   : > { %v8990_v41 = vadd.f32 %v8946_v60, %v8384_v31  ;;  %v10888_v31 = vshrl.u32 %v18004_v5, 16  ;;  %v9872_v20 = vsel %vm13590_vm3, %v9867_v0, %v17985_v58  ;;  %v10430_v51 = vsel %vm13839_vm8, %v13178_v49, %v10429_v14  ;;  %v13112_v58 = vld [vmem:[%s13563_s27 + $0x84] sm:$0xf] }
 0x5b1   : > { %13226 = vmatmul.msk.bf16.gmra.mxu3 %vm658_vm4, %v17941_v54  ;;  %v11497_v54 = vunpack.c.l.b16 %v18008_v38  ;;  %v10881_v6 = vrot.slane %v10880_v17, 4  ;;  %v10886_v32 = vrot.slane %v18017_v7, 4  ;;  %v11417_v60 = vrot.slane %v17962_v28, 6 }
 0x5b2   : > { %v10890_v9 = vrot.slane %v10888_v31, 5  ;;  %v9884_v26 = vshrl.u32 %v13112_v58, 16  ;;  %v9893_v38 = vshll.u32 %v18046_v29, 16  ;;  %v18053_v0 = vunpack.c.l.b16 %v9872_v20 }
 0x5b3   : > { %v18021_v11 = vpop.f32.mrf.mxu0  ;;  %v8345_v15 = vpop.f32.mrf.mxu1  ;;  %v10511_v17 = vunpack.c.l.b16 %v10430_v51  ;;  %v13260_v35 = vrot.slane %v13244_v1, 10  ;;  %v11419_v51 = vrot.slane %v11417_v60, 4  ;;  %v11420_v1 = vrot.slane %v18004_v5, 6 }
 0x5b4   : > { %19118 = vst [vmem:[#allocation15_spill] sm:$0xff] %v18021_v11  ;;  %v9328_v22 = vpop.f32.mrf.mxu3  ;;  %v8386_v23 = vadd.f32 %v8345_v15, %v17196_v33  ;;  %v9882_v33 = vsel %vm13590_vm3, %v9877_v18, %v9881_v42  ;;  %v10894_v63 = vor.u32 %v10893_v61, %v10890_v9  ;;  %v10433_v42 = vsel %vm13839_vm8, %v10431_v8, %v10432_v12  ;;  %v18061_v15 = vld [vmem:[%s13563_s27 + $0x8c] sm:$0x1] }
 0x5b5   : > { %v18029_v52 = vadd.f32 %v9328_v22, %v8990_v41  ;;  %v9887_v41 = vshll.u32 %v13112_v58, 16  ;;  %v18058_v49 = vunpack.c.l.b16 %v9882_v33  ;;  %v9886_v18 = vrot.slane %v9884_v26, 4 }
 0x5b6   : > { %13275 = vmatmul.msk.bf16.gmra.mxu0 %vm658_vm4, %v17943_v30  ;;  %13145 = vmatmul.msk.bf16.gmra.mxu1 %vm658_vm4, %v10138_v16  ;;  %v9897_v30 = vshrl.u32 %v18046_v29, 16  ;;  %v18051_v16 = vld [vmem:[%s13563_s27 + $0x84] sm:$0xe]  ;;  %v18063_v22 = vrot.slane %v9893_v38, 5  ;;  %v10885_v8 = vsel %vm13875_vm11, %v10881_v6, %v18017_v7  ;;  %v10895_v12 = vsel %vm13875_vm11, %v10886_v32, %v10894_v63 }
 0x5b7   : > { %19119 = vst [vmem:[#allocation7_spill] sm:$0xff] %v18029_v52  ;;  %v8948_v14 = vpop.f32.mrf.mxu2  ;;  %v10897_v28 = vshrl.u32 %v18051_v16, 16  ;;  %v9889_v31 = vrot.slane %v9887_v41, 5  ;;  %v9903_v7 = vshll.u32 %v18061_v15, 16  ;;  %v11524_v32 = vpack.c.b16 %v11498_v13, %v11497_v54 }
 0x5b8   : > { %v8991_v48 = vadd.f32 %v8948_v14, %v8385_v21  ;;  %v9899_v9 = vrot.slane %v9897_v30, 4  ;;  %v10900_v21 = vshll.u32 %v18051_v16, 16  ;;  %v10512_v14 = vunpack.c.l.b16 %v10433_v42  ;;  %v18090_v42 = vld [vmem:[%s13563_s27 + $0x8c] sm:$0x3] }
 0x5b9   : > { %v9890_v26 = vor.u32 %v9889_v31, %v9886_v18  ;;  %v10899_v41 = vrot.slane %v10897_v28, 5  ;;  %v11117_v63 = vunpack.c.l.b16 %v10885_v8  ;;  %v11118_v52 = vunpack.c.l.b16 %v10895_v12 }
 0x5ba   : > { %v9900_v11 = vor.u32 %v9899_v9, %v18063_v22  ;;  %v10902_v6 = vrot.slane %v10900_v21, 6  ;;  %v18082_v5 = vsel %vm13882_vm12, %v13260_v35, %v11417_v60  ;;  %v10905_v28 = vrot.slane %v9897_v30, 5 }
 0x5bb   : > { %v18066_v61 = vpop.f32.mrf.mxu0  ;;  %v8347_v20 = vpop.f32.mrf.mxu1  ;;  %v10906_v18 = vrot.slane %v9893_v38, 6  ;;  %v10139_v54 = vpack.c.b16 %v18058_v49, %v18053_v0  ;;  %v10537_v13 = vpack.c.b16 %v10512_v14, %v10511_v17  ;;  %v9891_v9 = vrot.slane %v9890_v26, 4 }
 0x5bc   : > { %19120 = vst [vmem:[#allocation9_spill] sm:$0xff] %v18066_v61  ;;  %v9330_v33 = vpop.f32.mrf.mxu3  ;;  %13194 = vmatmul.msk.bf16.gmra.mxu2 %vm658_vm4, %v10536_v43  ;;  %v8387_v58 = vadd.f32 %v8347_v20, %v17226_v40  ;;  %v18086_v40 = vsel %vm13882_vm12, %v11419_v51, %v11420_v1  ;;  %v9901_v35 = vrot.slane %v9900_v11, 4  ;;  %v9905_v21 = vrot.slane %v9903_v7, 5  ;;  %v13245_v51 = vld [vmem:[%s13563_s27 + $0x84] sm:$0xc] }
 0x5bd   : > { %v18076_v61 = vadd.f32 %v9330_v33, %v8991_v48  ;;  %v10436_v48 = vrot.slane %v18046_v29, 5  ;;  %v10903_v20 = vor.u32 %v10902_v6, %v10899_v41  ;;  %v18097_v8 = vpack.c.b16 %v11118_v52, %v11117_v63  ;;  %v19121_v1 = vld [vmem:[#allocation22_spill] sm:$0xff] }
 0x5be   : > { %v10914_v38 = vshll.u32 %v18090_v42, 16  ;;  %v13179_v17 = vrot.slane %v18051_v16, 9  ;;  %v10907_v11 = vor.u32 %v10906_v18, %v10905_v28  ;;  %v9896_v14 = vsel %vm13590_vm3, %v9891_v9, %v18063_v22  ;;  %v13115_v28 = vld [vmem:[%s13563_s27 + $0x90] sm:$0xf]  ;;  %v18121_v22 = vld [vmem:[%s13563_s27 + $0x94] sm:$0xf] }
 0x5bf   : > { %v8951_v43 = vpop.f32.mrf.mxu2  ;;  %v10438_v12 = vrot.slane %v10436_v48, 4  ;;  %v11424_v41 = vrot.slane %v18046_v29, 6  ;;  %v9906_v16 = vsel %vm13590_vm3, %v9901_v35, %v9905_v21  ;;  %v13261_v63 = vrot.slane %v13245_v51, 10  ;;  %v18133_v21 = vld [vmem:[%s13563_s27 + $0x90] sm:$0xe] }
 0x5c0   : > { %v8992_v31 = vadd.f32 %v8951_v43, %v8386_v23  ;;  %v10911_v23 = vshrl.u32 %v18090_v42, 16  ;;  %v10916_v6 = vrot.slane %v10914_v38, 6  ;;  %v11427_v43 = vrot.slane %v18090_v42, 6  ;;  %v18143_v51 = vld [vmem:[%s13563_s27 + $0x98] sm:$0x1] }
 0x5c1   : > { %13227 = vmatmul.msk.bf16.gmra.mxu3 %vm658_vm4, %v18023_v4  ;;  %v10439_v4 = vrot.slane %v18061_v15, 5  ;;  %v10904_v15 = vrot.slane %v10903_v20, 4  ;;  %v18125_v29 = vadd.f32 %v17780_v25, %v17796_v62  ;;  %v18129_v18 = vadd.f32 %v17833_v57, %v17846_v19 }
 0x5c2   : > { %v10913_v26 = vrot.slane %v10911_v23, 5  ;;  %v10909_v9 = vrot.slane %v10907_v11, 4  ;;  %v9911_v35 = vshll.u32 %v13115_v28, 16  ;;  %v11426_v23 = vrot.slane %v11424_v41, 4 }
 0x5c3   : > { %v18102_v0 = vpop.f32.mrf.mxu0  ;;  %v8350_v49 = vpop.f32.mrf.mxu1  ;;  %v9921_v38 = vshrl.u32 %v18121_v22, 16  ;;  %v18136_v25 = vunpack.c.l.b16 %v9896_v14  ;;  %v10437_v62 = vsel %vm13839_vm8, %v13179_v17, %v10436_v48  ;;  %v10908_v14 = vsel %vm13875_vm11, %v10904_v15, %v10907_v11 }
 0x5c4   : > { %v9333_v52 = vpop.f32.mrf.mxu3  ;;  %v8388_v33 = vadd.f32 %v8350_v49, %v19121_v1  ;;  %v10917_v20 = vor.u32 %v10916_v6, %v10913_v26  ;;  %v9913_v19 = vrot.slane %v9911_v35, 5  ;;  %v10440_v49 = vsel %vm13839_vm8, %v10438_v12, %v10439_v4  ;;  %v19123_v12 = vld [vmem:[#allocation2_spill] sm:$0xff] }
 0x5c5   : > { %v18112_v7 = vadd.f32 %v9333_v52, %v8992_v31  ;;  %v9923_v1 = vrot.slane %v9921_v38, 4  ;;  %v11425_v48 = vsel %vm13882_vm12, %v13261_v63, %v11424_v41  ;;  %v11428_v35 = vsel %vm13882_vm12, %v11426_v23, %v11427_v43 }
 0x5c6   : > { %13276 = vmatmul.msk.bf16.gmra.mxu0 %vm658_vm4, %v11524_v32  ;;  %13146 = vmatmul.msk.bf16.gmra.mxu1 %vm658_vm4, %v10139_v54  ;;  %v9908_v32 = vshrl.u32 %v13115_v28, 16  ;;  %v9917_v54 = vshll.u32 %v18121_v22, 16  ;;  %v10116_v28 = vunpack.c.l.b16 %v9906_v16  ;;  %v10923_v16 = vshll.u32 %v18133_v21, 16 }
 0x5c7   : > { %v8953_v31 = vpop.f32.mrf.mxu2  ;;  %v10513_v11 = vunpack.c.l.b16 %v10437_v62  ;;  %v10514_v15 = vunpack.c.l.b16 %v10440_v49  ;;  %v9927_v41 = vshll.u32 %v18143_v51, 16  ;;  %v11119_v63 = vunpack.c.l.b16 %v10908_v14 }
 0x5c8   : > { %v8993_v42 = vadd.f32 %v8953_v31, %v8387_v58  ;;  %v9910_v57 = vrot.slane %v9908_v32, 4  ;;  %v9919_v52 = vrot.slane %v9917_v54, 5  ;;  %v10920_v58 = vshrl.u32 %v18133_v21, 16 }
 0x5c9   : > { %v10918_v32 = vsel %vm13875_vm11, %v10909_v9, %v10917_v20  ;;  %v11501_v60 = vunpack.c.l.b16 %v11425_v48  ;;  %v11502_v9 = vunpack.c.l.b16 %v11428_v35  ;;  %v19124_v43 = vunpack.c.l.b16 %v18082_v5 }
 0x5ca   : > { %v9914_v17 = vor.u32 %v9913_v19, %v9910_v57  ;;  %v9924_v57 = vor.u32 %v9923_v1, %v9919_v52  ;;  %v10925_v19 = vrot.slane %v10923_v16, 6  ;;  %v10928_v49 = vrot.slane %v9921_v38, 5 }
 0x5cb   : > { %v18146_v26 = vpop.f32.mrf.mxu0  ;;  %v8352_v6 = vpop.f32.mrf.mxu1  ;;  %v10140_v1 = vpack.c.b16 %v10116_v28, %v18136_v25  ;;  %v13180_v14 = vrot.slane %v18133_v21, 9  ;;  %v10443_v48 = vrot.slane %v18121_v22, 5 }
 0x5cc   : > { %19122 = vst [vmem:[#allocation18_spill] sm:$0xff] %v18146_v26  ;;  %v9335_v31 = vpop.f32.mrf.mxu3  ;;  %13195 = vmatmul.msk.bf16.gmra.mxu2 %vm658_vm4, %v10537_v13  ;;  %v8389_v4 = vadd.f32 %v8352_v6, %v19123_v12  ;;  %v10922_v13 = vrot.slane %v10920_v58, 5  ;;  %v11120_v12 = vunpack.c.l.b16 %v10918_v32  ;;  %v9915_v20 = vrot.slane %v9914_v17, 4  ;;  %v18163_v26 = vld [vmem:[%s13563_s27 + $0x98] sm:$0x3] }
 0x5cd   : > { %v18159_v30 = vadd.f32 %v9335_v31, %v8993_v42  ;;  %v19125_v42 = vunpack.c.l.b16 %v18086_v40  ;;  %v10929_v31 = vrot.slane %v9917_v54, 6  ;;  %v9929_v58 = vrot.slane %v9927_v41, 5 }
 0x5ce   : > { %v9925_v17 = vrot.slane %v9924_v57, 4  ;;  %v10926_v32 = vor.u32 %v10925_v19, %v10922_v13  ;;  %v10934_v5 = vshrl.u32 %v18163_v26, 16  ;;  %v10937_v40 = vshll.u32 %v18163_v26, 16 }
 0x5cf   : > { %v8956_v6 = vpop.f32.mrf.mxu2  ;;  %v11525_v23 = vpack.c.b16 %v19125_v42, %v19124_v43  ;;  %v10538_v54 = vpack.c.b16 %v10514_v15, %v10513_v11  ;;  %v18178_v38 = vpack.c.b16 %v11120_v12, %v11119_v63  ;;  %v9920_v25 = vsel %vm13590_vm3, %v9915_v20, %v9919_v52  ;;  %v18201_v12 = vld [vmem:[%s13563_s27 + $0xa0] sm:$0xf]  ;;  %v13246_v20 = vld [vmem:[%s13563_s27 + $0x90] sm:$0xc] }
 0x5d0   : > { %v8994_v62 = vadd.f32 %v8956_v6, %v8388_v33  ;;  %v10930_v16 = vor.u32 %v10929_v31, %v10928_v49  ;;  %v10936_v41 = vrot.slane %v10934_v5, 5  ;;  %v10939_v57 = vrot.slane %v10937_v40, 6  ;;  %v13118_v6 = vld [vmem:[%s13563_s27 + $0x9c] sm:$0xf]  ;;  %v18218_v5 = vld [vmem:[%s13563_s27 + $0xa4] sm:$0x1] }
 0x5d1   : > { %13228 = vmatmul.msk.bf16.gmra.mxu3 %vm658_vm4, %v18097_v8  ;;  %v18180_v8 = vpack.c.b16 %v11502_v9, %v11501_v60  ;;  %v18189_v11 = vsel %vm13839_vm8, %v13180_v14, %v10443_v48  ;;  %v10445_v60 = vrot.slane %v10443_v48, 4  ;;  %v10446_v15 = vrot.slane %v18143_v51, 5 }
 0x5d2   : > { %v18196_v52 = vunpack.c.l.b16 %v9920_v25  ;;  %v10927_v63 = vrot.slane %v10926_v32, 4  ;;  %v11431_v19 = vrot.slane %v18121_v22, 6  ;;  %v9932_v51 = vshrl.u32 %v13118_v6, 16 }
 0x5d3   : > { %v18176_v35 = vpop.f32.mrf.mxu0  ;;  %v8355_v33 = vpop.f32.mrf.mxu1  ;;  %v9935_v43 = vshll.u32 %v13118_v6, 16  ;;  %v9941_v42 = vshll.u32 %v18201_v12, 16  ;;  %v10932_v49 = vrot.slane %v10930_v16, 4  ;;  %v10940_v31 = vor.u32 %v10939_v57, %v10936_v41 }
 0x5d4   : > { %19126 = vst [vmem:[#allocation16_spill] sm:$0xff] %v18176_v35  ;;  %v9338_v21 = vpop.f32.mrf.mxu3  ;;  %v8390_v28 = vadd.f32 %v8355_v33, %v17279_v46  ;;  %v9930_v46 = vsel %vm13590_vm3, %v9925_v17, %v9929_v58  ;;  %v18211_v22 = vadd.f32 %v17867_v37, %v17875_v34  ;;  %v10447_v14 = vsel %vm13839_vm8, %v10445_v60, %v10446_v15 }
 0x5d5   : > { %v18185_v13 = vadd.f32 %v9338_v21, %v8994_v62  ;;  %v18213_v58 = vunpack.c.l.b16 %v9930_v46  ;;  %v9934_v48 = vrot.slane %v9932_v51, 4  ;;  %v9937_v17 = vrot.slane %v9935_v43, 5 }
 0x5d6   : > { %13277 = vmatmul.msk.bf16.gmra.mxu0 %vm658_vm4, %v11525_v23  ;;  %13147 = vmatmul.msk.bf16.gmra.mxu1 %vm658_vm4, %v10140_v1  ;;  %v9945_v23 = vshrl.u32 %v18201_v12, 16  ;;  %v18207_v1 = vld [vmem:[%s13563_s27 + $0x9c] sm:$0xe]  ;;  %v13262_v32 = vrot.slane %v13246_v20, 10  ;;  %v9943_v40 = vrot.slane %v9941_v42, 5  ;;  %v11433_v41 = vrot.slane %v11431_v19, 4 }
 0x5d7   : > { %v8958_v9 = vpop.f32.mrf.mxu2  ;;  %v10943_v33 = vshrl.u32 %v18207_v1, 16  ;;  %v11434_v37 = vrot.slane %v18163_v26, 6  ;;  %v9938_v34 = vor.u32 %v9937_v17, %v9934_v48  ;;  %v10946_v57 = vshll.u32 %v18207_v1, 16 }
 0x5d8   : > { %v8995_v62 = vadd.f32 %v8958_v9, %v8389_v4  ;;  %v9947_v4 = vrot.slane %v9945_v23, 4  ;;  %v10515_v15 = vunpack.c.l.b16 %v18189_v11  ;;  %v10931_v6 = vsel %vm13875_vm11, %v10927_v63, %v10930_v16 }
 0x5d9   : > { %v10941_v9 = vsel %vm13875_vm11, %v10932_v49, %v10940_v31  ;;  %v9951_v51 = vshll.u32 %v18218_v5, 16  ;;  %v10450_v43 = vrot.slane %v18201_v12, 5  ;;  %v18240_v11 = vsel %vm13882_vm12, %v13262_v32, %v11431_v19  ;;  %v18247_v31 = vld [vmem:[%s13563_s27 + $0xa4] sm:$0x3] }
 0x5da   : > { %v9948_v26 = vor.u32 %v9947_v4, %v9943_v40  ;;  %v10945_v48 = vrot.slane %v10943_v33, 5  ;;  %v11121_v63 = vunpack.c.l.b16 %v10931_v6  ;;  %v9939_v49 = vrot.slane %v9938_v34, 4  ;;  %v13247_v6 = vld [vmem:[%s13563_s27 + $0x9c] sm:$0xc] }
 0x5db   : > { %v18221_v25 = vpop.f32.mrf.mxu0  ;;  %v8357_v21 = vpop.f32.mrf.mxu1  ;;  %v10948_v17 = vrot.slane %v10946_v57, 6  ;;  %v10452_v32 = vrot.slane %v10450_v43, 4  ;;  %v10453_v33 = vrot.slane %v18218_v5, 5  ;;  %v10957_v34 = vshrl.u32 %v18247_v31, 16 }
 0x5dc   : > { %19127 = vst [vmem:[#allocation19_spill] sm:$0xff] %v18221_v25  ;;  %v9340_v46 = vpop.f32.mrf.mxu3  ;;  %13196 = vmatmul.msk.bf16.gmra.mxu2 %vm658_vm4, %v10538_v54  ;;  %v8391_v60 = vadd.f32 %v8357_v21, %v17309_v24  ;;  %v10141_v54 = vpack.c.b16 %v18213_v58, %v18196_v52  ;;  %v10516_v24 = vunpack.c.l.b16 %v10447_v14  ;;  %v11122_v21 = vunpack.c.l.b16 %v10941_v9 }
 0x5dd   : > { %v18232_v20 = vadd.f32 %v9340_v46, %v8995_v62  ;;  %v18244_v62 = vsel %vm13882_vm12, %v11433_v41, %v11434_v37  ;;  %v13181_v52 = vrot.slane %v18207_v1, 9  ;;  %v10951_v58 = vrot.slane %v9945_v23, 5 }
 0x5de   : > { %v9949_v19 = vrot.slane %v9948_v26, 4  ;;  %v9953_v14 = vrot.slane %v9951_v51, 5  ;;  %v10949_v41 = vor.u32 %v10948_v17, %v10945_v48  ;;  %v10952_v37 = vrot.slane %v9941_v42, 6 }
 0x5df   : > { %19128 = vst [vmem:[#allocation17_spill] sm:$0xff] %v18232_v20  ;;  %v8961_v16 = vpop.f32.mrf.mxu2  ;;  %v10960_v57 = vshll.u32 %v18247_v31, 16  ;;  %v10539_v1 = vpack.c.b16 %v10516_v24, %v10515_v15  ;;  %v11438_v9 = vrot.slane %v18201_v12, 6  ;;  %v11504_v42 = vunpack.c.l.b16 %v18244_v62 }
 0x5e0   : > { %v8996_v4 = vadd.f32 %v8961_v16, %v8390_v28  ;;  %v10953_v26 = vor.u32 %v10952_v37, %v10951_v58  ;;  %v10959_v51 = vrot.slane %v10957_v34, 5  ;;  %v11145_v17 = vpack.c.b16 %v11122_v21, %v11121_v63 }
 0x5e1   : > { %13229 = vmatmul.msk.bf16.gmra.mxu3 %vm658_vm4, %v18178_v38  ;;  %v9944_v38 = vsel %vm13590_vm3, %v9939_v49, %v9943_v40  ;;  %v10962_v48 = vrot.slane %v10960_v57, 6  ;;  %v9954_v15 = vsel %vm13590_vm3, %v9949_v19, %v9953_v14  ;;  %v18269_v40 = vsel %vm13839_vm8, %v13181_v52, %v10450_v43  ;;  %v13121_v49 = vld [vmem:[%s13563_s27 + $0xa8] sm:$0xf] }
 0x5e2   : > { %v18274_v12 = vunpack.c.l.b16 %v9944_v38  ;;  %v18278_v24 = vsel %vm13839_vm8, %v10452_v32, %v10453_v33  ;;  %v10950_v63 = vrot.slane %v10949_v41, 4  ;;  %v13263_v62 = vrot.slane %v13247_v6, 10  ;;  %v13166_v19 = vld [vmem:[%s13563_s27 + $0xa8] sm:$0xe]  ;;  %v13123_v6 = vld [vmem:[%s13563_s27 + $0xb0] sm:$0x1] }
 0x5e3   : > { %v18255_v28 = vpop.f32.mrf.mxu0  ;;  %v10209_v46 = vpop.f32.mrf.mxu1  ;;  %v11440_v43 = vrot.slane %v11438_v9, 4  ;;  %v11441_v52 = vrot.slane %v18247_v31, 6  ;;  %v9956_v58 = vshrl.u32 %v13121_v49, 16  ;;  %v10955_v14 = vrot.slane %v10953_v26, 4 }
 0x5e4   : > { %19129 = vst [vmem:[#allocation20_spill] sm:$0xff] %v18255_v28  ;;  %v9343_v5 = vpop.f32.mrf.mxu3  ;;  %v10963_v37 = vor.u32 %v10962_v48, %v10959_v51  ;;  %v18287_v32 = vunpack.c.l.b16 %v9954_v15  ;;  %v10517_v38 = vunpack.c.l.b16 %v18269_v40  ;;  %v10966_v23 = vshrl.u32 %v13166_v19, 16 }
 0x5e5   : > { %v18263_v16 = vadd.f32 %v9343_v5, %v8996_v4  ;;  %v18282_v4 = vld [vmem:[%s13563_s27 + $0xac] sm:$0xf]  ;;  %v9958_v33 = vrot.slane %v9956_v58, 4  ;;  %v10969_v31 = vshll.u32 %v13166_v19, 16  ;;  %v11439_v51 = vsel %vm13882_vm12, %v13263_v62, %v11438_v9 }
 0x5e6   : > { %13278 = vmatmul.msk.bf16.gmra.mxu0 %vm658_vm4, %v18180_v8  ;;  %13148 = vmatmul.msk.bf16.gmra.mxu1 %vm658_vm4, %v10141_v54  ;;  %v9959_v8 = vshll.u32 %v13121_v49, 16  ;;  %v9965_v34 = vshll.u32 %v18282_v4, 16  ;;  %v9969_v57 = vshrl.u32 %v18282_v4, 16  ;;  %v10964_v40 = vsel %vm13875_vm11, %v10955_v14, %v10963_v37 }
 0x5e7   : > { %19130 = vst [vmem:[#allocation21_spill] sm:$0xff] %v18263_v16  ;;  %v8963_v21 = vpop.f32.mrf.mxu2  ;;  %v11442_v58 = vsel %vm13882_vm12, %v11440_v43, %v11441_v52  ;;  %v10971_v9 = vrot.slane %v10969_v31, 6  ;;  %v10289_v62 = vadd.f32 %v10209_v46, %v17319_v39  ;;  %v11505_v14 = vunpack.c.l.b16 %v11439_v51  ;;  %v18313_v31 = vld [vmem:[%s13563_s27 + $0xb0] sm:$0x3] }
 0x5e8   : > { %v8997_v54 = vadd.f32 %v8963_v21, %v8391_v60  ;;  %v9961_v41 = vrot.slane %v9959_v8, 5  ;;  %v9967_v5 = vrot.slane %v9965_v34, 5  ;;  %v10954_v60 = vsel %vm13875_vm11, %v10950_v63, %v10953_v26 }
 0x5e9   : > { %v9971_v15 = vrot.slane %v9969_v57, 4  ;;  %v9975_v8 = vshll.u32 %v13123_v6, 16  ;;  %v10968_v63 = vrot.slane %v10966_v23, 5  ;;  %v11506_v37 = vunpack.c.l.b16 %v11442_v58  ;;  %v19134_v58 = vld [vmem:[#allocation23_spill] sm:$0xff] }
 0x5ea   : > { %v9962_v48 = vor.u32 %v9961_v41, %v9958_v33  ;;  %v10518_v33 = vunpack.c.l.b16 %v18278_v24  ;;  %v13182_v41 = vrot.slane %v13166_v19, 9  ;;  %v10460_v43 = vrot.slane %v13123_v6, 5 }
 0x5eb   : > { %v18292_v28 = vpop.f32.mrf.mxu0  ;;  %v10211_v49 = vpop.f32.mrf.mxu1  ;;  %v9972_v26 = vor.u32 %v9971_v15, %v9967_v5  ;;  %v19133_v52 = vunpack.c.l.b16 %v18240_v11  ;;  %v11123_v15 = vunpack.c.l.b16 %v10954_v60  ;;  %v11124_v23 = vunpack.c.l.b16 %v10964_v40 }
 0x5ec   : > { %19131 = vst [vmem:[#allocation22_spill] sm:$0xff] %v18292_v28  ;;  %v9345_v21 = vpop.f32.mrf.mxu3  ;;  %13197 = vmatmul.msk.bf16.gmra.mxu2 %vm658_vm4, %v10539_v1  ;;  %v10457_v28 = vrot.slane %v18282_v4, 5  ;;  %v9963_v1 = vrot.slane %v9962_v48, 4  ;;  %v9977_v24 = vrot.slane %v9975_v8, 5  ;;  %v10972_v19 = vor.u32 %v10971_v9, %v10968_v63 }
 0x5ed   : > { %v18304_v16 = vadd.f32 %v9345_v21, %v8997_v54  ;;  %v11527_v35 = vpack.c.b16 %v11504_v42, %v19133_v52  ;;  %v10142_v54 = vpack.c.b16 %v18287_v32, %v18274_v12  ;;  %v9973_v46 = vrot.slane %v9972_v26, 4  ;;  %v13248_v21 = vld [vmem:[%s13563_s27 + $0xa8] sm:$0xc] }
 0x5ee   : > { %v10459_v20 = vrot.slane %v10457_v28, 4  ;;  %v9968_v6 = vsel %vm13590_vm3, %v9963_v1, %v9967_v5  ;;  %v10458_v11 = vsel %vm13839_vm8, %v13182_v41, %v10457_v28  ;;  %v10974_v42 = vrot.slane %v9969_v57, 5  ;;  %v18348_v1 = vld [vmem:[%s13563_s27 + $0xb8] sm:$0xf] }
 0x5ef   : > { %19132 = vst [vmem:[#allocation2_spill] sm:$0xff] %v18304_v16  ;;  %v10607_v25 = vpop.f32.mrf.mxu2  ;;  %v10975_v12 = vrot.slane %v9965_v34, 6  ;;  %v10540_v51 = vpack.c.b16 %v10518_v33, %v10517_v38  ;;  %v18320_v48 = vpack.c.b16 %v11506_v37, %v11505_v14  ;;  %v10290_v5 = vadd.f32 %v10211_v49, %v19134_v58  ;;  %v13124_v33 = vld [vmem:[%s13563_s27 + $0xb4] sm:$0xf] }
 0x5f0   : > { %v10687_v39 = vadd.f32 %v10607_v25, %v10289_v62  ;;  %v10461_v25 = vsel %vm13839_vm8, %v10459_v20, %v10460_v43  ;;  %v18327_v8 = vpack.c.b16 %v11124_v23, %v11123_v15  ;;  %v10983_v28 = vshll.u32 %v18313_v31, 16  ;;  %v18334_v20 = vld [vmem:[%s18758_s2] ss:$0 sm:$0xff]  ;;  %v13167_v58 = vld [vmem:[%s13563_s27 + $0xb4] sm:$0xe] }
 0x5f1   : > { %13230 = vmatmul.msk.bf16.gmra.mxu3 %vm658_vm4, %v11145_v17  ;;  %v10980_v17 = vshrl.u32 %v18313_v31, 16  ;;  %v11445_v34 = vrot.slane %v18282_v4, 6  ;;  %v9978_v38 = vsel %vm13590_vm3, %v9973_v46, %v9977_v24  ;;  %v18338_v26 = vunpack.c.l.b16 %v9968_v6 }
 0x5f2   : > { %v10519_v49 = vunpack.c.l.b16 %v10458_v11  ;;  %v10520_v63 = vunpack.c.l.b16 %v10461_v25  ;;  %v18342_v9 = vrot.slane %v10972_v19, 4  ;;  %v18344_v4 = vor.u32 %v10975_v12, %v10974_v42 }
 0x5f3   : > { %v11595_v32 = vpop.f32.mrf.mxu0  ;;  %v10214_v60 = vpop.f32.mrf.mxu1  ;;  %v13264_v62 = vrot.slane %v13248_v21, 10  ;;  %v10982_v37 = vrot.slane %v10980_v17, 5  ;;  %v11448_v43 = vrot.slane %v18313_v31, 6  ;;  %v9980_v52 = vshrl.u32 %v13124_v33, 16  ;;  %v13126_v31 = vld [vmem:[%s13563_s27 + $0xbc] sm:$0x1] }
 0x5f4   : > { %v11213_v40 = vpop.f32.mrf.mxu3  ;;  %v11447_v15 = vrot.slane %v11445_v34, 4  ;;  %v9989_v23 = vshll.u32 %v18348_v1, 16  ;;  %v18354_v24 = vunpack.c.l.b16 %v9978_v38  ;;  %v18361_v6 = vpack.c.b16 %v10520_v63, %v10519_v49 }
 0x5f5   : > { %v11293_v57 = vadd.f32 %v11213_v40, %v10687_v39  ;;  %v9982_v19 = vrot.slane %v9980_v52, 4  ;;  %v9993_v12 = vshrl.u32 %v18348_v1, 16  ;;  %v10978_v21 = vrot.slane %v18344_v4, 4 }
 0x5f6   : > { %13279 = vmatmul.msk.bf16.gmra.mxu0 %vm658_vm4, %v11527_v35  ;;  %13149 = vmatmul.msk.bf16.gmra.mxu1 %vm658_vm4, %v10142_v54  ;;  %v10985_v35 = vrot.slane %v10983_v28, 6  ;;  %v9983_v54 = vshll.u32 %v13124_v33, 16  ;;  %v18364_v42 = vrot.slane %v9989_v23, 5  ;;  %v11446_v40 = vsel %vm13882_vm12, %v13264_v62, %v11445_v34 }
 0x5f7   : > { %v11675_v41 = vadd.f32 %v11595_v32, %v11293_v57  ;;  %v10609_v14 = vpop.f32.mrf.mxu2  ;;  %v11449_v38 = vsel %vm13882_vm12, %v11447_v15, %v11448_v43  ;;  %v9995_v49 = vrot.slane %v9993_v12, 4  ;;  %v9999_v63 = vshll.u32 %v13126_v31, 16 }
 0x5f8   : > { %v10688_v46 = vadd.f32 %v10609_v14, %v10290_v5  ;;  %v9985_v11 = vrot.slane %v9983_v54, 5  ;;  %v10464_v5 = vrot.slane %v18348_v1, 5  ;;  %v10986_v57 = vor.u32 %v10985_v35, %v10982_v37 }
 0x5f9   : > { %v11711_v39 = vadd.f32 %v18334_v20, %v11675_v41  ;;  %v10291_v41 = vadd.f32 %v10214_v60, %v17365_v45  ;;  %v13183_v52 = vrot.slane %v13167_v58, 9  ;;  %v9996_v34 = vor.u32 %v9995_v49, %v18364_v42 }
 0x5fa   : > { %v9986_v14 = vor.u32 %v9985_v11, %v9982_v19  ;;  %v10466_v62 = vrot.slane %v10464_v5, 4  ;;  %v10467_v54 = vrot.slane %v13126_v31, 5  ;;  %v11507_v35 = vunpack.c.l.b16 %v11446_v40 }
 0x5fb   : > { %v11743_v32 = vpack.c.bf16 %v11711_v39, %v11711_v39  ;;  %v11597_v25 = vpop.f32.mrf.mxu0  ;;  %v10216_v17 = vpop.f32.mrf.mxu1  ;;  %v10989_v39 = vshrl.u32 %v13167_v58, 16  ;;  %v11508_v16 = vunpack.c.l.b16 %v11449_v38  ;;  %v10992_v43 = vshll.u32 %v13167_v58, 16 }
 0x5fc   : > { %v11215_v28 = vpop.f32.mrf.mxu3  ;;  %13198 = vmatmul.msk.bf16.gmra.mxu2 %vm658_vm4, %v10540_v51  ;;  %v10143_v15 = vpack.c.b16 %v18354_v24, %v18338_v26  ;;  %v10977_v45 = vsel %vm13875_vm11, %v18342_v9, %v18344_v4  ;;  %v10987_v60 = vsel %vm13875_vm11, %v10978_v21, %v10986_v57  ;;  %v9987_v11 = vrot.slane %v9986_v14, 4  ;;  %v18393_v26 = vld [vmem:[%s13563_s27 + $0xbc] sm:$0x3] }
 0x5fd   : > { %11776 = vst.msk [vmem:[%s18359_s23] sm:$0xf] %vm11775_vm13, %v11743_v32  ;;  %v11294_v33 = vadd.f32 %v11215_v28, %v10688_v46  ;;  %v10001_v46 = vrot.slane %v9999_v63, 5  ;;  %v10465_v32 = vsel %vm13839_vm8, %v13183_v52, %v10464_v5  ;;  %v9997_v24 = vrot.slane %v9996_v34, 4 }
 0x5fe   : > { %v10468_v9 = vsel %vm13839_vm8, %v10466_v62, %v10467_v54  ;;  %v10991_v4 = vrot.slane %v10989_v39, 5  ;;  %v11125_v28 = vunpack.c.l.b16 %v10977_v45  ;;  %v11126_v57 = vunpack.c.l.b16 %v10987_v60  ;;  %v13127_v62 = vld [vmem:[%s13563_s27 + $0xc0] sm:$0xf] }
 0x5ff   : > { %v11676_v51 = vadd.f32 %v11597_v25, %v11294_v33  ;;  %v10612_v37 = vpop.f32.mrf.mxu2  ;;  %v10994_v25 = vrot.slane %v10992_v43, 6  ;;  %v10997_v49 = vrot.slane %v9993_v12, 5  ;;  %v10998_v5 = vrot.slane %v9989_v23, 6 }
 0x600   : > { %v10689_v31 = vadd.f32 %v10612_v37, %v10291_v41  ;;  %v11003_v63 = vshrl.u32 %v18393_v26, 16  ;;  %v11006_v33 = vshll.u32 %v18393_v26, 16  ;;  %v9992_v14 = vsel %vm13590_vm3, %v9987_v11, %v18364_v42  ;;  %v18414_v37 = vld [vmem:[%s13563_s27 + $0xc4] sm:$0xf] }
 0x601   : > { %v11712_v19 = vadd.f32 %v18334_v20, %v11676_v51  ;;  %13231 = vmatmul.msk.bf16.gmra.mxu3 %vm658_vm4, %v18327_v8  ;;  %v18397_v8 = vpack.c.b16 %v11508_v16, %v11507_v35  ;;  %v10521_v52 = vunpack.c.l.b16 %v10465_v32  ;;  %v10522_v34 = vunpack.c.l.b16 %v10468_v9 }
 0x602   : > { %v10292_v16 = vadd.f32 %v10216_v17, %v17389_v27  ;;  %v10002_v23 = vsel %vm13590_vm3, %v9997_v24, %v10001_v46  ;;  %v10995_v12 = vor.u32 %v10994_v25, %v10991_v4  ;;  %v11147_v51 = vpack.c.b16 %v11126_v57, %v11125_v28  ;;  %v19135_v25 = vld [vmem:[#allocation24_spill] sm:$0xff] }
 0x603   : > { %v11744_v21 = vpack.c.bf16 %v11712_v19, %v11712_v19  ;;  %v11600_v40 = vpop.f32.mrf.mxu0  ;;  %v10219_v58 = vpop.f32.mrf.mxu1  ;;  %v10004_v42 = vshrl.u32 %v13127_v62, 16  ;;  %v10007_v35 = vshll.u32 %v13127_v62, 16  ;;  %v18416_v43 = vunpack.c.l.b16 %v9992_v14  ;;  %v13249_v28 = vld [vmem:[%s13563_s27 + $0xb4] sm:$0xc] }
 0x604   : > { %v11218_v38 = vpop.f32.mrf.mxu3  ;;  %v11005_v27 = vrot.slane %v11003_v63, 5  ;;  %v11008_v17 = vrot.slane %v11006_v33, 6  ;;  %v18419_v60 = vunpack.c.l.b16 %v10002_v23  ;;  %v18421_v46 = vpack.c.b16 %v10522_v34, %v10521_v52 }
 0x605   : > { %11777 = vst.msk [vmem:[%s18359_s23 + $0x4] sm:$0xf] %vm11775_vm13, %v11744_v21  ;;  %v11295_v41 = vadd.f32 %v11218_v38, %v10689_v31  ;;  %v10996_v19 = vrot.slane %v10995_v12, 4  ;;  %v13129_v31 = vld [vmem:[%s13563_s27 + $0xc8] sm:$0x1]  ;;  %v10006_v11 = vrot.slane %v10004_v42, 4  ;;  %v10293_v21 = vadd.f32 %v10219_v58, %v19135_v25 }
 0x606   : > { %13280 = vmatmul.msk.bf16.gmra.mxu0 %vm658_vm4, %v18320_v48  ;;  %13150 = vmatmul.msk.bf16.gmra.mxu1 %vm658_vm4, %v10143_v15  ;;  %v10999_v48 = vor.u32 %v10998_v5, %v10997_v49  ;;  %v10009_v32 = vrot.slane %v10007_v35, 5  ;;  %v10013_v24 = vshll.u32 %v18414_v37, 16  ;;  %v11452_v57 = vrot.slane %v18348_v1, 6  ;;  %v13168_v35 = vld [vmem:[%s13563_s27 + $0xc0] sm:$0xe] }
 0x607   : > { %v11677_v54 = vadd.f32 %v11600_v40, %v11295_v41  ;;  %v10614_v39 = vpop.f32.mrf.mxu2  ;;  %v10017_v38 = vshrl.u32 %v18414_v37, 16  ;;  %v11009_v63 = vor.u32 %v11008_v17, %v11005_v27  ;;  %v10144_v58 = vpack.c.b16 %v18419_v60, %v18416_v43 }
 0x608   : > { %v10690_v45 = vadd.f32 %v10614_v39, %v10292_v16  ;;  %v11001_v5 = vrot.slane %v10999_v48, 4  ;;  %v10010_v33 = vor.u32 %v10009_v32, %v10006_v11  ;;  %v10015_v41 = vrot.slane %v10013_v24, 5 }
 0x609   : > { %v11713_v15 = vadd.f32 %v18334_v20, %v11677_v54  ;;  %v10019_v52 = vrot.slane %v10017_v38, 4  ;;  %v10023_v34 = vshll.u32 %v13129_v31, 16  ;;  %v11000_v1 = vsel %vm13875_vm11, %v10996_v19, %v10999_v48 }
 0x60a   : > { %v13265_v16 = vrot.slane %v13249_v28, 10  ;;  %v11455_v23 = vrot.slane %v18393_v26, 6  ;;  %v11454_v54 = vrot.slane %v11452_v57, 4  ;;  %v10011_v39 = vrot.slane %v10010_v33, 4 }
 0x60b   : > { %v11745_v9 = vpack.c.bf16 %v11713_v15, %v11713_v15  ;;  %v11602_v4 = vpop.f32.mrf.mxu0  ;;  %v18426_v40 = vpop.f32.mrf.mxu1  ;;  %v10020_v42 = vor.u32 %v10019_v52, %v10015_v41  ;;  %v11010_v27 = vsel %vm13875_vm11, %v11001_v5, %v11009_v63  ;;  %v13184_v43 = vrot.slane %v13168_v35, 9 }
 0x60c   : > { %v11220_v49 = vpop.f32.mrf.mxu3  ;;  %13199 = vmatmul.msk.bf16.gmra.mxu2 %vm658_vm4, %v18361_v6  ;;  %v10471_v6 = vrot.slane %v18414_v37, 5  ;;  %v10474_v15 = vrot.slane %v13129_v31, 5  ;;  %v10025_v60 = vrot.slane %v10023_v34, 5  ;;  %v11127_v19 = vunpack.c.l.b16 %v11000_v1 }
 0x60d   : > { %11778 = vst.msk [vmem:[%s18359_s23 + $0x8] sm:$0xf] %vm11775_vm13, %v11745_v9  ;;  %v11296_v14 = vadd.f32 %v11220_v49, %v10690_v45  ;;  %v10021_v45 = vrot.slane %v10020_v42, 4  ;;  %v11453_v11 = vsel %vm13882_vm12, %v13265_v16, %v11452_v57  ;;  %v11012_v32 = vshrl.u32 %v13168_v35, 16 }
 0x60e   : > { %v10473_v17 = vrot.slane %v10471_v6, 4  ;;  %v11015_v9 = vshll.u32 %v13168_v35, 16  ;;  %v11128_v49 = vunpack.c.l.b16 %v11010_v27  ;;  %v11456_v31 = vsel %vm13882_vm12, %v11454_v54, %v11455_v23 }
 0x60f   : > { %v11678_v12 = vadd.f32 %v11602_v4, %v11296_v14  ;;  %v10617_v62 = vpop.f32.mrf.mxu2  ;;  %v10472_v63 = vsel %vm13839_vm8, %v13184_v43, %v10471_v6  ;;  %v11014_v33 = vrot.slane %v11012_v32, 5  ;;  %v10026_v34 = vsel %vm13590_vm3, %v10021_v45, %v10025_v60  ;;  %v18478_v32 = vld [vmem:[%s13563_s27 + $0xd0] sm:$0xf] }
 0x610   : > { %v10691_v26 = vadd.f32 %v10617_v62, %v10293_v21  ;;  %v18453_v21 = vld [vmem:[%s13563_s27 + $0xc8] sm:$0x3]  ;;  %v10475_v57 = vsel %vm13839_vm8, %v10473_v17, %v10474_v15  ;;  %v11017_v14 = vrot.slane %v11015_v9, 6  ;;  %v11020_v1 = vrot.slane %v10017_v38, 5  ;;  %v13130_v62 = vld [vmem:[%s13563_s27 + $0xcc] sm:$0xf] }
 0x611   : > { %v11714_v48 = vadd.f32 %v18334_v20, %v11678_v12  ;;  %13232 = vmatmul.msk.bf16.gmra.mxu3 %vm658_vm4, %v11147_v51  ;;  %v10016_v51 = vsel %vm13590_vm3, %v10011_v39, %v10015_v41  ;;  %v11021_v41 = vrot.slane %v10013_v24, 6  ;;  %v11509_v16 = vunpack.c.l.b16 %v11453_v11  ;;  %v19136_v39 = vld [vmem:[#allocation26_spill] sm:$0xff] }
 0x612   : > { %v11018_v23 = vor.u32 %v11017_v14, %v11014_v33  ;;  %v11026_v6 = vshrl.u32 %v18453_v21, 16  ;;  %v11029_v12 = vshll.u32 %v18453_v21, 16  ;;  %v10294_v42 = vadd.f32 %v18426_v40, %v19136_v39 }
 0x613   : > { %v11746_v4 = vpack.c.bf16 %v11714_v48, %v11714_v48  ;;  %v11605_v25 = vpop.f32.mrf.mxu0  ;;  %v10224_v28 = vpop.f32.mrf.mxu1  ;;  %v11148_v24 = vpack.c.b16 %v11128_v49, %v11127_v19  ;;  %v11510_v35 = vunpack.c.l.b16 %v11456_v31  ;;  %v18471_v27 = vunpack.c.l.b16 %v10016_v51 }
 0x614   : > { %v11223_v5 = vpop.f32.mrf.mxu3  ;;  %v10524_v43 = vunpack.c.l.b16 %v10475_v57  ;;  %v11022_v48 = vor.u32 %v11021_v41, %v11020_v1  ;;  %v10028_v45 = vshrl.u32 %v13130_v62, 16  ;;  %v11019_v60 = vrot.slane %v11018_v23, 4 }
 0x615   : > { %11779 = vst.msk [vmem:[%s18359_s23 + $0xc] sm:$0xf] %vm11775_vm13, %v11746_v4  ;;  %v11297_v52 = vadd.f32 %v11223_v5, %v10691_v26  ;;  %v13250_v26 = vld [vmem:[%s13563_s27 + $0xc0] sm:$0xc]  ;;  %v11028_v11 = vrot.slane %v11026_v6, 5  ;;  %v11031_v40 = vrot.slane %v11029_v12, 6  ;;  %v11530_v31 = vpack.c.b16 %v11510_v35, %v11509_v16 }
 0x616   : > { %13281 = vmatmul.msk.bf16.gmra.mxu0 %vm658_vm4, %v18397_v8  ;;  %13151 = vmatmul.msk.bf16.gmra.mxu1 %vm658_vm4, %v10144_v58  ;;  %v18473_v8 = vunpack.c.l.b16 %v10026_v34  ;;  %v10523_v58 = vunpack.c.l.b16 %v10472_v63  ;;  %v10031_v19 = vshll.u32 %v13130_v62, 16  ;;  %v10030_v5 = vrot.slane %v10028_v45, 4  ;;  %v13169_v62 = vld [vmem:[%s13563_s27 + $0xcc] sm:$0xe] }
 0x617   : > { %v11679_v54 = vadd.f32 %v11605_v25, %v11297_v52  ;;  %v10619_v38 = vpop.f32.mrf.mxu2  ;;  %v19137_v25 = vld [vmem:[#allocation25_spill] sm:$0xff]  ;;  %v13266_v33 = vrot.slane %v13250_v26, 10  ;;  %v11459_v14 = vrot.slane %v18414_v37, 6  ;;  %v13132_v52 = vld [vmem:[%s13563_s27 + $0xd4] sm:$0x1]  ;;  %v10037_v41 = vshll.u32 %v18478_v32, 16 }
 0x618   : > { %v10692_v15 = vadd.f32 %v10619_v38, %v10294_v42  ;;  %v10295_v49 = vadd.f32 %v10224_v28, %v19137_v25  ;;  %v18483_v57 = vpack.c.b16 %v10524_v43, %v10523_v58  ;;  %v10033_v34 = vrot.slane %v10031_v19, 5 }
 0x619   : > { %v11715_v17 = vadd.f32 %v18334_v20, %v11679_v54  ;;  %v10145_v28 = vpack.c.b16 %v18473_v8, %v18471_v27  ;;  %v10041_v16 = vshrl.u32 %v18478_v32, 16  ;;  %v11024_v23 = vrot.slane %v11022_v48, 4 }
 0x61a   : > { %v11032_v6 = vor.u32 %v11031_v40, %v11028_v11  ;;  %v10034_v12 = vor.u32 %v10033_v34, %v10030_v5  ;;  %v10039_v39 = vrot.slane %v10037_v41, 5  ;;  %v10047_v38 = vshll.u32 %v13132_v52, 16  ;;  %v18507_v5 = vld [vmem:[%s13563_s27 + $0xd4] sm:$0x3] }
 0x61b   : > { %v11747_v9 = vpack.c.bf16 %v11715_v17, %v11715_v17  ;;  %v11607_v4 = vpop.f32.mrf.mxu0  ;;  %v10226_v51 = vpop.f32.mrf.mxu1  ;;  %v10043_v42 = vrot.slane %v10041_v16, 4  ;;  %v18498_v35 = vsel %vm13882_vm12, %v13266_v33, %v11459_v14  ;;  %v11461_v27 = vrot.slane %v11459_v14, 4 }
 0x61c   : > { %v11225_v63 = vpop.f32.mrf.mxu3  ;;  %13200 = vmatmul.msk.bf16.gmra.mxu2 %vm658_vm4, %v18421_v46  ;;  %v11023_v46 = vsel %vm13875_vm11, %v11019_v60, %v11022_v48  ;;  %v11462_v8 = vrot.slane %v18453_v21, 6  ;;  %v10478_v58 = vrot.slane %v18478_v32, 5  ;;  %v11035_v48 = vshrl.u32 %v13169_v62, 16 }
 0x61d   : > { %11780 = vst.msk [vmem:[%s18359_s23 + $0x10] sm:$0xf] %vm11775_vm13, %v11747_v9  ;;  %v11298_v1 = vadd.f32 %v11225_v63, %v10692_v15  ;;  %v10044_v15 = vor.u32 %v10043_v42, %v10039_v39  ;;  %v11033_v26 = vsel %vm13875_vm11, %v11024_v23, %v11032_v6  ;;  %v11129_v45 = vunpack.c.l.b16 %v11023_v46 }
 0x61e   : > { %v13185_v60 = vrot.slane %v13169_v62, 9  ;;  %v11038_v11 = vshll.u32 %v13169_v62, 16  ;;  %v10035_v9 = vrot.slane %v10034_v12, 4  ;;  %v10481_v25 = vrot.slane %v13132_v52, 5 }
 0x61f   : > { %v11680_v37 = vadd.f32 %v11607_v4, %v11298_v1  ;;  %v10622_v54 = vpop.f32.mrf.mxu2  ;;  %v10049_v4 = vrot.slane %v10047_v38, 5  ;;  %v11037_v33 = vrot.slane %v11035_v48, 5  ;;  %v19138_v1 = vld [vmem:[#allocation14_spill] sm:$0xff]  ;;  %v11463_v23 = vsel %vm13882_vm12, %v11461_v27, %v11462_v8 }
 0x620   : > { %v10693_v17 = vadd.f32 %v10622_v54, %v10295_v49  ;;  %v10480_v49 = vrot.slane %v10478_v58, 4  ;;  %v11040_v14 = vrot.slane %v11038_v11, 6  ;;  %v10296_v46 = vadd.f32 %v10226_v51, %v19138_v1 }
 0x621   : > { %v11716_v43 = vadd.f32 %v18334_v20, %v11680_v37  ;;  %13233 = vmatmul.msk.bf16.gmra.mxu3 %vm658_vm4, %v11148_v24  ;;  %v10045_v24 = vrot.slane %v10044_v15, 4  ;;  %v11043_v6 = vrot.slane %v10041_v16, 5  ;;  %v11130_v52 = vunpack.c.l.b16 %v11033_v26 }
 0x622   : > { %v11041_v12 = vor.u32 %v11040_v14, %v11037_v33  ;;  %v11044_v62 = vrot.slane %v10037_v41, 6  ;;  %v11049_v37 = vshrl.u32 %v18507_v5, 16  ;;  %v10040_v38 = vsel %vm13590_vm3, %v10035_v9, %v10039_v39  ;;  %v19139_v14 = vld [vmem:[#allocation11_spill] sm:$0xff] }
 0x623   : > { %v11748_v40 = vpack.c.bf16 %v11716_v43, %v11716_v43  ;;  %v11610_v19 = vpop.f32.mrf.mxu0  ;;  %v10229_v21 = vpop.f32.mrf.mxu1  ;;  %v10479_v51 = vsel %vm13839_vm8, %v13185_v60, %v10478_v58  ;;  %v11052_v27 = vshll.u32 %v18507_v5, 16  ;;  %v11511_v15 = vunpack.c.l.b16 %v18498_v35 }
 0x624   : > { %v11228_v63 = vpop.f32.mrf.mxu3  ;;  %v11045_v41 = vor.u32 %v11044_v62, %v11043_v6  ;;  %v11042_v43 = vrot.slane %v11041_v12, 4  ;;  %v11512_v58 = vunpack.c.l.b16 %v11463_v23  ;;  %v10127_v11 = vunpack.c.l.b16 %v10040_v38 }
 0x625   : > { %11781 = vst.msk [vmem:[%s18359_s23 + $0x14] sm:$0xf] %vm11775_vm13, %v11748_v40  ;;  %v11299_v34 = vadd.f32 %v11228_v63, %v10693_v17  ;;  %v11051_v17 = vrot.slane %v11049_v37, 5  ;;  %v11054_v39 = vrot.slane %v11052_v27, 6  ;;  %v10525_v40 = vunpack.c.l.b16 %v10479_v51 }
 0x626   : > { %13282 = vmatmul.msk.bf16.gmra.mxu0 %vm658_vm4, %v11530_v31  ;;  %13152 = vmatmul.msk.bf16.gmra.mxu1 %vm658_vm4, %v10145_v28  ;;  %v10050_v31 = vsel %vm13590_vm3, %v10045_v24, %v10049_v4  ;;  %v10482_v28 = vsel %vm13839_vm8, %v10480_v49, %v10481_v25  ;;  %v11047_v25 = vrot.slane %v11045_v41, 4  ;;  %v13251_v24 = vld [vmem:[%s13563_s27 + $0xcc] sm:$0xc]  ;;  %v11149_v49 = vpack.c.b16 %v11130_v52, %v11129_v45  ;;  %v13133_v52 = vld [vmem:[%s13563_s27 + $0xd8] sm:$0xf] }
 0x627   : > { %v11681_v54 = vadd.f32 %v11610_v19, %v11299_v34  ;;  %v10624_v42 = vpop.f32.mrf.mxu2  ;;  %v10128_v9 = vunpack.c.l.b16 %v10050_v31  ;;  %v10526_v4 = vunpack.c.l.b16 %v10482_v28  ;;  %v11055_v63 = vor.u32 %v11054_v39, %v11051_v17 }
 0x628   : > { %v10694_v16 = vadd.f32 %v10624_v42, %v10296_v46  ;;  %v11046_v33 = vsel %vm13875_vm11, %v11042_v43, %v11045_v41  ;;  %v10297_v34 = vadd.f32 %v10229_v21, %v19139_v14  ;;  %v11531_v1 = vpack.c.b16 %v11512_v58, %v11511_v15  ;;  %v18546_v42 = vld [vmem:[%s13563_s27 + $0xdc] sm:$0xf]  ;;  %v13170_v21 = vld [vmem:[%s13563_s27 + $0xd8] sm:$0xe] }
 0x629   : > { %v11717_v8 = vadd.f32 %v18334_v20, %v11681_v54  ;;  %v13267_v23 = vrot.slane %v13251_v24, 10  ;;  %v11466_v6 = vrot.slane %v18478_v32, 6  ;;  %v11469_v12 = vrot.slane %v18507_v5, 6 }
 0x62a   : > { %v10146_v62 = vpack.c.b16 %v10128_v9, %v10127_v11  ;;  %v10544_v37 = vpack.c.b16 %v10526_v4, %v10525_v40  ;;  %v18540_v54 = vsel %vm13875_vm11, %v11047_v25, %v11055_v63  ;;  %v18542_v45 = vunpack.c.l.b16 %v11046_v33  ;;  %v13135_v40 = vld [vmem:[%s13563_s27 + $0xe0] sm:$0x1] }
 0x62b   : > { %v11749_v48 = vpack.c.bf16 %v11717_v8, %v11717_v8  ;;  %v11612_v26 = vpop.f32.mrf.mxu0  ;;  %v10231_v60 = vpop.f32.mrf.mxu1  ;;  %v10052_v32 = vshrl.u32 %v13133_v52, 16  ;;  %v10055_v5 = vshll.u32 %v13133_v52, 16  ;;  %v10061_v27 = vshll.u32 %v18546_v42, 16 }
 0x62c   : > { %v11230_v19 = vpop.f32.mrf.mxu3  ;;  %13201 = vmatmul.msk.bf16.gmra.mxu2 %vm658_vm4, %v18483_v57  ;;  %v11058_v31 = vshrl.u32 %v13170_v21, 16  ;;  %v11061_v28 = vshll.u32 %v13170_v21, 16  ;;  %v11468_v17 = vrot.slane %v11466_v6, 4  ;;  %v18556_v11 = vsel %vm13882_vm12, %v13267_v23, %v11466_v6 }
 0x62d   : > { %11782 = vst.msk [vmem:[%s18359_s23 + $0x18] sm:$0xf] %vm11775_vm13, %v11749_v48  ;;  %v11300_v35 = vadd.f32 %v11230_v19, %v10694_v16  ;;  %v10065_v16 = vshrl.u32 %v18546_v42, 16  ;;  %v10054_v39 = vrot.slane %v10052_v32, 4  ;;  %v10057_v15 = vrot.slane %v10055_v5, 5  ;;  %v19140_v48 = vld [vmem:[#allocation13_spill] sm:$0xff] }
 0x62e   : > { %v10063_v19 = vrot.slane %v10061_v27, 5  ;;  %v11132_v25 = vunpack.c.l.b16 %v18540_v54  ;;  %v10071_v24 = vshll.u32 %v13135_v40, 16  ;;  %v11060_v33 = vrot.slane %v11058_v31, 5 }
 0x62f   : > { %v11682_v46 = vadd.f32 %v11612_v26, %v11300_v35  ;;  %v10627_v57 = vpop.f32.mrf.mxu2  ;;  %v10298_v26 = vadd.f32 %v10231_v60, %v19140_v48  ;;  %v10067_v9 = vrot.slane %v10065_v16, 4  ;;  %v10058_v63 = vor.u32 %v10057_v15, %v10054_v39  ;;  %v18563_v35 = vld [vmem:[%s13563_s27 + $0xe0] sm:$0x3] }
 0x630   : > { %v10695_v51 = vadd.f32 %v10627_v57, %v10297_v34  ;;  %v11063_v14 = vrot.slane %v11061_v28, 6  ;;  %v11470_v57 = vsel %vm13882_vm12, %v11468_v17, %v11469_v12  ;;  %v10073_v6 = vrot.slane %v10071_v24, 5 }
 0x631   : > { %v11718_v38 = vadd.f32 %v18334_v20, %v11682_v46  ;;  %13234 = vmatmul.msk.bf16.gmra.mxu3 %vm658_vm4, %v11149_v49  ;;  %v10068_v60 = vor.u32 %v10067_v9, %v10063_v19  ;;  %v10485_v49 = vrot.slane %v18546_v42, 5  ;;  %v10059_v23 = vrot.slane %v10058_v63, 4 }
 0x632   : > { %v13186_v52 = vrot.slane %v13170_v21, 9  ;;  %v10488_v5 = vrot.slane %v13135_v40, 5  ;;  %v11064_v28 = vor.u32 %v11063_v14, %v11060_v33  ;;  %v11513_v17 = vunpack.c.l.b16 %v18556_v11  ;;  %v19141_v33 = vld [vmem:[#allocation8_spill] sm:$0xff] }
 0x633   : > { %v11750_v41 = vpack.c.bf16 %v11718_v38, %v11718_v38  ;;  %v11615_v8 = vpop.f32.mrf.mxu0  ;;  %v10234_v43 = vpop.f32.mrf.mxu1  ;;  %v10069_v54 = vrot.slane %v10068_v60, 4  ;;  %v11066_v38 = vrot.slane %v10065_v16, 5  ;;  %v10487_v32 = vrot.slane %v10485_v49, 4 }
 0x634   : > { %v11233_v58 = vpop.f32.mrf.mxu3  ;;  %v10064_v31 = vsel %vm13590_vm3, %v10059_v23, %v10063_v19  ;;  %v11514_v21 = vunpack.c.l.b16 %v11470_v57  ;;  %v11150_v11 = vpack.c.b16 %v11132_v25, %v18542_v45  ;;  %v11065_v24 = vrot.slane %v11064_v28, 4 }
 0x635   : > { %11783 = vst.msk [vmem:[%s18359_s23 + $0x1c] sm:$0xf] %vm11775_vm13, %v11750_v41  ;;  %v11301_v4 = vadd.f32 %v11233_v58, %v10695_v51  ;;  %v11072_v51 = vshrl.u32 %v18563_v35, 16  ;;  %v11067_v41 = vrot.slane %v10061_v27, 6  ;;  %v10074_v39 = vsel %vm13590_vm3, %v10069_v54, %v10073_v6 }
 0x636   : > { %13283 = vmatmul.msk.bf16.gmra.mxu0 %vm658_vm4, %v11531_v1  ;;  %13153 = vmatmul.msk.bf16.gmra.mxu1 %vm658_vm4, %v10146_v62  ;;  %v10486_v58 = vsel %vm13839_vm8, %v13186_v52, %v10485_v49  ;;  %v11075_v27 = vshll.u32 %v18563_v35, 16  ;;  %v10129_v19 = vunpack.c.l.b16 %v10064_v31  ;;  %v10489_v9 = vsel %vm13839_vm8, %v10487_v32, %v10488_v5  ;;  %v19142_v31 = vld [vmem:[#allocation3_spill] sm:$0xff] }
 0x637   : > { %v11683_v34 = vadd.f32 %v11615_v8, %v11301_v4  ;;  %v10629_v46 = vpop.f32.mrf.mxu2  ;;  %v11068_v48 = vor.u32 %v11067_v41, %v11066_v38  ;;  %v13252_v4 = vld [vmem:[%s13563_s27 + $0xd8] sm:$0xc]  ;;  %v10130_v63 = vunpack.c.l.b16 %v10074_v39  ;;  %v11473_v60 = vrot.slane %v18546_v42, 6  ;;  %v13136_v39 = vld [vmem:[%s13563_s27 + $0xe4] sm:$0xf] }
 0x638   : > { %v10696_v62 = vadd.f32 %v10629_v46, %v10298_v26  ;;  %v11074_v26 = vrot.slane %v11072_v51, 5  ;;  %v10299_v14 = vadd.f32 %v10234_v43, %v19141_v33  ;;  %v10527_v46 = vunpack.c.l.b16 %v10486_v58 }
 0x639   : > { %v11719_v1 = vadd.f32 %v18334_v20, %v11683_v34  ;;  %v10528_v57 = vunpack.c.l.b16 %v10489_v9  ;;  %v11070_v23 = vrot.slane %v11068_v48, 4  ;;  %v13268_v54 = vrot.slane %v13252_v4, 10 }
 0x63a   : > { %v11475_v52 = vrot.slane %v11473_v60, 4  ;;  %v11476_v38 = vrot.slane %v18563_v35, 6  ;;  %v11532_v42 = vpack.c.b16 %v11514_v21, %v11513_v17  ;;  %v10147_v51 = vpack.c.b16 %v10130_v63, %v10129_v19  ;;  %v13171_v63 = vld [vmem:[%s13563_s27 + $0xe4] sm:$0xe] }
 0x63b   : > { %v11751_v8 = vpack.c.bf16 %v11719_v1, %v11719_v1  ;;  %v11617_v12 = vpop.f32.mrf.mxu0  ;;  %v10236_v16 = vpop.f32.mrf.mxu1  ;;  %v11069_v43 = vsel %vm13875_vm11, %v11065_v24, %v11068_v48  ;;  %v18599_v35 = vsel %vm13882_vm12, %v13268_v54, %v11473_v60  ;;  %v10076_v58 = vshrl.u32 %v13136_v39, 16 }
 0x63c   : > { %v11235_v15 = vpop.f32.mrf.mxu3  ;;  %13202 = vmatmul.msk.bf16.gmra.mxu2 %vm658_vm4, %v10544_v37  ;;  %v11077_v37 = vrot.slane %v11075_v27, 6  ;;  %v10300_v28 = vadd.f32 %v10236_v16, %v19142_v31  ;;  %v11133_v17 = vunpack.c.l.b16 %v11069_v43  ;;  %v18605_v21 = vsel %vm13882_vm12, %v11475_v52, %v11476_v38  ;;  %v13138_v16 = vld [vmem:[%s13563_s27 + $0xec] sm:$0x1] }
 0x63d   : > { %11784 = vst.msk [vmem:[%s18359_s23 + $0x20] sm:$0xf] %vm11775_vm13, %v11751_v8  ;;  %v11302_v40 = vadd.f32 %v11235_v15, %v10696_v62  ;;  %v18609_v15 = vld [vmem:[%s13563_s27 + $0xe8] sm:$0xf]  ;;  %v10079_v48 = vshll.u32 %v13136_v39, 16  ;;  %v11515_v9 = vunpack.c.l.b16 %v18599_v35  ;;  %v10095_v4 = vshll.u32 %v13138_v16, 16 }
 0x63e   : > { %v11078_v6 = vor.u32 %v11077_v37, %v11074_v26  ;;  %v10085_v26 = vshll.u32 %v18609_v15, 16  ;;  %v10089_v27 = vshrl.u32 %v18609_v15, 16  ;;  %v10078_v24 = vrot.slane %v10076_v58, 4  ;;  %v18623_v43 = vld [vmem:[%s13563_s27 + $0xec] sm:$0x3] }
 0x63f   : > { %v11684_v49 = vadd.f32 %v11617_v12, %v11302_v40  ;;  %v10632_v34 = vpop.f32.mrf.mxu2  ;;  %v10545_v12 = vpack.c.b16 %v10528_v57, %v10527_v46  ;;  %v10081_v37 = vrot.slane %v10079_v48, 5  ;;  %v11084_v54 = vshll.u32 %v13171_v63, 16 }
 0x640   : > { %v10697_v25 = vadd.f32 %v10632_v34, %v10299_v14  ;;  %v11079_v41 = vsel %vm13875_vm11, %v11070_v23, %v11078_v6  ;;  %v10087_v60 = vrot.slane %v10085_v26, 5  ;;  %v11516_v34 = vunpack.c.l.b16 %v18605_v21 }
 0x641   : > { %v11720_v45 = vadd.f32 %v18334_v20, %v11684_v49  ;;  %13235 = vmatmul.msk.bf16.gmra.mxu3 %vm658_vm4, %v11150_v11  ;;  %v11134_v19 = vunpack.c.l.b16 %v11079_v41  ;;  %v10492_v49 = vrot.slane %v18609_v15, 5  ;;  %v10091_v46 = vrot.slane %v10089_v27, 4 }
 0x642   : > { %v10082_v23 = vor.u32 %v10081_v37, %v10078_v24  ;;  %v11081_v6 = vshrl.u32 %v13171_v63, 16  ;;  %v10495_v31 = vrot.slane %v13138_v16, 5  ;;  %v11086_v21 = vrot.slane %v11084_v54, 6 }
 0x643   : > { %v11752_v1 = vpack.c.bf16 %v11720_v45, %v11720_v45  ;;  %v11620_v62 = vpop.f32.mrf.mxu0  ;;  %v10239_v32 = vpop.f32.mrf.mxu1  ;;  %v10092_v38 = vor.u32 %v10091_v46, %v10087_v60  ;;  %v11090_v39 = vrot.slane %v10085_v26, 6  ;;  %v11095_v58 = vshrl.u32 %v18623_v43, 16 }
 0x644   : > { %v11238_v5 = vpop.f32.mrf.mxu3  ;;  %v10301_v57 = vadd.f32 %v10239_v32, %v17670_v47  ;;  %v11151_v32 = vpack.c.b16 %v11134_v19, %v11133_v17  ;;  %v11083_v35 = vrot.slane %v11081_v6, 5  ;;  %v11098_v36 = vshll.u32 %v18623_v43, 16  ;;  %v13253_v6 = vld [vmem:[%s13563_s27 + $0xe4] sm:$0xc] }
 0x645   : > { %11785 = vst.msk [vmem:[%s18359_s23 + $0x24] sm:$0xf] %vm11775_vm13, %v11752_v1  ;;  %v11303_v8 = vadd.f32 %v11238_v5, %v10697_v25  ;;  %v10494_v5 = vrot.slane %v10492_v49, 4  ;;  %v10093_v41 = vrot.slane %v10092_v38, 4  ;;  %v11097_v24 = vrot.slane %v11095_v58, 5 }
 0x646   : > { %13284 = vmatmul.msk.bf16.gmra.mxu0 %vm658_vm4, %v11532_v42  ;;  %13154 = vmatmul.msk.bf16.gmra.mxu1 %vm658_vm4, %v10147_v51  ;;  %v10097_v42 = vrot.slane %v10095_v4, 5  ;;  %v13187_v51 = vrot.slane %v13171_v63, 9  ;;  %v11087_v19 = vor.u32 %v11086_v21, %v11083_v35  ;;  %v11533_v37 = vpack.c.b16 %v11516_v34, %v11515_v9  ;;  %v19143_v9 = vld [vmem:[#allocation12_spill] sm:$0xff] }
 0x647   : > { %v11685_v40 = vadd.f32 %v11620_v62, %v11303_v8  ;;  %v10634_v11 = vpop.f32.mrf.mxu2  ;;  %v10083_v62 = vrot.slane %v10082_v23, 4  ;;  %v10496_v17 = vsel %vm13839_vm8, %v10494_v5, %v10495_v31  ;;  %v11100_v23 = vrot.slane %v11098_v36, 6 }
 0x648   : > { %v10698_v14 = vadd.f32 %v10634_v11, %v10300_v28  ;;  %v11089_v28 = vrot.slane %v10089_v27, 5  ;;  %v10493_v27 = vsel %vm13839_vm8, %v13187_v51, %v10492_v49  ;;  %v11480_v54 = vrot.slane %v18609_v15, 6 }
 0x649   : > { %v11721_v33 = vadd.f32 %v18334_v20, %v11685_v40  ;;  %v10088_v8 = vsel %vm13590_vm3, %v10083_v62, %v10087_v60  ;;  %v10530_v38 = vunpack.c.l.b16 %v10496_v17 }
 0x64a   : > { %v10131_v16 = vunpack.c.l.b16 %v10088_v8  ;;  %v11091_v4 = vor.u32 %v11090_v39, %v11089_v28  ;;  %v11482_v31 = vrot.slane %v11480_v54, 4  ;;  %v11483_v28 = vrot.slane %v18623_v43, 6 }
 0x64b   : > { %v11753_v45 = vpack.c.bf16 %v11721_v33, %v11721_v33  ;;  %v11622_v25 = vpop.f32.mrf.mxu0  ;;  %v10241_v52 = vpop.f32.mrf.mxu1  ;;  %v11088_v33 = vrot.slane %v11087_v19, 4 }
 0x64c   : > { %v11240_v1 = vpop.f32.mrf.mxu3  ;;  %13203 = vmatmul.msk.bf16.gmra.mxu2 %vm658_vm4, %v10545_v12  ;;  %v10098_v12 = vsel %vm13590_vm3, %v10093_v41, %v10097_v42  ;;  %v11093_v44 = vrot.slane %v11091_v4, 4  ;;  %v11101_v42 = vor.u32 %v11100_v23, %v11097_v24  ;;  %v10302_v34 = vadd.f32 %v10241_v52, %v19143_v9 }
 0x64d   : > { %11786 = vst.msk [vmem:[%s18359_s23 + $0x28] sm:$0xf] %vm11775_vm13, %v11753_v45  ;;  %v11304_v47 = vadd.f32 %v11240_v1, %v10698_v14  ;;  %v10132_v11 = vunpack.c.l.b16 %v10098_v12  ;;  %v11092_v51 = vsel %vm13875_vm11, %v11088_v33, %v11091_v4  ;;  %v13269_v1 = vrot.slane %v13253_v6, 10 }
 0x64e   : > { %v11102_v15 = vsel %vm13875_vm11, %v11093_v44, %v11101_v42  ;;  %v11135_v52 = vunpack.c.l.b16 %v11092_v51  ;;  %v11484_v58 = vsel %vm13882_vm12, %v11482_v31, %v11483_v28 }
 0x64f   : > { %v11686_v48 = vadd.f32 %v11622_v25, %v11304_v47  ;;  %v10637_v40 = vpop.f32.mrf.mxu2  ;;  %v10148_v60 = vpack.c.b16 %v10132_v11, %v10131_v16  ;;  %v10529_v25 = vunpack.c.l.b16 %v10493_v27  ;;  %v11136_v35 = vunpack.c.l.b16 %v11102_v15  ;;  %v19144_v27 = vld [vmem:[#allocation4_spill] sm:$0xff] }
 0x650   : > { %v10699_v63 = vadd.f32 %v10637_v40, %v10301_v57  ;;  %v11481_v39 = vsel %vm13882_vm12, %v13269_v1, %v11480_v54  ;;  %v11518_v12 = vunpack.c.l.b16 %v11484_v58 }
 0x651   : > { %v11722_v26 = vadd.f32 %v18334_v20, %v11686_v48  ;;  %13236 = vmatmul.msk.bf16.gmra.mxu3 %vm658_vm4, %v11151_v32  ;;  %v10546_v47 = vpack.c.b16 %v10530_v38, %v10529_v25  ;;  %v11517_v40 = vunpack.c.l.b16 %v11481_v39 }
 0x653   : > { %v11754_v49 = vpack.c.bf16 %v11722_v26, %v11722_v26  ;;  %v11625_v14 = vpop.f32.mrf.mxu0  ;;  %v10244_v46 = vpop.f32.mrf.mxu1  ;;  %v11534_v26 = vpack.c.b16 %v11518_v12, %v11517_v40 }
 0x654   : > { %v11243_v45 = vpop.f32.mrf.mxu3  ;;  %v10303_v11 = vadd.f32 %v10244_v46, %v19144_v27 }
 0x655   : > { %11787 = vst.msk [vmem:[%s18359_s23 + $0x2c] sm:$0xf] %vm11775_vm13, %v11754_v49  ;;  %v11305_v57 = vadd.f32 %v11243_v45, %v10699_v63  ;;  %v19145_v49 = vld [vmem:[#allocation10_spill] sm:$0xff] }
 0x656   : > { %13285 = vmatmul.msk.bf16.gmra.mxu0 %vm658_vm4, %v11533_v37  ;;  %13155 = vmatmul.msk.bf16.gmra.mxu1 %vm658_vm4, %v10148_v60 }
 0x657   : > { %v11687_v62 = vadd.f32 %v11625_v14, %v11305_v57  ;;  %v10639_v5 = vpop.f32.mrf.mxu2 }
 0x658   : > { %v10700_v41 = vadd.f32 %v10639_v5, %v10302_v34 }
 0x659   : > { %v11723_v32 = vadd.f32 %v18334_v20, %v11687_v62  ;;  %v11152_v20 = vpack.c.b16 %v11136_v35, %v11135_v52 }
 0x65b   : > { %v11755_v8 = vpack.c.bf16 %v11723_v32, %v11723_v32  ;;  %v11627_v21 = vpop.f32.mrf.mxu0  ;;  %v10246_v53 = vpop.f32.mrf.mxu1 }
 0x65c   : > { %v11245_v48 = vpop.f32.mrf.mxu3  ;;  %13204 = vmatmul.msk.bf16.gmra.mxu2 %vm658_vm4, %v10546_v47  ;;  %v10304_v14 = vadd.f32 %v10246_v53, %v19145_v49 }
 0x65d   : > { %11788 = vst.msk [vmem:[%s18359_s23 + $0x30] sm:$0xf] %vm11775_vm13, %v11755_v8  ;;  %v11306_v43 = vadd.f32 %v11245_v48, %v10700_v41 }
 0x65f   : > { %v11688_v16 = vadd.f32 %v11627_v21, %v11306_v43  ;;  %v10642_v17 = vpop.f32.mrf.mxu2 }
 0x660   : > { %v10701_v4 = vadd.f32 %v10642_v17, %v10303_v11 }
 0x661   : > { %v11724_v19 = vadd.f32 %v18664_v56, %v11688_v16  ;;  %13237 = vmatmul.msk.bf16.gmra.mxu3 %vm658_vm4, %v11152_v20 }
 0x663   : > { %v11756_v63 = vpack.c.bf16 %v11724_v19, %v11724_v19  ;;  %v11630_v24 = vpop.f32.mrf.mxu0  ;;  %v10249_v36 = vpop.f32.mrf.mxu1 }
 0x664   : > { %v11248_v37 = vpop.f32.mrf.mxu3  ;;  %v10305_v42 = vadd.f32 %v10249_v36, %v17966_v10 }
 0x665   : > { %11789 = vst.msk [vmem:[%s18359_s23 + $0x34] sm:$0xf] %vm11775_vm13, %v11756_v63  ;;  %v11307_v60 = vadd.f32 %v11248_v37, %v10701_v4 }
 0x666   : > { %13286 = vmatmul.msk.bf16.gmra.mxu0 %vm658_vm4, %v11534_v26 }
 0x667   : > { %v11689_v33 = vadd.f32 %v11630_v24, %v11307_v60  ;;  %v10644_v46 = vpop.f32.mrf.mxu2 }
 0x668   : > { %v10702_v23 = vadd.f32 %v10644_v46, %v10304_v14 }
 0x669   : > { %v11725_v44 = vadd.f32 %v18664_v56, %v11689_v33 }
 0x66b   : > { %v11757_v6 = vpack.c.bf16 %v11725_v44, %v11725_v44  ;;  %v11632_v54 = vpop.f32.mrf.mxu0  ;;  %v10251_v45 = vpop.f32.mrf.mxu1 }
 0x66c   : > { %v11250_v25 = vpop.f32.mrf.mxu3  ;;  %v10306_v47 = vadd.f32 %v10251_v45, %v17970_v50  ;;  %v19146_v45 = vld [vmem:[#allocation5_spill] sm:$0xff] }
 0x66d   : > { %11790 = vst.msk [vmem:[%s18359_s23 + $0x38] sm:$0xf] %vm11775_vm13, %v11757_v6  ;;  %v11308_v38 = vadd.f32 %v11250_v25, %v10702_v23  ;;  %v9656_v25 = vadd.f32 %v19146_v45, %v17925_v59 }
 0x66f   : > { %v11690_v57 = vadd.f32 %v11632_v54, %v11308_v38  ;;  %v10647_v9 = vpop.f32.mrf.mxu2 }
 0x670   : > { %v10703_v51 = vadd.f32 %v10647_v9, %v10305_v42 }
 0x671   : > { %v11726_v34 = vadd.f32 %v18664_v56, %v11690_v57 }
 0x673   : > { %v11758_v1 = vpack.c.bf16 %v11726_v34, %v11726_v34  ;;  %v11635_v62 = vpop.f32.mrf.mxu0  ;;  %v10254_v5 = vpop.f32.mrf.mxu1 }
 0x674   : > { %v11253_v15 = vpop.f32.mrf.mxu3  ;;  %v10307_v53 = vadd.f32 %v10254_v5, %v18125_v29 }
 0x675   : > { %11791 = vst.msk [vmem:[%s18359_s23 + $0x3c] sm:$0xf] %vm11775_vm13, %v11758_v1  ;;  %v11309_v31 = vadd.f32 %v11253_v15, %v10703_v51  ;;  %v9657_v15 = vadd.f32 %v17939_v55, %v17949_v2 }
 0x677   : > { %v11691_v28 = vadd.f32 %v11635_v62, %v11309_v31  ;;  %v10649_v32 = vpop.f32.mrf.mxu2 }
 0x678   : > { %v10704_v52 = vadd.f32 %v10649_v32, %v10306_v47 }
 0x679   : > { %v11727_v41 = vadd.f32 %v18664_v56, %v11691_v28 }
 0x67b   : > { %v11759_v10 = vpack.c.bf16 %v11727_v41, %v11727_v41  ;;  %v11637_v35 = vpop.f32.mrf.mxu0  ;;  %v10256_v8 = vpop.f32.mrf.mxu1 }
 0x67c   : > { %v11255_v21 = vpop.f32.mrf.mxu3  ;;  %v10308_v17 = vadd.f32 %v10256_v8, %v18129_v18 }
 0x67d   : > { %11792 = vst.msk [vmem:[%s18359_s23 + $0x40] sm:$0xf] %vm11775_vm13, %v11759_v10  ;;  %v11310_v39 = vadd.f32 %v11255_v21, %v10704_v52  ;;  %v19147_v21 = vld [vmem:[#allocation6_spill] sm:$0xff] }
 0x67f   : > { %v11692_v58 = vadd.f32 %v11637_v35, %v11310_v39  ;;  %v10652_v48 = vpop.f32.mrf.mxu2  ;;  %v9658_v39 = vadd.f32 %v19147_v21, %v17997_v3 }
 0x680   : > { %v10705_v20 = vadd.f32 %v10652_v48, %v10307_v53 }
 0x681   : > { %v11728_v43 = vadd.f32 %v18664_v56, %v11692_v58 }
 0x683   : > { %v11760_v50 = vpack.c.bf16 %v11728_v43, %v11728_v43  ;;  %v11640_v40 = vpop.f32.mrf.mxu0  ;;  %v10259_v12 = vpop.f32.mrf.mxu1 }
 0x684   : > { %v11258_v16 = vpop.f32.mrf.mxu3  ;;  %v10309_v33 = vadd.f32 %v10259_v12, %v18211_v22 }
 0x685   : > { %11793 = vst.msk [vmem:[%s18359_s23 + $0x44] sm:$0xf] %vm11775_vm13, %v11760_v50  ;;  %v11311_v27 = vadd.f32 %v11258_v16, %v10705_v20  ;;  %v19148_v16 = vld [vmem:[#allocation7_spill] sm:$0xff] }
 0x687   : > { %v11693_v11 = vadd.f32 %v11640_v40, %v11311_v27  ;;  %v10654_v19 = vpop.f32.mrf.mxu2  ;;  %v19149_v27 = vld [vmem:[#allocation15_spill] sm:$0xff] }
 0x688   : > { %v10706_v26 = vadd.f32 %v10654_v19, %v10308_v17 }
 0x689   : > { %v11729_v4 = vadd.f32 %v18664_v56, %v11693_v11  ;;  %v9659_v11 = vadd.f32 %v19149_v27, %v19148_v16 }
 0x68b   : > { %v11761_v29 = vpack.c.bf16 %v11729_v4, %v11729_v4  ;;  %v11642_v63 = vpop.f32.mrf.mxu0  ;;  %v10261_v24 = vpop.f32.mrf.mxu1 }
 0x68c   : > { %v11260_v36 = vpop.f32.mrf.mxu3  ;;  %v10310_v57 = vadd.f32 %v10261_v24, %v9656_v25 }
 0x68d   : > { %11794 = vst.msk [vmem:[%s18359_s23 + $0x48] sm:$0xf] %vm11775_vm13, %v11761_v29  ;;  %v11312_v37 = vadd.f32 %v11260_v36, %v10706_v26 }
 0x68f   : > { %v11694_v60 = vadd.f32 %v11642_v63, %v11312_v37  ;;  %v10657_v49 = vpop.f32.mrf.mxu2 }
 0x690   : > { %v10707_v46 = vadd.f32 %v10657_v49, %v10309_v33 }
 0x691   : > { %v11730_v14 = vadd.f32 %v18664_v56, %v11694_v60  ;;  %v19150_v60 = vld [vmem:[#allocation9_spill] sm:$0xff] }
 0x692   : > { %v9660_v33 = vadd.f32 %v19150_v60, %v18076_v61 }
 0x693   : > { %v11762_v18 = vpack.c.bf16 %v11730_v14, %v11730_v14  ;;  %v11645_v44 = vpop.f32.mrf.mxu0  ;;  %v10264_v23 = vpop.f32.mrf.mxu1 }
 0x694   : > { %v11263_v6 = vpop.f32.mrf.mxu3  ;;  %v10311_v28 = vadd.f32 %v10264_v23, %v9657_v15 }
 0x695   : > { %11795 = vst.msk [vmem:[%s18359_s23 + $0x4c] sm:$0xf] %vm11775_vm13, %v11762_v18  ;;  %v11313_v54 = vadd.f32 %v11263_v6, %v10707_v46 }
 0x697   : > { %v11695_v38 = vadd.f32 %v11645_v44, %v11313_v54  ;;  %v10659_v42 = vpop.f32.mrf.mxu2 }
 0x698   : > { %v10708_v9 = vadd.f32 %v10659_v42, %v10310_v57 }
 0x699   : > { %v11731_v22 = vadd.f32 %v18664_v56, %v11695_v38  ;;  %v9661_v38 = vadd.f32 %v18102_v0, %v18112_v7 }
 0x69b   : > { %v11763_v34 = vpack.c.bf16 %v11731_v22, %v11731_v22  ;;  %v11647_v51 = vpop.f32.mrf.mxu0  ;;  %v10266_v1 = vpop.f32.mrf.mxu1 }
 0x69c   : > { %v11265_v62 = vpop.f32.mrf.mxu3  ;;  %v10312_v53 = vadd.f32 %v10266_v1, %v9658_v39 }
 0x69d   : > { %11796 = vst.msk [vmem:[%s18359_s23 + $0x50] sm:$0xf] %vm11775_vm13, %v11763_v34  ;;  %v11314_v5 = vadd.f32 %v11265_v62, %v10708_v9 }
 0x69f   : > { %v11696_v31 = vadd.f32 %v11647_v51, %v11314_v5  ;;  %v10662_v59 = vpop.f32.mrf.mxu2  ;;  %v19151_v5 = vld [vmem:[#allocation18_spill] sm:$0xff] }
 0x6a0   : > { %v10709_v32 = vadd.f32 %v10662_v59, %v10311_v28  ;;  %v9662_v15 = vadd.f32 %v19151_v5, %v18159_v30 }
 0x6a1   : > { %v11732_v47 = vadd.f32 %v18664_v56, %v11696_v31 }
 0x6a3   : > { %v11764_v41 = vpack.c.bf16 %v11732_v47, %v11732_v47  ;;  %v11650_v52 = vpop.f32.mrf.mxu0  ;;  %v10269_v10 = vpop.f32.mrf.mxu1 }
 0x6a4   : > { %v11268_v35 = vpop.f32.mrf.mxu3  ;;  %v10313_v19 = vadd.f32 %v10269_v10, %v9659_v11 }
 0x6a5   : > { %11797 = vst.msk [vmem:[%s18359_s23 + $0x54] sm:$0xf] %vm11775_vm13, %v11764_v41  ;;  %v11315_v8 = vadd.f32 %v11268_v35, %v10709_v32  ;;  %v19152_v35 = vld [vmem:[#allocation16_spill] sm:$0xff] }
 0x6a7   : > { %v11697_v58 = vadd.f32 %v11650_v52, %v11315_v8  ;;  %v10664_v55 = vpop.f32.mrf.mxu2  ;;  %v9663_v8 = vadd.f32 %v19152_v35, %v18185_v13 }
 0x6a8   : > { %v10710_v48 = vadd.f32 %v10664_v55, %v10312_v53 }
 0x6a9   : > { %v11733_v2 = vadd.f32 %v18664_v56, %v11697_v58 }
 0x6ab   : > { %v11765_v43 = vpack.c.bf16 %v11733_v2, %v11733_v2  ;;  %v11652_v20 = vpop.f32.mrf.mxu0  ;;  %v10271_v50 = vpop.f32.mrf.mxu1 }
 0x6ac   : > { %v11270_v40 = vpop.f32.mrf.mxu3  ;;  %v10314_v14 = vadd.f32 %v10271_v50, %v9660_v33  ;;  %v19153_v50 = vld [vmem:[#allocation17_spill] sm:$0xff] }
 0x6ad   : > { %11798 = vst.msk [vmem:[%s18359_s23 + $0x58] sm:$0xf] %vm11775_vm13, %v11765_v43  ;;  %v11316_v12 = vadd.f32 %v11270_v40, %v10710_v48  ;;  %v19154_v40 = vld [vmem:[#allocation19_spill] sm:$0xff] }
 0x6af   : > { %v11698_v17 = vadd.f32 %v11652_v20, %v11316_v12  ;;  %v10667_v3 = vpop.f32.mrf.mxu2  ;;  %v9664_v12 = vadd.f32 %v19154_v40, %v19153_v50 }
 0x6b0   : > { %v10711_v26 = vadd.f32 %v10667_v3, %v10313_v19 }
 0x6b1   : > { %v11734_v4 = vadd.f32 %v18664_v56, %v11698_v17 }
 0x6b3   : > { %v11766_v29 = vpack.c.bf16 %v11734_v4, %v11734_v4  ;;  %v11655_v63 = vpop.f32.mrf.mxu0  ;;  %v10274_v24 = vpop.f32.mrf.mxu1 }
 0x6b4   : > { %v11273_v36 = vpop.f32.mrf.mxu3  ;;  %v10315_v42 = vadd.f32 %v10274_v24, %v9661_v38  ;;  %v19156_v24 = vld [vmem:[#allocation20_spill] sm:$0xff] }
 0x6b5   : > { %11799 = vst.msk [vmem:[%s18359_s23 + $0x5c] sm:$0xf] %vm11775_vm13, %v11766_v29  ;;  %v11317_v37 = vadd.f32 %v11273_v36, %v10711_v26 }
 0x6b7   : > { %v11699_v49 = vadd.f32 %v11655_v63, %v11317_v37  ;;  %v10669_v46 = vpop.f32.mrf.mxu2  ;;  %v19155_v63 = vld [vmem:[#allocation21_spill] sm:$0xff] }
 0x6b8   : > { %v10712_v44 = vadd.f32 %v10669_v46, %v10314_v14  ;;  %v9665_v36 = vadd.f32 %v19156_v24, %v19155_v63 }
 0x6b9   : > { %v11735_v18 = vadd.f32 %v18664_v56, %v11699_v49 }
 0x6bb   : > { %v11767_v23 = vpack.c.bf16 %v11735_v18, %v11735_v18  ;;  %v11657_v6 = vpop.f32.mrf.mxu0  ;;  %v10276_v54 = vpop.f32.mrf.mxu1 }
 0x6bc   : > { %v11275_v45 = vpop.f32.mrf.mxu3  ;;  %v10316_v59 = vadd.f32 %v10276_v54, %v9662_v15  ;;  %v19157_v54 = vld [vmem:[#allocation2_spill] sm:$0xff] }
 0x6bd   : > { %11800 = vst.msk [vmem:[%s18359_s23 + $0x60] sm:$0xf] %vm11775_vm13, %v11767_v23  ;;  %v11318_v25 = vadd.f32 %v11275_v45, %v10712_v44  ;;  %v19158_v45 = vld [vmem:[#allocation22_spill] sm:$0xff] }
 0x6bf   : > { %v11700_v57 = vadd.f32 %v11657_v6, %v11318_v25  ;;  %v10672_v61 = vpop.f32.mrf.mxu2  ;;  %v9666_v25 = vadd.f32 %v19158_v45, %v19157_v54 }
 0x6c0   : > { %v10713_v9 = vadd.f32 %v10672_v61, %v10315_v42 }
 0x6c1   : > { %v11736_v22 = vadd.f32 %v18664_v56, %v11700_v57 }
 0x6c3   : > { %v11768_v34 = vpack.c.bf16 %v11736_v22, %v11736_v22  ;;  %v11660_v51 = vpop.f32.mrf.mxu0  ;;  %v10279_v31 = vpop.f32.mrf.mxu1 }
 0x6c4   : > { %v11278_v1 = vpop.f32.mrf.mxu3  ;;  %v10317_v39 = vadd.f32 %v10279_v31, %v9663_v8 }
 0x6c5   : > { %11801 = vst.msk [vmem:[%s18359_s23 + $0x64] sm:$0xf] %vm11775_vm13, %v11768_v34  ;;  %v11319_v62 = vadd.f32 %v11278_v1, %v10713_v9 }
 0x6c7   : > { %v11701_v28 = vadd.f32 %v11660_v51, %v11319_v62  ;;  %v10674_v0 = vpop.f32.mrf.mxu2 }
 0x6c8   : > { %v10714_v47 = vadd.f32 %v10674_v0, %v10316_v59 }
 0x6c9   : > { %v11737_v7 = vadd.f32 %v18664_v56, %v11701_v28 }
 0x6cb   : > { %v11769_v32 = vpack.c.bf16 %v11737_v7, %v11737_v7  ;;  %v11662_v41 = vpop.f32.mrf.mxu0  ;;  %v10281_v58 = vpop.f32.mrf.mxu1 }
 0x6cc   : > { %v11280_v52 = vpop.f32.mrf.mxu3  ;;  %v10318_v27 = vadd.f32 %v10281_v58, %v9664_v12 }
 0x6cd   : > { %11802 = vst.msk [vmem:[%s18359_s23 + $0x68] sm:$0xf] %vm11775_vm13, %v11769_v32  ;;  %v11320_v10 = vadd.f32 %v11280_v52, %v10714_v47 }
 0x6cf   : > { %v11702_v21 = vadd.f32 %v11662_v41, %v11320_v10  ;;  %v10677_v30 = vpop.f32.mrf.mxu2 }
 0x6d0   : > { %v10715_v55 = vadd.f32 %v10677_v30, %v10317_v39 }
 0x6d1   : > { %v11738_v53 = vadd.f32 %v18664_v56, %v11702_v21 }
 0x6d3   : > { %v11770_v2 = vpack.c.bf16 %v11738_v53, %v11738_v53  ;;  %v11665_v48 = vpop.f32.mrf.mxu0  ;;  %v10284_v19 = vpop.f32.mrf.mxu1 }
 0x6d4   : > { %v11283_v43 = vpop.f32.mrf.mxu3  ;;  %v10319_v60 = vadd.f32 %v10284_v19, %v9665_v36 }
 0x6d5   : > { %11803 = vst.msk [vmem:[%s18359_s23 + $0x6c] sm:$0xf] %vm11775_vm13, %v11770_v2  ;;  %v11321_v20 = vadd.f32 %v11283_v43, %v10715_v55 }
 0x6d7   : > { %v11703_v16 = vadd.f32 %v11665_v48, %v11321_v20  ;;  %v10679_v13 = vpop.f32.mrf.mxu2 }
 0x6d8   : > { %v10716_v17 = vadd.f32 %v10679_v13, %v10318_v27 }
 0x6d9   : > { %v11739_v11 = vadd.f32 %v18664_v56, %v11703_v16 }
 0x6db   : > { %v11771_v3 = vpack.c.bf16 %v11739_v11, %v11739_v11  ;;  %v11667_v4 = vpop.f32.mrf.mxu0  ;;  %v10286_v18 = vpop.f32.mrf.mxu1 }
 0x6dc   : > { %v11285_v26 = vpop.f32.mrf.mxu3  ;;  %v10320_v57 = vadd.f32 %v10286_v18, %v9666_v25 }
 0x6dd   : > { %11804 = vst.msk [vmem:[%s18359_s23 + $0x70] sm:$0xf] %vm11775_vm13, %v11771_v3  ;;  %v11322_v29 = vadd.f32 %v11285_v26, %v10716_v17 }
 0x6df   : > { %v11704_v37 = vadd.f32 %v11667_v4, %v11322_v29  ;;  %v10682_v33 = vpop.f32.mrf.mxu2 }
 0x6e0   : > { %v10717_v14 = vadd.f32 %v10682_v33, %v10319_v60 }
 0x6e1   : > { %v11740_v49 = vadd.f32 %v18664_v56, %v11704_v37 }
 0x6e3   : > { %v11772_v46 = vpack.c.bf16 %v11740_v49, %v11740_v49  ;;  %v11670_v44 = vpop.f32.mrf.mxu0 }
 0x6e4   : > { %v11288_v23 = vpop.f32.mrf.mxu3 }
 0x6e5   : > { %11805 = vst.msk [vmem:[%s18359_s23 + $0x74] sm:$0xf] %vm11775_vm13, %v11772_v46  ;;  %v11323_v6 = vadd.f32 %v11288_v23, %v10717_v14 }
 0x6e7   : > { %v11705_v38 = vadd.f32 %v11670_v44, %v11323_v6  ;;  %v10684_v42 = vpop.f32.mrf.mxu2 }
 0x6e8   : > { %v10718_v22 = vadd.f32 %v10684_v42, %v10320_v57 }
 0x6e9   : > { %v11741_v61 = vadd.f32 %v18664_v56, %v11705_v38 }
 0x6eb   : > { %v11773_v9 = vpack.c.bf16 %v11741_v61, %v11741_v61  ;;  %v11672_v1 = vpop.f32.mrf.mxu0 }
 0x6ec   : > { %v11290_v34 = vpop.f32.mrf.mxu3 }
 0x6ed   : > { %11806 = vst.msk [vmem:[%s18359_s23 + $0x78] sm:$0xf] %vm11775_vm13, %v11773_v9  ;;  %v11324_v51 = vadd.f32 %v11290_v34, %v10718_v22 }
 0x6ef   : > { %v11706_v62 = vadd.f32 %v11672_v1, %v11324_v51 }
 0x6f1   : > { %v11742_v5 = vadd.f32 %v18664_v56, %v11706_v62 }
 0x6f3   : > { %v11774_v15 = vpack.c.bf16 %v11742_v5, %v11742_v5 }
 0x6f5   : > { %11807 = vst.msk [vmem:[%s18359_s23 + $0x7c] sm:$0xf] %vm11775_vm13, %v11774_v15 }
 0x6f6 PF: > { %s13_s12 = sadd.s32 1, %s13508_s12  }
 0x6f7   : > { %p10_p4 = scmp.ge.s32.totalorder %s13_s12, 4  }
 0x6f9   :  { %12 = sbr.rel (!%p10_p4) target bundleno = 1 (0x1), region = 90 }

</bundles_post_ra>
